<compile_context>
chip_gen: v7x
topology: tpu7x:2x2x1
jax: 0.10.0
libtpu: 0.0.40
codegen_flags: <defaults>
</compile_context>

<pallas_src>
import math
from functools import partial

import jax
import jax.numpy as jnp
from jax.experimental import pallas as pl
from jax.experimental.pallas import tpu as pltpu


MXU_DTYPE = jnp.bfloat16   # operand dtype fed to the MXU (accumulate in f32)
LN_EPS = 1e-6
VMEM_LIMIT = 64 * 1024 * 1024


def _round_up(x, m):
    return (x + m - 1) // m * m


def _pick_tile(dim, target, align):
    """Largest block <= target that evenly divides `dim` and is a multiple of
    `align`, falling back to the full dimension (always a legal block)."""
    if dim <= target:
        return dim
    t = (min(target, dim) // align) * align
    while t >= align:
        if dim % t == 0:
            return t
        t -= align
    return dim


# ----------------------------- Pallas kernels ------------------------------

def _matmul_kernel(x_ref, w_ref, b_ref, o_ref, acc_ref):
    @pl.when(pl.program_id(2) == 0)
    def _():
        acc_ref[...] = jnp.zeros_like(acc_ref)

    acc_ref[...] += jnp.dot(x_ref[...].astype(MXU_DTYPE),
                            w_ref[...].astype(MXU_DTYPE),
                            preferred_element_type=jnp.float32)

    @pl.when(pl.program_id(2) == pl.num_programs(2) - 1)
    def _():
        o_ref[...] = (acc_ref[...] + b_ref[...]).astype(o_ref.dtype)


def _matmul_residual_kernel(x_ref, w_ref, b_ref, r_ref, o_ref, acc_ref):
    @pl.when(pl.program_id(2) == 0)
    def _():
        acc_ref[...] = jnp.zeros_like(acc_ref)

    acc_ref[...] += jnp.dot(x_ref[...].astype(MXU_DTYPE),
                            w_ref[...].astype(MXU_DTYPE),
                            preferred_element_type=jnp.float32)

    @pl.when(pl.program_id(2) == pl.num_programs(2) - 1)
    def _():
        # fused residual add: out = residual + x @ w + b
        o_ref[...] = (acc_ref[...] + b_ref[...] + r_ref[...]).astype(o_ref.dtype)


def linear(x2d, w, b, residual=None, out_dtype=jnp.float32,
           tm=256, tn=512, tk=512):
    """Tiled (M,N,K) matmul: x2d(M,K) @ w(K,N) + b(N) [+ residual(M,N)].
    M is padded to the row tile (never one giant block)."""
    M, K = x2d.shape
    N = w.shape[1]
    tn = _pick_tile(N, tn, 128)
    tk = _pick_tile(K, tk, 128)
    tm = min(tm, _round_up(M, 16))          # 16: bf16 sublane alignment
    Mp = _round_up(M, tm)
    pad = Mp - M
    xp = x2d if pad == 0 else jnp.pad(x2d, ((0, pad), (0, 0)))

    grid = (Mp // tm, N // tn, K // tk)
    in_specs = [
        pl.BlockSpec((tm, tk), lambda i, j, k: (i, k)),
        pl.BlockSpec((tk, tn), lambda i, j, k: (k, j)),
        pl.BlockSpec((1, tn), lambda i, j, k: (0, j)),
    ]
    args = [xp, w, b.reshape(1, N)]
    if residual is None:
        kernel = _matmul_kernel
    else:
        rp = residual if pad == 0 else jnp.pad(residual, ((0, pad), (0, 0)))
        kernel = _matmul_residual_kernel
        in_specs.append(pl.BlockSpec((tm, tn), lambda i, j, k: (i, j)))
        args.append(rp)

    out = pl.pallas_call(
        kernel,
        out_shape=jax.ShapeDtypeStruct((Mp, N), out_dtype),
        grid=grid,
        in_specs=in_specs,
        out_specs=pl.BlockSpec((tm, tn), lambda i, j, k: (i, j)),
        scratch_shapes=[pltpu.VMEM((tm, tn), jnp.float32)],
        compiler_params=pltpu.CompilerParams(
            dimension_semantics=("parallel", "parallel", "arbitrary"),
            vmem_limit_bytes=VMEM_LIMIT),
    )(*args)
    return out if pad == 0 else out[:M]


def _ln_linear_kernel(x_ref, g_ref, bln_ref, w_ref, b_ref, o_ref, nx_ref,
                      *, eps, relu):
    # LayerNorm is computed once per row-tile (first N-tile) and stashed in a
    # persistent bf16 VMEM scratch, then reused for the remaining N-tiles.
    @pl.when(pl.program_id(1) == 0)
    def _():
        x = x_ref[...]                                       # (tm, K) f32
        mean = jnp.mean(x, axis=-1, keepdims=True)
        var = jnp.mean((x - mean) ** 2, axis=-1, keepdims=True)  # unbiased=False
        # NOTE: eps added to std (matches the reference custom LayerNorm).
        nx = g_ref[...] * (x - mean) / (jnp.sqrt(var) + eps) + bln_ref[...]
        nx_ref[...] = nx.astype(MXU_DTYPE)

    y = jnp.dot(nx_ref[...], w_ref[...].astype(MXU_DTYPE),
                preferred_element_type=jnp.float32)
    y = y + b_ref[...]
    if relu:
        y = jnp.maximum(y, 0.0)                              # torch.clamp(min=0)
    o_ref[...] = y.astype(o_ref.dtype)


def fused_ln_linear(x2d, gamma, beta, w, b, relu=False, out_dtype=jnp.float32,
                    tm=128, tn=512):
    """LayerNorm(x2d) @ w + b with LN fused into the matmul (K kept whole)."""
    M, K = x2d.shape
    N = w.shape[1]
    tn = _pick_tile(N, tn, 128)
    tm = min(tm, _round_up(M, 16))
    Mp = _round_up(M, tm)
    pad = Mp - M
    xp = x2d if pad == 0 else jnp.pad(x2d, ((0, pad), (0, 0)))

    grid = (Mp // tm, N // tn)
    out = pl.pallas_call(
        partial(_ln_linear_kernel, eps=LN_EPS, relu=relu),
        out_shape=jax.ShapeDtypeStruct((Mp, N), out_dtype),
        grid=grid,
        in_specs=[
            pl.BlockSpec((tm, K), lambda i, j: (i, 0)),
            pl.BlockSpec((1, K), lambda i, j: (0, 0)),
            pl.BlockSpec((1, K), lambda i, j: (0, 0)),
            pl.BlockSpec((K, tn), lambda i, j: (0, j)),
            pl.BlockSpec((1, tn), lambda i, j: (0, j)),
        ],
        out_specs=pl.BlockSpec((tm, tn), lambda i, j: (i, j)),
        scratch_shapes=[pltpu.VMEM((tm, K), MXU_DTYPE)],
        compiler_params=pltpu.CompilerParams(
            dimension_semantics=("parallel", "arbitrary"),
            vmem_limit_bytes=VMEM_LIMIT),
    )(xp, gamma.reshape(1, K), beta.reshape(1, K), w, b.reshape(1, N))
    return out if pad == 0 else out[:M]


def _flash_attn_kernel(q_ref, k_ref, v_ref, m_ref, o_ref,
                       m_sc, l_sc, acc_sc, *, scale):
    ki = pl.program_id(3)

    @pl.when(ki == 0)
    def _():
        m_sc[...] = jnp.full_like(m_sc, -jnp.inf)
        l_sc[...] = jnp.zeros_like(l_sc)
        acc_sc[...] = jnp.zeros_like(acc_sc)

    q = q_ref[0]                                           # (tq, dk)  bf16
    k = k_ref[0]                                           # (tsk, dk) bf16
    v = v_ref[0]                                           # (tsk, dk) bf16
    s = jax.lax.dot_general(q, k, (((1,), (1,)), ((), ())),
                            preferred_element_type=jnp.float32) * scale
    msk = m_ref[0]                                         # (tq|1, tsk) f32
    s = jnp.where(msk == 0.0, -1e9, s)                     # masked_fill(mask==0)

    m_prev = m_sc[...]
    m_new = jnp.maximum(m_prev, jnp.max(s, axis=-1, keepdims=True))
    alpha = jnp.exp(m_prev - m_new)
    p = jnp.exp(s - m_new)
    l_sc[...] = alpha * l_sc[...] + jnp.sum(p, axis=-1, keepdims=True)
    acc_sc[...] = alpha * acc_sc[...] + jnp.dot(
        p.astype(v.dtype), v, preferred_element_type=jnp.float32)
    m_sc[...] = m_new

    @pl.when(ki == pl.num_programs(3) - 1)
    def _():
        o_ref[0] = (acc_sc[...] * pl.reciprocal(l_sc[...], approx=True)
                    ).astype(o_ref.dtype)


def _flash_call(q_src, q_off, k_src, k_off, v_src, v_off, mask, H, dk,
                tq, tsk, out_dtype):
    """Flash attention over grid (B, H, Tq, Sk).  Heads are addressed through
    BlockSpec column offsets on the flat source arrays; the output is written
    already head-merged as (B, T, H*dk)."""
    B, T, _ = q_src.shape
    S = k_src.shape[1]
    Tm = mask.shape[1]                     # 1 (padding mask) or T (causal mask)
    tq = _pick_tile(T, tq, 16)
    tsk = _pick_tile(S, tsk, 16)
    grid = (B, H, T // tq, S // tsk)
    qb, kb, vb = q_off // dk, k_off // dk, v_off // dk

    q_spec = pl.BlockSpec((1, tq, dk), lambda b, h, qi, ki: (b, qi, qb + h))
    k_spec = pl.BlockSpec((1, tsk, dk), lambda b, h, qi, ki: (b, ki, kb + h))
    v_spec = pl.BlockSpec((1, tsk, dk), lambda b, h, qi, ki: (b, ki, vb + h))
    if Tm == 1:
        m_spec = pl.BlockSpec((1, 1, tsk), lambda b, h, qi, ki: (b, 0, ki))
    else:
        m_spec = pl.BlockSpec((1, tq, tsk), lambda b, h, qi, ki: (b, qi, ki))
    o_spec = pl.BlockSpec((1, tq, dk), lambda b, h, qi, ki: (b, qi, h))

    return pl.pallas_call(
        partial(_flash_attn_kernel, scale=1.0 / math.sqrt(dk)),
        out_shape=jax.ShapeDtypeStruct((B, T, H * dk), out_dtype),
        grid=grid,
        in_specs=[q_spec, k_spec, v_spec, m_spec],
        out_specs=o_spec,
        scratch_shapes=[pltpu.VMEM((tq, 1), jnp.float32),
                        pltpu.VMEM((tq, 1), jnp.float32),
                        pltpu.VMEM((tq, dk), jnp.float32)],
        compiler_params=pltpu.CompilerParams(
            dimension_semantics=("parallel", "parallel", "parallel", "arbitrary"),
            vmem_limit_bytes=VMEM_LIMIT),
    )(q_src, k_src, v_src, mask)


def flash_mha(q_src, q_off, kv_src, k_off, v_off, mask, H, dk,
              tq=128, tsk=256, out_dtype=MXU_DTYPE):
    """Multi-head attention with no JAX-level head split/merge transposes
    when dk is lane-aligned (dk % 128 == 0)."""
    B, T, _ = q_src.shape
    S = kv_src.shape[1]

    if dk % 128 == 0:
        return _flash_call(q_src, q_off, kv_src, k_off, kv_src, v_off,
                           mask, H, dk, tq, tsk, out_dtype)

    # Fallback for dk < 128: materialize per-head layout (adds transposes).
    # TODO(synk): avoid this HBM round trip for non-lane-aligned head dims.
    q = q_src[..., q_off:q_off + H * dk].reshape(B, T, H, dk)
    q = q.transpose(0, 2, 1, 3).reshape(B * H, T, dk)
    k = kv_src[..., k_off:k_off + H * dk].reshape(B, S, H, dk)
    k = k.transpose(0, 2, 1, 3).reshape(B * H, S, dk)
    v = kv_src[..., v_off:v_off + H * dk].reshape(B, S, H, dk)
    v = v.transpose(0, 2, 1, 3).reshape(B * H, S, dk)
    m = jnp.repeat(mask, H, axis=0)
    ctx = _flash_call(q, 0, k, 0, v, 0, m, 1, dk, tq, tsk, out_dtype)
    return ctx.reshape(B, H, T, dk).transpose(0, 2, 1, 3).reshape(B, T, H * dk)


# --------------------------- model glue (plain JAX) -------------------------

def _prep_mask(mask):
    """(B, 1, Tm, S) -> (B, Tm, S) f32; no head / query-length broadcast.
    TODO(synk): per-head (B, H, T, S) masks not supported."""
    if mask.ndim == 4:
        mask = mask[:, 0]
    return mask.astype(jnp.float32)


def decoder_block(x, tgt_m, enc2_bf16, src_m, p, heads):
    B, T, D = x.shape
    S = src_m.shape[-1]
    H = heads
    dk = D // H

    x2 = x.reshape(B * T, D)                               # f32 residual stream

    # 1) pre-norm self-attention: LN fused into the joint QKV projection;
    #    heads indexed via BlockSpec column offsets on the flat (B,T,3D) qkv.
    sa = p["sa"]
    qkv = fused_ln_linear(x2, p["ln0_g"], p["ln0_b"], sa["wqkv"], sa["bqkv"],
                          out_dtype=MXU_DTYPE).reshape(B, T, 3 * D)
    ctx = flash_mha(qkv, 0, qkv, D, 2 * D, tgt_m, H, dk)   # (B, T, D) bf16
    x2 = linear(ctx.reshape(B * T, D), sa["wo"], sa["bo"], residual=x2)

    # 2) pre-norm cross-attention: Q from LN(x) (fused), K/V from enc_out.
    ca = p["ca"]
    qc = fused_ln_linear(x2, p["ln1_g"], p["ln1_b"], ca["wq"], ca["bq"],
                         out_dtype=MXU_DTYPE).reshape(B, T, D)
    kv = linear(enc2_bf16, ca["wkv"], ca["bkv"],
                out_dtype=MXU_DTYPE).reshape(B, S, 2 * D)
    ctx = flash_mha(qc, 0, kv, 0, D, src_m, H, dk)
    x2 = linear(ctx.reshape(B * T, D), ca["wo"], ca["bo"], residual=x2)

    # 3) pre-norm feed-forward: LN + ReLU fused into linear1, residual into linear2.
    ff = p["ffn"]
    h = fused_ln_linear(x2, p["ln2_g"], p["ln2_b"], ff["w1"], ff["b1"],
                        relu=True, out_dtype=MXU_DTYPE)
    x2 = linear(h, ff["w2"], ff["b2"], residual=x2)

    return x2.reshape(B, T, D)


def decoder_forward(dec_emb, tgt_mask, enc_output, src_mask, params, heads):
    B, T, D = dec_emb.shape
    S = enc_output.shape[1]
    tgt_m = _prep_mask(tgt_mask)                           # (B, T, T)
    src_m = _prep_mask(src_mask)                           # (B, 1, S)
    # encoder output feeds only the K/V projection MXU -> cast to bf16 once.
    enc2 = enc_output.reshape(B * S, D).astype(MXU_DTYPE)
    x = dec_emb
    for layer_p in params:
        x = decoder_block(x, tgt_m, enc2, src_m, layer_p, heads)
    return x


# ------------------------------ parameter init ------------------------------

def _init_linear(key, d_in, d_out):
    kw, kb = jax.random.split(key)
    bound = 1.0 / math.sqrt(d_in)
    w = jax.random.uniform(kw, (d_in, d_out), jnp.float32, -bound, bound)
    b = jax.random.uniform(kb, (d_out,), jnp.float32, -bound, bound)
    return w.astype(MXU_DTYPE), b                          # bf16 weights, f32 bias


def _init_self_mha(key, d_model):
    ks = jax.random.split(key, 4)
    wq, bq = _init_linear(ks[0], d_model, d_model)
    wk, bk = _init_linear(ks[1], d_model, d_model)
    wv, bv = _init_linear(ks[2], d_model, d_model)
    wo, bo = _init_linear(ks[3], d_model, d_model)
    return dict(wqkv=jnp.concatenate([wq, wk, wv], axis=1),
                bqkv=jnp.concatenate([bq, bk, bv], axis=0),
                wo=wo, bo=bo)


def _init_cross_mha(key, d_model):
    ks = jax.random.split(key, 4)
    wq, bq = _init_linear(ks[0], d_model, d_model)
    wk, bk = _init_linear(ks[1], d_model, d_model)
    wv, bv = _init_linear(ks[2], d_model, d_model)
    wo, bo = _init_linear(ks[3], d_model, d_model)
    return dict(wq=wq, bq=bq,
                wkv=jnp.concatenate([wk, wv], axis=1),
                bkv=jnp.concatenate([bk, bv], axis=0),
                wo=wo, bo=bo)


def init_decoder_params(key, d_model, n_layers, d_ff):
    layers = []
    for lkey in jax.random.split(key, n_layers):
        k1, k2, k3, k4 = jax.random.split(lkey, 4)
        w1, b1 = _init_linear(k3, d_model, d_ff)
        w2, b2 = _init_linear(k4, d_ff, d_model)
        layers.append(dict(
            sa=_init_self_mha(k1, d_model),
            ca=_init_cross_mha(k2, d_model),
            ffn=dict(w1=w1, b1=b1, w2=w2, b2=b2),
            ln0_g=jnp.ones((d_model,), jnp.float32),
            ln0_b=jnp.zeros((d_model,), jnp.float32),
            ln1_g=jnp.ones((d_model,), jnp.float32),
            ln1_b=jnp.zeros((d_model,), jnp.float32),
            ln2_g=jnp.ones((d_model,), jnp.float32),
            ln2_b=jnp.zeros((d_model,), jnp.float32),
        ))
    return layers


# ------------------------- pure-JAX f32 reference ---------------------------

def _ref_ln(x, g, b, eps=LN_EPS):
    mean = x.mean(-1, keepdims=True)
    var = ((x - mean) ** 2).mean(-1, keepdims=True)
    return g * (x - mean) / (jnp.sqrt(var) + eps) + b


def _ref_attention(q, k, v, mask):
    dk = q.shape[-1]
    scores = jnp.einsum('bhtd,bhsd->bhts', q, k) / math.sqrt(dk)
    scores = jnp.where(mask == 0.0, -1e9, scores)
    p = jax.nn.softmax(scores, axis=-1)
    return jnp.einsum('bhts,bhsd->bhtd', p, v)


def ref_decoder_block(x, tgt_mask, enc, src_mask, p, heads):
    B, T, D = x.shape
    S = enc.shape[1]
    H = heads
    dk = D // H
    sh = lambda t, n: t.reshape(B, n, H, dk).transpose(0, 2, 1, 3)
    mh = lambda t: t.transpose(0, 2, 1, 3).reshape(B, T, D)

    nx = _ref_ln(x, p["ln0_g"], p["ln0_b"])
    qkv = nx @ p["sa"]["wqkv"] + p["sa"]["bqkv"]
    q, k, v = jnp.split(qkv, 3, axis=-1)
    ctx = mh(_ref_attention(sh(q, T), sh(k, T), sh(v, T), tgt_mask))
    x = x + ctx @ p["sa"]["wo"] + p["sa"]["bo"]

    nx = _ref_ln(x, p["ln1_g"], p["ln1_b"])
    qc = nx @ p["ca"]["wq"] + p["ca"]["bq"]
    kv = enc @ p["ca"]["wkv"] + p["ca"]["bkv"]
    kc, vc = jnp.split(kv, 2, axis=-1)
    ctx = mh(_ref_attention(sh(qc, T), sh(kc, S), sh(vc, S), src_mask))
    x = x + ctx @ p["ca"]["wo"] + p["ca"]["bo"]

    nx = _ref_ln(x, p["ln2_g"], p["ln2_b"])
    h = jnp.maximum(nx @ p["ffn"]["w1"] + p["ffn"]["b1"], 0.0)
    x = x + h @ p["ffn"]["w2"] + p["ffn"]["b2"]
    return x


def ref_decoder_forward(dec_emb, tgt_mask, enc_output, src_mask, params, heads):
    x = dec_emb
    for layer_p in params:
        x = ref_decoder_block(x, tgt_mask, enc_output, src_mask, layer_p, heads)
    return x


# ----------------------------------- main -----------------------------------

if __name__ == "__main__":
    # Small shapes, but with dk = d_model // heads = 128 so the no-transpose
    # (lane-aligned) attention path is the one exercised.
    B, T, S = 2, 16, 16
    d_model, heads, d_ff, n_layers = 256, 2, 512, 2

    key = jax.random.PRNGKey(0)
    k_params, k_dec, k_enc = jax.random.split(key, 3)

    params = init_decoder_params(k_params, d_model, n_layers, d_ff)

    dec_emb = jax.random.normal(k_dec, (B, T, d_model), jnp.float32)
    enc_output = jax.random.normal(k_enc, (B, S, d_model), jnp.float32)

    # causal target mask (B,1,T,T); source mask (B,1,1,S) with some padding
    tgt_mask = jnp.tril(jnp.ones((T, T), jnp.float32))[None, None, :, :]
    tgt_mask = jnp.broadcast_to(tgt_mask, (B, 1, T, T))
    src_mask = jnp.stack([
        jnp.ones((S,), jnp.float32),
        jnp.concatenate([jnp.ones((S - 3,), jnp.float32),
                         jnp.zeros((3,), jnp.float32)]),
    ]).reshape(B, 1, 1, S)

    fwd = jax.jit(partial(decoder_forward, heads=heads))
    out = jax.block_until_ready(fwd(dec_emb, tgt_mask, enc_output, src_mask, params))

    assert out.shape == (B, T, d_model), out.shape
    assert bool(jnp.all(jnp.isfinite(out)))

    # correctness vs pure-JAX f32 reference (bf16 MXU operands -> loose tol)
    ref = ref_decoder_forward(dec_emb, tgt_mask, enc_output, src_mask, params, heads)
    err = float(jnp.max(jnp.abs(out - ref)))
    rel = err / max(1.0, float(jnp.max(jnp.abs(ref))))
    assert rel < 5e-2, f"rel err {rel} (abs {err}) vs f32 reference"

    print("KERNEL_OK")
</pallas_src>

<mosaic_0001>
module attributes {stable_mosaic.version = 11 : i64} {
  func.func @_matmul_residual_kernel(%arg0: i32, %arg1: i32, %arg2: i32, %arg3: memref<32x256xbf16, #tpu.memory_space<vmem>>, %arg4: memref<256x256xbf16, #tpu.memory_space<vmem>>, %arg5: memref<1x256xf32, #tpu.memory_space<vmem>>, %arg6: memref<32x256xf32, #tpu.memory_space<vmem>>, %arg7: memref<32x256xf32, #tpu.memory_space<vmem>>, %arg8: memref<32x256xf32, #tpu.memory_space<vmem>>) attributes {dimension_semantics = [#tpu.dimension_semantics<parallel>, #tpu.dimension_semantics<parallel>, #tpu.dimension_semantics<arbitrary>], iteration_bounds = array<i64: 1, 1, 1>, scalar_prefetch = 0 : i64, scratch_operands = 1 : i64, tpu.core_type = #tpu.core_type<tc>, window_params = [{transform_indices = @transform_0, window_bounds = array<i64: 32, 256>}, {transform_indices = @transform_1, window_bounds = array<i64: 256, 256>}, {transform_indices = @transform_2, window_bounds = array<i64: 1, 256>}, {transform_indices = @transform_3, window_bounds = array<i64: 32, 256>}, {transform_indices = @transform_4, window_bounds = array<i64: 32, 256>}]} {
    %c0_i32 = arith.constant 0 : i32
    %0 = arith.cmpi eq, %arg2, %c0_i32 : i32
    %1 = arith.extui %0 : i1 to i32
    %c0_i32_0 = arith.constant 0 : i32
    %2 = arith.cmpi ne, %1, %c0_i32_0 : i32
    scf.if %2 {
      %cst_10 = arith.constant 0.000000e+00 : f32
      %12 = vector.broadcast %cst_10 : f32 to vector<32x256xf32>
      %c0_11 = arith.constant 0 : index
      %c0_12 = arith.constant 0 : index
      %13 = vector.load %arg8[%c0_11, %c0_12] : memref<32x256xf32, #tpu.memory_space<vmem>>, vector<32x256xf32>
      tpu.vector_store %arg8[%c0_11, %c0_12], %12 {strides = array<i32>} : memref<32x256xf32, #tpu.memory_space<vmem>>, vector<32x256xf32>,
    } else {
    }
    %c0 = arith.constant 0 : index
    %c0_1 = arith.constant 0 : index
    %3 = vector.load %arg8[%c0, %c0_1] : memref<32x256xf32, #tpu.memory_space<vmem>>, vector<32x256xf32>
    %c0_2 = arith.constant 0 : index
    %c0_3 = arith.constant 0 : index
    %4 = vector.load %arg3[%c0_2, %c0_3] : memref<32x256xbf16, #tpu.memory_space<vmem>>, vector<32x256xbf16>
    %c0_4 = arith.constant 0 : index
    %c0_5 = arith.constant 0 : index
    %5 = vector.load %arg4[%c0_4, %c0_5] : memref<256x256xbf16, #tpu.memory_space<vmem>>, vector<256x256xbf16>
    %cst = arith.constant dense<0.000000e+00> : vector<32x256xf32>
    %6 = tpu.matmul %4, %5, %cst {dimension_numbers = #tpu.dot_dimension_numbers<[1], [0], [0], [1], [0, 0, 1, 1], [], []>} : vector<32x256xbf16>, vector<256x256xbf16>, vector<32x256xf32> -> vector<32x256xf32>
    %7 = arith.addf %3, %6 : vector<32x256xf32>
    %c0_6 = arith.constant 0 : index
    %c0_7 = arith.constant 0 : index
    %8 = vector.load %arg8[%c0_6, %c0_7] : memref<32x256xf32, #tpu.memory_space<vmem>>, vector<32x256xf32>
    tpu.vector_store %arg8[%c0_6, %c0_7], %7 {strides = array<i32>} : memref<32x256xf32, #tpu.memory_space<vmem>>, vector<32x256xf32>,
    %c0_i32_8 = arith.constant 0 : i32
    %9 = arith.cmpi eq, %arg2, %c0_i32_8 : i32
    %10 = arith.extui %9 : i1 to i32
    %c0_i32_9 = arith.constant 0 : i32
    %11 = arith.cmpi ne, %10, %c0_i32_9 : i32
    scf.if %11 {
      %c0_10 = arith.constant 0 : index
      %c0_11 = arith.constant 0 : index
      %12 = vector.load %arg8[%c0_10, %c0_11] : memref<32x256xf32, #tpu.memory_space<vmem>>, vector<32x256xf32>
      %c0_12 = arith.constant 0 : index
      %c0_13 = arith.constant 0 : index
      %13 = vector.load %arg5[%c0_12, %c0_13] : memref<1x256xf32, #tpu.memory_space<vmem>>, vector<1x256xf32>
      %14 = vector.broadcast %13 : vector<1x256xf32> to vector<32x256xf32>
      %15 = arith.addf %12, %14 : vector<32x256xf32>
      %c0_14 = arith.constant 0 : index
      %c0_15 = arith.constant 0 : index
      %16 = vector.load %arg6[%c0_14, %c0_15] : memref<32x256xf32, #tpu.memory_space<vmem>>, vector<32x256xf32>
      %17 = arith.addf %15, %16 : vector<32x256xf32>
      %c0_16 = arith.constant 0 : index
      %c0_17 = arith.constant 0 : index
      %18 = vector.load %arg7[%c0_16, %c0_17] : memref<32x256xf32, #tpu.memory_space<vmem>>, vector<32x256xf32>
      tpu.vector_store %arg7[%c0_16, %c0_17], %17 {strides = array<i32>} : memref<32x256xf32, #tpu.memory_space<vmem>>, vector<32x256xf32>,
    } else {
    }
    return
  }
  func.func @transform_0(%arg0: i32, %arg1: i32, %arg2: i32) -> (i32, i32) {
    %c0_i32 = arith.constant 0 : i32
    return %arg0, %arg2 : i32, i32
  }
  func.func @transform_1(%arg0: i32, %arg1: i32, %arg2: i32) -> (i32, i32) {
    %c0_i32 = arith.constant 0 : i32
    return %arg2, %arg1 : i32, i32
  }
  func.func @transform_2(%arg0: i32, %arg1: i32, %arg2: i32) -> (i32, i32) {
    %c0_i32 = arith.constant 0 : i32
    %c0_i32_0 = arith.constant 0 : i32
    return %c0_i32, %arg1 : i32, i32
  }
  func.func @transform_3(%arg0: i32, %arg1: i32, %arg2: i32) -> (i32, i32) {
    %c0_i32 = arith.constant 0 : i32
    return %arg0, %arg1 : i32, i32
  }
  func.func @transform_4(%arg0: i32, %arg1: i32, %arg2: i32) -> (i32, i32) {
    %c0_i32 = arith.constant 0 : i32
    return %arg0, %arg1 : i32, i32
  }
}

module attributes {stable_mosaic.version = 11 : i64} {
  func.func @_flash_attn_kernel(%arg0: i32, %arg1: i32, %arg2: i32, %arg3: i32, %arg4: memref<1x16x128xbf16, #tpu.memory_space<vmem>>, %arg5: memref<1x16x128xbf16, #tpu.memory_space<vmem>>, %arg6: memref<1x16x128xbf16, #tpu.memory_space<vmem>>, %arg7: memref<1x16x16xf32, #tpu.memory_space<vmem>>, %arg8: memref<1x16x128xbf16, #tpu.memory_space<vmem>>, %arg9: memref<16x1xf32, #tpu.memory_space<vmem>>, %arg10: memref<16x1xf32, #tpu.memory_space<vmem>>, %arg11: memref<16x128xf32, #tpu.memory_space<vmem>>) attributes {dimension_semantics = [#tpu.dimension_semantics<parallel>, #tpu.dimension_semantics<parallel>, #tpu.dimension_semantics<parallel>, #tpu.dimension_semantics<arbitrary>], iteration_bounds = array<i64: 2, 2, 1, 1>, scalar_prefetch = 0 : i64, scratch_operands = 3 : i64, tpu.core_type = #tpu.core_type<tc>, window_params = [{transform_indices = @transform_0, window_bounds = array<i64: 1, 16, 128>}, {transform_indices = @transform_1, window_bounds = array<i64: 1, 16, 128>}, {transform_indices = @transform_2, window_bounds = array<i64: 1, 16, 128>}, {transform_indices = @transform_3, window_bounds = array<i64: 1, 16, 16>}, {transform_indices = @transform_4, window_bounds = array<i64: 1, 16, 128>}]} {
    %c0_i32 = arith.constant 0 : i32
    %0 = arith.cmpi eq, %arg3, %c0_i32 : i32
    %1 = arith.extui %0 : i1 to i32
    %c0_i32_0 = arith.constant 0 : i32
    %2 = arith.cmpi ne, %1, %c0_i32_0 : i32
    scf.if %2 {
      %cst_32 = arith.constant 0xFF800000 : f32
      %44 = vector.broadcast %cst_32 : f32 to vector<16x1xf32>
      %c0_33 = arith.constant 0 : index
      %c0_34 = arith.constant 0 : index
      %45 = vector.load %arg9[%c0_33, %c0_34] : memref<16x1xf32, #tpu.memory_space<vmem>>, vector<16x1xf32>
      tpu.vector_store %arg9[%c0_33, %c0_34], %44 {strides = array<i32>} : memref<16x1xf32, #tpu.memory_space<vmem>>, vector<16x1xf32>,
      %cst_35 = arith.constant 0.000000e+00 : f32
      %46 = vector.broadcast %cst_35 : f32 to vector<16x1xf32>
      %c0_36 = arith.constant 0 : index
      %c0_37 = arith.constant 0 : index
      %47 = vector.load %arg10[%c0_36, %c0_37] : memref<16x1xf32, #tpu.memory_space<vmem>>, vector<16x1xf32>
      tpu.vector_store %arg10[%c0_36, %c0_37], %46 {strides = array<i32>} : memref<16x1xf32, #tpu.memory_space<vmem>>, vector<16x1xf32>,
      %cst_38 = arith.constant 0.000000e+00 : f32
      %48 = vector.broadcast %cst_38 : f32 to vector<16x128xf32>
      %c0_39 = arith.constant 0 : index
      %c0_40 = arith.constant 0 : index
      %49 = vector.load %arg11[%c0_39, %c0_40] : memref<16x128xf32, #tpu.memory_space<vmem>>, vector<16x128xf32>
      tpu.vector_store %arg11[%c0_39, %c0_40], %48 {strides = array<i32>} : memref<16x128xf32, #tpu.memory_space<vmem>>, vector<16x128xf32>,
    } else {
    }
    %c0 = arith.constant 0 : index
    %c0_1 = arith.constant 0 : index
    %c0_2 = arith.constant 0 : index
    %3 = vector.load %arg4[%c0, %c0_1, %c0_2] : memref<1x16x128xbf16, #tpu.memory_space<vmem>>, vector<1x16x128xbf16>
    %4 = vector.shape_cast %3 : vector<1x16x128xbf16> to vector<16x128xbf16>
    %c0_3 = arith.constant 0 : index
    %c0_4 = arith.constant 0 : index
    %c0_5 = arith.constant 0 : index
    %5 = vector.load %arg5[%c0_3, %c0_4, %c0_5] : memref<1x16x128xbf16, #tpu.memory_space<vmem>>, vector<1x16x128xbf16>
    %6 = vector.shape_cast %5 : vector<1x16x128xbf16> to vector<16x128xbf16>
    %c0_6 = arith.constant 0 : index
    %c0_7 = arith.constant 0 : index
    %c0_8 = arith.constant 0 : index
    %7 = vector.load %arg6[%c0_6, %c0_7, %c0_8] : memref<1x16x128xbf16, #tpu.memory_space<vmem>>, vector<1x16x128xbf16>
    %8 = vector.shape_cast %7 : vector<1x16x128xbf16> to vector<16x128xbf16>
    %cst = arith.constant dense<0.000000e+00> : vector<16x16xf32>
    %9 = tpu.matmul %4, %6, %cst {dimension_numbers = #tpu.dot_dimension_numbers<[1], [1], [0], [0], [0, 0, 1, 0], [], []>} : vector<16x128xbf16>, vector<16x128xbf16>, vector<16x16xf32> -> vector<16x16xf32>
    %cst_9 = arith.constant 0.0883883461 : f32
    %10 = vector.broadcast %cst_9 : f32 to vector<16x16xf32>
    %11 = arith.mulf %9, %10 : vector<16x16xf32>
    %c0_10 = arith.constant 0 : index
    %c0_11 = arith.constant 0 : index
    %c0_12 = arith.constant 0 : index
    %12 = vector.load %arg7[%c0_10, %c0_11, %c0_12] : memref<1x16x16xf32, #tpu.memory_space<vmem>>, vector<1x16x16xf32>
    %13 = vector.shape_cast %12 : vector<1x16x16xf32> to vector<16x16xf32>
    %cst_13 = arith.constant 0.000000e+00 : f32
    %14 = vector.broadcast %cst_13 : f32 to vector<16x16xf32>
    %15 = arith.cmpf oeq, %13, %14 : vector<16x16xf32>
    %cst_14 = arith.constant -1.000000e+09 : f32
    %16 = vector.broadcast %cst_14 : f32 to vector<16x16xf32>
    %17 = arith.select %15, %16, %11 : vector<16x16xi1>, vector<16x16xf32>
    %c0_15 = arith.constant 0 : index
    %c0_16 = arith.constant 0 : index
    %18 = vector.load %arg9[%c0_15, %c0_16] : memref<16x1xf32, #tpu.memory_space<vmem>>, vector<16x1xf32>
    %cst_17 = arith.constant dense<0xFF800000> : vector<16xf32>
    %19 = vector.multi_reduction <maximumf>, %17, %cst_17 [1] : vector<16x16xf32> to vector<16xf32>
    %20 = vector.shape_cast %19 : vector<16xf32> to vector<16x1xf32>
    %21 = arith.maximumf %18, %20 : vector<16x1xf32>
    %22 = arith.subf %18, %21 : vector<16x1xf32>
    %23 = math.exp %22 : vector<16x1xf32>
    %24 = vector.broadcast %21 : vector<16x1xf32> to vector<16x16xf32>
    %25 = arith.subf %17, %24 : vector<16x16xf32>
    %26 = math.exp %25 : vector<16x16xf32>
    %c0_18 = arith.constant 0 : index
    %c0_19 = arith.constant 0 : index
    %27 = vector.load %arg10[%c0_18, %c0_19] : memref<16x1xf32, #tpu.memory_space<vmem>>, vector<16x1xf32>
    %28 = arith.mulf %23, %27 : vector<16x1xf32>
    %cst_20 = arith.constant dense<0.000000e+00> : vector<16xf32>
    %29 = vector.multi_reduction <add>, %26, %cst_20 [1] : vector<16x16xf32> to vector<16xf32>
    %30 = vector.shape_cast %29 : vector<16xf32> to vector<16x1xf32>
    %31 = arith.addf %28, %30 : vector<16x1xf32>
    %c0_21 = arith.constant 0 : index
    %c0_22 = arith.constant 0 : index
    %32 = vector.load %arg10[%c0_21, %c0_22] : memref<16x1xf32, #tpu.memory_space<vmem>>, vector<16x1xf32>
    tpu.vector_store %arg10[%c0_21, %c0_22], %31 {strides = array<i32>} : memref<16x1xf32, #tpu.memory_space<vmem>>, vector<16x1xf32>,
    %c0_23 = arith.constant 0 : index
    %c0_24 = arith.constant 0 : index
    %33 = vector.load %arg11[%c0_23, %c0_24] : memref<16x128xf32, #tpu.memory_space<vmem>>, vector<16x128xf32>
    %34 = vector.broadcast %23 : vector<16x1xf32> to vector<16x128xf32>
    %35 = arith.mulf %34, %33 : vector<16x128xf32>
    %36 = arith.truncf %26 : vector<16x16xf32> to vector<16x16xbf16>
    %cst_25 = arith.constant dense<0.000000e+00> : vector<16x128xf32>
    %37 = tpu.matmul %36, %8, %cst_25 {dimension_numbers = #tpu.dot_dimension_numbers<[1], [0], [0], [1], [0, 0, 1, 1], [], []>} : vector<16x16xbf16>, vector<16x128xbf16>, vector<16x128xf32> -> vector<16x128xf32>
    %38 = arith.addf %35, %37 : vector<16x128xf32>
    %c0_26 = arith.constant 0 : index
    %c0_27 = arith.constant 0 : index
    %39 = vector.load %arg11[%c0_26, %c0_27] : memref<16x128xf32, #tpu.memory_space<vmem>>, vector<16x128xf32>
    tpu.vector_store %arg11[%c0_26, %c0_27], %38 {strides = array<i32>} : memref<16x128xf32, #tpu.memory_space<vmem>>, vector<16x128xf32>,
    %c0_28 = arith.constant 0 : index
    %c0_29 = arith.constant 0 : index
    %40 = vector.load %arg9[%c0_28, %c0_29] : memref<16x1xf32, #tpu.memory_space<vmem>>, vector<16x1xf32>
    tpu.vector_store %arg9[%c0_28, %c0_29], %21 {strides = array<i32>} : memref<16x1xf32, #tpu.memory_space<vmem>>, vector<16x1xf32>,
    %c0_i32_30 = arith.constant 0 : i32
    %41 = arith.cmpi eq, %arg3, %c0_i32_30 : i32
    %42 = arith.extui %41 : i1 to i32
    %c0_i32_31 = arith.constant 0 : i32
    %43 = arith.cmpi ne, %42, %c0_i32_31 : i32
    scf.if %43 {
      %c0_32 = arith.constant 0 : index
      %c0_33 = arith.constant 0 : index
      %44 = vector.load %arg11[%c0_32, %c0_33] : memref<16x128xf32, #tpu.memory_space<vmem>>, vector<16x128xf32>
      %c0_34 = arith.constant 0 : index
      %c0_35 = arith.constant 0 : index
      %45 = vector.load %arg10[%c0_34, %c0_35] : memref<16x1xf32, #tpu.memory_space<vmem>>, vector<16x1xf32>
      %46 = tpu.reciprocal %45 {approx = true} : vector<16x1xf32> -> vector<16x1xf32>
      %47 = vector.broadcast %46 : vector<16x1xf32> to vector<16x128xf32>
      %48 = arith.mulf %44, %47 : vector<16x128xf32>
      %49 = arith.truncf %48 : vector<16x128xf32> to vector<16x128xbf16>
      %c0_36 = arith.constant 0 : index
      %c0_37 = arith.constant 0 : index
      %c0_38 = arith.constant 0 : index
      %50 = vector.load %arg8[%c0_36, %c0_37, %c0_38] : memref<1x16x128xbf16, #tpu.memory_space<vmem>>, vector<1x16x128xbf16>
      %51 = vector.shape_cast %50 : vector<1x16x128xbf16> to vector<16x128xbf16>
      %52 = vector.shape_cast %49 : vector<16x128xbf16> to vector<1x16x128xbf16>
      tpu.vector_store %arg8[%c0_36, %c0_37, %c0_38], %52 {strides = array<i32>} : memref<1x16x128xbf16, #tpu.memory_space<vmem>>, vector<1x16x128xbf16>,
    } else {
    }
    return
  }
  func.func @transform_0(%arg0: i32, %arg1: i32, %arg2: i32, %arg3: i32) -> (i32, i32, i32) {
    %c0_i32 = arith.constant 0 : i32
    %0 = arith.addi %c0_i32, %arg1 : i32
    %c0_i32_0 = arith.constant 0 : i32
    return %arg0, %arg2, %0 : i32, i32, i32
  }
  func.func @transform_1(%arg0: i32, %arg1: i32, %arg2: i32, %arg3: i32) -> (i32, i32, i32) {
    %c2_i32 = arith.constant 2 : i32
    %0 = arith.addi %c2_i32, %arg1 : i32
    %c0_i32 = arith.constant 0 : i32
    return %arg0, %arg3, %0 : i32, i32, i32
  }
  func.func @transform_2(%arg0: i32, %arg1: i32, %arg2: i32, %arg3: i32) -> (i32, i32, i32) {
    %c4_i32 = arith.constant 4 : i32
    %0 = arith.addi %c4_i32, %arg1 : i32
    %c0_i32 = arith.constant 0 : i32
    return %arg0, %arg3, %0 : i32, i32, i32
  }
  func.func @transform_3(%arg0: i32, %arg1: i32, %arg2: i32, %arg3: i32) -> (i32, i32, i32) {
    %c0_i32 = arith.constant 0 : i32
    return %arg0, %arg2, %arg3 : i32, i32, i32
  }
  func.func @transform_4(%arg0: i32, %arg1: i32, %arg2: i32, %arg3: i32) -> (i32, i32, i32) {
    %c0_i32 = arith.constant 0 : i32
    return %arg0, %arg2, %arg1 : i32, i32, i32
  }
}

module attributes {stable_mosaic.version = 11 : i64} {
  func.func @_ln_linear_kernel(%arg0: i32, %arg1: i32, %arg2: memref<32x256xf32, #tpu.memory_space<vmem>>, %arg3: memref<1x256xf32, #tpu.memory_space<vmem>>, %arg4: memref<1x256xf32, #tpu.memory_space<vmem>>, %arg5: memref<256x384xbf16, #tpu.memory_space<vmem>>, %arg6: memref<1x384xf32, #tpu.memory_space<vmem>>, %arg7: memref<32x384xbf16, #tpu.memory_space<vmem>>, %arg8: memref<32x256xbf16, #tpu.memory_space<vmem>>) attributes {dimension_semantics = [#tpu.dimension_semantics<parallel>, #tpu.dimension_semantics<arbitrary>], iteration_bounds = array<i64: 1, 2>, scalar_prefetch = 0 : i64, scratch_operands = 1 : i64, tpu.core_type = #tpu.core_type<tc>, window_params = [{transform_indices = @transform_0, window_bounds = array<i64: 32, 256>}, {pipeline_mode = #tpu.pipeline_mode<synchronous>, transform_indices = @transform_1, window_bounds = array<i64: 1, 256>}, {pipeline_mode = #tpu.pipeline_mode<synchronous>, transform_indices = @transform_2, window_bounds = array<i64: 1, 256>}, {transform_indices = @transform_3, window_bounds = array<i64: 256, 384>}, {transform_indices = @transform_4, window_bounds = array<i64: 1, 384>}, {transform_indices = @transform_5, window_bounds = array<i64: 32, 384>}]} {
    %c0_i32 = arith.constant 0 : i32
    %0 = arith.cmpi eq, %arg1, %c0_i32 : i32
    %1 = arith.extui %0 : i1 to i32
    %c0_i32_0 = arith.constant 0 : i32
    %2 = arith.cmpi ne, %1, %c0_i32_0 : i32
    scf.if %2 {
      %c0_8 = arith.constant 0 : index
      %c0_9 = arith.constant 0 : index
      %11 = vector.load %arg2[%c0_8, %c0_9] : memref<32x256xf32, #tpu.memory_space<vmem>>, vector<32x256xf32>
      %cst_10 = arith.constant dense<0.000000e+00> : vector<32xf32>
      %12 = vector.multi_reduction <add>, %11, %cst_10 [1] : vector<32x256xf32> to vector<32xf32>
      %13 = vector.shape_cast %12 : vector<32xf32> to vector<32x1xf32>
      %cst_11 = arith.constant 2.560000e+02 : f32
      %14 = vector.broadcast %cst_11 : f32 to vector<32x1xf32>
      %15 = arith.divf %13, %14 : vector<32x1xf32>
      %16 = vector.broadcast %15 : vector<32x1xf32> to vector<32x256xf32>
      %17 = arith.subf %11, %16 : vector<32x256xf32>
      %18 = arith.mulf %17, %17 : vector<32x256xf32>
      %cst_12 = arith.constant dense<0.000000e+00> : vector<32xf32>
      %19 = vector.multi_reduction <add>, %18, %cst_12 [1] : vector<32x256xf32> to vector<32xf32>
      %20 = vector.shape_cast %19 : vector<32xf32> to vector<32x1xf32>
      %cst_13 = arith.constant 2.560000e+02 : f32
      %21 = vector.broadcast %cst_13 : f32 to vector<32x1xf32>
      %22 = arith.divf %20, %21 : vector<32x1xf32>
      %c0_14 = arith.constant 0 : index
      %c0_15 = arith.constant 0 : index
      %23 = vector.load %arg3[%c0_14, %c0_15] : memref<1x256xf32, #tpu.memory_space<vmem>>, vector<1x256xf32>
      %24 = vector.broadcast %15 : vector<32x1xf32> to vector<32x256xf32>
      %25 = arith.subf %11, %24 : vector<32x256xf32>
      %26 = vector.broadcast %23 : vector<1x256xf32> to vector<32x256xf32>
      %27 = arith.mulf %26, %25 : vector<32x256xf32>
      %28 = math.sqrt %22 : vector<32x1xf32>
      %cst_16 = arith.constant 9.99999997E-7 : f32
      %29 = vector.broadcast %cst_16 : f32 to vector<32x1xf32>
      %30 = arith.addf %28, %29 : vector<32x1xf32>
      %31 = vector.broadcast %30 : vector<32x1xf32> to vector<32x256xf32>
      %32 = arith.divf %27, %31 : vector<32x256xf32>
      %c0_17 = arith.constant 0 : index
      %c0_18 = arith.constant 0 : index
      %33 = vector.load %arg4[%c0_17, %c0_18] : memref<1x256xf32, #tpu.memory_space<vmem>>, vector<1x256xf32>
      %34 = vector.broadcast %33 : vector<1x256xf32> to vector<32x256xf32>
      %35 = arith.addf %32, %34 : vector<32x256xf32>
      %36 = arith.truncf %35 : vector<32x256xf32> to vector<32x256xbf16>
      %c0_19 = arith.constant 0 : index
      %c0_20 = arith.constant 0 : index
      %37 = vector.load %arg8[%c0_19, %c0_20] : memref<32x256xbf16, #tpu.memory_space<vmem>>, vector<32x256xbf16>
      tpu.vector_store %arg8[%c0_19, %c0_20], %36 {strides = array<i32>} : memref<32x256xbf16, #tpu.memory_space<vmem>>, vector<32x256xbf16>,
    } else {
    }
    %c0 = arith.constant 0 : index
    %c0_1 = arith.constant 0 : index
    %3 = vector.load %arg8[%c0, %c0_1] : memref<32x256xbf16, #tpu.memory_space<vmem>>, vector<32x256xbf16>
    %c0_2 = arith.constant 0 : index
    %c0_3 = arith.constant 0 : index
    %4 = vector.load %arg5[%c0_2, %c0_3] : memref<256x384xbf16, #tpu.memory_space<vmem>>, vector<256x384xbf16>
    %cst = arith.constant dense<0.000000e+00> : vector<32x384xf32>
    %5 = tpu.matmul %3, %4, %cst {dimension_numbers = #tpu.dot_dimension_numbers<[1], [0], [0], [1], [0, 0, 1, 1], [], []>} : vector<32x256xbf16>, vector<256x384xbf16>, vector<32x384xf32> -> vector<32x384xf32>
    %c0_4 = arith.constant 0 : index
    %c0_5 = arith.constant 0 : index
    %6 = vector.load %arg6[%c0_4, %c0_5] : memref<1x384xf32, #tpu.memory_space<vmem>>, vector<1x384xf32>
    %7 = vector.broadcast %6 : vector<1x384xf32> to vector<32x384xf32>
    %8 = arith.addf %5, %7 : vector<32x384xf32>
    %9 = arith.truncf %8 : vector<32x384xf32> to vector<32x384xbf16>
    %c0_6 = arith.constant 0 : index
    %c0_7 = arith.constant 0 : index
    %10 = vector.load %arg7[%c0_6, %c0_7] : memref<32x384xbf16, #tpu.memory_space<vmem>>, vector<32x384xbf16>
    tpu.vector_store %arg7[%c0_6, %c0_7], %9 {strides = array<i32>} : memref<32x384xbf16, #tpu.memory_space<vmem>>, vector<32x384xbf16>,
    return
  }
  func.func @transform_0(%arg0: i32, %arg1: i32) -> (i32, i32) {
    %c0_i32 = arith.constant 0 : i32
    %c0_i32_0 = arith.constant 0 : i32
    return %arg0, %c0_i32 : i32, i32
  }
  func.func @transform_1(%arg0: i32, %arg1: i32) -> (i32, i32) {
    %c0_i32 = arith.constant 0 : i32
    %c0_i32_0 = arith.constant 0 : i32
    %c0_i32_1 = arith.constant 0 : i32
    return %c0_i32, %c0_i32_0 : i32, i32
  }
  func.func @transform_2(%arg0: i32, %arg1: i32) -> (i32, i32) {
    %c0_i32 = arith.constant 0 : i32
    %c0_i32_0 = arith.constant 0 : i32
    %c0_i32_1 = arith.constant 0 : i32
    return %c0_i32, %c0_i32_0 : i32, i32
  }
  func.func @transform_3(%arg0: i32, %arg1: i32) -> (i32, i32) {
    %c0_i32 = arith.constant 0 : i32
    %c0_i32_0 = arith.constant 0 : i32
    return %c0_i32, %arg1 : i32, i32
  }
  func.func @transform_4(%arg0: i32, %arg1: i32) -> (i32, i32) {
    %c0_i32 = arith.constant 0 : i32
    %c0_i32_0 = arith.constant 0 : i32
    return %c0_i32, %arg1 : i32, i32
  }
  func.func @transform_5(%arg0: i32, %arg1: i32) -> (i32, i32) {
    %c0_i32 = arith.constant 0 : i32
    return %arg0, %arg1 : i32, i32
  }
}

module attributes {stable_mosaic.version = 11 : i64} {
  func.func @_ln_linear_kernel(%arg0: i32, %arg1: i32, %arg2: memref<32x256xf32, #tpu.memory_space<vmem>>, %arg3: memref<1x256xf32, #tpu.memory_space<vmem>>, %arg4: memref<1x256xf32, #tpu.memory_space<vmem>>, %arg5: memref<256x256xbf16, #tpu.memory_space<vmem>>, %arg6: memref<1x256xf32, #tpu.memory_space<vmem>>, %arg7: memref<32x256xbf16, #tpu.memory_space<vmem>>, %arg8: memref<32x256xbf16, #tpu.memory_space<vmem>>) attributes {dimension_semantics = [#tpu.dimension_semantics<parallel>, #tpu.dimension_semantics<arbitrary>], iteration_bounds = array<i64: 1, 1>, scalar_prefetch = 0 : i64, scratch_operands = 1 : i64, tpu.core_type = #tpu.core_type<tc>, window_params = [{transform_indices = @transform_0, window_bounds = array<i64: 32, 256>}, {pipeline_mode = #tpu.pipeline_mode<synchronous>, transform_indices = @transform_1, window_bounds = array<i64: 1, 256>}, {pipeline_mode = #tpu.pipeline_mode<synchronous>, transform_indices = @transform_2, window_bounds = array<i64: 1, 256>}, {transform_indices = @transform_3, window_bounds = array<i64: 256, 256>}, {transform_indices = @transform_4, window_bounds = array<i64: 1, 256>}, {transform_indices = @transform_5, window_bounds = array<i64: 32, 256>}]} {
    %c0_i32 = arith.constant 0 : i32
    %0 = arith.cmpi eq, %arg1, %c0_i32 : i32
    %1 = arith.extui %0 : i1 to i32
    %c0_i32_0 = arith.constant 0 : i32
    %2 = arith.cmpi ne, %1, %c0_i32_0 : i32
    scf.if %2 {
      %c0_8 = arith.constant 0 : index
      %c0_9 = arith.constant 0 : index
      %11 = vector.load %arg2[%c0_8, %c0_9] : memref<32x256xf32, #tpu.memory_space<vmem>>, vector<32x256xf32>
      %cst_10 = arith.constant dense<0.000000e+00> : vector<32xf32>
      %12 = vector.multi_reduction <add>, %11, %cst_10 [1] : vector<32x256xf32> to vector<32xf32>
      %13 = vector.shape_cast %12 : vector<32xf32> to vector<32x1xf32>
      %cst_11 = arith.constant 2.560000e+02 : f32
      %14 = vector.broadcast %cst_11 : f32 to vector<32x1xf32>
      %15 = arith.divf %13, %14 : vector<32x1xf32>
      %16 = vector.broadcast %15 : vector<32x1xf32> to vector<32x256xf32>
      %17 = arith.subf %11, %16 : vector<32x256xf32>
      %18 = arith.mulf %17, %17 : vector<32x256xf32>
      %cst_12 = arith.constant dense<0.000000e+00> : vector<32xf32>
      %19 = vector.multi_reduction <add>, %18, %cst_12 [1] : vector<32x256xf32> to vector<32xf32>
      %20 = vector.shape_cast %19 : vector<32xf32> to vector<32x1xf32>
      %cst_13 = arith.constant 2.560000e+02 : f32
      %21 = vector.broadcast %cst_13 : f32 to vector<32x1xf32>
      %22 = arith.divf %20, %21 : vector<32x1xf32>
      %c0_14 = arith.constant 0 : index
      %c0_15 = arith.constant 0 : index
      %23 = vector.load %arg3[%c0_14, %c0_15] : memref<1x256xf32, #tpu.memory_space<vmem>>, vector<1x256xf32>
      %24 = vector.broadcast %15 : vector<32x1xf32> to vector<32x256xf32>
      %25 = arith.subf %11, %24 : vector<32x256xf32>
      %26 = vector.broadcast %23 : vector<1x256xf32> to vector<32x256xf32>
      %27 = arith.mulf %26, %25 : vector<32x256xf32>
      %28 = math.sqrt %22 : vector<32x1xf32>
      %cst_16 = arith.constant 9.99999997E-7 : f32
      %29 = vector.broadcast %cst_16 : f32 to vector<32x1xf32>
      %30 = arith.addf %28, %29 : vector<32x1xf32>
      %31 = vector.broadcast %30 : vector<32x1xf32> to vector<32x256xf32>
      %32 = arith.divf %27, %31 : vector<32x256xf32>
      %c0_17 = arith.constant 0 : index
      %c0_18 = arith.constant 0 : index
      %33 = vector.load %arg4[%c0_17, %c0_18] : memref<1x256xf32, #tpu.memory_space<vmem>>, vector<1x256xf32>
      %34 = vector.broadcast %33 : vector<1x256xf32> to vector<32x256xf32>
      %35 = arith.addf %32, %34 : vector<32x256xf32>
      %36 = arith.truncf %35 : vector<32x256xf32> to vector<32x256xbf16>
      %c0_19 = arith.constant 0 : index
      %c0_20 = arith.constant 0 : index
      %37 = vector.load %arg8[%c0_19, %c0_20] : memref<32x256xbf16, #tpu.memory_space<vmem>>, vector<32x256xbf16>
      tpu.vector_store %arg8[%c0_19, %c0_20], %36 {strides = array<i32>} : memref<32x256xbf16, #tpu.memory_space<vmem>>, vector<32x256xbf16>,
    } else {
    }
    %c0 = arith.constant 0 : index
    %c0_1 = arith.constant 0 : index
    %3 = vector.load %arg8[%c0, %c0_1] : memref<32x256xbf16, #tpu.memory_space<vmem>>, vector<32x256xbf16>
    %c0_2 = arith.constant 0 : index
    %c0_3 = arith.constant 0 : index
    %4 = vector.load %arg5[%c0_2, %c0_3] : memref<256x256xbf16, #tpu.memory_space<vmem>>, vector<256x256xbf16>
    %cst = arith.constant dense<0.000000e+00> : vector<32x256xf32>
    %5 = tpu.matmul %3, %4, %cst {dimension_numbers = #tpu.dot_dimension_numbers<[1], [0], [0], [1], [0, 0, 1, 1], [], []>} : vector<32x256xbf16>, vector<256x256xbf16>, vector<32x256xf32> -> vector<32x256xf32>
    %c0_4 = arith.constant 0 : index
    %c0_5 = arith.constant 0 : index
    %6 = vector.load %arg6[%c0_4, %c0_5] : memref<1x256xf32, #tpu.memory_space<vmem>>, vector<1x256xf32>
    %7 = vector.broadcast %6 : vector<1x256xf32> to vector<32x256xf32>
    %8 = arith.addf %5, %7 : vector<32x256xf32>
    %9 = arith.truncf %8 : vector<32x256xf32> to vector<32x256xbf16>
    %c0_6 = arith.constant 0 : index
    %c0_7 = arith.constant 0 : index
    %10 = vector.load %arg7[%c0_6, %c0_7] : memref<32x256xbf16, #tpu.memory_space<vmem>>, vector<32x256xbf16>
    tpu.vector_store %arg7[%c0_6, %c0_7], %9 {strides = array<i32>} : memref<32x256xbf16, #tpu.memory_space<vmem>>, vector<32x256xbf16>,
    return
  }
  func.func @transform_0(%arg0: i32, %arg1: i32) -> (i32, i32) {
    %c0_i32 = arith.constant 0 : i32
    %c0_i32_0 = arith.constant 0 : i32
    return %arg0, %c0_i32 : i32, i32
  }
  func.func @transform_1(%arg0: i32, %arg1: i32) -> (i32, i32) {
    %c0_i32 = arith.constant 0 : i32
    %c0_i32_0 = arith.constant 0 : i32
    %c0_i32_1 = arith.constant 0 : i32
    return %c0_i32, %c0_i32_0 : i32, i32
  }
  func.func @transform_2(%arg0: i32, %arg1: i32) -> (i32, i32) {
    %c0_i32 = arith.constant 0 : i32
    %c0_i32_0 = arith.constant 0 : i32
    %c0_i32_1 = arith.constant 0 : i32
    return %c0_i32, %c0_i32_0 : i32, i32
  }
  func.func @transform_3(%arg0: i32, %arg1: i32) -> (i32, i32) {
    %c0_i32 = arith.constant 0 : i32
    %c0_i32_0 = arith.constant 0 : i32
    return %c0_i32, %arg1 : i32, i32
  }
  func.func @transform_4(%arg0: i32, %arg1: i32) -> (i32, i32) {
    %c0_i32 = arith.constant 0 : i32
    %c0_i32_0 = arith.constant 0 : i32
    return %c0_i32, %arg1 : i32, i32
  }
  func.func @transform_5(%arg0: i32, %arg1: i32) -> (i32, i32) {
    %c0_i32 = arith.constant 0 : i32
    return %arg0, %arg1 : i32, i32
  }
}

module attributes {stable_mosaic.version = 11 : i64} {
  func.func @_matmul_kernel(%arg0: i32, %arg1: i32, %arg2: i32, %arg3: memref<32x256xbf16, #tpu.memory_space<vmem>>, %arg4: memref<256x512xbf16, #tpu.memory_space<vmem>>, %arg5: memref<1x512xf32, #tpu.memory_space<vmem>>, %arg6: memref<32x512xbf16, #tpu.memory_space<vmem>>, %arg7: memref<32x512xf32, #tpu.memory_space<vmem>>) attributes {dimension_semantics = [#tpu.dimension_semantics<parallel>, #tpu.dimension_semantics<parallel>, #tpu.dimension_semantics<arbitrary>], iteration_bounds = array<i64: 1, 1, 1>, scalar_prefetch = 0 : i64, scratch_operands = 1 : i64, tpu.core_type = #tpu.core_type<tc>, window_params = [{transform_indices = @transform_0, window_bounds = array<i64: 32, 256>}, {transform_indices = @transform_1, window_bounds = array<i64: 256, 512>}, {transform_indices = @transform_2, window_bounds = array<i64: 1, 512>}, {transform_indices = @transform_3, window_bounds = array<i64: 32, 512>}]} {
    %c0_i32 = arith.constant 0 : i32
    %0 = arith.cmpi eq, %arg2, %c0_i32 : i32
    %1 = arith.extui %0 : i1 to i32
    %c0_i32_0 = arith.constant 0 : i32
    %2 = arith.cmpi ne, %1, %c0_i32_0 : i32
    scf.if %2 {
      %cst_10 = arith.constant 0.000000e+00 : f32
      %12 = vector.broadcast %cst_10 : f32 to vector<32x512xf32>
      %c0_11 = arith.constant 0 : index
      %c0_12 = arith.constant 0 : index
      %13 = vector.load %arg7[%c0_11, %c0_12] : memref<32x512xf32, #tpu.memory_space<vmem>>, vector<32x512xf32>
      tpu.vector_store %arg7[%c0_11, %c0_12], %12 {strides = array<i32>} : memref<32x512xf32, #tpu.memory_space<vmem>>, vector<32x512xf32>,
    } else {
    }
    %c0 = arith.constant 0 : index
    %c0_1 = arith.constant 0 : index
    %3 = vector.load %arg7[%c0, %c0_1] : memref<32x512xf32, #tpu.memory_space<vmem>>, vector<32x512xf32>
    %c0_2 = arith.constant 0 : index
    %c0_3 = arith.constant 0 : index
    %4 = vector.load %arg3[%c0_2, %c0_3] : memref<32x256xbf16, #tpu.memory_space<vmem>>, vector<32x256xbf16>
    %c0_4 = arith.constant 0 : index
    %c0_5 = arith.constant 0 : index
    %5 = vector.load %arg4[%c0_4, %c0_5] : memref<256x512xbf16, #tpu.memory_space<vmem>>, vector<256x512xbf16>
    %cst = arith.constant dense<0.000000e+00> : vector<32x512xf32>
    %6 = tpu.matmul %4, %5, %cst {dimension_numbers = #tpu.dot_dimension_numbers<[1], [0], [0], [1], [0, 0, 1, 1], [], []>} : vector<32x256xbf16>, vector<256x512xbf16>, vector<32x512xf32> -> vector<32x512xf32>
    %7 = arith.addf %3, %6 : vector<32x512xf32>
    %c0_6 = arith.constant 0 : index
    %c0_7 = arith.constant 0 : index
    %8 = vector.load %arg7[%c0_6, %c0_7] : memref<32x512xf32, #tpu.memory_space<vmem>>, vector<32x512xf32>
    tpu.vector_store %arg7[%c0_6, %c0_7], %7 {strides = array<i32>} : memref<32x512xf32, #tpu.memory_space<vmem>>, vector<32x512xf32>,
    %c0_i32_8 = arith.constant 0 : i32
    %9 = arith.cmpi eq, %arg2, %c0_i32_8 : i32
    %10 = arith.extui %9 : i1 to i32
    %c0_i32_9 = arith.constant 0 : i32
    %11 = arith.cmpi ne, %10, %c0_i32_9 : i32
    scf.if %11 {
      %c0_10 = arith.constant 0 : index
      %c0_11 = arith.constant 0 : index
      %12 = vector.load %arg7[%c0_10, %c0_11] : memref<32x512xf32, #tpu.memory_space<vmem>>, vector<32x512xf32>
      %c0_12 = arith.constant 0 : index
      %c0_13 = arith.constant 0 : index
      %13 = vector.load %arg5[%c0_12, %c0_13] : memref<1x512xf32, #tpu.memory_space<vmem>>, vector<1x512xf32>
      %14 = vector.broadcast %13 : vector<1x512xf32> to vector<32x512xf32>
      %15 = arith.addf %12, %14 : vector<32x512xf32>
      %16 = arith.truncf %15 : vector<32x512xf32> to vector<32x512xbf16>
      %c0_14 = arith.constant 0 : index
      %c0_15 = arith.constant 0 : index
      %17 = vector.load %arg6[%c0_14, %c0_15] : memref<32x512xbf16, #tpu.memory_space<vmem>>, vector<32x512xbf16>
      tpu.vector_store %arg6[%c0_14, %c0_15], %16 {strides = array<i32>} : memref<32x512xbf16, #tpu.memory_space<vmem>>, vector<32x512xbf16>,
    } else {
    }
    return
  }
  func.func @transform_0(%arg0: i32, %arg1: i32, %arg2: i32) -> (i32, i32) {
    %c0_i32 = arith.constant 0 : i32
    return %arg0, %arg2 : i32, i32
  }
  func.func @transform_1(%arg0: i32, %arg1: i32, %arg2: i32) -> (i32, i32) {
    %c0_i32 = arith.constant 0 : i32
    return %arg2, %arg1 : i32, i32
  }
  func.func @transform_2(%arg0: i32, %arg1: i32, %arg2: i32) -> (i32, i32) {
    %c0_i32 = arith.constant 0 : i32
    %c0_i32_0 = arith.constant 0 : i32
    return %c0_i32, %arg1 : i32, i32
  }
  func.func @transform_3(%arg0: i32, %arg1: i32, %arg2: i32) -> (i32, i32) {
    %c0_i32 = arith.constant 0 : i32
    return %arg0, %arg1 : i32, i32
  }
}

module attributes {stable_mosaic.version = 11 : i64} {
  func.func @_flash_attn_kernel(%arg0: i32, %arg1: i32, %arg2: i32, %arg3: i32, %arg4: memref<1x16x128xbf16, #tpu.memory_space<vmem>>, %arg5: memref<1x16x128xbf16, #tpu.memory_space<vmem>>, %arg6: memref<1x16x128xbf16, #tpu.memory_space<vmem>>, %arg7: memref<1x1x16xf32, #tpu.memory_space<vmem>>, %arg8: memref<1x16x128xbf16, #tpu.memory_space<vmem>>, %arg9: memref<16x1xf32, #tpu.memory_space<vmem>>, %arg10: memref<16x1xf32, #tpu.memory_space<vmem>>, %arg11: memref<16x128xf32, #tpu.memory_space<vmem>>) attributes {dimension_semantics = [#tpu.dimension_semantics<parallel>, #tpu.dimension_semantics<parallel>, #tpu.dimension_semantics<parallel>, #tpu.dimension_semantics<arbitrary>], iteration_bounds = array<i64: 2, 2, 1, 1>, scalar_prefetch = 0 : i64, scratch_operands = 3 : i64, tpu.core_type = #tpu.core_type<tc>, window_params = [{transform_indices = @transform_0, window_bounds = array<i64: 1, 16, 128>}, {transform_indices = @transform_1, window_bounds = array<i64: 1, 16, 128>}, {transform_indices = @transform_2, window_bounds = array<i64: 1, 16, 128>}, {transform_indices = @transform_3, window_bounds = array<i64: 1, 1, 16>}, {transform_indices = @transform_4, window_bounds = array<i64: 1, 16, 128>}]} {
    %c0_i32 = arith.constant 0 : i32
    %0 = arith.cmpi eq, %arg3, %c0_i32 : i32
    %1 = arith.extui %0 : i1 to i32
    %c0_i32_0 = arith.constant 0 : i32
    %2 = arith.cmpi ne, %1, %c0_i32_0 : i32
    scf.if %2 {
      %cst_32 = arith.constant 0xFF800000 : f32
      %46 = vector.broadcast %cst_32 : f32 to vector<16x1xf32>
      %c0_33 = arith.constant 0 : index
      %c0_34 = arith.constant 0 : index
      %47 = vector.load %arg9[%c0_33, %c0_34] : memref<16x1xf32, #tpu.memory_space<vmem>>, vector<16x1xf32>
      tpu.vector_store %arg9[%c0_33, %c0_34], %46 {strides = array<i32>} : memref<16x1xf32, #tpu.memory_space<vmem>>, vector<16x1xf32>,
      %cst_35 = arith.constant 0.000000e+00 : f32
      %48 = vector.broadcast %cst_35 : f32 to vector<16x1xf32>
      %c0_36 = arith.constant 0 : index
      %c0_37 = arith.constant 0 : index
      %49 = vector.load %arg10[%c0_36, %c0_37] : memref<16x1xf32, #tpu.memory_space<vmem>>, vector<16x1xf32>
      tpu.vector_store %arg10[%c0_36, %c0_37], %48 {strides = array<i32>} : memref<16x1xf32, #tpu.memory_space<vmem>>, vector<16x1xf32>,
      %cst_38 = arith.constant 0.000000e+00 : f32
      %50 = vector.broadcast %cst_38 : f32 to vector<16x128xf32>
      %c0_39 = arith.constant 0 : index
      %c0_40 = arith.constant 0 : index
      %51 = vector.load %arg11[%c0_39, %c0_40] : memref<16x128xf32, #tpu.memory_space<vmem>>, vector<16x128xf32>
      tpu.vector_store %arg11[%c0_39, %c0_40], %50 {strides = array<i32>} : memref<16x128xf32, #tpu.memory_space<vmem>>, vector<16x128xf32>,
    } else {
    }
    %c0 = arith.constant 0 : index
    %c0_1 = arith.constant 0 : index
    %c0_2 = arith.constant 0 : index
    %3 = vector.load %arg4[%c0, %c0_1, %c0_2] : memref<1x16x128xbf16, #tpu.memory_space<vmem>>, vector<1x16x128xbf16>
    %4 = vector.shape_cast %3 : vector<1x16x128xbf16> to vector<16x128xbf16>
    %c0_3 = arith.constant 0 : index
    %c0_4 = arith.constant 0 : index
    %c0_5 = arith.constant 0 : index
    %5 = vector.load %arg5[%c0_3, %c0_4, %c0_5] : memref<1x16x128xbf16, #tpu.memory_space<vmem>>, vector<1x16x128xbf16>
    %6 = vector.shape_cast %5 : vector<1x16x128xbf16> to vector<16x128xbf16>
    %c0_6 = arith.constant 0 : index
    %c0_7 = arith.constant 0 : index
    %c0_8 = arith.constant 0 : index
    %7 = vector.load %arg6[%c0_6, %c0_7, %c0_8] : memref<1x16x128xbf16, #tpu.memory_space<vmem>>, vector<1x16x128xbf16>
    %8 = vector.shape_cast %7 : vector<1x16x128xbf16> to vector<16x128xbf16>
    %cst = arith.constant dense<0.000000e+00> : vector<16x16xf32>
    %9 = tpu.matmul %4, %6, %cst {dimension_numbers = #tpu.dot_dimension_numbers<[1], [1], [0], [0], [0, 0, 1, 0], [], []>} : vector<16x128xbf16>, vector<16x128xbf16>, vector<16x16xf32> -> vector<16x16xf32>
    %cst_9 = arith.constant 0.0883883461 : f32
    %10 = vector.broadcast %cst_9 : f32 to vector<16x16xf32>
    %11 = arith.mulf %9, %10 : vector<16x16xf32>
    %c0_10 = arith.constant 0 : index
    %c0_11 = arith.constant 0 : index
    %c0_12 = arith.constant 0 : index
    %12 = vector.load %arg7[%c0_10, %c0_11, %c0_12] : memref<1x1x16xf32, #tpu.memory_space<vmem>>, vector<1x1x16xf32>
    %13 = vector.shape_cast %12 : vector<1x1x16xf32> to vector<1x16xf32>
    %cst_13 = arith.constant 0.000000e+00 : f32
    %14 = vector.broadcast %cst_13 : f32 to vector<1x16xf32>
    %15 = arith.cmpf oeq, %13, %14 : vector<1x16xf32>
    %cst_14 = arith.constant -1.000000e+09 : f32
    %16 = vector.shape_cast %15 : vector<1x16xi1> to vector<1x16xi1>
    %17 = vector.broadcast %16 : vector<1x16xi1> to vector<16x16xi1>
    %18 = vector.broadcast %cst_14 : f32 to vector<16x16xf32>
    %19 = arith.select %17, %18, %11 : vector<16x16xi1>, vector<16x16xf32>
    %c0_15 = arith.constant 0 : index
    %c0_16 = arith.constant 0 : index
    %20 = vector.load %arg9[%c0_15, %c0_16] : memref<16x1xf32, #tpu.memory_space<vmem>>, vector<16x1xf32>
    %cst_17 = arith.constant dense<0xFF800000> : vector<16xf32>
    %21 = vector.multi_reduction <maximumf>, %19, %cst_17 [1] : vector<16x16xf32> to vector<16xf32>
    %22 = vector.shape_cast %21 : vector<16xf32> to vector<16x1xf32>
    %23 = arith.maximumf %20, %22 : vector<16x1xf32>
    %24 = arith.subf %20, %23 : vector<16x1xf32>
    %25 = math.exp %24 : vector<16x1xf32>
    %26 = vector.broadcast %23 : vector<16x1xf32> to vector<16x16xf32>
    %27 = arith.subf %19, %26 : vector<16x16xf32>
    %28 = math.exp %27 : vector<16x16xf32>
    %c0_18 = arith.constant 0 : index
    %c0_19 = arith.constant 0 : index
    %29 = vector.load %arg10[%c0_18, %c0_19] : memref<16x1xf32, #tpu.memory_space<vmem>>, vector<16x1xf32>
    %30 = arith.mulf %25, %29 : vector<16x1xf32>
    %cst_20 = arith.constant dense<0.000000e+00> : vector<16xf32>
    %31 = vector.multi_reduction <add>, %28, %cst_20 [1] : vector<16x16xf32> to vector<16xf32>
    %32 = vector.shape_cast %31 : vector<16xf32> to vector<16x1xf32>
    %33 = arith.addf %30, %32 : vector<16x1xf32>
    %c0_21 = arith.constant 0 : index
    %c0_22 = arith.constant 0 : index
    %34 = vector.load %arg10[%c0_21, %c0_22] : memref<16x1xf32, #tpu.memory_space<vmem>>, vector<16x1xf32>
    tpu.vector_store %arg10[%c0_21, %c0_22], %33 {strides = array<i32>} : memref<16x1xf32, #tpu.memory_space<vmem>>, vector<16x1xf32>,
    %c0_23 = arith.constant 0 : index
    %c0_24 = arith.constant 0 : index
    %35 = vector.load %arg11[%c0_23, %c0_24] : memref<16x128xf32, #tpu.memory_space<vmem>>, vector<16x128xf32>
    %36 = vector.broadcast %25 : vector<16x1xf32> to vector<16x128xf32>
    %37 = arith.mulf %36, %35 : vector<16x128xf32>
    %38 = arith.truncf %28 : vector<16x16xf32> to vector<16x16xbf16>
    %cst_25 = arith.constant dense<0.000000e+00> : vector<16x128xf32>
    %39 = tpu.matmul %38, %8, %cst_25 {dimension_numbers = #tpu.dot_dimension_numbers<[1], [0], [0], [1], [0, 0, 1, 1], [], []>} : vector<16x16xbf16>, vector<16x128xbf16>, vector<16x128xf32> -> vector<16x128xf32>
    %40 = arith.addf %37, %39 : vector<16x128xf32>
    %c0_26 = arith.constant 0 : index
    %c0_27 = arith.constant 0 : index
    %41 = vector.load %arg11[%c0_26, %c0_27] : memref<16x128xf32, #tpu.memory_space<vmem>>, vector<16x128xf32>
    tpu.vector_store %arg11[%c0_26, %c0_27], %40 {strides = array<i32>} : memref<16x128xf32, #tpu.memory_space<vmem>>, vector<16x128xf32>,
    %c0_28 = arith.constant 0 : index
    %c0_29 = arith.constant 0 : index
    %42 = vector.load %arg9[%c0_28, %c0_29] : memref<16x1xf32, #tpu.memory_space<vmem>>, vector<16x1xf32>
    tpu.vector_store %arg9[%c0_28, %c0_29], %23 {strides = array<i32>} : memref<16x1xf32, #tpu.memory_space<vmem>>, vector<16x1xf32>,
    %c0_i32_30 = arith.constant 0 : i32
    %43 = arith.cmpi eq, %arg3, %c0_i32_30 : i32
    %44 = arith.extui %43 : i1 to i32
    %c0_i32_31 = arith.constant 0 : i32
    %45 = arith.cmpi ne, %44, %c0_i32_31 : i32
    scf.if %45 {
      %c0_32 = arith.constant 0 : index
      %c0_33 = arith.constant 0 : index
      %46 = vector.load %arg11[%c0_32, %c0_33] : memref<16x128xf32, #tpu.memory_space<vmem>>, vector<16x128xf32>
      %c0_34 = arith.constant 0 : index
      %c0_35 = arith.constant 0 : index
      %47 = vector.load %arg10[%c0_34, %c0_35] : memref<16x1xf32, #tpu.memory_space<vmem>>, vector<16x1xf32>
      %48 = tpu.reciprocal %47 {approx = true} : vector<16x1xf32> -> vector<16x1xf32>
      %49 = vector.broadcast %48 : vector<16x1xf32> to vector<16x128xf32>
      %50 = arith.mulf %46, %49 : vector<16x128xf32>
      %51 = arith.truncf %50 : vector<16x128xf32> to vector<16x128xbf16>
      %c0_36 = arith.constant 0 : index
      %c0_37 = arith.constant 0 : index
      %c0_38 = arith.constant 0 : index
      %52 = vector.load %arg8[%c0_36, %c0_37, %c0_38] : memref<1x16x128xbf16, #tpu.memory_space<vmem>>, vector<1x16x128xbf16>
      %53 = vector.shape_cast %52 : vector<1x16x128xbf16> to vector<16x128xbf16>
      %54 = vector.shape_cast %51 : vector<16x128xbf16> to vector<1x16x128xbf16>
      tpu.vector_store %arg8[%c0_36, %c0_37, %c0_38], %54 {strides = array<i32>} : memref<1x16x128xbf16, #tpu.memory_space<vmem>>, vector<1x16x128xbf16>,
    } else {
    }
    return
  }
  func.func @transform_0(%arg0: i32, %arg1: i32, %arg2: i32, %arg3: i32) -> (i32, i32, i32) {
    %c0_i32 = arith.constant 0 : i32
    %0 = arith.addi %c0_i32, %arg1 : i32
    %c0_i32_0 = arith.constant 0 : i32
    return %arg0, %arg2, %0 : i32, i32, i32
  }
  func.func @transform_1(%arg0: i32, %arg1: i32, %arg2: i32, %arg3: i32) -> (i32, i32, i32) {
    %c0_i32 = arith.constant 0 : i32
    %0 = arith.addi %c0_i32, %arg1 : i32
    %c0_i32_0 = arith.constant 0 : i32
    return %arg0, %arg3, %0 : i32, i32, i32
  }
  func.func @transform_2(%arg0: i32, %arg1: i32, %arg2: i32, %arg3: i32) -> (i32, i32, i32) {
    %c2_i32 = arith.constant 2 : i32
    %0 = arith.addi %c2_i32, %arg1 : i32
    %c0_i32 = arith.constant 0 : i32
    return %arg0, %arg3, %0 : i32, i32, i32
  }
  func.func @transform_3(%arg0: i32, %arg1: i32, %arg2: i32, %arg3: i32) -> (i32, i32, i32) {
    %c0_i32 = arith.constant 0 : i32
    %c0_i32_0 = arith.constant 0 : i32
    return %arg0, %c0_i32, %arg3 : i32, i32, i32
  }
  func.func @transform_4(%arg0: i32, %arg1: i32, %arg2: i32, %arg3: i32) -> (i32, i32, i32) {
    %c0_i32 = arith.constant 0 : i32
    return %arg0, %arg2, %arg1 : i32, i32, i32
  }
}

module attributes {stable_mosaic.version = 11 : i64} {
  func.func @_ln_linear_kernel(%arg0: i32, %arg1: i32, %arg2: memref<32x256xf32, #tpu.memory_space<vmem>>, %arg3: memref<1x256xf32, #tpu.memory_space<vmem>>, %arg4: memref<1x256xf32, #tpu.memory_space<vmem>>, %arg5: memref<256x512xbf16, #tpu.memory_space<vmem>>, %arg6: memref<1x512xf32, #tpu.memory_space<vmem>>, %arg7: memref<32x512xbf16, #tpu.memory_space<vmem>>, %arg8: memref<32x256xbf16, #tpu.memory_space<vmem>>) attributes {dimension_semantics = [#tpu.dimension_semantics<parallel>, #tpu.dimension_semantics<arbitrary>], iteration_bounds = array<i64: 1, 1>, scalar_prefetch = 0 : i64, scratch_operands = 1 : i64, tpu.core_type = #tpu.core_type<tc>, window_params = [{transform_indices = @transform_0, window_bounds = array<i64: 32, 256>}, {pipeline_mode = #tpu.pipeline_mode<synchronous>, transform_indices = @transform_1, window_bounds = array<i64: 1, 256>}, {pipeline_mode = #tpu.pipeline_mode<synchronous>, transform_indices = @transform_2, window_bounds = array<i64: 1, 256>}, {transform_indices = @transform_3, window_bounds = array<i64: 256, 512>}, {transform_indices = @transform_4, window_bounds = array<i64: 1, 512>}, {transform_indices = @transform_5, window_bounds = array<i64: 32, 512>}]} {
    %c0_i32 = arith.constant 0 : i32
    %0 = arith.cmpi eq, %arg1, %c0_i32 : i32
    %1 = arith.extui %0 : i1 to i32
    %c0_i32_0 = arith.constant 0 : i32
    %2 = arith.cmpi ne, %1, %c0_i32_0 : i32
    scf.if %2 {
      %c0_9 = arith.constant 0 : index
      %c0_10 = arith.constant 0 : index
      %13 = vector.load %arg2[%c0_9, %c0_10] : memref<32x256xf32, #tpu.memory_space<vmem>>, vector<32x256xf32>
      %cst_11 = arith.constant dense<0.000000e+00> : vector<32xf32>
      %14 = vector.multi_reduction <add>, %13, %cst_11 [1] : vector<32x256xf32> to vector<32xf32>
      %15 = vector.shape_cast %14 : vector<32xf32> to vector<32x1xf32>
      %cst_12 = arith.constant 2.560000e+02 : f32
      %16 = vector.broadcast %cst_12 : f32 to vector<32x1xf32>
      %17 = arith.divf %15, %16 : vector<32x1xf32>
      %18 = vector.broadcast %17 : vector<32x1xf32> to vector<32x256xf32>
      %19 = arith.subf %13, %18 : vector<32x256xf32>
      %20 = arith.mulf %19, %19 : vector<32x256xf32>
      %cst_13 = arith.constant dense<0.000000e+00> : vector<32xf32>
      %21 = vector.multi_reduction <add>, %20, %cst_13 [1] : vector<32x256xf32> to vector<32xf32>
      %22 = vector.shape_cast %21 : vector<32xf32> to vector<32x1xf32>
      %cst_14 = arith.constant 2.560000e+02 : f32
      %23 = vector.broadcast %cst_14 : f32 to vector<32x1xf32>
      %24 = arith.divf %22, %23 : vector<32x1xf32>
      %c0_15 = arith.constant 0 : index
      %c0_16 = arith.constant 0 : index
      %25 = vector.load %arg3[%c0_15, %c0_16] : memref<1x256xf32, #tpu.memory_space<vmem>>, vector<1x256xf32>
      %26 = vector.broadcast %17 : vector<32x1xf32> to vector<32x256xf32>
      %27 = arith.subf %13, %26 : vector<32x256xf32>
      %28 = vector.broadcast %25 : vector<1x256xf32> to vector<32x256xf32>
      %29 = arith.mulf %28, %27 : vector<32x256xf32>
      %30 = math.sqrt %24 : vector<32x1xf32>
      %cst_17 = arith.constant 9.99999997E-7 : f32
      %31 = vector.broadcast %cst_17 : f32 to vector<32x1xf32>
      %32 = arith.addf %30, %31 : vector<32x1xf32>
      %33 = vector.broadcast %32 : vector<32x1xf32> to vector<32x256xf32>
      %34 = arith.divf %29, %33 : vector<32x256xf32>
      %c0_18 = arith.constant 0 : index
      %c0_19 = arith.constant 0 : index
      %35 = vector.load %arg4[%c0_18, %c0_19] : memref<1x256xf32, #tpu.memory_space<vmem>>, vector<1x256xf32>
      %36 = vector.broadcast %35 : vector<1x256xf32> to vector<32x256xf32>
      %37 = arith.addf %34, %36 : vector<32x256xf32>
      %38 = arith.truncf %37 : vector<32x256xf32> to vector<32x256xbf16>
      %c0_20 = arith.constant 0 : index
      %c0_21 = arith.constant 0 : index
      %39 = vector.load %arg8[%c0_20, %c0_21] : memref<32x256xbf16, #tpu.memory_space<vmem>>, vector<32x256xbf16>
      tpu.vector_store %arg8[%c0_20, %c0_21], %38 {strides = array<i32>} : memref<32x256xbf16, #tpu.memory_space<vmem>>, vector<32x256xbf16>,
    } else {
    }
    %c0 = arith.constant 0 : index
    %c0_1 = arith.constant 0 : index
    %3 = vector.load %arg8[%c0, %c0_1] : memref<32x256xbf16, #tpu.memory_space<vmem>>, vector<32x256xbf16>
    %c0_2 = arith.constant 0 : index
    %c0_3 = arith.constant 0 : index
    %4 = vector.load %arg5[%c0_2, %c0_3] : memref<256x512xbf16, #tpu.memory_space<vmem>>, vector<256x512xbf16>
    %cst = arith.constant dense<0.000000e+00> : vector<32x512xf32>
    %5 = tpu.matmul %3, %4, %cst {dimension_numbers = #tpu.dot_dimension_numbers<[1], [0], [0], [1], [0, 0, 1, 1], [], []>} : vector<32x256xbf16>, vector<256x512xbf16>, vector<32x512xf32> -> vector<32x512xf32>
    %c0_4 = arith.constant 0 : index
    %c0_5 = arith.constant 0 : index
    %6 = vector.load %arg6[%c0_4, %c0_5] : memref<1x512xf32, #tpu.memory_space<vmem>>, vector<1x512xf32>
    %7 = vector.broadcast %6 : vector<1x512xf32> to vector<32x512xf32>
    %8 = arith.addf %5, %7 : vector<32x512xf32>
    %cst_6 = arith.constant 0.000000e+00 : f32
    %9 = vector.broadcast %cst_6 : f32 to vector<32x512xf32>
    %10 = arith.maximumf %8, %9 : vector<32x512xf32>
    %11 = arith.truncf %10 : vector<32x512xf32> to vector<32x512xbf16>
    %c0_7 = arith.constant 0 : index
    %c0_8 = arith.constant 0 : index
    %12 = vector.load %arg7[%c0_7, %c0_8] : memref<32x512xbf16, #tpu.memory_space<vmem>>, vector<32x512xbf16>
    tpu.vector_store %arg7[%c0_7, %c0_8], %11 {strides = array<i32>} : memref<32x512xbf16, #tpu.memory_space<vmem>>, vector<32x512xbf16>,
    return
  }
  func.func @transform_0(%arg0: i32, %arg1: i32) -> (i32, i32) {
    %c0_i32 = arith.constant 0 : i32
    %c0_i32_0 = arith.constant 0 : i32
    return %arg0, %c0_i32 : i32, i32
  }
  func.func @transform_1(%arg0: i32, %arg1: i32) -> (i32, i32) {
    %c0_i32 = arith.constant 0 : i32
    %c0_i32_0 = arith.constant 0 : i32
    %c0_i32_1 = arith.constant 0 : i32
    return %c0_i32, %c0_i32_0 : i32, i32
  }
  func.func @transform_2(%arg0: i32, %arg1: i32) -> (i32, i32) {
    %c0_i32 = arith.constant 0 : i32
    %c0_i32_0 = arith.constant 0 : i32
    %c0_i32_1 = arith.constant 0 : i32
    return %c0_i32, %c0_i32_0 : i32, i32
  }
  func.func @transform_3(%arg0: i32, %arg1: i32) -> (i32, i32) {
    %c0_i32 = arith.constant 0 : i32
    %c0_i32_0 = arith.constant 0 : i32
    return %c0_i32, %arg1 : i32, i32
  }
  func.func @transform_4(%arg0: i32, %arg1: i32) -> (i32, i32) {
    %c0_i32 = arith.constant 0 : i32
    %c0_i32_0 = arith.constant 0 : i32
    return %c0_i32, %arg1 : i32, i32
  }
  func.func @transform_5(%arg0: i32, %arg1: i32) -> (i32, i32) {
    %c0_i32 = arith.constant 0 : i32
    return %arg0, %arg1 : i32, i32
  }
}

module attributes {stable_mosaic.version = 11 : i64} {
  func.func @_matmul_residual_kernel(%arg0: i32, %arg1: i32, %arg2: i32, %arg3: memref<32x512xbf16, #tpu.memory_space<vmem>>, %arg4: memref<512x256xbf16, #tpu.memory_space<vmem>>, %arg5: memref<1x256xf32, #tpu.memory_space<vmem>>, %arg6: memref<32x256xf32, #tpu.memory_space<vmem>>, %arg7: memref<32x256xf32, #tpu.memory_space<vmem>>, %arg8: memref<32x256xf32, #tpu.memory_space<vmem>>) attributes {dimension_semantics = [#tpu.dimension_semantics<parallel>, #tpu.dimension_semantics<parallel>, #tpu.dimension_semantics<arbitrary>], iteration_bounds = array<i64: 1, 1, 1>, scalar_prefetch = 0 : i64, scratch_operands = 1 : i64, tpu.core_type = #tpu.core_type<tc>, window_params = [{transform_indices = @transform_0, window_bounds = array<i64: 32, 512>}, {transform_indices = @transform_1, window_bounds = array<i64: 512, 256>}, {transform_indices = @transform_2, window_bounds = array<i64: 1, 256>}, {transform_indices = @transform_3, window_bounds = array<i64: 32, 256>}, {transform_indices = @transform_4, window_bounds = array<i64: 32, 256>}]} {
    %c0_i32 = arith.constant 0 : i32
    %0 = arith.cmpi eq, %arg2, %c0_i32 : i32
    %1 = arith.extui %0 : i1 to i32
    %c0_i32_0 = arith.constant 0 : i32
    %2 = arith.cmpi ne, %1, %c0_i32_0 : i32
    scf.if %2 {
      %cst_10 = arith.constant 0.000000e+00 : f32
      %12 = vector.broadcast %cst_10 : f32 to vector<32x256xf32>
      %c0_11 = arith.constant 0 : index
      %c0_12 = arith.constant 0 : index
      %13 = vector.load %arg8[%c0_11, %c0_12] : memref<32x256xf32, #tpu.memory_space<vmem>>, vector<32x256xf32>
      tpu.vector_store %arg8[%c0_11, %c0_12], %12 {strides = array<i32>} : memref<32x256xf32, #tpu.memory_space<vmem>>, vector<32x256xf32>,
    } else {
    }
    %c0 = arith.constant 0 : index
    %c0_1 = arith.constant 0 : index
    %3 = vector.load %arg8[%c0, %c0_1] : memref<32x256xf32, #tpu.memory_space<vmem>>, vector<32x256xf32>
    %c0_2 = arith.constant 0 : index
    %c0_3 = arith.constant 0 : index
    %4 = vector.load %arg3[%c0_2, %c0_3] : memref<32x512xbf16, #tpu.memory_space<vmem>>, vector<32x512xbf16>
    %c0_4 = arith.constant 0 : index
    %c0_5 = arith.constant 0 : index
    %5 = vector.load %arg4[%c0_4, %c0_5] : memref<512x256xbf16, #tpu.memory_space<vmem>>, vector<512x256xbf16>
    %cst = arith.constant dense<0.000000e+00> : vector<32x256xf32>
    %6 = tpu.matmul %4, %5, %cst {dimension_numbers = #tpu.dot_dimension_numbers<[1], [0], [0], [1], [0, 0, 1, 1], [], []>} : vector<32x512xbf16>, vector<512x256xbf16>, vector<32x256xf32> -> vector<32x256xf32>
    %7 = arith.addf %3, %6 : vector<32x256xf32>
    %c0_6 = arith.constant 0 : index
    %c0_7 = arith.constant 0 : index
    %8 = vector.load %arg8[%c0_6, %c0_7] : memref<32x256xf32, #tpu.memory_space<vmem>>, vector<32x256xf32>
    tpu.vector_store %arg8[%c0_6, %c0_7], %7 {strides = array<i32>} : memref<32x256xf32, #tpu.memory_space<vmem>>, vector<32x256xf32>,
    %c0_i32_8 = arith.constant 0 : i32
    %9 = arith.cmpi eq, %arg2, %c0_i32_8 : i32
    %10 = arith.extui %9 : i1 to i32
    %c0_i32_9 = arith.constant 0 : i32
    %11 = arith.cmpi ne, %10, %c0_i32_9 : i32
    scf.if %11 {
      %c0_10 = arith.constant 0 : index
      %c0_11 = arith.constant 0 : index
      %12 = vector.load %arg8[%c0_10, %c0_11] : memref<32x256xf32, #tpu.memory_space<vmem>>, vector<32x256xf32>
      %c0_12 = arith.constant 0 : index
      %c0_13 = arith.constant 0 : index
      %13 = vector.load %arg5[%c0_12, %c0_13] : memref<1x256xf32, #tpu.memory_space<vmem>>, vector<1x256xf32>
      %14 = vector.broadcast %13 : vector<1x256xf32> to vector<32x256xf32>
      %15 = arith.addf %12, %14 : vector<32x256xf32>
      %c0_14 = arith.constant 0 : index
      %c0_15 = arith.constant 0 : index
      %16 = vector.load %arg6[%c0_14, %c0_15] : memref<32x256xf32, #tpu.memory_space<vmem>>, vector<32x256xf32>
      %17 = arith.addf %15, %16 : vector<32x256xf32>
      %c0_16 = arith.constant 0 : index
      %c0_17 = arith.constant 0 : index
      %18 = vector.load %arg7[%c0_16, %c0_17] : memref<32x256xf32, #tpu.memory_space<vmem>>, vector<32x256xf32>
      tpu.vector_store %arg7[%c0_16, %c0_17], %17 {strides = array<i32>} : memref<32x256xf32, #tpu.memory_space<vmem>>, vector<32x256xf32>,
    } else {
    }
    return
  }
  func.func @transform_0(%arg0: i32, %arg1: i32, %arg2: i32) -> (i32, i32) {
    %c0_i32 = arith.constant 0 : i32
    return %arg0, %arg2 : i32, i32
  }
  func.func @transform_1(%arg0: i32, %arg1: i32, %arg2: i32) -> (i32, i32) {
    %c0_i32 = arith.constant 0 : i32
    return %arg2, %arg1 : i32, i32
  }
  func.func @transform_2(%arg0: i32, %arg1: i32, %arg2: i32) -> (i32, i32) {
    %c0_i32 = arith.constant 0 : i32
    %c0_i32_0 = arith.constant 0 : i32
    return %c0_i32, %arg1 : i32, i32
  }
  func.func @transform_3(%arg0: i32, %arg1: i32, %arg2: i32) -> (i32, i32) {
    %c0_i32 = arith.constant 0 : i32
    return %arg0, %arg1 : i32, i32
  }
  func.func @transform_4(%arg0: i32, %arg1: i32, %arg2: i32) -> (i32, i32) {
    %c0_i32 = arith.constant 0 : i32
    return %arg0, %arg1 : i32, i32
  }
}

</mosaic_0001>

<bundles_post_ra>
// kernel: decoder_forward.20
= control target key start
LH: loop header
LB: loop body
LE: loop exit
PB: predicated region body
PF: predicated region fallthrough
CT: control target
= control target key end

     0   :  { %9 = vsyncpa [#allocation4], 0  ;;  %s813_s0 = inlined_call_operand.hbm [shape: bf16[32,256], index: 0, kind: input, shape index: {}]   ;;  %s814_s1 = inlined_call_operand.hbm [shape: bf16[256,256], index: 1, kind: input, shape index: {}]   ;;  %s815_s2 = inlined_call_operand.hbm [shape: f32[1,256], index: 2, kind: input, shape index: {}]   ;;  %s816_s3 = inlined_call_operand.hbm [shape: f32[32,256], index: 3, kind: input, shape index: {}]   ;;  %s817_s4 = inlined_call_operand.hbm [shape: f32[32,256], index: 4, kind: output, shape index: {}]  }
   0x1   :  { %10 = vsyncpa [#allocation7], 0 }
   0x2   :  { %11 = vsyncpa [#allocation10], 0 }
   0x3   :  { %12 = vsyncpa [#allocation5], 0  ;;  %s699_s15 = smov [#allocation6]   ;;  %s700_s17 = smov [#allocation3]  }
   0x4   :  { %s30_s16 = sshll.u32 %s699_s15, 4  ;;  %s18_s18 = sshll.u32 %s700_s17, 4  ;;  %s31_s16 = int_to_ptr.vmem [resolvable:$true] %s30_s16  ;;  %s733_s18 = int_to_ptr.vmem [resolvable:$true] %s18_s18 }
   0x5   :  { %s581_s21 = scalar_lea.hbm %s814_s1, 4096 }
   0x6   :  { %p582_p0 = scmp.ne.s32.totalorder %s814_s1, %s581_s21  ;;  %p585_p1 = scmp.lt.u32.totalorder %s581_s21, %s814_s1 }
   0x8   :  { %p587_p2 = pnand %p585_p1, %p582_p0 }
   0xa   :  { %590 = shalt.err (!%p587_p2)
}
   0xb   :  { %s591_s26 = scalar_lea.vmem %s31_s16, 4096  ;;  %p596_p4 = scmp.lt.s32.totalorder %s31_s16, %s31_s16 }
   0xc   :  { %p592_p3 = scmp.ne.s32.totalorder %s31_s16, %s591_s26  ;;  %p597_p5 = scmp.lt.s32.totalorder %s591_s26, %s591_s26 }
   0xe   :  { %p598_p6 = por %p597_p5, %p596_p4 }
  0x10   :  { %p599_p7 = pnand %p598_p6, %p592_p3 }
  0x12   :  { %602 = shalt.err (!%p599_p7)
}
  0x13   :  { %s701_s27 = smov 128   ;;  %s702_s28 = smov 8  }
  0x14   :  { %36 = dma.hbm_to_vmem [thread:$0]  %s814_s1, 4096, %s31_s16, [#allocation7], %s701_s27, %s701_s27, %s702_s28  }
  0x15   :  { %s603_s7 = scalar_lea.hbm %s813_s0, 512 }
  0x16   :  { %p604_p8 = scmp.ne.s32.totalorder %s813_s0, %s603_s7  ;;  %p607_p9 = scmp.lt.u32.totalorder %s603_s7, %s813_s0 }
  0x18   :  { %p609_p10 = pnand %p607_p9, %p604_p8 }
  0x1a   :  { %612 = shalt.err (!%p609_p10)
}
  0x1b   :  { %s613_s12 = scalar_lea.vmem %s733_s18, 512  ;;  %p618_p12 = scmp.lt.s32.totalorder %s733_s18, %s733_s18 }
  0x1c   :  { %p614_p11 = scmp.ne.s32.totalorder %s733_s18, %s613_s12  ;;  %p619_p13 = scmp.lt.s32.totalorder %s613_s12, %s613_s12 }
  0x1e   :  { %p620_p0 = por %p619_p13, %p618_p12 }
  0x20   :  { %p621_p1 = pnand %p620_p0, %p614_p11 }
  0x22   :  { %624 = shalt.err (!%p621_p1)
}
  0x23   :  { %24 = dma.hbm_to_vmem [thread:$0]  %s813_s0, 512, %s733_s18, [#allocation4], %s701_s27, %s701_s27, %s702_s28  }
  0x24   :  { %s703_s14 = smov [#allocation8]   ;;  %s704_s16 = smov [#allocation9]  }
  0x25   :  { %s43_s15 = sshll.u32 %s703_s14, 4  ;;  %s52_s17 = sshll.u32 %s704_s16, 4  ;;  %s44_s15 = int_to_ptr.vmem [resolvable:$true] %s43_s15  ;;  %s764_s17 = int_to_ptr.vmem [resolvable:$true] %s52_s17 }
  0x26   :  { %s625_s21 = scalar_lea.hbm %s815_s2, 32 }
  0x27   :  { %p626_p2 = scmp.ne.s32.totalorder %s815_s2, %s625_s21  ;;  %p629_p3 = scmp.lt.u32.totalorder %s625_s21, %s815_s2 }
  0x29   :  { %p631_p4 = pnand %p629_p3, %p626_p2 }
  0x2b   :  { %634 = shalt.err (!%p631_p4)
}
  0x2c   :  { %s635_s0 = scalar_lea.vmem %s44_s15, 32  ;;  %p640_p6 = scmp.lt.s32.totalorder %s44_s15, %s44_s15 }
  0x2d   :  { %p636_p5 = scmp.ne.s32.totalorder %s44_s15, %s635_s0  ;;  %p641_p7 = scmp.lt.s32.totalorder %s635_s0, %s635_s0 }
  0x2f   :  { %p642_p8 = por %p641_p7, %p640_p6 }
  0x31   :  { %p643_p9 = pnand %p642_p8, %p636_p5 }
  0x33   :  { %646 = shalt.err (!%p643_p9)
}
  0x34   :  { %46 = dma.hbm_to_vmem [thread:$0]  %s815_s2, 32, %s44_s15, [#allocation7]  }
  0x35   :  { %s647_s29 = scalar_lea.hbm %s816_s3, 1024 }
  0x36   :  { %p648_p10 = scmp.ne.s32.totalorder %s816_s3, %s647_s29  ;;  %p651_p11 = scmp.lt.u32.totalorder %s647_s29, %s816_s3 }
  0x38   :  { %p653_p12 = pnand %p651_p11, %p648_p10 }
  0x3a   :  { %656 = shalt.err (!%p653_p12)
}
  0x3b   :  { %s657_s8 = scalar_lea.vmem %s764_s17, 1024  ;;  %p662_p0 = scmp.lt.s32.totalorder %s764_s17, %s764_s17 }
  0x3c   :  { %p658_p13 = scmp.ne.s32.totalorder %s764_s17, %s657_s8  ;;  %p663_p1 = scmp.lt.s32.totalorder %s657_s8, %s657_s8 }
  0x3e   :  { %p664_p2 = por %p663_p1, %p662_p0 }
  0x40   :  { %p665_p3 = pnand %p664_p2, %p658_p13 }
  0x42   :  { %668 = shalt.err (!%p665_p3)
}
  0x43   :  { %s705_s2 = smov 256   ;;  %s706_s9 = smov 16  }
  0x44   :  { %58 = dma.hbm_to_vmem [thread:$0]  %s816_s3, 1024, %s764_s17, [#allocation10], %s705_s2, %s705_s2, %s706_s9  }
  0x45   :  { %691 = dma.done.wait [#allocation4], 512  }
  0x46   :  { %692 = vsyncadd [#allocation4], 4294966784 }
  0x47   :  { %693 = dma.done.wait [#allocation7], 4128  }
  0x48   :  { %694 = vsyncadd [#allocation7], 4294963168 }
  0x49   :  { %695 = dma.done.wait [#allocation10], 1024  }
  0x4a   :  { %696 = vsyncadd [#allocation10], 4294966272  ;;  %v527_v0 = vld [vmem:[#allocation6 + $0x4] ss:$8 sps:$4 sm:$0xff]   ;;  %v529_v1 = vld [vmem:[#allocation6] ss:$8 sps:$4 sm:$0xff]   ;;  %v389_v36 = vlaneseq }
  0x4b   :  { %307 = vmatprep.subr.bf16.mxu0 %v527_v0  ;;  %486 = vmatprep.subr.bf16.mxu1 %v527_v0  ;;  %v530_v2 = vld [vmem:[#allocation6 + $0x14] ss:$8 sps:$4 sm:$0xff]   ;;  %v532_v3 = vld [vmem:[#allocation6 + $0x10] ss:$8 sps:$4 sm:$0xff]   ;;  %v533_v4 = vld [vmem:[#allocation6 + $0x24] ss:$8 sps:$4 sm:$0xff]  }
  0x4c   :  { %308 = vmatpush1.bf16.msra.mxu0 %v529_v1  ;;  %502 = vmatpush1.bf16.msra.mxu1 %v529_v1  ;;  %v535_v5 = vld [vmem:[#allocation6 + $0x20] ss:$8 sps:$4 sm:$0xff]   ;;  %v536_v6 = vld [vmem:[#allocation6 + $0x34] ss:$8 sps:$4 sm:$0xff]   ;;  %v538_v7 = vld [vmem:[#allocation6 + $0x30] ss:$8 sps:$4 sm:$0xff]  }
  0x4d   :  { %309 = vmatprep.subr.bf16.mxu0 %v530_v2  ;;  %487 = vmatprep.subr.bf16.mxu1 %v530_v2  ;;  %v539_v8 = vld [vmem:[#allocation6 + $0x44] ss:$8 sps:$4 sm:$0xff]   ;;  %v541_v9 = vld [vmem:[#allocation6 + $0x40] ss:$8 sps:$4 sm:$0xff]   ;;  %v542_v10 = vld [vmem:[#allocation6 + $0x54] ss:$8 sps:$4 sm:$0xff]  }
  0x4e   :  { %v544_v11 = vld [vmem:[#allocation6 + $0x50] ss:$8 sps:$4 sm:$0xff]   ;;  %v545_v12 = vld [vmem:[#allocation6 + $0x64] ss:$8 sps:$4 sm:$0xff]   ;;  %v547_v14 = vld [vmem:[#allocation6 + $0x60] ss:$8 sps:$4 sm:$0xff]  }
  0x4f   :  { %v577_v13 = vld [vmem:[#allocation3 + $0x4] ss:$8 sps:$4 sm:$0xff]   ;;  %v580_v15 = vld [vmem:[#allocation3 + $0x14] ss:$8 sps:$4 sm:$0xff]   ;;  %v550_v17 = vld [vmem:[#allocation6 + $0x70] ss:$8 sps:$4 sm:$0xff]  }
  0x50   :  { %310 = vmatpush1.bf16.msra.mxu0 %v532_v3  ;;  %503 = vmatpush1.bf16.msra.mxu1 %v532_v3  ;;  %v548_v16 = vld [vmem:[#allocation6 + $0x74] ss:$8 sps:$4 sm:$0xff]   ;;  %v551_v18 = vld [vmem:[#allocation6 + $0x84] ss:$8 sps:$4 sm:$0xff]   ;;  %v553_v19 = vld [vmem:[#allocation6 + $0x80] ss:$8 sps:$4 sm:$0xff]  }
  0x51   :  { %311 = vmatprep.subr.bf16.mxu0 %v533_v4  ;;  %488 = vmatprep.subr.bf16.mxu1 %v533_v4  ;;  %v554_v20 = vld [vmem:[#allocation6 + $0x94] ss:$8 sps:$4 sm:$0xff]   ;;  %v556_v21 = vld [vmem:[#allocation6 + $0x90] ss:$8 sps:$4 sm:$0xff]   ;;  %v557_v22 = vld [vmem:[#allocation6 + $0xa4] ss:$8 sps:$4 sm:$0xff]  }
  0x52   :  { %339 = vmatprep.mubr.bf16.mxu0 %v577_v13  ;;  %349 = vmatprep.mubr.bf16.mxu1 %v580_v15  ;;  %v559_v23 = vld [vmem:[#allocation6 + $0xa0] ss:$8 sps:$4 sm:$0xff]   ;;  %v560_v24 = vld [vmem:[#allocation6 + $0xb4] ss:$8 sps:$4 sm:$0xff]   ;;  %v562_v25 = vld [vmem:[#allocation6 + $0xb0] ss:$8 sps:$4 sm:$0xff]  }
  0x53   :  { %v563_v26 = vld [vmem:[#allocation6 + $0xc4] ss:$8 sps:$4 sm:$0xff]   ;;  %v565_v27 = vld [vmem:[#allocation6 + $0xc0] ss:$8 sps:$4 sm:$0xff]   ;;  %v566_v28 = vld [vmem:[#allocation6 + $0xd4] ss:$8 sps:$4 sm:$0xff]  }
  0x54   :  { %312 = vmatpush1.bf16.msra.mxu0 %v535_v5  ;;  %504 = vmatpush1.bf16.msra.mxu1 %v535_v5  ;;  %v568_v29 = vld [vmem:[#allocation6 + $0xd0] ss:$8 sps:$4 sm:$0xff]   ;;  %v569_v30 = vld [vmem:[#allocation6 + $0xe4] ss:$8 sps:$4 sm:$0xff]   ;;  %v571_v31 = vld [vmem:[#allocation6 + $0xe0] ss:$8 sps:$4 sm:$0xff]  }
  0x55   :  { %313 = vmatprep.subr.bf16.mxu0 %v536_v6  ;;  %489 = vmatprep.subr.bf16.mxu1 %v536_v6  ;;  %v572_v32 = vld [vmem:[#allocation6 + $0xf4] ss:$8 sps:$4 sm:$0xff]   ;;  %v574_v33 = vld [vmem:[#allocation6 + $0xf0] ss:$8 sps:$4 sm:$0xff]   ;;  %v575_v34 = vld [vmem:[#allocation3] ss:$8 sps:$4 sm:$0xff]  }
  0x56   :  { %v578_v35 = vld [vmem:[#allocation3 + $0x10] ss:$8 sps:$4 sm:$0xff]   ;;  %v390_v37 = vshrl.u32 %v389_v36, 7  ;;  %v387_v39 = vld [vmem:[#allocation8] sm:$0x3]  ;;  %v407_v44 = vld [vmem:[#allocation9] sm:$0xff] }
  0x57   :  { %v411_v46 = vld [vmem:[#allocation9 + $0x20] sm:$0xff]  ;;  %v408_v50 = vld [vmem:[#allocation9 + $0x8] sm:$0xff]  ;;  %v409_v56 = vld [vmem:[#allocation9 + $0x10] sm:$0xff]  ;;  %s707_s3 = smov [#allocation11]  }
  0x58   :  { %314 = vmatpush1.bf16.msra.mxu0 %v538_v7  ;;  %505 = vmatpush1.bf16.msra.mxu1 %v538_v7  ;;  %v391_v38 = vsub.s32 0, %v390_v37  ;;  %v395_v40 = vsub.s32 1, %v390_v37  ;;  %v412_v52 = vld [vmem:[#allocation9 + $0x28] sm:$0xff]  ;;  %v413_v58 = vld [vmem:[#allocation9 + $0x30] sm:$0xff]  ;;  %v410_v0 = vld [vmem:[#allocation9 + $0x18] sm:$0xff]  ;;  %s436_s12 = sshll.u32 %s707_s3, 4  ;;  %s437_s12 = int_to_ptr.vmem [resolvable:$true] %s436_s12 }
  0x59   :  { %315 = vmatprep.subr.bf16.mxu0 %v539_v8  ;;  %490 = vmatprep.subr.bf16.mxu1 %v539_v8  ;;  %v414_v2 = vld [vmem:[#allocation9 + $0x38] sm:$0xff]  ;;  %s669_s1 = scalar_lea.vmem %s437_s12, 1024  ;;  %p674_p5 = scmp.lt.s32.totalorder %s437_s12, %s437_s12 }
  0x5a   :  { %v392_v41 = vrot.slane %v387_v39, %v391_v38  ;;  %v396_v42 = vrot.slane %v387_v39, %v395_v40  ;;  %p670_p4 = scmp.ne.s32.totalorder %s437_s12, %s669_s1  ;;  %p675_p6 = scmp.lt.s32.totalorder %s669_s1, %s669_s1 }
  0x5c   :  { %316 = vmatpush1.bf16.msra.mxu0 %v541_v9  ;;  %506 = vmatpush1.bf16.msra.mxu1 %v541_v9  ;;  %p676_p7 = por %p675_p6, %p674_p5 }
  0x5d   :  { %317 = vmatprep.subr.bf16.mxu0 %v542_v10  ;;  %491 = vmatprep.subr.bf16.mxu1 %v542_v10 }
  0x5e   :  { %p677_p8 = pnand %p676_p7, %p670_p4 }
  0x60   :  { %318 = vmatpush1.bf16.msra.mxu0 %v544_v11  ;;  %507 = vmatpush1.bf16.msra.mxu1 %v544_v11 }
  0x61   :  { %319 = vmatprep.subr.bf16.mxu0 %v545_v12  ;;  %492 = vmatprep.subr.bf16.mxu1 %v545_v12 }
  0x64   :  { %320 = vmatpush1.bf16.msra.mxu0 %v547_v14  ;;  %508 = vmatpush1.bf16.msra.mxu1 %v547_v14 }
  0x65   :  { %321 = vmatprep.subr.bf16.mxu0 %v548_v16  ;;  %493 = vmatprep.subr.bf16.mxu1 %v548_v16 }
  0x68   :  { %322 = vmatpush1.bf16.msra.mxu0 %v550_v17  ;;  %509 = vmatpush1.bf16.msra.mxu1 %v550_v17 }
  0x69   :  { %323 = vmatprep.subr.bf16.mxu0 %v551_v18  ;;  %494 = vmatprep.subr.bf16.mxu1 %v551_v18 }
  0x6c   :  { %324 = vmatpush1.bf16.msra.mxu0 %v553_v19  ;;  %510 = vmatpush1.bf16.msra.mxu1 %v553_v19 }
  0x6d   :  { %325 = vmatprep.subr.bf16.mxu0 %v554_v20  ;;  %495 = vmatprep.subr.bf16.mxu1 %v554_v20 }
  0x70   :  { %326 = vmatpush1.bf16.msra.mxu0 %v556_v21  ;;  %511 = vmatpush1.bf16.msra.mxu1 %v556_v21 }
  0x71   :  { %327 = vmatprep.subr.bf16.mxu0 %v557_v22  ;;  %496 = vmatprep.subr.bf16.mxu1 %v557_v22 }
  0x74   :  { %328 = vmatpush1.bf16.msra.mxu0 %v559_v23  ;;  %512 = vmatpush1.bf16.msra.mxu1 %v559_v23 }
  0x75   :  { %329 = vmatprep.subr.bf16.mxu0 %v560_v24  ;;  %497 = vmatprep.subr.bf16.mxu1 %v560_v24 }
  0x78   :  { %330 = vmatpush1.bf16.msra.mxu0 %v562_v25  ;;  %513 = vmatpush1.bf16.msra.mxu1 %v562_v25 }
  0x79   :  { %331 = vmatprep.subr.bf16.mxu0 %v563_v26  ;;  %498 = vmatprep.subr.bf16.mxu1 %v563_v26 }
  0x7c   :  { %332 = vmatpush1.bf16.msra.mxu0 %v565_v27  ;;  %514 = vmatpush1.bf16.msra.mxu1 %v565_v27 }
  0x7d   :  { %333 = vmatprep.subr.bf16.mxu0 %v566_v28  ;;  %499 = vmatprep.subr.bf16.mxu1 %v566_v28 }
  0x80   :  { %334 = vmatpush1.bf16.msra.mxu0 %v568_v29  ;;  %515 = vmatpush1.bf16.msra.mxu1 %v568_v29 }
  0x81   :  { %335 = vmatprep.subr.bf16.mxu0 %v569_v30  ;;  %500 = vmatprep.subr.bf16.mxu1 %v569_v30 }
  0x84   :  { %336 = vmatpush1.bf16.msra.mxu0 %v571_v31  ;;  %516 = vmatpush1.bf16.msra.mxu1 %v571_v31 }
  0x85   :  { %337 = vmatprep.subr.bf16.mxu0 %v572_v32  ;;  %501 = vmatprep.subr.bf16.mxu1 %v572_v32 }
  0x88   :  { %338 = vmatpush1.bf16.msra.mxu0 %v574_v33  ;;  %517 = vmatpush1.bf16.msra.mxu1 %v574_v33 }
  0x8b   :  { %340 = vmatmul.mubr.bf16.vlgmr.msra.gmra.mrb[0].mxu0 %v575_v34  ;;  %350 = vmatmul.mubr.bf16.vlgmr.msra.gmra.mrb[0].mxu1 %v578_v35 }
 0x15e   :  { %v341_v43 = vpop.f32.mrb[0].mxu0  ;;  %v351_v45 = vpop.f32.mrb[0].mxu1 }
 0x15f   :  { %v399_v47 = vadd.f32 %v392_v41, %v341_v43  ;;  %v403_v48 = vadd.f32 %v392_v41, %v351_v45  ;;  %v343_v49 = vpop.f32.mrb[1].mxu0  ;;  %v353_v51 = vpop.f32.mrb[1].mxu1 }
 0x160   :  { %v400_v53 = vadd.f32 %v396_v42, %v343_v49  ;;  %v404_v54 = vadd.f32 %v396_v42, %v353_v51  ;;  %v345_v55 = vpop.f32.mrb[2].mxu0  ;;  %v355_v57 = vpop.f32.mrb[2].mxu1 }
 0x161   :  { %v415_v59 = vadd.f32 %v407_v44, %v399_v47  ;;  %v419_v60 = vadd.f32 %v411_v46, %v403_v48  ;;  %v401_v61 = vadd.f32 %v392_v41, %v345_v55  ;;  %v405_v62 = vadd.f32 %v392_v41, %v355_v57  ;;  %v347_v63 = vpop.f32.mrb[3].mxu0  ;;  %v357_v1 = vpop.f32.mrb[3].mxu1 }
 0x162   :  { %v416_v3 = vadd.f32 %v408_v50, %v400_v53  ;;  %v420_v4 = vadd.f32 %v412_v52, %v404_v54  ;;  %v402_v5 = vadd.f32 %v396_v42, %v347_v63  ;;  %v406_v6 = vadd.f32 %v396_v42, %v357_v1 }
 0x163   :  { %423 = vst [vmem:[#allocation11] sm:$0xff] %v415_v59  ;;  %427 = vst [vmem:[#allocation11 + $0x20] sm:$0xff] %v419_v60  ;;  %v417_v7 = vadd.f32 %v409_v56, %v401_v61  ;;  %v421_v8 = vadd.f32 %v413_v58, %v405_v62 }
 0x164   :  { %424 = vst [vmem:[#allocation11 + $0x8] sm:$0xff] %v416_v3  ;;  %428 = vst [vmem:[#allocation11 + $0x28] sm:$0xff] %v420_v4  ;;  %v418_v9 = vadd.f32 %v410_v0, %v402_v5  ;;  %v422_v10 = vadd.f32 %v414_v2, %v406_v6 }
 0x165   :  { %425 = vst [vmem:[#allocation11 + $0x10] sm:$0xff] %v417_v7  ;;  %429 = vst [vmem:[#allocation11 + $0x30] sm:$0xff] %v421_v8 }
 0x166   :  { %426 = vst [vmem:[#allocation11 + $0x18] sm:$0xff] %v418_v9  ;;  %430 = vst [vmem:[#allocation11 + $0x38] sm:$0xff] %v422_v10 }
 0x167   :  { %680 = shalt.err (!%p677_p8)
}
 0x168   :  { %s681_s15 = scalar_lea.hbm %s817_s4, 1024 }
 0x169   :  { %p682_p9 = scmp.ne.s32.totalorder %s817_s4, %s681_s15  ;;  %p685_p10 = scmp.lt.u32.totalorder %s681_s15, %s817_s4 }
 0x16b   :  { %p687_p11 = pnand %p685_p10, %p682_p9 }
 0x16d   :  { %690 = shalt.err (!%p687_p11)
}
 0x16e   :  { %442 = dma.vmem_to_hbm [thread:$0]  %s437_s12, 1024, %s817_s4, [#allocation5], %s705_s2, %s705_s2, %s706_s9  }
 0x16f   :  { %697 = dma.done.wait [#allocation5], 1024  }
 0x170   :  { %698 = vsyncadd [#allocation5], 4294966272 }
 0x171   :  { %446 = vsyncpa [#allocation4], 1 }
 0x172   :  { %447 = vsyncpa [#allocation7], 1 }
 0x173   :  { %448 = vsyncpa [#allocation10], 1 }
 0x174   :  { %449 = vsyncpa [#allocation5], 1 }

// kernel: decoder_forward.19
= control target key start
LH: loop header
LB: loop body
LE: loop exit
PB: predicated region body
PF: predicated region fallthrough
CT: control target
= control target key end

     0   :  { %s1960_s0 = inlined_call_operand.hbm [shape: bf16[2,16,768], index: 0, kind: input, shape index: {}, may-alias: {0,1,2}]   ;;  %s1961_s1 = inlined_call_operand.hbm [shape: bf16[2,16,768], index: 1, kind: input, shape index: {}, may-alias: {0,1,2}]   ;;  %s1962_s2 = inlined_call_operand.hbm [shape: bf16[2,16,768], index: 2, kind: input, shape index: {}, may-alias: {0,1,2}]   ;;  %s1963_s3 = inlined_call_operand.hbm [shape: f32[2,16,16], index: 3, kind: input, shape index: {}]   ;;  %s1964_s4 = inlined_call_operand.hbm [shape: bf16[2,16,256], index: 4, kind: output, shape index: {}]  }
   0x1   :  { %1994 = sst [smem:[#allocation35_spill]] %s1960_s0 }
   0x2   :  { %1995 = sst [smem:[#allocation36_spill]] %s1961_s1 }
   0x3   :  { %1996 = sst [smem:[#allocation37_spill]] %s1962_s2 }
   0x4   :  { %1997 = sst [smem:[#allocation38_spill]] %s1963_s3 }
   0x5   :  { %1998 = sst [smem:[#allocation39_spill]] %s1964_s4 }
   0x6   :  { %9 = vsyncpa [#allocation6], 0 }
   0x7   :  { %11 = vsyncpa [#allocation6 + $0x1], 0 }
   0x8   :  { %12 = vsyncpa [#allocation9], 0 }
   0x9   :  { %14 = vsyncpa [#allocation9 + $0x1], 0 }
   0xa   :  { %15 = vsyncpa [#allocation12], 0 }
   0xb   :  { %17 = vsyncpa [#allocation12 + $0x1], 0 }
   0xc   :  { %18 = vsyncpa [#allocation7], 0 }
   0xd   :  { %20 = vsyncpa [#allocation7 + $0x1], 0  ;;  %s1429_s15 = smov 0   ;;  %s1431_s16 = smov 0  }
   0xe   :  { %s1433_s17 = smov 0   ;;  %s1435_s18 = smov 0  }
   0xf   :  { %s1437_s19 = smov 0   ;;  %s1439_s20 = smov 0  }
  0x10   :  { %s1441_s21 = smov 0   ;;  %s1443_s22 = smov 0  }
  0x11   :  { %s1445_s23 = smov 0   ;;  %s1447_s24 = smov 0  }
  0x12   :  { %s1449_s25 = smov 0   ;;  %s1451_s26 = smov 0  }
  0x13   :  { %s1453_s27 = smov 0   ;;  %s1455_s28 = smov 0  }
  0x14   :  { %s1457_s29 = smov 0   ;;  %s1459_s30 = smov 0  }
  0x15   :  { %s1461_s5 = smov 0  }
  0x16 LB: > { %1999 = sst [smem:[#allocation19_spill]] %s1321_s15  ;;  %s1515_s6 = sadd.s32 4294967295, %s1385_s5   ;;  %s1385_s5 = sphi %s1461_s5, %s26_s5   ;;  %s1381_s30 = sphi %s1459_s30, %s2086_s30   ;;  %s1377_s29 = sphi %s1457_s29, %s2074_s29   ;;  %s1373_s28 = sphi %s1455_s28, %s2085_s28   ;;  %s1369_s27 = sphi %s1453_s27, %s2073_s27   ;;  %s1365_s26 = sphi %s1451_s26, %s2072_s26   ;;  %s1361_s25 = sphi %s1449_s25, %s2084_s25   ;;  %s1357_s24 = sphi %s1447_s24, %s2083_s24   ;;  %s1353_s23 = sphi %s1445_s23, %s2070_s23   ;;  %s1349_s22 = sphi %s1443_s22, %s2082_s22   ;;  %s1345_s21 = sphi %s1441_s21, %s2081_s21   ;;  %s1341_s20 = sphi %s1439_s20, %s2080_s20   ;;  %s1337_s19 = sphi %s1437_s19, %s2079_s19   ;;  %s1333_s18 = sphi %s1435_s18, %s2078_s18   ;;  %s1329_s17 = sphi %s1433_s17, %s2077_s17   ;;  %s1325_s16 = sphi %s1431_s16, %s2076_s16   ;;  %s1321_s15 = sphi %s1429_s15, %s2065_s15  }
  0x17   : > { %2000 = sst [smem:[#allocation20_spill]] %s1325_s16  ;;  %s48_s7 = sadd.s32 1, %s1377_s29 }
  0x18   : > { %2001 = sst [smem:[#allocation21_spill]] %s1329_s17  ;;  %p50_p0 = scmp.ge.s32.totalorder %s48_s7, 2 }
  0x19   : > { %2002 = sst [smem:[#allocation22_spill]] %s1333_s18  ;;  %s52_s8 = sadd.s32 1, %s1381_s30 }
  0x1a   : > { %2003 = sst [smem:[#allocation23_spill]] %s1349_s22  ;;  %p1976_p1 = scmp.eq.s32.totalorder %s1385_s5, 0 }
  0x1b   : > { %2004 = sst [smem:[#allocation24_spill]] %s1353_s23  ;;  %p1975_p2 = scmp.eq.s32.totalorder %s1515_s6, 0 }
  0x1c   : > { %2005 = sst [smem:[#allocation25_spill]] %s1365_s26  ;;  %s2088_s7 = smov (%p50_p0, %s48_s7), 0 }
  0x1d   : > { %2006 = sst [smem:[#allocation26_spill]] %s1369_s27  ;;  %s2090_s8 = smov (!%p50_p0, %s52_s8), %s1381_s30 }
  0x1e   : > { %2007 = sst [smem:[#allocation27_spill]] %s1373_s28  ;;  %s86_s9 = sadd.s32 2, %s1377_s29 }
  0x1f   : > { %2008 = sst [smem:[#allocation28_spill]] %s1377_s29  ;;  %s87_s10 = sadd.s32 2, %s2088_s7 }
  0x20   : > { %2009 = sst [smem:[#allocation29_spill]] %s2088_s7  ;;  %p54_p3 = scmp.ge.s32.totalorder %s2090_s8, 2 }
  0x21   : > { %s91_s11 = ssub.s32 %s86_s9, %s87_s10  ;;  %s95_s12 = sadd.s32 1, %s1353_s23 }
  0x22   : > { %p102_p4 = scmp.ne.s32.totalorder %s1353_s23, %s1349_s22  ;;  %s2092_s8 = smov (%p54_p3, %s2090_s8), 0 }
  0x23   : > { %2010 = sst [smem:[#allocation30_spill]] %s2092_s8  ;;  %p108_p6 = scmp.ne.s32.totalorder %s1349_s22, %s1345_s21 }
  0x24   : > { %p1533_p5 = por %p102_p4, %p1976_p1  ;;  %s1541_s14 = ssub.s32 %s1381_s30, %s2092_s8 }
  0x25   : > { %s118_s9 = sadd.s32 4, %s1377_s29  ;;  %s92_s10 = sor.u32 %s91_s11, %s1541_s14 }
  0x26   : > { %p1547_p7 = por %p108_p6, %p1975_p2  ;;  %p93_p8 = scmp.eq.s32.totalorder %s92_s10, 0 }
  0x27   : > { %s119_s27 = sadd.s32 4, %s2088_s7  ;;  %p1974_p9 = scmp.lt.s32.totalorder %s1385_s5, 4 }
  0x28   : > { %s2012_s4 = scalar_select %p1547_p7, 1, 0 }
  0x29   : > { %s1552_s28 = ssub.s32 %s118_s9, %s119_s27  ;;  %s886_s22 = smul.u32 12, %s1381_s30 }
  0x2a   : > { %2013 = sst [smem:[#allocation31_spill]] %s2012_s4  ;;  %s249_s11 = sand.u32 1, %s1385_s5  }
  0x2b   : > { %s1555_s21 = scalar_select %p93_p8, %s1353_s23, %s95_s12  }
  0x2c   : > { %s236_s3 = sadd.s32 %s1377_s29, %s886_s22  ;;  %s251_s16 = sand.u32 1, %s1353_s23  }
  0x2d   : > { %2014 = sst [smem:[#allocation32_spill]] %s1555_s21  ;;  %s1563_s15 = sshll.u32 %s236_s3, 6 }
  0x2e   : > { %s2015_s1 = sld [smem:[#allocation36_spill]]  ;;  %s838_s4 = sshll.u32 %s251_s16, 3 }
  0x2f   : > { %p1576_p10 = pnand %p1974_p9, %p1533_p5  ;;  %s253_s3 = scalar_lea.vmem [#allocation8], %s838_s4 }
  0x30   : > { %s265_s22 = sshll.u32 %s253_s3, 4  ;;  %s1583_s2 = scalar_lea.sflag [#allocation9], %s249_s11  ;;  %s1581_s22 = int_to_ptr.vmem [resolvable:$true] %s265_s22 }
  0x31   : > { %p1083_p13 = pneg %p1576_p10 }
  0x34   : > { %s704_s10 = scalar_lea.hbm %s2015_s1, %s1563_s15  ;;  %s1086_s13 = scalar_lea.hbm %s2015_s1, 1536 }
  0x35   : > { %s1570_s18 = scalar_lea.hbm %s704_s10, 128  ;;  %s1111_s16 = scalar_lea.hbm %s704_s10, 256 }
  0x36   : > { %p1082_p12 = scmp.ne.s32.totalorder %s1570_s18, %s1111_s16  ;;  %p1087_p4 = scmp.lt.u32.totalorder %s1570_s18, %s2015_s1 }
  0x37   : > { %p1088_p5 = scmp.lt.u32.totalorder %s1086_s13, %s1111_s16  ;;  %p1090_p8 = scmp.lt.u32.totalorder %s1111_s16, %s1570_s18 }
  0x38   : > { %p1084_p0 = pnand %p1083_p13, %p1082_p12 }
  0x39   : > { %p1089_p6 = por %p1088_p5, %p1087_p4 }
  0x3a   : > { %p1085_p3 = pneg %p1084_p0 }
  0x3b   : > { %p1091_p9 = por %p1090_p8, %p1089_p6 }
  0x3d   : > { %p1092_p2 = pnand %p1091_p9, %p1085_p3 }
  0x3f   : > { %1095 = shalt.err (!%p1092_p2)
}
  0x40   : > { %s1096_s11 = scalar_lea.vmem %s1581_s22, 128  ;;  %s1387_s10 = smov [#allocation8]  }
  0x41   : > { %p1097_p12 = scmp.ne.s32.totalorder %s1581_s22, %s1096_s11  ;;  %s1101_s3 = sshll.u32 %s1387_s10, 4  ;;  %s1102_s3 = int_to_ptr.vmem [resolvable:$false] %s1101_s3 }
  0x42   : > { %s1103_s17 = scalar_lea.vmem %s1102_s3, 256  ;;  %p1104_p11 = scmp.lt.s32.totalorder %s1581_s22, %s1102_s3 }
  0x43   : > { %p1099_p0 = pnand %p1097_p12, %p1083_p13  ;;  %p1105_p4 = scmp.lt.s32.totalorder %s1103_s17, %s1096_s11 }
  0x45   : > { %p1100_p1 = pneg %p1099_p0  ;;  %p1106_p5 = por %p1105_p4, %p1104_p11 }
  0x47   : > { %p1107_p6 = pnand %p1106_p5, %p1100_p1 }
  0x49   : > { %1110 = shalt.err (!%p1107_p6)
}
  0x4a   : > { %s1977_s16 = smov 384   ;;  %s1979_s12 = smov 64  }
  0x4b   : > { %s1981_s13 = smov 4   ;;  %p323_p1 = scmp.lt.s32.totalorder %s1385_s5, 5 }
  0x4c   : > { %903 = dma.hbm_to_vmem [thread:$0]  (!%p1576_p10), %s1570_s18, 128, %s1581_s22, %s1583_s2, %s1977_s16, %s1979_s12, %s1981_s13  }
  0x4d   : > { %p2017_p2 = scmp.ge.s32.totalorder %s1385_s5, 1  ;;  %s833_s4 = sadd.s32 4294967294, %s1385_s5  }
  0x4e   : > { %s59_s11 = ssub.s32 %s1377_s29, %s2088_s7  ;;  %s63_s3 = sadd.s32 1, %s1365_s26 }
  0x4f   : > { %p1616_p9 = pnand %p2017_p2, %p323_p1  ;;  %s60_s10 = sor.u32 %s59_s11, %s1541_s14 }
  0x50   : > { %p61_p11 = scmp.eq.s32.totalorder %s60_s10, 0  ;;  %p70_p13 = scmp.ne.s32.totalorder %s1365_s26, %s1361_s25 }
  0x51   : > { %p76_p3 = scmp.ne.s32.totalorder %s1361_s25, %s1357_s24  ;;  %p198_p8 = scmp.eq.s32.totalorder %s1515_s6, 3 }
  0x52   : > { %s1631_s27 = scalar_select %p61_p11, %s1365_s26, %s63_s3  }
  0x53   : > { %p2020_p10 = scmp.eq.s32.totalorder %s1385_s5, 0  ;;  %p2021_p0 = scmp.eq.s32.totalorder %s1515_s6, 0 }
  0x54   : > { %2019 = sst [smem:[#allocation33_spill]] %s1631_s27  ;;  %p1641_p5 = por %p198_p8, %p70_p13 }
  0x55   : > { %p72_p12 = por %p2020_p10, %p70_p13  ;;  %p1637_p4 = por %p2021_p0, %p76_p3 }
  0x56   : > { %s2023_s22 = scalar_select %p1641_p5, 1, 0 }
  0x57   : > { %s2022_s18 = scalar_select %p1637_p4, 1, 0 }
  0x58   : > { %p204_p6 = scmp.eq.s32.totalorder %s833_s4, 3  ;;  %s224_s17 = sand.u32 1, %s1365_s26  }
  0x59   : > { %s2024_s0 = sld [smem:[#allocation35_spill]]  ;;  %s836_s16 = sshll.u32 %s224_s17, 3 }
  0x5a   : > { %p1652_p1 = por %p204_p6, %p76_p3  ;;  %p2027_p2 = scmp.lt.s32.totalorder %s1385_s5, 4 }
  0x5b   : > { %s228_s4 = scalar_lea.vmem [#allocation5], %s836_s16  ;;  %s1664_s10 = scalar_lea.sflag [#allocation6], %s224_s17 }
  0x5c   : > { %s2025_s3 = scalar_select %p1652_p1, 1, 0 }
  0x5d   : > { %p1658_p11 = pnand %p2027_p2, %p72_p12  ;;  %s239_s11 = sshll.u32 %s228_s4, 4  ;;  %s1662_s11 = int_to_ptr.vmem [resolvable:$true] %s239_s11 }
  0x5e   : > { %2026 = sst [smem:[#allocation34_spill]] %s2025_s3 }
  0x5f   : > { %s1650_s8 = scalar_lea.hbm %s2024_s0, %s1563_s15  ;;  %p1114_p3 = pneg %p1658_p11 }
  0x60   : > { %s1112_s13 = scalar_lea.hbm %s1650_s8, 128  ;;  %s1117_s29 = scalar_lea.hbm %s2024_s0, 1536 }
  0x61   : > { %p1113_p13 = scmp.ne.s32.totalorder %s1650_s8, %s1112_s13  ;;  %p1118_p12 = scmp.lt.u32.totalorder %s1650_s8, %s2024_s0 }
  0x62   : > { %p1119_p0 = scmp.lt.u32.totalorder %s1117_s29, %s1112_s13  ;;  %p1121_p2 = scmp.lt.u32.totalorder %s1112_s13, %s1650_s8 }
  0x63   : > { %p1115_p8 = pnand %p1114_p3, %p1113_p13 }
  0x64   : > { %p1120_p6 = por %p1119_p0, %p1118_p12 }
  0x65   : > { %p1116_p10 = pneg %p1115_p8 }
  0x66   : > { %p1122_p1 = por %p1121_p2, %p1120_p6 }
  0x68   : > { %p1123_p5 = pnand %p1122_p1, %p1116_p10 }
  0x6a   : > { %1126 = shalt.err (!%p1123_p5)
}
  0x6b   : > { %s1127_s16 = scalar_lea.vmem %s1662_s11, 128  ;;  %s1391_s1 = smov [#allocation5]  }
  0x6c   : > { %p1128_p13 = scmp.ne.s32.totalorder %s1662_s11, %s1127_s16  ;;  %s1132_s7 = sshll.u32 %s1391_s1, 4  ;;  %s1133_s7 = int_to_ptr.vmem [resolvable:$false] %s1132_s7 }
  0x6d   : > { %s1134_s26 = scalar_lea.vmem %s1133_s7, 256  ;;  %p1135_p4 = scmp.lt.s32.totalorder %s1662_s11, %s1133_s7 }
  0x6e   : > { %p1130_p8 = pnand %p1128_p13, %p1114_p3  ;;  %p1136_p12 = scmp.lt.s32.totalorder %s1134_s26, %s1127_s16 }
  0x70   : > { %p1131_p7 = pneg %p1130_p8  ;;  %p1137_p0 = por %p1136_p12, %p1135_p4 }
  0x72   : > { %p1138_p6 = pnand %p1137_p0, %p1131_p7 }
  0x74   : > { %1141 = shalt.err (!%p1138_p6)
}
  0x75   : > { %s2029_s29 = smov 4   ;;  %s2030_s13 = smov 64  }
  0x76   : > { %s2031_s27 = smov 384   ;;  %s2032_s17 = sld [smem:[#allocation22_spill]] }
  0x77   : > { %900 = dma.hbm_to_vmem [thread:$0]  (!%p1658_p11), %s1650_s8, 128, %s1662_s11, %s1664_s10, %s2031_s27, %s2030_s13, %s2029_s29  }
  0x78   : > { %s2033_s12 = sor.u32 %s1552_s28, %s1541_s14  ;;  %s127_s4 = sadd.s32 1, %s1341_s20 }
  0x79   : > { %p125_p7 = scmp.eq.s32.totalorder %s2033_s12, 0  ;;  %p134_p4 = scmp.ne.s32.totalorder %s1341_s20, %s1337_s19 }
  0x7a   : > { %p2034_p1 = scmp.eq.s32.totalorder %s1385_s5, 0  ;;  %p2035_p10 = scmp.eq.s32.totalorder %s1515_s6, 0 }
  0x7b   : > { %s1704_s16 = scalar_select %p125_p7, %s1341_s20, %s127_s4  }
  0x7c   : > { %p140_p5 = scmp.ne.s32.totalorder %s1337_s19, %s2032_s17  ;;  %p136_p3 = por %p134_p4, %p2034_p1 }
  0x7d   : > { %s277_s7 = sand.u32 1, %s1341_s20   ;;  %s2037_s21 = sld [smem:[#allocation37_spill]] }
  0x7e   : > { %p1710_p2 = por %p140_p5, %p2035_p10  ;;  %s840_s8 = sshll.u32 %s277_s7, 3 }
  0x7f   : > { %p2039_p11 = scmp.lt.s32.totalorder %s1385_s5, 4  ;;  %s279_s10 = scalar_lea.vmem [#allocation10], %s840_s8 }
  0x80   : > { %s2036_s1 = scalar_select %p1710_p2, 1, 0 }
  0x81   : > { %p1723_p13 = pnand %p2039_p11, %p136_p3  ;;  %s291_s17 = sshll.u32 %s279_s10, 4  ;;  %s1727_s17 = int_to_ptr.vmem [resolvable:$true] %s291_s17 }
  0x83   : > { %s2038_s3 = smov %s2037_s21  ;;  %s714_s23 = scalar_lea.hbm %s2037_s21, %s1563_s15 }
  0x84   : > { %s1719_s28 = scalar_lea.hbm %s714_s23, 256  ;;  %s1172_s12 = scalar_lea.hbm %s714_s23, 384 }
  0x85   : > { %p1143_p8 = scmp.ne.s32.totalorder %s1719_s28, %s1172_s12  ;;  %p1144_p12 = pneg %p1723_p13 }
  0x86   : > { %s1147_s21 = scalar_lea.hbm %s2038_s3, 1536  ;;  %p1148_p7 = scmp.lt.u32.totalorder %s1719_s28, %s2038_s3 }
  0x87   : > { %p1145_p0 = pnand %p1144_p12, %p1143_p8  ;;  %p1149_p4 = scmp.lt.u32.totalorder %s1147_s21, %s1172_s12 }
  0x88   : > { %p1151_p1 = scmp.lt.u32.totalorder %s1172_s12, %s1719_s28 }
  0x89   : > { %p1146_p6 = pneg %p1145_p0  ;;  %p1150_p5 = por %p1149_p4, %p1148_p7 }
  0x8b   : > { %p1152_p3 = por %p1151_p1, %p1150_p5 }
  0x8d   : > { %p1153_p10 = pnand %p1152_p3, %p1146_p6 }
  0x8f   : > { %1156 = shalt.err (!%p1153_p10)
}
  0x90   : > { %s1157_s23 = scalar_lea.vmem %s1727_s17, 128  ;;  %s1392_s26 = smov [#allocation10]  }
  0x91   : > { %p1158_p11 = scmp.ne.s32.totalorder %s1727_s17, %s1157_s23  ;;  %s1162_s8 = sshll.u32 %s1392_s26, 4  ;;  %s1163_s8 = int_to_ptr.vmem [resolvable:$false] %s1162_s8 }
  0x92   : > { %s1164_s10 = scalar_lea.vmem %s1163_s8, 256  ;;  %p1165_p2 = scmp.lt.s32.totalorder %s1727_s17, %s1163_s8 }
  0x93   : > { %p1160_p8 = pnand %p1158_p11, %p1144_p12  ;;  %p1166_p7 = scmp.lt.s32.totalorder %s1164_s10, %s1157_s23 }
  0x95   : > { %p1161_p0 = pneg %p1160_p8  ;;  %p1167_p4 = por %p1166_p7, %p1165_p2 }
  0x97   : > { %p1168_p5 = pnand %p1167_p4, %p1161_p0 }
  0x99   : > { %1171 = shalt.err (!%p1168_p5)
}
  0x9a   : > { %s2041_s12 = sld [smem:[#allocation21_spill]]  ;;  %s2042_s0 = sld [smem:[#allocation20_spill]] }
  0x9b   : > { %s2043_s15 = sld [smem:[#allocation19_spill]]  ;;  %p155_p2 = scmp.eq.s32.totalorder %s1541_s14, 0 }
  0x9c   : > { %906 = dma.hbm_to_vmem [thread:$0]  (!%p1723_p13), %s1719_s28, 128, %s1727_s17, %s1583_s2, %s2031_s27, %s2030_s13, %s2029_s29  }
  0x9d   : > { %p2044_p6 = scmp.eq.s32.totalorder %s1385_s5, 0  ;;  %s862_s7 = sshll.u32 %s1381_s30, 8 }
  0x9e   : > { %p2045_p10 = scmp.eq.s32.totalorder %s1515_s6, 0  ;;  %s2047_s3 = sld [smem:[#allocation38_spill]] }
  0x9f   : > { %p2048_p13 = scmp.lt.s32.totalorder %s1385_s5, 4 }
  0xa0   : > { %s157_s11 = sadd.s32 1, %s2041_s12  ;;  %p164_p12 = scmp.ne.s32.totalorder %s2041_s12, %s2042_s0 }
  0xa1   : > { %s1762_s21 = scalar_select %p155_p2, %s2041_s12, %s157_s11  }
  0xa2   : > { %p166_p1 = por %p164_p12, %p2044_p6  ;;  %p170_p3 = scmp.ne.s32.totalorder %s2042_s0, %s2043_s15 }
  0xa3   : > { %s301_s4 = sand.u32 1, %s2041_s12  }
  0xa4   : > { %p1772_p11 = por %p170_p3, %p2045_p10  ;;  %s842_s26 = sshll.u32 %s301_s4, 4 }
  0xa5   : > { %s1779_s2 = scalar_lea.hbm %s2047_s3, %s862_s7  ;;  %p1783_p8 = pnand %p2048_p13, %p166_p1 }
  0xa6   : > { %s2046_s23 = scalar_select %p1772_p11, 1, 0 }
  0xa7   : > { %s305_s29 = scalar_lea.vmem [#allocation11], %s842_s26  ;;  %s1789_s27 = scalar_lea.sflag [#allocation12], %s301_s4 }
  0xa8   : > { %s315_s13 = sshll.u32 %s305_s29, 4  ;;  %s1173_s28 = scalar_lea.hbm %s1779_s2, 256  ;;  %s1787_s13 = int_to_ptr.vmem [resolvable:$true] %s315_s13 }
  0xa9   : > { %p1174_p0 = scmp.ne.s32.totalorder %s1779_s2, %s1173_s28  ;;  %p1175_p7 = pneg %p1783_p8 }
  0xaa   : > { %s1178_s0 = scalar_lea.hbm %s2047_s3, 512  ;;  %p1179_p2 = scmp.lt.u32.totalorder %s1779_s2, %s2047_s3 }
  0xab   : > { %p1176_p4 = pnand %p1175_p7, %p1174_p0  ;;  %p1180_p12 = scmp.lt.u32.totalorder %s1178_s0, %s1173_s28 }
  0xac   : > { %p1182_p1 = scmp.lt.u32.totalorder %s1173_s28, %s1779_s2 }
  0xad   : > { %p1177_p5 = pneg %p1176_p4  ;;  %p1181_p6 = por %p1180_p12, %p1179_p2 }
  0xaf   : > { %p1183_p3 = por %p1182_p1, %p1181_p6 }
  0xb1   : > { %p1184_p10 = pnand %p1183_p3, %p1177_p5 }
  0xb3   : > { %1187 = shalt.err (!%p1184_p10)
}
  0xb4   : > { %s1188_s4 = scalar_lea.vmem %s1787_s13, 256  ;;  %s1393_s7 = smov [#allocation11]  }
  0xb5   : > { %p1189_p13 = scmp.ne.s32.totalorder %s1787_s13, %s1188_s4  ;;  %s1193_s26 = sshll.u32 %s1393_s7, 4  ;;  %s1194_s26 = int_to_ptr.vmem [resolvable:$false] %s1193_s26 }
  0xb6   : > { %s1195_s8 = scalar_lea.vmem %s1194_s26, 512  ;;  %p1196_p11 = scmp.lt.s32.totalorder %s1787_s13, %s1194_s26 }
  0xb7   : > { %p1191_p0 = pnand %p1189_p13, %p1175_p7  ;;  %p1197_p2 = scmp.lt.s32.totalorder %s1195_s8, %s1188_s4 }
  0xb9   : > { %p1192_p4 = pneg %p1191_p0  ;;  %p1198_p12 = por %p1197_p2, %p1196_p11 }
  0xbb   : > { %p1199_p6 = pnand %p1198_p12, %p1192_p4 }
  0xbd   : > { %1202 = shalt.err (!%p1199_p6)
}
  0xbe   : > { %s1394_s10 = smov 128   ;;  %s1395_s29 = smov 8  }
  0xbf   : > { %909 = dma.hbm_to_vmem [thread:$0]  (!%p1783_p8), %s1779_s2, 256, %s1787_s13, %s1789_s27, %s1394_s10, %s1394_s10, %s1395_s29  }
  0xc0   : > { %327 = sbr.rel (%p1616_p9) target bundleno = 1053 (0x41d), region = 36  ;;  %s1820_s28 = sand.u32 (!%p1616_p9), 1, %s1361_s25  }
  0xc1   : > { %s846_s17 = sshll.u32 (!%p1616_p9), %s1820_s28, 3  ;;  %s330_s12 = scalar_lea.sflag (!%p1616_p9), [#allocation6], %s1820_s28 }
  0xc2   : > { %s333_s0 = scalar_lea.vmem (!%p1616_p9), [#allocation5], %s846_s17  ;;  %p2050_p11 = scmp.ne.s32.totalorder (!%p1616_p9), %s2022_s18, 0 }
  0xc7   : > { %1300 = dma.done.wait (%p2050_p11), %s330_s12, 128  }
  0xc8   : > { %1302 = vsyncadd (%p2050_p11), %s330_s12, 4294967168  ;;  %s2051_s2 = sld [smem:[#allocation23_spill]]  ;;  %s2052_s9 = sld [smem:[#allocation31_spill]] }
  0xc9   : > { %s338_s14 = sand.u32 1, %s1515_s6  }
  0xca   : > { %s339_s15 = scalar_lea.sflag [#allocation9], %s338_s14 }
  0xce   : > { %s340_s13 = sand.u32 1, %s2051_s2   ;;  %p2053_p9 = scmp.ne.s32.totalorder %s2052_s9, 0 }
  0xcf   : > { %s847_s27 = sshll.u32 %s340_s13, 3 }
  0xd0   : > { %s342_s11 = scalar_lea.vmem [#allocation8], %s847_s27 }
  0xd1   : > { %1304 = dma.done.wait (%p2053_p9), %s339_s15, 128  }
  0xd2   : > { %1306 = vsyncadd (%p2053_p9), %s339_s15, 4294967168  ;;  %s349_s4 = sand.u32 1, %s1337_s19   ;;  %p2054_p8 = scmp.ne.s32.totalorder %s2036_s1, 0 }
  0xd3   : > { %s1837_s7 = sshll.u32 %s349_s4, 3 }
  0xd4   : > { %s351_s18 = scalar_lea.vmem [#allocation10], %s1837_s7 }
  0xd5   : > { %1308 = dma.done.wait (%p2054_p8), %s339_s15, 128  }
  0xd6   : > { %1310 = vsyncadd (%p2054_p8), %s339_s15, 4294967168  ;;  %s2055_s6 = sld [smem:[#allocation20_spill]]  ;;  %p2056_p7 = scmp.ne.s32.totalorder %s2046_s23, 0 }
  0xdc   : > { %s356_s26 = sand.u32 1, %s2055_s6  }
  0xdd   : > { %s849_s8 = sshll.u32 %s356_s26, 4  ;;  %s357_s10 = scalar_lea.sflag [#allocation12], %s356_s26 }
  0xde   : > { %s360_s29 = scalar_lea.vmem [#allocation11], %s849_s8 }
  0xdf   : > { %1312 = dma.done.wait (%p2056_p7), %s357_s10, 256  }
  0xe0   : > { %1314 = vsyncadd (%p2056_p7), %s357_s10, 4294967040  ;;  %v1396_v0 = vmov 0.0   ;;  %vm1397_vm0 = vmmov 0   ;;  %v1066_v1 = vld [vmem:[%s342_s11] sm:$0xff]   ;;  %v1067_v2 = vld [vmem:[%s333_s0] sm:$0xff]   ;;  %vm412_vm1 = vcmask 7168  }
  0xe1   : > { %874 = vmatprep.subr.bf16.mxu0 %v1396_v0  ;;  %876 = vmatprep.mubr.msk.bf16.mxu0 %vm1397_vm0, %v1396_v0  ;;  %v1398_v3 = vmov -inf   ;;  %415 = vst.msk [vmem:[#allocation3] sm:$0xff] %vm412_vm1, %v1396_v0  ;;  %416 = vst.msk [vmem:[#allocation3 + $0x8] sm:$0xff] %vm412_vm1, %v1396_v0  ;;  %v480_v4 = vld [vmem:[%s360_s29] sm:$0xff]  ;;  %v481_v5 = vld [vmem:[%s360_s29 + $0x8] sm:$0xff]  ;;  %vm488_vm3 = vcmask 130048  }
  0xe2   : > { %880 = vmatprep.subr.bf16.mxu1 %v1396_v0  ;;  %882 = vmatprep.mubr.msk.bf16.mxu1 %vm1397_vm0, %v1396_v0  ;;  %413 = vst.msk [vmem:[#allocation2] sm:$0xff] %vm412_vm1, %v1398_v3  ;;  %414 = vst.msk [vmem:[#allocation2 + $0x8] sm:$0xff] %vm412_vm1, %v1398_v3  ;;  %vm482_vm2 = vcmp.eq.f32.partialorder %v480_v4, 0.0  ;;  %vm483_vm4 = vcmp.eq.f32.partialorder %v481_v5, 0.0  ;;  %v1399_v16 = vmov 0   ;;  %v1068_v25 = vld [vmem:[%s351_s18] sm:$0xff]  }
  0xe3   : > { %875 = vmatpush3.bf16.xpose.msra.mxu0 %v1066_v1  ;;  %1064 = vset.pattern.permute.xlu1 %v1399_v16  ;;  %s2057_s1 = sld [smem:[#allocation27_spill]]  ;;  %s2058_s23 = sld [smem:[#allocation26_spill]] }
  0xe4   : > { %1065 = vset.pattern.permute.xlu0 %v1399_v16  ;;  %881 = vmatpush3.bf16.msra.mxu1 %v1068_v25  ;;  %s399_s2 = scalar_lea.vmem [#allocation13], %s846_s17  ;;  %s2059_s15 = sld [smem:[#allocation39_spill]] }
  0xe5   : > { %s654_s9 = sshll.u32 %s399_s2, 4  ;;  %s637_s17 = scalar_lea.sflag [#allocation7], %s1820_s28  ;;  %s1868_s9 = int_to_ptr.vmem [resolvable:$true] %s654_s9 }
  0xe6   : > { %s1203_s7 = scalar_lea.vmem %s1868_s9, 128  ;;  %p2061_p1 = scmp.ne.s32.totalorder %s2023_s22, 0 }
  0xe7   : > { %p1204_p5 = scmp.ne.s32.totalorder %s1868_s9, %s1203_s7  ;;  %s1400_s18 = smov [#allocation13]  }
  0xe8   : > { %v519_v41 = vld [vmem:[#allocation3] sm:$0xff]  ;;  %v520_v44 = vld [vmem:[#allocation3 + $0x8] sm:$0xff]  ;;  %s1207_s6 = sshll.u32 %s1400_s18, 4  ;;  %s1208_s6 = int_to_ptr.vmem [resolvable:$false] %s1207_s6 }
  0xe9   : > { %v486_v17 = vld [vmem:[#allocation2] sm:$0xff]  ;;  %v487_v20 = vld [vmem:[#allocation2 + $0x8] sm:$0xff]  ;;  %s858_s12 = sshll.u32 %s2057_s1, 2  ;;  %p1205_p3 = pnand %p1204_p5, %p2061_p1 }
  0xea   : > { %877 = vmatmul.mubr.bf16.vlgmr.msra.gmra.mrb[0].mxu0 %v1067_v2  ;;  %s651_s0 = sadd.s32 %s2058_s23, %s858_s12  ;;  %s2060_s11 = smov %s2059_s15 }
  0xeb   : > { %s859_s14 = sshll.u32 %s651_s0, 6  ;;  %p1206_p10 = pneg %p1205_p3 }
  0xec   : > { %s1873_s4 = scalar_lea.hbm %s2059_s15, %s859_s14  ;;  %s1209_s26 = scalar_lea.vmem %s1208_s6, 256 }
  0xed   : > { %p1210_p13 = scmp.lt.s32.totalorder %s1868_s9, %s1208_s6  ;;  %p1211_p0 = scmp.lt.s32.totalorder %s1209_s26, %s1203_s7 }
  0xef   : > { %p1212_p4 = por %p1211_p0, %p1210_p13 }
  0xf1   : > { %p1213_p2 = pnand %p1212_p4, %p1206_p10 }
 0x1bd   : > { %v471_v6 = vpop.f32.mrb[0].mxu0 }
 0x1be   : > { %v478_v7 = vmul.f32 0.088388346, %v471_v6  ;;  %v878_v8 = vpop.f32.mrb[1].mxu0 }
 0x1bf   : > { %v474_v9 = vpop.f32.mrb[2].mxu0 }
 0x1c0   : > { %v479_v10 = vmul.f32 0.088388346, %v474_v9  ;;  %v879_v11 = vpop.f32.mrb[3].mxu0  ;;  %v484_v12 = vsel %vm482_vm2, -1e+09, %v478_v7 }
 0x1c1   : > { %v489_v13 = vsel %vm488_vm3, %v484_v12, -inf }
 0x1c2   : > { %490 = vmax.xlane.f32.xlu0 %v489_v13  ;;  %v485_v14 = vsel %vm483_vm4, -1e+09, %v479_v10 }
 0x1c3   : > { %v492_v15 = vsel %vm488_vm3, %v485_v14, -inf }
 0x1c6   : > { %493 = vmax.xlane.f32.xlu0 %v492_v15 }
 0x24f   : > { %v491_v18 = vpop.xlane.xlu0 %490 }
 0x250   : > { %v495_v19 = vmax.f32 %v486_v17, %v491_v18 }
 0x252   : > { %v497_v21 = vsub.f32 %v486_v17, %v495_v19  ;;  %603 = vst.msk [vmem:[#allocation2] sm:$0xff] %vm412_vm1, %v495_v19  ;;  %505 = vperm.xlu1 %1064, %v495_v19  }
 0x253   : > { %v494_v22 = vpop.xlane.xlu0 %493 }
 0x254   : > { %v496_v23 = vmax.f32 %v487_v20, %v494_v22  ;;  %v499_v38 = vmul.f32 1.442695, %v497_v21 }
 0x256   : > { %v498_v24 = vsub.f32 %v487_v20, %v496_v23  ;;  %604 = vst.msk [vmem:[#allocation2 + $0x8] sm:$0xff] %vm412_vm1, %v496_v23  ;;  %510 = vperm.xlu1 %1064, %v496_v23  }
 0x258   : > { %v501_v37 = vmul.f32 1.442695, %v498_v24 }
 0x2d1   : > { %v506_v26 = vpop.permute.xlu1 %505 }
 0x2d2   : > { %v513_v27 = vsub.f32 %v484_v12, %v506_v26 }
 0x2d4   : > { %v515_v28 = vmul.f32 1.442695, %v513_v27 }
 0x2d5   : > { %v511_v29 = vpop.permute.xlu1 %510 }
 0x2d6   : > { %1069 = vpow2.f32 %v515_v28  ;;  %v514_v30 = vsub.f32 %v485_v14, %v511_v29 }
 0x2d8   : > { %v517_v31 = vmul.f32 1.442695, %v514_v30 }
 0x2da   : > { %1071 = vpow2.f32 %v517_v31 }
 0x2db   : > { %1073 = vpow2.f32 %v501_v37 }
 0x2dc   : > { %1075 = vpow2.f32 %v499_v38 }
 0x2e0   : > { %v1070_v32 = vpop.eup %1069 }
 0x2e1   : > { %v523_v33 = vsel %vm488_vm3, %v1070_v32, 0.0 }
 0x2e2   : > { %524 = vadd.xlane.f32.xlu0 %v523_v33 }
 0x2e4   : > { %v1072_v34 = vpop.eup %1071 }
 0x2e5   : > { %v526_v35 = vsel %vm488_vm3, %v1072_v34, 0.0  ;;  %v548_v36 = vpack.c.bf16 %v1072_v34, %v1070_v32  ;;  %v1074_v39 = vpop.eup %1073 }
 0x2e6   : > { %527 = vadd.xlane.f32.xlu1 %v526_v35  ;;  %v1076_v40 = vpop.eup %1075  ;;  %v522_v46 = vmul.f32 %v1074_v39, %v520_v44 }
 0x2e7   : > { %883 = vmatmul.mubr.msk.bf16.vlgmr.msra.gmra.mrb[0].mxu1 %vm488_vm3, %v548_v36  ;;  %v521_v42 = vmul.f32 %v1076_v40, %v519_v41 }
 0x2f7   : > { %543 = vperm.xlu1 %1064, %v1074_v39  }
 0x2f8   : > { %538 = vperm.xlu0 %1065, %v1076_v40  }
 0x36f   : > { %v525_v43 = vpop.xlane.xlu0 %524 }
 0x370   : > { %v529_v45 = vadd.f32 %v525_v43, %v521_v42 }
 0x372   : > { %532 = vst.msk [vmem:[#allocation3] sm:$0xff] %vm412_vm1, %v529_v45 }
 0x373   : > { %v528_v47 = vpop.xlane.xlu1 %527 }
 0x374   : > { %v530_v48 = vadd.f32 %v528_v47, %v522_v46 }
 0x376   : > { %533 = vst.msk [vmem:[#allocation3 + $0x8] sm:$0xff] %vm412_vm1, %v530_v48 }
 0x377   : > { %v539_v57 = vpop.permute.xlu0 %538  ;;  %v544_v58 = vpop.permute.xlu1 %543 }
 0x378   : > { %v547_v60 = vmul.f32 0.0, %v544_v58  ;;  %v546_v61 = vmul.f32 0.0, %v539_v57 }
 0x379   : > { %v610_v49 = vld [vmem:[#allocation3] sm:$0xff] }
 0x37a   : > { %1077 = vrcp.f32 %v610_v49 }
 0x37d   : > { %v611_v50 = vld [vmem:[#allocation3 + $0x8] sm:$0xff] }
 0x37e   : > { %1079 = vrcp.f32 %v611_v50 }
 0x384   : > { %v1078_v51 = vpop.eup %1077 }
 0x385   : > { %616 = vperm.xlu0 %1065, %v1078_v51  }
 0x388   : > { %v1080_v52 = vpop.eup %1079 }
 0x389   : > { %621 = vperm.xlu0 %1065, %v1080_v52  }
 0x3ba   : > { %v592_v53 = vpop.f32.mrb[0].mxu1 }
 0x3bb   : > { %v884_v54 = vpop.f32.mrb[1].mxu1  ;;  %v599_v62 = vadd.f32 %v592_v53, %v546_v61 }
 0x3bc   : > { %v595_v55 = vpop.f32.mrb[2].mxu1 }
 0x3bd   : > { %v885_v56 = vpop.f32.mrb[3].mxu1  ;;  %v600_v63 = vadd.f32 %v595_v55, %v547_v60 }
 0x404   : > { %v617_v59 = vpop.permute.xlu0 %616 }
 0x405   : > { %v624_v1 = vmul.f32 %v617_v59, %v599_v62 }
 0x408   : > { %v622_v0 = vpop.permute.xlu0 %621 }
 0x409   : > { %v625_v2 = vmul.f32 %v622_v0, %v600_v63 }
 0x40b   : > { %v868_v3 = vpack.c.bf16 %v625_v2, %v624_v1 }
 0x40d   : > { %869 = vst [vmem:[%s399_s2] sm:$0xff] %v868_v3  }
 0x40e   : > { %1216 = shalt.err (!%p1213_p2)
}
 0x40f   : > { %s1217_s8 = scalar_lea.hbm %s1873_s4, 128  ;;  %s1221_s1 = scalar_lea.hbm %s2060_s11, 512 }
 0x410   : > { %p1218_p12 = scmp.ne.s32.totalorder %s1873_s4, %s1217_s8  ;;  %p1222_p9 = scmp.lt.u32.totalorder %s1873_s4, %s2060_s11 }
 0x411   : > { %p1223_p8 = scmp.lt.u32.totalorder %s1221_s1, %s1217_s8  ;;  %p1225_p5 = scmp.lt.u32.totalorder %s1217_s8, %s1873_s4 }
 0x412   : > { %p1219_p6 = pnand %p1218_p12, %p2061_p1 }
 0x413   : > { %p1224_p7 = por %p1223_p8, %p1222_p9 }
 0x414   : > { %p1220_p11 = pneg %p1219_p6 }
 0x415   : > { %p1226_p3 = por %p1225_p5, %p1224_p7 }
 0x417   : > { %p1227_p10 = pnand %p1226_p3, %p1220_p11 }
 0x419   : > { %1230 = shalt.err (!%p1227_p10)
}
 0x41a   : > { %s1401_s0 = smov 64   ;;  %s1402_s2 = smov 128  }
 0x41b   : > { %s1403_s14 = smov 4  }
 0x41c   : > { %895 = dma.vmem_to_hbm [thread:$0]  (%p2061_p1), %s1868_s9, 128, %s1873_s4, %s637_s17, %s1401_s0, %s1402_s2, %s1403_s14  }
 0x41d PF: > { %s2062_s13 = sld [smem:[#allocation34_spill]]  ;;  %p915_p13 = scmp.ge.s32.totalorder %s1385_s5, 2 }
 0x41e   : > { %s669_s27 = sand.u32 1, %s1357_s24  }
 0x41f   : > { %s670_s15 = scalar_lea.sflag [#allocation7], %s669_s27 }
 0x423   : > { %p2063_p0 = scmp.ne.s32.totalorder %s2062_s13, 0 }
 0x425   : > { %p911_p4 = pnand %p915_p13, %p2063_p0 }
 0x427   : > { %1316 = dma.done.wait (!%p911_p4), %s670_s15, 128  }
 0x428   : > { %1318 = vsyncadd (!%p911_p4), %s670_s15, 4294967168  ;;  %s26_s5 = sadd.s32 1, %s1385_s5   ;;  %s2065_s15 = sld [smem:[#allocation20_spill]] }
 0x429   : > { %p1904_p2 = scmp.ge.s32.totalorder %s26_s5, 6   ;;  %s2066_s22 = sld [smem:[#allocation21_spill]] }
 0x42a   : > { %s2067_s28 = smov %s1704_s16  ;;  %s2068_s9 = sld [smem:[#allocation23_spill]] }
 0x42b   : > { %s2069_s4 = sld [smem:[#allocation24_spill]]  ;;  %s2070_s23 = sld [smem:[#allocation32_spill]] }
 0x42c   : > { %s2071_s6 = sld [smem:[#allocation25_spill]]  ;;  %s2072_s26 = sld [smem:[#allocation33_spill]] }
 0x42d   : > { %s2073_s27 = sld [smem:[#allocation28_spill]]  ;;  %s2074_s29 = sld [smem:[#allocation29_spill]] }
 0x42e   : > { %s2075_s8 = sld [smem:[#allocation30_spill]]  ;;  %s2077_s17 = smov %s1762_s21 }
 0x42f   : > { %s2076_s16 = smov %s2066_s22  ;;  %s2078_s18 = smov %s1337_s19 }
 0x430   : > { %s2079_s19 = smov %s1341_s20  ;;  %s2080_s20 = smov %s2067_s28 }
 0x431   : > { %s2081_s21 = smov %s2068_s9  ;;  %s2082_s22 = smov %s2069_s4 }
 0x432   : > { %s2083_s24 = smov %s1361_s25  ;;  %s2084_s25 = smov %s2071_s6 }
 0x433   : > { %s2085_s28 = smov %s1381_s30  ;;  %25 = sbr.rel (!%p1904_p2) target bundleno = 22 (0x16), region = 126 }
 0x434   : > { %s2086_s30 = smov %s2075_s8 }
 0x43a   :  { %675 = vsyncpa [#allocation6], 1 }
 0x43b   :  { %677 = vsyncpa [#allocation6 + $0x1], 1 }
 0x43c   :  { %678 = vsyncpa [#allocation9], 1 }
 0x43d   :  { %680 = vsyncpa [#allocation9 + $0x1], 1 }
 0x43e   :  { %681 = vsyncpa [#allocation12], 1 }
 0x43f   :  { %683 = vsyncpa [#allocation12 + $0x1], 1 }
 0x440   :  { %684 = vsyncpa [#allocation7], 1 }
 0x441   :  { %686 = vsyncpa [#allocation7 + $0x1], 1 }

// kernel: decoder_forward.18
= control target key start
LH: loop header
LB: loop body
LE: loop exit
PB: predicated region body
PF: predicated region fallthrough
CT: control target
= control target key end

     0   :  { %s2137_s0 = inlined_call_operand.hbm [shape: f32[32,256], index: 0, kind: input, shape index: {}]   ;;  %s2138_s1 = inlined_call_operand.hbm [shape: f32[1,256], index: 1, kind: input, shape index: {}]   ;;  %s2139_s2 = inlined_call_operand.hbm [shape: f32[1,256], index: 2, kind: input, shape index: {}]   ;;  %s2140_s3 = inlined_call_operand.hbm [shape: bf16[256,768], index: 3, kind: input, shape index: {}]   ;;  %s2141_s4 = inlined_call_operand.hbm [shape: f32[1,768], index: 4, kind: input, shape index: {}]   ;;  %s2142_s5 = inlined_call_operand.hbm [shape: bf16[32,768], index: 5, kind: output, shape index: {}]  }
   0x1   :  { %2159 = sst [smem:[#allocation22_spill]] %s2138_s1 }
   0x2   :  { %2160 = sst [smem:[#allocation23_spill]] %s2140_s3 }
   0x3   :  { %2161 = sst [smem:[#allocation24_spill]] %s2142_s5 }
   0x4   :  { %10 = vsyncpa [#allocation4], 0 }
   0x5   :  { %11 = vsyncpa [#allocation7], 0 }
   0x6   :  { %12 = vsyncpa [#allocation10], 0 }
   0x7   :  { %14 = vsyncpa [#allocation10 + $0x1], 0 }
   0x8   :  { %15 = vsyncpa [#allocation5], 0 }
   0x9   :  { %17 = vsyncpa [#allocation5 + $0x1], 0  ;;  %s1728_s18 = smov 0   ;;  %s1730_s19 = smov 0  }
   0xa   :  { %s1732_s20 = smov 0   ;;  %s1734_s21 = smov 0  }
   0xb   :  { %s1736_s22 = smov 0   ;;  %s1738_s23 = smov 0  }
   0xc LB: > { %2162 = sst [smem:[#allocation17_spill]] %s1662_s18  ;;  %s1759_s24 = sadd.s32 4294967295, %s1682_s23   ;;  %s1682_s23 = sphi %s1738_s23, %s23_s23   ;;  %s1678_s22 = sphi %s1736_s22, %s2206_s22   ;;  %s1674_s21 = sphi %s1734_s21, %s2205_s21   ;;  %s1670_s20 = sphi %s1732_s20, %s2204_s20   ;;  %s1666_s19 = sphi %s1730_s19, %s2203_s19   ;;  %s1662_s18 = sphi %s1728_s18, %s2202_s18  }
   0xd   : > { %2163 = sst [smem:[#allocation18_spill]] %s1682_s23  ;;  %s1146_s25 = sadd.s32 4294967294, %s1682_s23  }
   0xe   : > { %p117_p0 = scmp.ne.s32.totalorder %s1670_s20, %s1666_s19  ;;  %p118_p1 = scmp.eq.s32.totalorder %s1682_s23, 0 }
   0xf   : > { %p123_p2 = scmp.ne.s32.totalorder %s1666_s19, %s1662_s18  ;;  %p2143_p3 = scmp.eq.s32.totalorder %s1759_s24, 0 }
  0x10   : > { %p175_p4 = scmp.eq.s32.totalorder %s1759_s24, 1  ;;  %p1770_p5 = por %p118_p1, %p117_p0 }
  0x11   : > { %p181_p6 = scmp.eq.s32.totalorder %s1146_s25, 1  ;;  %p1776_p7 = por %p2143_p3, %p123_p2 }
  0x12   : > { %p1780_p8 = por %p175_p4, %p117_p0  ;;  %p1147_p10 = scmp.ge.s32.totalorder %s1682_s23, 1 }
  0x13   : > { %s2165_s28 = scalar_select %p1776_p7, 1, 0 }
  0x14   : > { %s2166_s29 = scalar_select %p1780_p8, 1, 0 }
  0x15   : > { %p1784_p9 = por %p181_p6, %p123_p2  ;;  %p188_p11 = scmp.lt.s32.totalorder %s1682_s23, 3 }
  0x16   : > { %s1684_s7 = smov [#allocation6]   ;;  %p1304_p1 = scmp.lt.s32.totalorder %s1682_s23, 2 }
  0x17   : > { %s2167_s30 = scalar_select %p1784_p9, 1, 0 }
  0x18   : > { %p1791_p13 = pnand %p1147_p10, %p188_p11  ;;  %s218_s8 = sshll.u32 %s1684_s7, 4  ;;  %s219_s8 = int_to_ptr.vmem [resolvable:$true] %s218_s8 }
  0x19   : > { %2168 = sst [smem:[#allocation19_spill]] %s2167_s30  ;;  %p1800_p4 = pnand %p1304_p1, %p1770_p5 }
  0x1a   : > { %s2169_s6 = scalar_select %p1791_p13, 1, 0 }
  0x1b   : > { %p1280_p0 = pneg %p1791_p13  ;;  %s32_s11 = sadd.s32 1, %s1678_s22 }
  0x1c   : > { %s2170_s9 = scalar_select %p1800_p4, 1, 0 }
  0x1d   : > { %p1806_p2 = pnand %p1280_p0, %p2143_p3  ;;  %p1811_p6 = scmp.ge.s32.totalorder %s32_s11, 2 }
  0x1e   : > { %s2173_s1 = sld [smem:[#allocation22_spill]] }
  0x1f   : > { %s2171_s10 = scalar_select %p1806_p2, 1, 0 }
  0x20   : > { %s2172_s12 = scalar_select %p1811_p6, 1, 0 }
  0x21   : > { %p1824_p10 = pneg %p1806_p2 }
  0x24   : > { %s1448_s16 = scalar_lea.hbm %s2173_s1, 32 }
  0x25   : > { %p1449_p5 = scmp.ne.s32.totalorder %s2173_s1, %s1448_s16  ;;  %p1455_p0 = scmp.lt.u32.totalorder %s1448_s16, %s2173_s1 }
  0x27   : > { %p1451_p11 = pnand %p1824_p10, %p1449_p5 }
  0x29   : > { %p1452_p1 = pneg %p1451_p11 }
  0x2b   : > { %p1457_p12 = pnand %p1455_p0, %p1452_p1 }
  0x2d   : > { %1460 = shalt.err (!%p1457_p12)
}
  0x2e   : > { %s1461_s14 = scalar_lea.vmem %s219_s8, 32  ;;  %p1469_p7 = scmp.lt.s32.totalorder %s219_s8, %s219_s8 }
  0x2f   : > { %p1462_p3 = scmp.ne.s32.totalorder %s219_s8, %s1461_s14  ;;  %p1470_p13 = scmp.lt.s32.totalorder %s1461_s14, %s1461_s14 }
  0x31   : > { %p1464_p9 = pnand %p1462_p3, %p1824_p10  ;;  %p1471_p4 = por %p1470_p13, %p1469_p7 }
  0x33   : > { %p1465_p8 = pneg %p1464_p9 }
  0x35   : > { %p1472_p6 = pnand %p1471_p4, %p1465_p8 }
  0x37   : > { %1475 = shalt.err (!%p1472_p6)
}
  0x38   : > { %1286 = dma.hbm_to_vmem [thread:$0]  (!%p1806_p2), %s2173_s1, 32, %s219_s8, [#allocation7]  }
  0x39   : > { %p2175_p3 = scmp.ne.s32.totalorder %s2172_s12, 0  ;;  %s2149_s26 = sand.u32 1, %s1670_s20  }
  0x3a   : > { %s1257_s25 = smul.u32 384, %s2149_s26  ;;  %s2177_s14 = sadd.s32 1, %s1670_s20 }
  0x3b   : > { %s2208_s11 = smov (%p2175_p3, %s32_s11), 0  ;;  %s1218_s7 = smul.u32 192, %s1678_s22 }
  0x3c   : > { %2176 = sst [smem:[#allocation20_spill]] %s2208_s11  ;;  %s107_s16 = ssub.s32 %s1678_s22, %s2208_s11 }
  0x3d   : > { %p108_p7 = scmp.eq.s32.totalorder %s107_s16, 0  ;;  %s2179_s3 = sld [smem:[#allocation23_spill]] }
  0x3e   : > { %s244_s8 = scalar_lea.vmem [#allocation9], %s1257_s25  ;;  %s2180_s1 = sand.u32 1, %s1682_s23  }
  0x3f   : > { %s1853_s15 = scalar_select %p108_p7, %s1670_s20, %s2177_s14  }
  0x40   : > { %s251_s12 = sshll.u32 %s244_s8, 4  ;;  %s1864_s26 = scalar_lea.sflag [#allocation10], %s2180_s1  ;;  %s1860_s12 = int_to_ptr.vmem [resolvable:$true] %s251_s12 }
  0x41   : > { %2178 = sst [smem:[#allocation21_spill]] %s1853_s15  ;;  %p2181_p9 = scmp.ne.s32.totalorder %s2170_s9, 0 }
  0x43   : > { %s1858_s30 = scalar_lea.hbm %s2179_s3, %s1218_s7  ;;  %p2155_p12 = pneg %p2181_p9 }
  0x44   : > { %s1476_s16 = scalar_lea.hbm %s1858_s30, 6144  ;;  %s1481_s14 = scalar_lea.hbm %s2179_s3, 12288 }
  0x45   : > { %p1477_p8 = scmp.ne.s32.totalorder %s1858_s30, %s1476_s16  ;;  %p1482_p6 = scmp.lt.u32.totalorder %s1858_s30, %s2179_s3 }
  0x46   : > { %p1483_p5 = scmp.lt.u32.totalorder %s1481_s14, %s1476_s16  ;;  %p1485_p1 = scmp.lt.u32.totalorder %s1476_s16, %s1858_s30 }
  0x47   : > { %p1479_p13 = pnand %p2155_p12, %p1477_p8 }
  0x48   : > { %p1484_p11 = por %p1483_p5, %p1482_p6 }
  0x49   : > { %p1480_p4 = pneg %p1479_p13 }
  0x4a   : > { %p1486_p0 = por %p1485_p1, %p1484_p11 }
  0x4c   : > { %p1487_p3 = pnand %p1486_p0, %p1480_p4 }
  0x4e   : > { %1490 = shalt.err (!%p1487_p3)
}
  0x4f   : > { %s1491_s1 = scalar_lea.vmem %s1860_s12, 6144  ;;  %s1685_s8 = smov [#allocation9]  }
  0x50   : > { %p1492_p7 = scmp.ne.s32.totalorder %s1860_s12, %s1491_s1  ;;  %s1496_s13 = sshll.u32 %s1685_s8, 4  ;;  %s1497_s13 = int_to_ptr.vmem [resolvable:$false] %s1496_s13 }
  0x51   : > { %s1498_s7 = scalar_lea.vmem %s1497_s13, 12288  ;;  %p1499_p2 = scmp.lt.s32.totalorder %s1860_s12, %s1497_s13 }
  0x52   : > { %p1494_p8 = pnand %p1492_p7, %p2155_p12  ;;  %p1500_p6 = scmp.lt.s32.totalorder %s1498_s7, %s1491_s1 }
  0x54   : > { %p1495_p13 = pneg %p1494_p8  ;;  %p1501_p5 = por %p1500_p6, %p1499_p2 }
  0x56   : > { %p1502_p11 = pnand %p1501_p5, %p1495_p13 }
  0x58   : > { %1505 = shalt.err (!%p1502_p11)
}
  0x59   : > { %s1686_s16 = smov 384   ;;  %s1687_s14 = smov 192  }
  0x5a   : > { %s1688_s17 = smov 12   ;;  %s1689_s25 = smov [#allocation3]  }
  0x5b   : > { %1293 = dma.hbm_to_vmem [thread:$0]  (!%p2181_p9), %s1858_s30, 6144, %s1860_s12, %s1864_s26, %s1686_s16, %s1687_s14, %s1688_s17  }
  0x5c   : > { %s204_s3 = sshll.u32 %s1689_s25, 4  ;;  %s1506_s1 = scalar_lea.hbm %s2137_s0, 1024  ;;  %s205_s3 = int_to_ptr.vmem [resolvable:$true] %s204_s3 }
  0x5d   : > { %p1507_p2 = scmp.ne.s32.totalorder %s2137_s0, %s1506_s1  ;;  %p1513_p0 = scmp.lt.u32.totalorder %s1506_s1, %s2137_s0 }
  0x5f   : > { %p1509_p4 = pnand %p1507_p2, %p1824_p10 }
  0x61   : > { %p1510_p1 = pneg %p1509_p4 }
  0x63   : > { %p1515_p3 = pnand %p1513_p0, %p1510_p1 }
  0x65   : > { %1518 = shalt.err (!%p1515_p3)
}
  0x66   : > { %s1519_s30 = scalar_lea.vmem %s205_s3, 1024  ;;  %p1527_p6 = scmp.lt.s32.totalorder %s205_s3, %s205_s3 }
  0x67   : > { %p1520_p7 = scmp.ne.s32.totalorder %s205_s3, %s1519_s30  ;;  %p1528_p5 = scmp.lt.s32.totalorder %s1519_s30, %s1519_s30 }
  0x69   : > { %p1522_p8 = pnand %p1520_p7, %p1824_p10  ;;  %p1529_p11 = por %p1528_p5, %p1527_p6 }
  0x6b   : > { %p1523_p13 = pneg %p1522_p8 }
  0x6d   : > { %p1530_p12 = pnand %p1529_p11, %p1523_p13 }
  0x6f   : > { %1533 = shalt.err (!%p1530_p12)
}
  0x70   : > { %s1690_s11 = smov 256   ;;  %s1691_s23 = smov 16  }
  0x71   : > { %p2182_p2 = scmp.ne.s32.totalorder %s2171_s10, 0  ;;  %s2183_s16 = sand.u32 1, %s1670_s20  }
  0x72   : > { %s1258_s14 = smul.u32 3, %s2183_s16  ;;  %s1692_s17 = smov [#allocation8]  }
  0x73   : > { %1283 = dma.hbm_to_vmem [thread:$0]  (!%p2182_p2), %s2137_s0, 1024, %s205_s3, [#allocation4], %s1690_s11, %s1690_s11, %s1691_s23  }
  0x74   : > { %s229_s25 = sshll.u32 %s1692_s17, 4  ;;  %s1219_s8 = smul.u32 48, %s1678_s22  ;;  %s230_s25 = int_to_ptr.vmem [resolvable:$true] %s229_s25 }
  0x75   : > { %s1534_s7 = scalar_lea.hbm %s2139_s2, 32 }
  0x76   : > { %p1535_p12 = scmp.ne.s32.totalorder %s2139_s2, %s1534_s7  ;;  %p1541_p0 = scmp.lt.u32.totalorder %s1534_s7, %s2139_s2 }
  0x78   : > { %p1537_p4 = pnand %p1535_p12, %p1824_p10 }
  0x7a   : > { %p1538_p1 = pneg %p1537_p4 }
  0x7c   : > { %p1543_p3 = pnand %p1541_p0, %p1538_p1 }
  0x7e   : > { %1546 = shalt.err (!%p1543_p3)
}
  0x7f   : > { %s1547_s3 = scalar_lea.vmem %s230_s25, 32  ;;  %p1555_p6 = scmp.lt.s32.totalorder %s230_s25, %s230_s25 }
  0x80   : > { %p1548_p7 = scmp.ne.s32.totalorder %s230_s25, %s1547_s3  ;;  %p1556_p5 = scmp.lt.s32.totalorder %s1547_s3, %s1547_s3 }
  0x82   : > { %p1550_p8 = pnand %p1548_p7, %p1824_p10  ;;  %p1557_p11 = por %p1556_p5, %p1555_p6 }
  0x84   : > { %p1551_p13 = pneg %p1550_p8 }
  0x86   : > { %p1558_p9 = pnand %p1557_p11, %p1551_p13 }
  0x88   : > { %1561 = shalt.err (!%p1558_p9)
}
  0x89   : > { %1289 = dma.hbm_to_vmem [thread:$0]  (!%p2182_p2), %s2139_s2, 32, %s230_s25, [#allocation7]  }
  0x8a   : > { %s1934_s12 = scalar_lea.hbm %s2141_s4, %s1219_s8  ;;  %s265_s27 = scalar_lea.vmem [#allocation11], %s1258_s14 }
  0x8b   : > { %s273_s16 = sshll.u32 %s265_s27, 4  ;;  %s1562_s17 = scalar_lea.hbm %s1934_s12, 48  ;;  %s274_s16 = int_to_ptr.vmem [resolvable:$true] %s273_s16 }
  0x8c   : > { %p1563_p10 = scmp.ne.s32.totalorder %s1934_s12, %s1562_s17  ;;  %p2184_p9 = scmp.ne.s32.totalorder %s2170_s9, 0 }
  0x8d   : > { %s1567_s1 = scalar_lea.hbm %s2141_s4, 96  ;;  %p1568_p2 = scmp.lt.u32.totalorder %s1934_s12, %s2141_s4 }
  0x8e   : > { %p2185_p12 = pneg %p2184_p9  ;;  %p1569_p0 = scmp.lt.u32.totalorder %s1567_s1, %s1562_s17 }
  0x8f   : > { %p1571_p7 = scmp.lt.u32.totalorder %s1562_s17, %s1934_s12 }
  0x90   : > { %p1565_p4 = pnand %p1563_p10, %p2185_p12  ;;  %p1570_p3 = por %p1569_p0, %p1568_p2 }
  0x92   : > { %p1566_p1 = pneg %p1565_p4  ;;  %p1572_p8 = por %p1571_p7, %p1570_p3 }
  0x94   : > { %p1573_p13 = pnand %p1572_p8, %p1566_p1 }
  0x96   : > { %1576 = shalt.err (!%p1573_p13)
}
  0x97   : > { %s1577_s14 = scalar_lea.vmem %s274_s16, 48  ;;  %p2186_p5 = pmov %p2185_p12 }
  0x98   : > { %p1578_p6 = scmp.ne.s32.totalorder %s274_s16, %s1577_s14  ;;  %s1693_s7 = smov [#allocation11]  }
  0x99   : > { %s1582_s30 = sshll.u32 %s1693_s7, 4  ;;  %s1583_s30 = int_to_ptr.vmem [resolvable:$false] %s1582_s30 }
  0x9a   : > { %p1580_p11 = pnand %p1578_p6, %p2186_p5  ;;  %s1584_s15 = scalar_lea.vmem %s1583_s30, 96 }
  0x9b   : > { %p1585_p12 = scmp.lt.s32.totalorder %s274_s16, %s1583_s30  ;;  %p1586_p4 = scmp.lt.s32.totalorder %s1584_s15, %s1577_s14 }
  0x9c   : > { %p1581_p10 = pneg %p1580_p11 }
  0x9d   : > { %p1587_p0 = por %p1586_p4, %p1585_p12 }
  0x9f   : > { %p1588_p2 = pnand %p1587_p0, %p1581_p10 }
  0xa1   : > { %1591 = shalt.err (!%p1588_p2)
}
  0xa2   : > { %1296 = dma.hbm_to_vmem [thread:$0]  (!%p2184_p9), %s1934_s12, 48, %s274_s16, %s1864_s26  }
  0xa3   : > { %p2187_p1 = scmp.ne.s32.totalorder %s2169_s6, 0 }
  0xa4   : > { %p2188_p3 = scmp.eq.s32.totalorder (!%p2187_p1), %s1759_s24, 0 }
  0xa5   : > { %282 = sbr.rel (%p2187_p1) target bundleno = 830 (0x33e), region = 40 }
  0xac   : > { %1645 = dma.done.wait (%p2188_p3), [#allocation4], 1024   ;;  %p2189_p7 = pmov %p2188_p3 }
  0xad   : > { %p2190_p8 = pmov %p2188_p3 }
  0xae   : > { %1647 = vsyncadd (%p2189_p7), [#allocation4], 4294966272 }
  0xaf   : > { %1649 = dma.done.wait (%p2190_p8), [#allocation7], 64   ;;  %p2191_p13 = pmov %p2188_p3 }
  0xb0   : > { %s296_s9 = sand.u32 1, %s1759_s24   ;;  %s1968_s26 = sand.u32 1, %s1666_s19  }
  0xb1   : > { %1651 = vsyncadd (%p2191_p13), [#allocation7], 4294967232  ;;  %s1259_s6 = smul.u32 384, %s1968_s26  ;;  %s297_s3 = scalar_lea.sflag [#allocation10], %s296_s9 }
  0xb2   : > { %p2192_p9 = scmp.ne.s32.totalorder %s2165_s28, 0 }
  0xb3   : > { %s1971_s18 = scalar_lea.vmem [#allocation9], %s1259_s6 }
  0xb4   : > { %1653 = dma.done.wait (%p2192_p9), %s297_s3, 6192  }
  0xb5   : > { %1655 = vsyncadd (%p2192_p9), %s297_s3, 4294961104  ;;  %s1260_s11 = smul.u32 3, %s1968_s26  ;;  %p1158_p6 = scmp.ne.s32.totalorder %s1674_s21, 0 }
  0xb6   : > { %s1261_s5 = smul.u32 48, %s1968_s26  ;;  %v351_v0 = vld [vmem:[#allocation3] sm:$0xff] (!%p1158_p6)  ;;  %v352_v1 = vld [vmem:[#allocation3 + $0x8] sm:$0xff] (!%p1158_p6)  ;;  %v353_v5 = vld [vmem:[#allocation3 + $0x10] sm:$0xff] (!%p1158_p6)  ;;  %v410_v49 = vlaneseq (!%p1158_p6) }
  0xb7   : > { %s1979_s23 = scalar_lea.vmem [#allocation11], %s1260_s11  ;;  %350 = sbr.rel (%p1158_p6) target bundleno = 522 (0x20a), region = 64  ;;  %v355_v2 = vld [vmem:[#allocation3 + $0x20] sm:$0xff] (!%p1158_p6)  ;;  %v359_v3 = vadd.f32 (!%p1158_p6), %v352_v1, %v351_v0  ;;  %v356_v4 = vld [vmem:[#allocation3 + $0x28] sm:$0xff] (!%p1158_p6)  ;;  %v354_v6 = vld [vmem:[#allocation3 + $0x18] sm:$0xff] (!%p1158_p6) }
  0xb8   : > { %s1981_s12 = scalar_lea.vmem [#allocation12], %s1261_s5  ;;  %v365_v7 = vadd.f32 (!%p1158_p6), %v356_v4, %v355_v2  ;;  %v357_v8 = vld [vmem:[#allocation3 + $0x30] sm:$0xff] (!%p1158_p6)  ;;  %v358_v9 = vld [vmem:[#allocation3 + $0x38] sm:$0xff] (!%p1158_p6)  ;;  %v362_v10 = vadd.f32 (!%p1158_p6), %v354_v6, %v353_v5  ;;  %v411_v54 = vshrl.u32 (!%p1158_p6), %v410_v49, 7 }
  0xb9   : > { %360 = vadd.xlane.f32.xlu0 (!%p1158_p6), %v359_v3  ;;  %v368_v11 = vadd.f32 (!%p1158_p6), %v358_v9, %v357_v8 }
  0xba   : > { %366 = vadd.xlane.f32.xlu1 (!%p1158_p6), %v365_v7  ;;  %v416_v3 = vsub.s32 (!%p1158_p6), 1, %v411_v54  ;;  %v408_v7 = vld [vmem:[#allocation6] sm:$0x3] (!%p1158_p6) }
  0xbd   : > { %363 = vadd.xlane.f32.xlu0 (!%p1158_p6), %v362_v10 }
  0xbe   : > { %369 = vadd.xlane.f32.xlu1 %v368_v11 }
 0x146   : > { %v361_v12 = vpop.xlane.xlu0 %360 }
 0x147   : > { %v372_v13 = vmul.f32 0.00390625, %v361_v12  ;;  %v367_v14 = vpop.xlane.xlu1 %366 }
 0x148   : > { %v374_v15 = vmul.f32 0.00390625, %v367_v14 }
 0x149   : > { %v1984_v16 = vsub.f32 %v351_v0, %v372_v13  ;;  %v1986_v17 = vsub.f32 %v352_v1, %v372_v13  ;;  %v412_v0 = vsub.s32 0, %v411_v54  ;;  %v417_v13 = vrot.slane %v408_v7, %v416_v3 }
 0x14a   : > { %v1988_v18 = vsub.f32 %v355_v2, %v374_v15  ;;  %v1990_v19 = vsub.f32 %v356_v4, %v374_v15  ;;  %v364_v20 = vpop.xlane.xlu0 %363  ;;  %v472_v15 = vld [vmem:[#allocation8] sm:$0x3] }
 0x14b   : > { %v373_v21 = vmul.f32 0.00390625, %v364_v20  ;;  %v370_v22 = vpop.xlane.xlu1 %369  ;;  %v384_v23 = vmul.f32 %v1984_v16, %v1984_v16  ;;  %v385_v25 = vmul.f32 %v1986_v17, %v1986_v17  ;;  %v413_v12 = vrot.slane %v408_v7, %v412_v0 }
 0x14c   : > { %v375_v24 = vmul.f32 0.00390625, %v370_v22  ;;  %v388_v28 = vmul.f32 %v1988_v18, %v1988_v18  ;;  %v389_v29 = vmul.f32 %v1990_v19, %v1990_v19  ;;  %v421_v22 = vmul.f32 %v417_v13, %v1986_v17 }
 0x14d   : > { %v1996_v26 = vsub.f32 %v353_v5, %v373_v21  ;;  %v1998_v27 = vsub.f32 %v354_v6, %v373_v21  ;;  %v392_v32 = vadd.f32 %v385_v25, %v384_v23  ;;  %v420_v21 = vmul.f32 %v413_v12, %v1984_v16 }
 0x14e   : > { %v2004_v30 = vsub.f32 %v357_v8, %v375_v24  ;;  %v2006_v31 = vsub.f32 %v358_v9, %v375_v24  ;;  %v398_v34 = vadd.f32 %v389_v29, %v388_v28  ;;  %v477_v23 = vrot.slane %v472_v15, %v412_v0 }
 0x14f   : > { %v386_v33 = vmul.f32 %v1996_v26, %v1996_v26  ;;  %393 = vadd.xlane.f32.xlu0 %v392_v32  ;;  %v387_v35 = vmul.f32 %v1998_v27, %v1998_v27  ;;  %v481_v24 = vrot.slane %v472_v15, %v416_v3  ;;  %v422_v29 = vmul.f32 %v413_v12, %v1996_v26 }
 0x150   : > { %v390_v36 = vmul.f32 %v2004_v30, %v2004_v30  ;;  %v391_v37 = vmul.f32 %v2006_v31, %v2006_v31  ;;  %v423_v32 = vmul.f32 %v417_v13, %v1998_v27  ;;  %v426_v16 = vmul.f32 %v413_v12, %v2004_v30 }
 0x151   : > { %v395_v38 = vadd.f32 %v387_v35, %v386_v33  ;;  %v424_v35 = vmul.f32 %v413_v12, %v1988_v18  ;;  %v427_v17 = vmul.f32 %v417_v13, %v2006_v31 }
 0x152   : > { %v401_v39 = vadd.f32 %v391_v37, %v390_v36  ;;  %v425_v36 = vmul.f32 %v417_v13, %v1990_v19 }
 0x153   : > { %399 = vadd.xlane.f32.xlu0 %v398_v34  ;;  %396 = vadd.xlane.f32.xlu1 %v395_v38 }
 0x157   : > { %402 = vadd.xlane.f32.xlu1 %v401_v39 }
 0x1dc   : > { %v394_v40 = vpop.xlane.xlu0 %393 }
 0x1dd   : > { %v404_v41 = vmul.f32 0.00390625, %v394_v40 }
 0x1df   : > { %1368 = vrsqrt.f32 %v404_v41  ;;  %vm430_vm0 = vcmp.eq.f32.partialorder %v404_v41, inf  ;;  %v433_v51 = vand.u32 2147483648, %v404_v41  ;;  %vm432_vm1 = vcmp.eq.f32.partialorder %v404_v41, 0.0 }
 0x1e0   : > { %v397_v42 = vpop.xlane.xlu1 %396  ;;  %v400_v43 = vpop.xlane.xlu0 %399 }
 0x1e1   : > { %v405_v44 = vmul.f32 0.00390625, %v397_v42  ;;  %v406_v45 = vmul.f32 0.00390625, %v400_v43 }
 0x1e3   : > { %1370 = vrsqrt.f32 %v405_v44  ;;  %vm437_vm2 = vcmp.eq.f32.partialorder %v405_v44, inf  ;;  %vm439_vm3 = vcmp.eq.f32.partialorder %v405_v44, 0.0  ;;  %v440_v59 = vand.u32 2147483648, %v405_v44 }
 0x1e4   : > { %1372 = vrsqrt.f32 %v406_v45  ;;  %v403_v46 = vpop.xlane.xlu1 %402  ;;  %vm444_vm4 = vcmp.eq.f32.partialorder %v406_v45, inf  ;;  %v447_v62 = vand.u32 2147483648, %v406_v45  ;;  %vm446_vm5 = vcmp.eq.f32.partialorder %v406_v45, 0.0 }
 0x1e5   : > { %v407_v47 = vmul.f32 0.00390625, %v403_v46 }
 0x1e7   : > { %1374 = vrsqrt.f32 %v407_v47  ;;  %vm451_vm6 = vcmp.eq.f32.partialorder %v407_v47, inf  ;;  %v454_v9 = vand.u32 2147483648, %v407_v47  ;;  %vm453_vm7 = vcmp.eq.f32.partialorder %v407_v47, 0.0 }
 0x1e9   : > { %v1369_v48 = vpop.eup %1368 }
 0x1ea   : > { %v429_v50 = vmul.f32 %v1369_v48, %v404_v41 }
 0x1ec   : > { %v431_v52 = vsel %vm430_vm0, %v404_v41, %v429_v50 }
 0x1ed   : > { %v1371_v53 = vpop.eup %1370  ;;  %v434_v55 = vsel %vm432_vm1, %v433_v51, %v431_v52 }
 0x1ee   : > { %v1373_v56 = vpop.eup %1372  ;;  %v456_v57 = vadd.f32 1e-06, %v434_v55  ;;  %v436_v58 = vmul.f32 %v1371_v53, %v405_v44 }
 0x1ef   : > { %v443_v60 = vmul.f32 %v1373_v56, %v406_v45 }
 0x1f0   : > { %1376 = vrcp.f32 %v456_v57  ;;  %v438_v61 = vsel %vm437_vm2, %v405_v44, %v436_v58 }
 0x1f1   : > { %v1375_v63 = vpop.eup %1374  ;;  %v441_v1 = vsel %vm439_vm3, %v440_v59, %v438_v61  ;;  %v445_v2 = vsel %vm444_vm4, %v406_v45, %v443_v60 }
 0x1f2   : > { %v457_v4 = vadd.f32 1e-06, %v441_v1  ;;  %v448_v5 = vsel %vm446_vm5, %v447_v62, %v445_v2  ;;  %v450_v6 = vmul.f32 %v1375_v63, %v407_v47 }
 0x1f3   : > { %v458_v8 = vadd.f32 1e-06, %v448_v5 }
 0x1f4   : > { %1378 = vrcp.f32 %v457_v4  ;;  %v452_v10 = vsel %vm451_vm6, %v407_v47, %v450_v6 }
 0x1f5   : > { %1380 = vrcp.f32 %v458_v8  ;;  %v455_v11 = vsel %vm453_vm7, %v454_v9, %v452_v10 }
 0x1f6   : > { %v459_v14 = vadd.f32 1e-06, %v455_v11 }
 0x1f8   : > { %1382 = vrcp.f32 %v459_v14 }
 0x1fa   : > { %v1377_v20 = vpop.eup %1376 }
 0x1fb   : > { %v461_v25 = vmul.f32 %v1377_v20, %v420_v21  ;;  %v462_v28 = vmul.f32 %v1377_v20, %v421_v22 }
 0x1fd   : > { %v484_v39 = vadd.f32 %v477_v23, %v461_v25  ;;  %v485_v40 = vadd.f32 %v481_v24, %v462_v28 }
 0x1fe   : > { %v1379_v33 = vpop.eup %1378 }
 0x1ff   : > { %v1381_v34 = vpop.eup %1380  ;;  %v464_v37 = vmul.f32 %v1379_v33, %v422_v29  ;;  %v465_v38 = vmul.f32 %v1379_v33, %v423_v32 }
 0x200   : > { %v467_v43 = vmul.f32 %v1381_v34, %v424_v35  ;;  %v468_v26 = vmul.f32 %v1381_v34, %v425_v36 }
 0x201   : > { %v486_v41 = vadd.f32 %v477_v23, %v464_v37  ;;  %v487_v42 = vadd.f32 %v481_v24, %v465_v38 }
 0x202   : > { %v1383_v44 = vpop.eup %1382  ;;  %v488_v18 = vadd.f32 %v477_v23, %v467_v43  ;;  %v489_v19 = vadd.f32 %v481_v24, %v468_v26 }
 0x203   : > { %v492_v27 = vpack.c.bf16 %v486_v41, %v484_v39  ;;  %v493_v45 = vpack.c.bf16 %v487_v42, %v485_v40  ;;  %v470_v46 = vmul.f32 %v1383_v44, %v426_v16  ;;  %v471_v47 = vmul.f32 %v1383_v44, %v427_v17 }
 0x205   : > { %496 = vst [vmem:[#allocation2] sm:$0xff] %v492_v27  ;;  %497 = vst [vmem:[#allocation2 + $0x8] sm:$0xff] %v493_v45  ;;  %v490_v48 = vadd.f32 %v477_v23, %v470_v46  ;;  %v491_v49 = vadd.f32 %v481_v24, %v471_v47 }
 0x207   : > { %v494_v30 = vpack.c.bf16 %v490_v48, %v488_v18  ;;  %v495_v50 = vpack.c.bf16 %v491_v49, %v489_v19 }
 0x209   : > { %498 = vst [vmem:[#allocation2 + $0x10] sm:$0xff] %v494_v30  ;;  %499 = vst [vmem:[#allocation2 + $0x18] sm:$0xff] %v495_v50 }
 0x20a PF: > { %v1384_v31 = vld [vmem:[%s1971_s18 + $0x4] ss:$12 sps:$4 sm:$0xff]   ;;  %v1386_v51 = vld [vmem:[%s1971_s18] ss:$12 sps:$4 sm:$0xff]   ;;  %v1387_v52 = vld [vmem:[%s1971_s18 + $0x1c] ss:$12 sps:$4 sm:$0xff]   ;;  %v570_v26 = vlaneseq }
 0x20b   : > { %841 = vmatprep.subr.bf16.mxu0 %v1384_v31  ;;  %v1389_v53 = vld [vmem:[%s1971_s18 + $0x18] ss:$12 sps:$4 sm:$0xff]   ;;  %v1390_v54 = vld [vmem:[%s1971_s18 + $0x34] ss:$12 sps:$4 sm:$0xff]   ;;  %v1392_v55 = vld [vmem:[%s1971_s18 + $0x30] ss:$12 sps:$4 sm:$0xff]  }
 0x20c   : > { %842 = vmatpush1.bf16.msra.mxu0 %v1386_v51  ;;  %v1393_v56 = vld [vmem:[%s1971_s18 + $0x4c] ss:$12 sps:$4 sm:$0xff]   ;;  %v1405_v57 = vld [vmem:[%s1971_s18 + $0xc8] ss:$12 sps:$4 sm:$0xff]   ;;  %v1396_v59 = vld [vmem:[%s1971_s18 + $0x64] ss:$12 sps:$4 sm:$0xff]  }
 0x20d   : > { %843 = vmatprep.subr.bf16.mxu0 %v1387_v52  ;;  %v1395_v58 = vld [vmem:[%s1971_s18 + $0x48] ss:$12 sps:$4 sm:$0xff]   ;;  %1229 = vmatprep.subr.bf16.mxu1 %v1405_v57  ;;  %v1410_v61 = vld [vmem:[%s1971_s18 + $0xe0] ss:$12 sps:$4 sm:$0xff]   ;;  %v1415_v1 = vld [vmem:[%s1971_s18 + $0xf8] ss:$12 sps:$4 sm:$0xff]  }
 0x20e   : > { %v1408_v60 = vld [vmem:[%s1971_s18 + $0x8] ss:$12 sps:$4 sm:$0xff]   ;;  %v1398_v62 = vld [vmem:[%s1971_s18 + $0x60] ss:$12 sps:$4 sm:$0xff]   ;;  %v1401_v2 = vld [vmem:[%s1971_s18 + $0x78] ss:$12 sps:$4 sm:$0xff]  }
 0x20f   : > { %1230 = vmatpush3.bf16.msra.mxu1 %v1408_v60  ;;  %v1399_v63 = vld [vmem:[%s1971_s18 + $0x7c] ss:$12 sps:$4 sm:$0xff]   ;;  %v1413_v0 = vld [vmem:[%s1971_s18 + $0x20] ss:$12 sps:$4 sm:$0xff]   ;;  %v1418_v3 = vld [vmem:[%s1971_s18 + $0x38] ss:$12 sps:$4 sm:$0xff]  }
 0x210   : > { %844 = vmatpush1.bf16.msra.mxu0 %v1389_v53  ;;  %1231 = vmatprep.subr.bf16.mxu1 %v1410_v61  ;;  %v1402_v4 = vld [vmem:[%s1971_s18 + $0x94] ss:$12 sps:$4 sm:$0xff]   ;;  %v1420_v5 = vld [vmem:[%s1971_s18 + $0x110] ss:$12 sps:$4 sm:$0xff]   ;;  %v1406_v9 = vld [vmem:[%s1971_s18 + $0xac] ss:$12 sps:$4 sm:$0xff]  }
 0x211   : > { %845 = vmatprep.subr.bf16.mxu0 %v1390_v54  ;;  %v1404_v6 = vld [vmem:[%s1971_s18 + $0x90] ss:$12 sps:$4 sm:$0xff]   ;;  %v1425_v8 = vld [vmem:[%s1971_s18 + $0x128] ss:$12 sps:$4 sm:$0xff]   ;;  %v1430_v12 = vld [vmem:[%s1971_s18 + $0x140] ss:$12 sps:$4 sm:$0xff]  }
 0x212   : > { %v1423_v7 = vld [vmem:[%s1971_s18 + $0x50] ss:$12 sps:$4 sm:$0xff]   ;;  %v1409_v10 = vld [vmem:[%s1971_s18 + $0xa8] ss:$12 sps:$4 sm:$0xff]   ;;  %v1414_v14 = vld [vmem:[%s1971_s18 + $0xc0] ss:$12 sps:$4 sm:$0xff]  }
 0x213   : > { %1232 = vmatpush3.bf16.msra.mxu1 %v1413_v0  ;;  %v1428_v11 = vld [vmem:[%s1971_s18 + $0x68] ss:$12 sps:$4 sm:$0xff]   ;;  %v1411_v13 = vld [vmem:[%s1971_s18 + $0xc4] ss:$12 sps:$4 sm:$0xff]   ;;  %v1433_v15 = vld [vmem:[%s1971_s18 + $0x80] ss:$12 sps:$4 sm:$0xff]  }
 0x214   : > { %846 = vmatpush1.bf16.msra.mxu0 %v1392_v55  ;;  %1233 = vmatprep.subr.bf16.mxu1 %v1415_v1  ;;  %v1435_v20 = vld [vmem:[%s1971_s18 + $0x158] ss:$12 sps:$4 sm:$0xff]   ;;  %v1416_v21 = vld [vmem:[%s1971_s18 + $0xdc] ss:$12 sps:$4 sm:$0xff]   ;;  %v1421_v25 = vld [vmem:[%s1971_s18 + $0xf4] ss:$12 sps:$4 sm:$0xff]  }
 0x215   : > { %847 = vmatprep.subr.bf16.mxu0 %v1393_v56  ;;  %v1438_v22 = vld [vmem:[%s1971_s18 + $0x98] ss:$12 sps:$4 sm:$0xff]   ;;  %v1440_v24 = vld [vmem:[%s1971_s18 + $0x170] ss:$12 sps:$4 sm:$0xff]   ;;  %v1429_v35 = vld [vmem:[%s1971_s18 + $0x108] ss:$12 sps:$4 sm:$0xff]  }
 0x216   : > { %v1419_v23 = vld [vmem:[%s1971_s18 + $0xd8] ss:$12 sps:$4 sm:$0xff]   ;;  %v1443_v29 = vld [vmem:[%s1971_s18 + $0xb0] ss:$12 sps:$4 sm:$0xff]   ;;  %v1434_v38 = vld [vmem:[%s1971_s18 + $0x120] ss:$12 sps:$4 sm:$0xff]  }
 0x217   : > { %1234 = vmatpush3.bf16.msra.mxu1 %v1418_v3  ;;  %v501_v28 = vld [vmem:[#allocation2 + $0x8] sm:$0xff]  ;;  %v1424_v32 = vld [vmem:[%s1971_s18 + $0xf0] ss:$12 sps:$4 sm:$0xff]   ;;  %v1426_v33 = vld [vmem:[%s1971_s18 + $0x10c] ss:$12 sps:$4 sm:$0xff]   ;;  %v571_v44 = vshrl.u32 %v570_v26, 7 }
 0x218   : > { %848 = vmatpush1.bf16.msra.mxu0 %v1395_v58  ;;  %1235 = vmatprep.subr.bf16.mxu1 %v1420_v5  ;;  %v500_v34 = vld [vmem:[#allocation2] sm:$0xff]  ;;  %v503_v36 = vld [vmem:[#allocation2 + $0x18] sm:$0xff]  ;;  %v1431_v37 = vld [vmem:[%s1971_s18 + $0x124] ss:$12 sps:$4 sm:$0xff]   ;;  %s1228_s24 = smul.u32 192, %s1674_s21  ;;  %s1008_s28 = sshll.u32 %s1981_s12, 4  ;;  %s2086_s28 = int_to_ptr.vmem [resolvable:$true] %s1008_s28 }
 0x219   : > { %849 = vmatprep.subr.bf16.mxu0 %v1396_v59  ;;  %926 = vmatprep.mubr.bf16.mxu1 %v501_v28  ;;  %v1436_v16 = vld [vmem:[%s1971_s18 + $0x13c] ss:$12 sps:$4 sm:$0xff]   ;;  %v502_v17 = vld [vmem:[#allocation2 + $0x10] sm:$0xff]  ;;  %v1439_v39 = vld [vmem:[%s1971_s18 + $0x138] ss:$12 sps:$4 sm:$0xff]   ;;  %v580_v27 = vsub.s32 2, %v571_v44 }
 0x21a   : > { %873 = vmatprep.mubr.bf16.mxu0 %v501_v28  ;;  %v1441_v40 = vld [vmem:[%s1971_s18 + $0x154] ss:$12 sps:$4 sm:$0xff]   ;;  %v1444_v41 = vld [vmem:[%s1971_s18 + $0x150] ss:$12 sps:$4 sm:$0xff]   ;;  %v1445_v42 = vld [vmem:[%s1971_s18 + $0x16c] ss:$12 sps:$4 sm:$0xff]  }
 0x21b   : > { %1236 = vmatpush3.bf16.msra.mxu1 %v1423_v7  ;;  %v1447_v43 = vld [vmem:[%s1971_s18 + $0x168] ss:$12 sps:$4 sm:$0xff]   ;;  %v568_v45 = vld [vmem:[%s1979_s23] sm:$0x7]  ;;  %v572_v60 = vsub.s32 0, %v571_v44  ;;  %s2193_s17 = sld [smem:[#allocation24_spill]] }
 0x21c   : > { %850 = vmatpush1.bf16.msra.mxu0 %v1398_v62  ;;  %1237 = vmatprep.subr.bf16.mxu1 %v1425_v8  ;;  %v581_v47 = vrot.slane %v568_v45, %v580_v27  ;;  %s992_s21 = scalar_lea.sflag [#allocation5], %s1968_s26  ;;  %s1592_s25 = scalar_lea.vmem %s2086_s28, 768 }
 0x21d   : > { %851 = vmatprep.subr.bf16.mxu0 %v1399_v63  ;;  %v576_v63 = vsub.s32 1, %v571_v44  ;;  %v573_v1 = vrot.slane %v568_v45, %v572_v60  ;;  %p1593_p5 = scmp.ne.s32.totalorder %s2086_s28, %s1592_s25  ;;  %p2194_p11 = scmp.ne.s32.totalorder %s2166_s29, 0 }
 0x21e   : > { %s1694_s1 = smov [#allocation12]  }
 0x21f   : > { %1238 = vmatpush3.bf16.msra.mxu1 %v1428_v11  ;;  %p1594_p10 = pnand %p1593_p5, %p2194_p11  ;;  %s1596_s13 = sshll.u32 %s1694_s1, 4  ;;  %s1597_s13 = int_to_ptr.vmem [resolvable:$false] %s1596_s13 }
 0x220   : > { %852 = vmatpush1.bf16.msra.mxu0 %v1401_v2  ;;  %1239 = vmatprep.subr.bf16.mxu1 %v1430_v12  ;;  %v577_v2 = vrot.slane %v568_v45, %v576_v63  ;;  %s1598_s8 = scalar_lea.vmem %s1597_s13, 1536  ;;  %p1599_p4 = scmp.lt.s32.totalorder %s2086_s28, %s1597_s13 }
 0x221   : > { %853 = vmatprep.subr.bf16.mxu0 %v1402_v4  ;;  %s2084_s10 = scalar_lea.hbm %s2193_s17, %s1228_s24  ;;  %p1595_p12 = pneg %p1594_p10 }
 0x222   : > { %p1600_p0 = scmp.lt.s32.totalorder %s1598_s8, %s1592_s25 }
 0x223   : > { %1240 = vmatpush3.bf16.msra.mxu1 %v1433_v15 }
 0x224   : > { %854 = vmatpush1.bf16.msra.mxu0 %v1404_v6  ;;  %1241 = vmatprep.subr.bf16.mxu1 %v1435_v20  ;;  %p1601_p2 = por %p1600_p0, %p1599_p4 }
 0x225   : > { %855 = vmatprep.subr.bf16.mxu0 %v1406_v9 }
 0x226   : > { %p1602_p1 = pnand %p1601_p2, %p1595_p12 }
 0x227   : > { %1242 = vmatpush3.bf16.msra.mxu1 %v1438_v22 }
 0x228   : > { %856 = vmatpush1.bf16.msra.mxu0 %v1409_v10  ;;  %1243 = vmatprep.subr.bf16.mxu1 %v1440_v24 }
 0x229   : > { %857 = vmatprep.subr.bf16.mxu0 %v1411_v13 }
 0x22b   : > { %1244 = vmatpush3.bf16.msra.mxu1 %v1443_v29 }
 0x22c   : > { %858 = vmatpush1.bf16.msra.mxu0 %v1414_v14 }
 0x22d   : > { %859 = vmatprep.subr.bf16.mxu0 %v1416_v21 }
 0x22e   : > { %927 = vmatmul.mubr.bf16.vlgmr.msra.gmra.mrb[0].mxu1 %v500_v34 }
 0x22f   : > { %934 = vmatprep.mubr.bf16.mxu1 %v503_v36 }
 0x230   : > { %860 = vmatpush1.bf16.msra.mxu0 %v1419_v23 }
 0x231   : > { %861 = vmatprep.subr.bf16.mxu0 %v1421_v25 }
 0x234   : > { %862 = vmatpush1.bf16.msra.mxu0 %v1424_v32 }
 0x235   : > { %863 = vmatprep.subr.bf16.mxu0 %v1426_v33 }
 0x236   : > { %935 = vmatmul.mubr.bf16.gmra.mrb[4].mxu1 %v502_v17 }
 0x238   : > { %864 = vmatpush1.bf16.msra.mxu0 %v1429_v35 }
 0x239   : > { %865 = vmatprep.subr.bf16.mxu0 %v1431_v37 }
 0x23c   : > { %866 = vmatpush1.bf16.msra.mxu0 %v1434_v38 }
 0x23d   : > { %867 = vmatprep.subr.bf16.mxu0 %v1436_v16 }
 0x240   : > { %868 = vmatpush1.bf16.msra.mxu0 %v1439_v39 }
 0x241   : > { %869 = vmatprep.subr.bf16.mxu0 %v1441_v40 }
 0x244   : > { %870 = vmatpush1.bf16.msra.mxu0 %v1444_v41 }
 0x245   : > { %871 = vmatprep.subr.bf16.mxu0 %v1445_v42 }
 0x248   : > { %872 = vmatpush1.bf16.msra.mxu0 %v1447_v43 }
 0x24b   : > { %874 = vmatmul.mubr.bf16.vlgmr.msra.gmra.mrb[0].mxu0 %v500_v34 }
 0x24c   : > { %883 = vmatprep.mubr.bf16.mxu0 %v503_v36 }
 0x253   : > { %884 = vmatmul.mubr.bf16.gmra.mrb[4].mxu0 %v502_v17 }
 0x301   : > { %v1245_v46 = vpop.f32.mrb[0].mxu1 }
 0x302   : > { %v1246_v18 = vpop.f32.mrb[1].mxu1 }
 0x303   : > { %v1247_v19 = vadd.f32 %v1246_v18, %v1245_v46  ;;  %v1248_v48 = vpop.f32.mrb[2].mxu1 }
 0x304   : > { %v1249_v49 = vpop.f32.mrb[3].mxu1 }
 0x305   : > { %v929_v30 = vadd.f32 %v1247_v19, %v581_v47  ;;  %v1250_v50 = vadd.f32 %v1249_v49, %v1248_v48 }
 0x307   : > { %v1221_v31 = vpack.c.bf16 %v929_v30, %v929_v30  ;;  %v932_v51 = vadd.f32 %v1250_v50, %v581_v47 }
 0x309   : > { %984 = vst [vmem:[%s1981_s12 + $0x8] sm:$0xf] %v1221_v31  ;;  %v1223_v52 = vpack.c.bf16 %v932_v51, %v932_v51  ;;  %v1251_v53 = vpop.f32.mrb[4].mxu1 }
 0x30a   : > { %v1252_v54 = vpop.f32.mrb[5].mxu1 }
 0x30b   : > { %986 = vst [vmem:[%s1981_s12 + $0x14] sm:$0xf] %v1223_v52  ;;  %v1253_v55 = vadd.f32 %v1252_v54, %v1251_v53  ;;  %v1254_v56 = vpop.f32.mrb[6].mxu1 }
 0x30c   : > { %v1255_v57 = vpop.f32.mrb[7].mxu1 }
 0x30d   : > { %v937_v58 = vadd.f32 %v1253_v55, %v581_v47  ;;  %v1256_v59 = vadd.f32 %v1255_v57, %v1254_v56 }
 0x30f   : > { %v1225_v61 = vpack.c.bf16 %v937_v58, %v937_v58  ;;  %v940_v62 = vadd.f32 %v1256_v59, %v581_v47 }
 0x311   : > { %988 = vst [vmem:[%s1981_s12 + $0x20] sm:$0xf] %v1225_v61  ;;  %v1227_v0 = vpack.c.bf16 %v940_v62, %v940_v62 }
 0x313   : > { %990 = vst [vmem:[%s1981_s12 + $0x2c] sm:$0xf] %v1227_v0 }
 0x31e   : > { %v875_v3 = vpop.f32.mrb[0].mxu0 }
 0x31f   : > { %v876_v4 = vadd.f32 %v875_v3, %v573_v1  ;;  %v877_v5 = vpop.f32.mrb[1].mxu0 }
 0x320   : > { %v878_v6 = vadd.f32 %v877_v5, %v577_v2  ;;  %v879_v7 = vpop.f32.mrb[2].mxu0 }
 0x321   : > { %v880_v8 = vadd.f32 %v879_v7, %v573_v1  ;;  %v881_v9 = vpop.f32.mrb[3].mxu0 }
 0x322   : > { %v1220_v10 = vpack.c.bf16 %v878_v6, %v876_v4  ;;  %v882_v11 = vadd.f32 %v881_v9, %v577_v2 }
 0x324   : > { %983 = vst [vmem:[%s1981_s12] sm:$0xff] %v1220_v10  ;;  %v1222_v12 = vpack.c.bf16 %v882_v11, %v880_v8 }
 0x326   : > { %985 = vst [vmem:[%s1981_s12 + $0xc] sm:$0xff] %v1222_v12  ;;  %v885_v13 = vpop.f32.mrb[4].mxu0 }
 0x327   : > { %v886_v14 = vadd.f32 %v885_v13, %v573_v1  ;;  %v887_v15 = vpop.f32.mrb[5].mxu0 }
 0x328   : > { %v888_v20 = vadd.f32 %v887_v15, %v577_v2  ;;  %v889_v21 = vpop.f32.mrb[6].mxu0 }
 0x329   : > { %v890_v22 = vadd.f32 %v889_v21, %v573_v1  ;;  %v891_v23 = vpop.f32.mrb[7].mxu0 }
 0x32a   : > { %v1224_v24 = vpack.c.bf16 %v888_v20, %v886_v14  ;;  %v892_v25 = vadd.f32 %v891_v23, %v577_v2 }
 0x32c   : > { %987 = vst [vmem:[%s1981_s12 + $0x18] sm:$0xff] %v1224_v24  ;;  %v1226_v28 = vpack.c.bf16 %v892_v25, %v890_v22 }
 0x32e   : > { %989 = vst [vmem:[%s1981_s12 + $0x24] sm:$0xff] %v1226_v28 }
 0x32f   : > { %1605 = shalt.err (!%p1602_p1)
}
 0x330   : > { %s1606_s14 = scalar_lea.hbm %s2084_s10, 768  ;;  %s1610_s15 = scalar_lea.hbm %s2193_s17, 1536 }
 0x331   : > { %p1607_p3 = scmp.ne.s32.totalorder %s2084_s10, %s1606_s14  ;;  %p1611_p13 = scmp.lt.u32.totalorder %s2084_s10, %s2193_s17 }
 0x332   : > { %p1612_p9 = scmp.lt.u32.totalorder %s1610_s15, %s1606_s14  ;;  %p1614_p5 = scmp.lt.u32.totalorder %s1606_s14, %s2084_s10 }
 0x333   : > { %p1608_p7 = pnand %p1607_p3, %p2194_p11 }
 0x334   : > { %p1613_p6 = por %p1612_p9, %p1611_p13 }
 0x335   : > { %p1609_p8 = pneg %p1608_p7 }
 0x336   : > { %p1615_p10 = por %p1614_p5, %p1613_p6 }
 0x338   : > { %p1616_p12 = pnand %p1615_p10, %p1609_p8 }
 0x33a   : > { %1619 = shalt.err (!%p1616_p12)
}
 0x33b   : > { %s1695_s3 = smov 192   ;;  %s1696_s18 = smov 384  }
 0x33c   : > { %s1697_s11 = smov 12  }
 0x33d   : > { %1278 = dma.vmem_to_hbm [thread:$0]  (%p2194_p11), %s2086_s28, 768, %s2084_s10, %s992_s21, %s1695_s3, %s1696_s18, %s1697_s11  }
 0x33e PF: > { %s2195_s5 = sld [smem:[#allocation17_spill]]  ;;  %s2196_s23 = sld [smem:[#allocation19_spill]] }
 0x33f   : > { %s2197_s12 = sld [smem:[#allocation18_spill]] }
 0x344   : > { %s1023_s24 = sand.u32 1, %s2195_s5   ;;  %p2198_p4 = scmp.ne.s32.totalorder %s2196_s23, 0 }
 0x345   : > { %p2199_p0 = scmp.ge.s32.totalorder %s2197_s12, 2  ;;  %s1024_s27 = scalar_lea.sflag [#allocation5], %s1023_s24 }
 0x347   : > { %p1298_p2 = pnand %p2199_p0, %p2198_p4 }
 0x349   : > { %1657 = dma.done.wait (!%p1298_p2), %s1024_s27, 768  }
 0x34a   : > { %1659 = vsyncadd (!%p1298_p2), %s1024_s27, 4294966528  ;;  %s23_s23 = sadd.s32 1, %s2197_s12   ;;  %s2200_s16 = sld [smem:[#allocation21_spill]] }
 0x34b   : > { %p20_p1 = scmp.ge.s32.totalorder %s23_s23, 4   ;;  %s2201_s29 = sld [smem:[#allocation20_spill]] }
 0x34c   : > { %s2202_s18 = smov %s1666_s19  ;;  %s2203_s19 = smov %s1670_s20 }
 0x34d   : > { %s2205_s21 = smov %s1678_s22  ;;  %22 = sbr.rel (!%p20_p1) target bundleno = 12 (0xc), region = 114 }
 0x350   : > { %s2204_s20 = smov %s2200_s16 }
 0x351   : > { %s2206_s22 = smov %s2201_s29 }
 0x354   :  { %1029 = vsyncpa [#allocation4], 1 }
 0x355   :  { %1031 = vsyncpa [#allocation4 + $0x1], 1 }
 0x356   :  { %1032 = vsyncpa [#allocation7], 1 }
 0x357   :  { %1033 = vsyncpa [#allocation10], 1 }
 0x358   :  { %1035 = vsyncpa [#allocation10 + $0x1], 1 }
 0x359   :  { %1036 = vsyncpa [#allocation5], 1 }
 0x35a   :  { %1038 = vsyncpa [#allocation5 + $0x1], 1 }

// kernel: decoder_forward.21
= control target key start
LH: loop header
LB: loop body
LE: loop exit
PB: predicated region body
PF: predicated region fallthrough
CT: control target
= control target key end

     0   :  { %10 = vsyncpa [#allocation4], 0  ;;  %s995_s0 = inlined_call_operand.hbm [shape: f32[32,256], index: 0, kind: input, shape index: {}]   ;;  %s996_s1 = inlined_call_operand.hbm [shape: f32[1,256], index: 1, kind: input, shape index: {}]   ;;  %s997_s2 = inlined_call_operand.hbm [shape: f32[1,256], index: 2, kind: input, shape index: {}]   ;;  %s998_s3 = inlined_call_operand.hbm [shape: bf16[256,256], index: 3, kind: input, shape index: {}]   ;;  %s999_s4 = inlined_call_operand.hbm [shape: f32[1,256], index: 4, kind: input, shape index: {}]   ;;  %s1000_s5 = inlined_call_operand.hbm [shape: bf16[32,256], index: 5, kind: output, shape index: {}]  }
   0x1   :  { %11 = vsyncpa [#allocation7], 0 }
   0x2   :  { %12 = vsyncpa [#allocation10], 0 }
   0x3   :  { %13 = vsyncpa [#allocation5], 0  ;;  %s830_s18 = smov [#allocation6]   ;;  %s831_s20 = smov [#allocation9]  }
   0x4   :  { %s32_s19 = sshll.u32 %s830_s18, 4  ;;  %s51_s21 = sshll.u32 %s831_s20, 4  ;;  %s33_s19 = int_to_ptr.vmem [resolvable:$true] %s32_s19  ;;  %s870_s21 = int_to_ptr.vmem [resolvable:$true] %s51_s21 }
   0x5   :  { %s690_s24 = scalar_lea.hbm %s996_s1, 32 }
   0x6   :  { %p691_p0 = scmp.ne.s32.totalorder %s996_s1, %s690_s24  ;;  %p694_p1 = scmp.lt.u32.totalorder %s690_s24, %s996_s1 }
   0x8   :  { %p696_p2 = pnand %p694_p1, %p691_p0 }
   0xa   :  { %699 = shalt.err (!%p696_p2)
}
   0xb   :  { %s700_s29 = scalar_lea.vmem %s33_s19, 32  ;;  %p705_p4 = scmp.lt.s32.totalorder %s33_s19, %s33_s19 }
   0xc   :  { %p701_p3 = scmp.ne.s32.totalorder %s33_s19, %s700_s29  ;;  %p706_p5 = scmp.lt.s32.totalorder %s700_s29, %s700_s29 }
   0xe   :  { %p707_p6 = por %p706_p5, %p705_p4 }
  0x10   :  { %p708_p7 = pnand %p707_p6, %p701_p3 }
  0x12   :  { %711 = shalt.err (!%p708_p7)
}
  0x13   :  { %35 = dma.hbm_to_vmem [thread:$0]  %s996_s1, 32, %s33_s19, [#allocation7]  }
  0x14   :  { %s712_s9 = scalar_lea.hbm %s998_s3, 4096 }
  0x15   :  { %p713_p8 = scmp.ne.s32.totalorder %s998_s3, %s712_s9  ;;  %p716_p9 = scmp.lt.u32.totalorder %s712_s9, %s998_s3 }
  0x17   :  { %p718_p10 = pnand %p716_p9, %p713_p8 }
  0x19   :  { %721 = shalt.err (!%p718_p10)
}
  0x1a   :  { %s722_s14 = scalar_lea.vmem %s870_s21, 4096  ;;  %p727_p12 = scmp.lt.s32.totalorder %s870_s21, %s870_s21 }
  0x1b   :  { %p723_p11 = scmp.ne.s32.totalorder %s870_s21, %s722_s14  ;;  %p728_p13 = scmp.lt.s32.totalorder %s722_s14, %s722_s14 }
  0x1d   :  { %p729_p0 = por %p728_p13, %p727_p12 }
  0x1f   :  { %p730_p1 = pnand %p729_p0, %p723_p11 }
  0x21   :  { %733 = shalt.err (!%p730_p1)
}
  0x22   :  { %s832_s1 = smov 128   ;;  %s833_s15 = smov 8  }
  0x23   :  { %57 = dma.hbm_to_vmem [thread:$0]  %s998_s3, 4096, %s870_s21, [#allocation10], %s832_s1, %s832_s1, %s833_s15  }
  0x24   :  { %s834_s18 = smov [#allocation3]   ;;  %s734_s23 = scalar_lea.hbm %s995_s0, 1024 }
  0x25   :  { %s19_s19 = sshll.u32 %s834_s18, 4  ;;  %p735_p2 = scmp.ne.s32.totalorder %s995_s0, %s734_s23  ;;  %s20_s19 = int_to_ptr.vmem [resolvable:$true] %s19_s19 }
  0x26   :  { %p738_p3 = scmp.lt.u32.totalorder %s734_s23, %s995_s0 }
  0x28   :  { %p740_p4 = pnand %p738_p3, %p735_p2 }
  0x2a   :  { %743 = shalt.err (!%p740_p4)
}
  0x2b   :  { %s744_s28 = scalar_lea.vmem %s20_s19, 1024  ;;  %p749_p6 = scmp.lt.s32.totalorder %s20_s19, %s20_s19 }
  0x2c   :  { %p745_p5 = scmp.ne.s32.totalorder %s20_s19, %s744_s28  ;;  %p750_p7 = scmp.lt.s32.totalorder %s744_s28, %s744_s28 }
  0x2e   :  { %p751_p8 = por %p750_p7, %p749_p6 }
  0x30   :  { %p752_p9 = pnand %p751_p8, %p745_p5 }
  0x32   :  { %755 = shalt.err (!%p752_p9)
}
  0x33   :  { %s835_s3 = smov 256   ;;  %s836_s21 = smov 16  }
  0x34   :  { %25 = dma.hbm_to_vmem [thread:$0]  %s995_s0, 1024, %s20_s19, [#allocation4], %s835_s3, %s835_s3, %s836_s21  }
  0x35   :  { %s837_s6 = smov [#allocation8]   ;;  %s838_s8 = smov [#allocation11]  }
  0x36   :  { %s42_s7 = sshll.u32 %s837_s6, 4  ;;  %s64_s9 = sshll.u32 %s838_s8, 4  ;;  %s43_s7 = int_to_ptr.vmem [resolvable:$true] %s42_s7  ;;  %s65_s9 = int_to_ptr.vmem [resolvable:$true] %s64_s9 }
  0x37   :  { %s756_s12 = scalar_lea.hbm %s997_s2, 32 }
  0x38   :  { %p757_p10 = scmp.ne.s32.totalorder %s997_s2, %s756_s12  ;;  %p760_p11 = scmp.lt.u32.totalorder %s756_s12, %s997_s2 }
  0x3a   :  { %p762_p12 = pnand %p760_p11, %p757_p10 }
  0x3c   :  { %765 = shalt.err (!%p762_p12)
}
  0x3d   :  { %s766_s0 = scalar_lea.vmem %s43_s7, 32  ;;  %p771_p0 = scmp.lt.s32.totalorder %s43_s7, %s43_s7 }
  0x3e   :  { %p767_p13 = scmp.ne.s32.totalorder %s43_s7, %s766_s0  ;;  %p772_p1 = scmp.lt.s32.totalorder %s766_s0, %s766_s0 }
  0x40   :  { %p773_p2 = por %p772_p1, %p771_p0 }
  0x42   :  { %p774_p3 = pnand %p773_p2, %p767_p13 }
  0x44   :  { %777 = shalt.err (!%p774_p3)
}
  0x45   :  { %45 = dma.hbm_to_vmem [thread:$0]  %s997_s2, 32, %s43_s7, [#allocation7]  }
  0x46   :  { %s778_s23 = scalar_lea.hbm %s999_s4, 32 }
  0x47   :  { %p779_p4 = scmp.ne.s32.totalorder %s999_s4, %s778_s23  ;;  %p782_p5 = scmp.lt.u32.totalorder %s778_s23, %s999_s4 }
  0x49   :  { %p784_p6 = pnand %p782_p5, %p779_p4 }
  0x4b   :  { %787 = shalt.err (!%p784_p6)
}
  0x4c   :  { %s788_s28 = scalar_lea.vmem %s65_s9, 32  ;;  %p793_p8 = scmp.lt.s32.totalorder %s65_s9, %s65_s9 }
  0x4d   :  { %p789_p7 = scmp.ne.s32.totalorder %s65_s9, %s788_s28  ;;  %p794_p9 = scmp.lt.s32.totalorder %s788_s28, %s788_s28 }
  0x4f   :  { %p795_p10 = por %p794_p9, %p793_p8 }
  0x51   :  { %p796_p11 = pnand %p795_p10, %p789_p7 }
  0x53   :  { %799 = shalt.err (!%p796_p11)
}
  0x54   :  { %67 = dma.hbm_to_vmem [thread:$0]  %s999_s4, 32, %s65_s9, [#allocation10]  }
  0x55   :  { %822 = dma.done.wait [#allocation4], 1024  }
  0x56   :  { %823 = vsyncadd [#allocation4], 4294966272 }
  0x57   :  { %824 = dma.done.wait [#allocation7], 64  }
  0x58   :  { %825 = vsyncadd [#allocation7], 4294967232 }
  0x59   :  { %826 = dma.done.wait [#allocation10], 4128  }
  0x5a   :  { %827 = vsyncadd [#allocation10], 4294963168  ;;  %v87_v0 = vld [vmem:[#allocation3] sm:$0xff]  ;;  %v88_v1 = vld [vmem:[#allocation3 + $0x8] sm:$0xff]  ;;  %s839_s4 = smov [#allocation12]  }
  0x5b   :  { %v91_v2 = vld [vmem:[#allocation3 + $0x20] sm:$0xff]  ;;  %v95_v3 = vadd.f32 %v88_v1, %v87_v0  ;;  %v92_v4 = vld [vmem:[#allocation3 + $0x28] sm:$0xff]  ;;  %v89_v5 = vld [vmem:[#allocation3 + $0x10] sm:$0xff]  ;;  %s530_s21 = sshll.u32 %s839_s4, 4  ;;  %s531_s21 = int_to_ptr.vmem [resolvable:$true] %s530_s21 }
  0x5c   :  { %v90_v6 = vld [vmem:[#allocation3 + $0x18] sm:$0xff]  ;;  %v101_v7 = vadd.f32 %v92_v4, %v91_v2  ;;  %v93_v8 = vld [vmem:[#allocation3 + $0x30] sm:$0xff]  ;;  %v628_v13 = vld [vmem:[#allocation9] ss:$8 sps:$4 sm:$0xff]   ;;  %s800_s29 = scalar_lea.vmem %s531_s21, 512  ;;  %p805_p13 = scmp.lt.s32.totalorder %s531_s21, %s531_s21 }
  0x5d   :  { %v94_v9 = vld [vmem:[#allocation3 + $0x38] sm:$0xff]  ;;  %96 = vadd.xlane.f32.xlu0 %v95_v3  ;;  %v98_v10 = vadd.f32 %v90_v6, %v89_v5  ;;  %v626_v12 = vld [vmem:[#allocation9 + $0x4] ss:$8 sps:$4 sm:$0xff]   ;;  %v634_v17 = vld [vmem:[#allocation9 + $0x20] ss:$8 sps:$4 sm:$0xff]   ;;  %p801_p12 = scmp.ne.s32.totalorder %s531_s21, %s800_s29  ;;  %p806_p0 = scmp.lt.s32.totalorder %s800_s29, %s800_s29 }
  0x5e   :  { %102 = vadd.xlane.f32.xlu1 %v101_v7  ;;  %v104_v11 = vadd.f32 %v94_v9, %v93_v8  ;;  %v629_v14 = vld [vmem:[#allocation9 + $0x14] ss:$8 sps:$4 sm:$0xff]   ;;  %444 = vmatprep.subr.bf16.mxu0 %v626_v12  ;;  %v631_v15 = vld [vmem:[#allocation9 + $0x10] ss:$8 sps:$4 sm:$0xff]   ;;  %v632_v16 = vld [vmem:[#allocation9 + $0x24] ss:$8 sps:$4 sm:$0xff]  }
  0x5f   :  { %584 = vmatprep.subr.bf16.mxu1 %v626_v12  ;;  %445 = vmatpush1.bf16.msra.mxu0 %v628_v13  ;;  %v635_v18 = vld [vmem:[#allocation9 + $0x34] ss:$8 sps:$4 sm:$0xff]   ;;  %v637_v19 = vld [vmem:[#allocation9 + $0x30] ss:$8 sps:$4 sm:$0xff]   ;;  %v638_v20 = vld [vmem:[#allocation9 + $0x44] ss:$8 sps:$4 sm:$0xff]   ;;  %p807_p1 = por %p806_p0, %p805_p13 }
  0x60   :  { %600 = vmatpush1.bf16.msra.mxu1 %v628_v13  ;;  %446 = vmatprep.subr.bf16.mxu0 %v629_v14  ;;  %v640_v21 = vld [vmem:[#allocation9 + $0x40] ss:$8 sps:$4 sm:$0xff]   ;;  %v641_v22 = vld [vmem:[#allocation9 + $0x54] ss:$8 sps:$4 sm:$0xff]   ;;  %v643_v23 = vld [vmem:[#allocation9 + $0x50] ss:$8 sps:$4 sm:$0xff]  }
  0x61   :  { %99 = vadd.xlane.f32.xlu0 %v98_v10  ;;  %585 = vmatprep.subr.bf16.mxu1 %v629_v14  ;;  %v644_v52 = vld [vmem:[#allocation9 + $0x64] ss:$8 sps:$4 sm:$0xff]   ;;  %v646_v53 = vld [vmem:[#allocation9 + $0x60] ss:$8 sps:$4 sm:$0xff]   ;;  %v647_v54 = vld [vmem:[#allocation9 + $0x74] ss:$8 sps:$4 sm:$0xff]   ;;  %p808_p2 = pnand %p807_p1, %p801_p12 }
  0x62   :  { %105 = vadd.xlane.f32.xlu1 %v104_v11  ;;  %v649_v55 = vld [vmem:[#allocation9 + $0x70] ss:$8 sps:$4 sm:$0xff]   ;;  %v650_v56 = vld [vmem:[#allocation9 + $0x84] ss:$8 sps:$4 sm:$0xff]   ;;  %v652_v57 = vld [vmem:[#allocation9 + $0x80] ss:$8 sps:$4 sm:$0xff]  }
  0x63   :  { %447 = vmatpush1.bf16.msra.mxu0 %v631_v15  ;;  %v653_v58 = vld [vmem:[#allocation9 + $0x94] ss:$8 sps:$4 sm:$0xff]   ;;  %v655_v59 = vld [vmem:[#allocation9 + $0x90] ss:$8 sps:$4 sm:$0xff]   ;;  %v656_v60 = vld [vmem:[#allocation9 + $0xa4] ss:$8 sps:$4 sm:$0xff]  }
  0x64   :  { %601 = vmatpush1.bf16.msra.mxu1 %v631_v15  ;;  %448 = vmatprep.subr.bf16.mxu0 %v632_v16  ;;  %v658_v61 = vld [vmem:[#allocation9 + $0xa0] ss:$8 sps:$4 sm:$0xff]   ;;  %v659_v62 = vld [vmem:[#allocation9 + $0xb4] ss:$8 sps:$4 sm:$0xff]   ;;  %v661_v63 = vld [vmem:[#allocation9 + $0xb0] ss:$8 sps:$4 sm:$0xff]  }
  0x65   :  { %586 = vmatprep.subr.bf16.mxu1 %v632_v16  ;;  %v667_v3 = vld [vmem:[#allocation9 + $0xd0] ss:$8 sps:$4 sm:$0xff]  }
  0x66   :  { %v673_v7 = vld [vmem:[#allocation9 + $0xf0] ss:$8 sps:$4 sm:$0xff]  }
  0x67   :  { %449 = vmatpush1.bf16.msra.mxu0 %v634_v17 }
  0x68   :  { %602 = vmatpush1.bf16.msra.mxu1 %v634_v17  ;;  %450 = vmatprep.subr.bf16.mxu0 %v635_v18  ;;  %v146_v17 = vlaneseq }
  0x69   :  { %587 = vmatprep.subr.bf16.mxu1 %v635_v18 }
  0x6b   :  { %451 = vmatpush1.bf16.msra.mxu0 %v637_v19 }
  0x6c   :  { %603 = vmatpush1.bf16.msra.mxu1 %v637_v19  ;;  %452 = vmatprep.subr.bf16.mxu0 %v638_v20 }
  0x6d   :  { %588 = vmatprep.subr.bf16.mxu1 %v638_v20 }
  0x6f   :  { %453 = vmatpush1.bf16.msra.mxu0 %v640_v21 }
  0x70   :  { %604 = vmatpush1.bf16.msra.mxu1 %v640_v21  ;;  %454 = vmatprep.subr.bf16.mxu0 %v641_v22 }
  0x71   :  { %589 = vmatprep.subr.bf16.mxu1 %v641_v22  ;;  %v147_v22 = vshrl.u32 %v146_v17, 7 }
  0x73   :  { %455 = vmatpush1.bf16.msra.mxu0 %v643_v23 }
  0x74   :  { %605 = vmatpush1.bf16.msra.mxu1 %v643_v23  ;;  %456 = vmatprep.subr.bf16.mxu0 %v644_v52 }
  0x75   :  { %590 = vmatprep.subr.bf16.mxu1 %v644_v52 }
  0x77   :  { %457 = vmatpush1.bf16.msra.mxu0 %v646_v53 }
  0x78   :  { %606 = vmatpush1.bf16.msra.mxu1 %v646_v53  ;;  %458 = vmatprep.subr.bf16.mxu0 %v647_v54 }
  0x79   :  { %591 = vmatprep.subr.bf16.mxu1 %v647_v54 }
  0x7b   :  { %459 = vmatpush1.bf16.msra.mxu0 %v649_v55 }
  0x7c   :  { %607 = vmatpush1.bf16.msra.mxu1 %v649_v55  ;;  %460 = vmatprep.subr.bf16.mxu0 %v650_v56  ;;  %v208_v55 = vld [vmem:[#allocation8] sm:$0x3] }
  0x7d   :  { %592 = vmatprep.subr.bf16.mxu1 %v650_v56 }
  0x7f   :  { %461 = vmatpush1.bf16.msra.mxu0 %v652_v57 }
  0x80   :  { %608 = vmatpush1.bf16.msra.mxu1 %v652_v57  ;;  %462 = vmatprep.subr.bf16.mxu0 %v653_v58 }
  0x81   :  { %593 = vmatprep.subr.bf16.mxu1 %v653_v58 }
  0x83   :  { %463 = vmatpush1.bf16.msra.mxu0 %v655_v59 }
  0x84   :  { %609 = vmatpush1.bf16.msra.mxu1 %v655_v59  ;;  %464 = vmatprep.subr.bf16.mxu0 %v656_v60 }
  0x85   :  { %594 = vmatprep.subr.bf16.mxu1 %v656_v60 }
  0x87   :  { %465 = vmatpush1.bf16.msra.mxu0 %v658_v61 }
  0x88   :  { %610 = vmatpush1.bf16.msra.mxu1 %v658_v61  ;;  %466 = vmatprep.subr.bf16.mxu0 %v659_v62 }
  0x89   :  { %595 = vmatprep.subr.bf16.mxu1 %v659_v62 }
  0x8b   :  { %467 = vmatpush1.bf16.msra.mxu0 %v661_v63 }
  0x8c   :  { %611 = vmatpush1.bf16.msra.mxu1 %v661_v63 }
  0xea   :  { %v97_v24 = vpop.xlane.xlu0 %96 }
  0xeb   :  { %v108_v25 = vmul.f32 0.00390625, %v97_v24  ;;  %v103_v26 = vpop.xlane.xlu1 %102 }
  0xec   :  { %v110_v27 = vmul.f32 0.00390625, %v103_v26 }
  0xed   :  { %v940_v28 = vsub.f32 %v87_v0, %v108_v25  ;;  %v942_v29 = vsub.f32 %v88_v1, %v108_v25  ;;  %v662_v0 = vld [vmem:[#allocation9 + $0xc4] ss:$8 sps:$4 sm:$0xff]   ;;  %v664_v1 = vld [vmem:[#allocation9 + $0xc0] ss:$8 sps:$4 sm:$0xff]  }
  0xee   :  { %v944_v30 = vsub.f32 %v91_v2, %v110_v27  ;;  %v946_v31 = vsub.f32 %v92_v4, %v110_v27  ;;  %v100_v32 = vpop.xlane.xlu0 %99  ;;  %v665_v2 = vld [vmem:[#allocation9 + $0xd4] ss:$8 sps:$4 sm:$0xff]   ;;  %468 = vmatprep.subr.bf16.mxu0 %v662_v0  ;;  %596 = vmatprep.subr.bf16.mxu1 %v662_v0  ;;  %v668_v4 = vld [vmem:[#allocation9 + $0xe4] ss:$8 sps:$4 sm:$0xff]  }
  0xef   :  { %v109_v33 = vmul.f32 0.00390625, %v100_v32  ;;  %v106_v34 = vpop.xlane.xlu1 %105  ;;  %v120_v35 = vmul.f32 %v940_v28, %v940_v28  ;;  %v121_v37 = vmul.f32 %v942_v29, %v942_v29  ;;  %469 = vmatpush1.bf16.msra.mxu0 %v664_v1  ;;  %612 = vmatpush1.bf16.msra.mxu1 %v664_v1 }
  0xf0   :  { %v111_v36 = vmul.f32 0.00390625, %v106_v34  ;;  %v124_v40 = vmul.f32 %v944_v30, %v944_v30  ;;  %v125_v41 = vmul.f32 %v946_v31, %v946_v31  ;;  %470 = vmatprep.subr.bf16.mxu0 %v665_v2  ;;  %597 = vmatprep.subr.bf16.mxu1 %v665_v2 }
  0xf1   :  { %v952_v38 = vsub.f32 %v89_v5, %v109_v33  ;;  %v954_v39 = vsub.f32 %v90_v6, %v109_v33  ;;  %v128_v44 = vadd.f32 %v121_v37, %v120_v35  ;;  %v670_v5 = vld [vmem:[#allocation9 + $0xe0] ss:$8 sps:$4 sm:$0xff]   ;;  %v671_v6 = vld [vmem:[#allocation9 + $0xf4] ss:$8 sps:$4 sm:$0xff]  }
  0xf2   :  { %v960_v42 = vsub.f32 %v93_v8, %v111_v36  ;;  %v962_v43 = vsub.f32 %v94_v9, %v111_v36  ;;  %v134_v46 = vadd.f32 %v125_v41, %v124_v40  ;;  %v148_v36 = vsub.s32 0, %v147_v22 }
  0xf3   :  { %v122_v45 = vmul.f32 %v952_v38, %v952_v38  ;;  %129 = vadd.xlane.f32.xlu0 %v128_v44  ;;  %v123_v47 = vmul.f32 %v954_v39, %v954_v39  ;;  %471 = vmatpush1.bf16.msra.mxu0 %v667_v3  ;;  %v152_v41 = vsub.s32 1, %v147_v22 }
  0xf4   :  { %v126_v48 = vmul.f32 %v960_v42, %v960_v42  ;;  %v127_v49 = vmul.f32 %v962_v43, %v962_v43  ;;  %613 = vmatpush1.bf16.msra.mxu1 %v667_v3  ;;  %472 = vmatprep.subr.bf16.mxu0 %v668_v4  ;;  %v213_v60 = vrot.slane %v208_v55, %v148_v36 }
  0xf5   :  { %v131_v50 = vadd.f32 %v123_v47, %v122_v45  ;;  %598 = vmatprep.subr.bf16.mxu1 %v668_v4  ;;  %v144_v47 = vld [vmem:[#allocation6] sm:$0x3]  ;;  %v217_v61 = vrot.slane %v208_v55, %v152_v41 }
  0xf6   :  { %v137_v51 = vadd.f32 %v127_v49, %v126_v48  ;;  %v149_v52 = vrot.slane %v144_v47, %v148_v36  ;;  %v153_v53 = vrot.slane %v144_v47, %v152_v41 }
  0xf7   :  { %135 = vadd.xlane.f32.xlu0 %v134_v46  ;;  %132 = vadd.xlane.f32.xlu1 %v131_v50 }
  0xf8   :  { %473 = vmatpush1.bf16.msra.mxu0 %v670_v5  ;;  %614 = vmatpush1.bf16.msra.mxu1 %v670_v5  ;;  %v156_v57 = vmul.f32 %v149_v52, %v940_v28  ;;  %v157_v58 = vmul.f32 %v153_v53, %v942_v29  ;;  %v158_v63 = vmul.f32 %v149_v52, %v952_v38 }
  0xf9   :  { %474 = vmatprep.subr.bf16.mxu0 %v671_v6  ;;  %599 = vmatprep.subr.bf16.mxu1 %v671_v6  ;;  %v159_v0 = vmul.f32 %v153_v53, %v954_v39  ;;  %v160_v3 = vmul.f32 %v149_v52, %v944_v30  ;;  %v161_v4 = vmul.f32 %v153_v53, %v946_v31 }
  0xfa   :  { %v162_v28 = vmul.f32 %v149_v52, %v960_v42  ;;  %v163_v29 = vmul.f32 %v153_v53, %v962_v43  ;;  %v272_v43 = vld [vmem:[#allocation11] sm:$0x3] }
  0xfb   :  { %138 = vadd.xlane.f32.xlu1 %v137_v51 }
  0xfc   :  { %475 = vmatpush1.bf16.msra.mxu0 %v673_v7  ;;  %615 = vmatpush1.bf16.msra.mxu1 %v673_v7 }
 0x180   :  { %v130_v8 = vpop.xlane.xlu0 %129 }
 0x181   :  { %v140_v9 = vmul.f32 0.00390625, %v130_v8 }
 0x183   :  { %674 = vrsqrt.f32 %v140_v9  ;;  %vm166_vm0 = vcmp.eq.f32.partialorder %v140_v9, inf  ;;  %v169_v19 = vand.u32 2147483648, %v140_v9  ;;  %vm168_vm1 = vcmp.eq.f32.partialorder %v140_v9, 0.0 }
 0x184   :  { %v133_v10 = vpop.xlane.xlu1 %132  ;;  %v136_v11 = vpop.xlane.xlu0 %135 }
 0x185   :  { %v141_v12 = vmul.f32 0.00390625, %v133_v10  ;;  %v142_v13 = vmul.f32 0.00390625, %v136_v11 }
 0x187   :  { %676 = vrsqrt.f32 %v141_v12  ;;  %vm173_vm2 = vcmp.eq.f32.partialorder %v141_v12, inf  ;;  %v176_v27 = vand.u32 2147483648, %v141_v12  ;;  %vm180_vm3 = vcmp.eq.f32.partialorder %v142_v13, inf }
 0x188   :  { %678 = vrsqrt.f32 %v142_v13  ;;  %v139_v14 = vpop.xlane.xlu1 %138  ;;  %v183_v33 = vand.u32 2147483648, %v142_v13  ;;  %vm175_vm4 = vcmp.eq.f32.partialorder %v141_v12, 0.0  ;;  %vm182_vm5 = vcmp.eq.f32.partialorder %v142_v13, 0.0 }
 0x189   :  { %v143_v15 = vmul.f32 0.00390625, %v139_v14 }
 0x18b   :  { %680 = vrsqrt.f32 %v143_v15  ;;  %vm187_vm6 = vcmp.eq.f32.partialorder %v143_v15, inf  ;;  %v190_v48 = vand.u32 2147483648, %v143_v15  ;;  %vm189_vm7 = vcmp.eq.f32.partialorder %v143_v15, 0.0 }
 0x18d   :  { %v675_v16 = vpop.eup %674 }
 0x18e   :  { %v165_v18 = vmul.f32 %v675_v16, %v140_v9 }
 0x190   :  { %v167_v20 = vsel %vm166_vm0, %v140_v9, %v165_v18 }
 0x191   :  { %v677_v21 = vpop.eup %676  ;;  %v170_v23 = vsel %vm168_vm1, %v169_v19, %v167_v20  ;;  %v277_v19 = vrot.slane %v272_v43, %v148_v36  ;;  %v281_v20 = vrot.slane %v272_v43, %v152_v41 }
 0x192   :  { %v679_v24 = vpop.eup %678  ;;  %v172_v25 = vmul.f32 %v677_v21, %v141_v12  ;;  %v192_v26 = vadd.f32 1e-06, %v170_v23 }
 0x193   :  { %v179_v32 = vmul.f32 %v679_v24, %v142_v13 }
 0x194   :  { %v174_v34 = vsel %vm173_vm2, %v141_v12, %v172_v25  ;;  %682 = vrcp.f32 %v192_v26 }
 0x195   :  { %v681_v35 = vpop.eup %680  ;;  %v181_v37 = vsel %vm180_vm3, %v142_v13, %v179_v32  ;;  %v177_v40 = vsel %vm175_vm4, %v176_v27, %v174_v34 }
 0x196   :  { %v186_v44 = vmul.f32 %v681_v35, %v143_v15  ;;  %v193_v45 = vadd.f32 1e-06, %v177_v40  ;;  %v184_v46 = vsel %vm182_vm5, %v183_v33, %v181_v37 }
 0x197   :  { %v194_v49 = vadd.f32 1e-06, %v184_v46 }
 0x198   :  { %v188_v50 = vsel %vm187_vm6, %v143_v15, %v186_v44  ;;  %684 = vrcp.f32 %v193_v45 }
 0x199   :  { %v191_v51 = vsel %vm189_vm7, %v190_v48, %v188_v50  ;;  %686 = vrcp.f32 %v194_v49 }
 0x19a   :  { %v195_v54 = vadd.f32 1e-06, %v191_v51 }
 0x19c   :  { %688 = vrcp.f32 %v195_v54 }
 0x19e   :  { %v683_v56 = vpop.eup %682 }
 0x19f   :  { %v198_v59 = vmul.f32 %v683_v56, %v157_v58  ;;  %v197_v62 = vmul.f32 %v683_v56, %v156_v57 }
 0x1a1   :  { %v221_v7 = vadd.f32 %v217_v61, %v198_v59  ;;  %v220_v8 = vadd.f32 %v213_v60, %v197_v62 }
 0x1a2   :  { %v685_v1 = vpop.eup %684 }
 0x1a3   :  { %v687_v2 = vpop.eup %686  ;;  %v201_v5 = vmul.f32 %v685_v1, %v159_v0  ;;  %v200_v6 = vmul.f32 %v685_v1, %v158_v63 }
 0x1a4   :  { %v204_v11 = vmul.f32 %v687_v2, %v161_v4  ;;  %v203_v38 = vmul.f32 %v687_v2, %v160_v3 }
 0x1a5   :  { %v223_v9 = vadd.f32 %v217_v61, %v201_v5  ;;  %v222_v10 = vadd.f32 %v213_v60, %v200_v6 }
 0x1a6   :  { %v689_v12 = vpop.eup %688  ;;  %v225_v30 = vadd.f32 %v217_v61, %v204_v11  ;;  %v224_v16 = vadd.f32 %v213_v60, %v203_v38 }
 0x1a7   :  { %v229_v39 = vpack.c.bf16 %v223_v9, %v221_v7  ;;  %v228_v13 = vpack.c.bf16 %v222_v10, %v220_v8  ;;  %v207_v14 = vmul.f32 %v689_v12, %v163_v29  ;;  %v206_v15 = vmul.f32 %v689_v12, %v162_v28 }
 0x1a9   :  { %476 = vmatprep.mubr.bf16.mxu0 %v229_v39  ;;  %v227_v31 = vadd.f32 %v217_v61, %v207_v14  ;;  %v226_v17 = vadd.f32 %v213_v60, %v206_v15 }
 0x1aa   :  { %477 = vmatmul.mubr.bf16.vlgmr.msra.gmra.mrb[0].mxu0 %v228_v13 }
 0x1ab   :  { %v231_v42 = vpack.c.bf16 %v227_v31, %v225_v30  ;;  %v230_v18 = vpack.c.bf16 %v226_v17, %v224_v16 }
 0x1ad   :  { %486 = vmatprep.mubr.bf16.mxu1 %v231_v42 }
 0x1ae   :  { %487 = vmatmul.mubr.bf16.vlgmr.msra.gmra.mrb[0].mxu1 %v230_v18 }
 0x27d   :  { %v478_v21 = vpop.f32.mrb[0].mxu0 }
 0x27e   :  { %v479_v22 = vadd.f32 %v478_v21, %v277_v19  ;;  %v480_v23 = vpop.f32.mrb[1].mxu0 }
 0x27f   :  { %v481_v24 = vadd.f32 %v480_v23, %v281_v20  ;;  %v482_v25 = vpop.f32.mrb[2].mxu0 }
 0x280   :  { %v483_v26 = vadd.f32 %v482_v25, %v277_v19  ;;  %v484_v27 = vpop.f32.mrb[3].mxu0 }
 0x281   :  { %v580_v32 = vpack.c.bf16 %v481_v24, %v479_v22  ;;  %v485_v33 = vadd.f32 %v484_v27, %v281_v20  ;;  %v488_v34 = vpop.f32.mrb[0].mxu1 }
 0x282   :  { %v489_v35 = vadd.f32 %v488_v34, %v277_v19  ;;  %v490_v37 = vpop.f32.mrb[1].mxu1 }
 0x283   :  { %521 = vst [vmem:[#allocation12] sm:$0xff] %v580_v32  ;;  %v581_v40 = vpack.c.bf16 %v485_v33, %v483_v26  ;;  %v491_v44 = vadd.f32 %v490_v37, %v281_v20  ;;  %v492_v45 = vpop.f32.mrb[2].mxu1 }
 0x284   :  { %v493_v46 = vadd.f32 %v492_v45, %v277_v19  ;;  %v494_v47 = vpop.f32.mrb[3].mxu1 }
 0x285   :  { %522 = vst [vmem:[#allocation12 + $0x8] sm:$0xff] %v581_v40  ;;  %v582_v36 = vpack.c.bf16 %v491_v44, %v489_v35  ;;  %v495_v41 = vadd.f32 %v494_v47, %v281_v20 }
 0x287   :  { %523 = vst [vmem:[#allocation12 + $0x10] sm:$0xff] %v582_v36  ;;  %v583_v48 = vpack.c.bf16 %v495_v41, %v493_v46 }
 0x289   :  { %524 = vst [vmem:[#allocation12 + $0x18] sm:$0xff] %v583_v48 }
 0x28a   :  { %811 = shalt.err (!%p808_p2)
}
 0x28b   :  { %s812_s7 = scalar_lea.hbm %s1000_s5, 512 }
 0x28c   :  { %p813_p3 = scmp.ne.s32.totalorder %s1000_s5, %s812_s7  ;;  %p816_p4 = scmp.lt.u32.totalorder %s812_s7, %s1000_s5 }
 0x28e   :  { %p818_p5 = pnand %p816_p4, %p813_p3 }
 0x290   :  { %821 = shalt.err (!%p818_p5)
}
 0x291   :  { %536 = dma.vmem_to_hbm [thread:$0]  %s531_s21, 512, %s1000_s5, [#allocation5], %s832_s1, %s832_s1, %s833_s15  }
 0x292   :  { %828 = dma.done.wait [#allocation5], 512  }
 0x293   :  { %829 = vsyncadd [#allocation5], 4294966784 }
 0x294   :  { %540 = vsyncpa [#allocation4], 1 }
 0x295   :  { %541 = vsyncpa [#allocation7], 1 }
 0x296   :  { %542 = vsyncpa [#allocation10], 1 }
 0x297   :  { %543 = vsyncpa [#allocation5], 1 }

// kernel: decoder_forward.23
= control target key start
LH: loop header
LB: loop body
LE: loop exit
PB: predicated region body
PF: predicated region fallthrough
CT: control target
= control target key end

     0   :  { %s1853_s0 = inlined_call_operand.hbm [shape: bf16[2,16,256], index: 0, kind: input, shape index: {}]   ;;  %s1854_s1 = inlined_call_operand.hbm [shape: bf16[2,16,512], index: 1, kind: input, shape index: {}, may-alias: {1,2}]   ;;  %s1855_s2 = inlined_call_operand.hbm [shape: bf16[2,16,512], index: 2, kind: input, shape index: {}, may-alias: {1,2}]   ;;  %s1856_s3 = inlined_call_operand.hbm [shape: f32[2,1,16], index: 3, kind: input, shape index: {}]   ;;  %s1857_s4 = inlined_call_operand.hbm [shape: bf16[2,16,256], index: 4, kind: output, shape index: {}]  }
   0x1   :  { %1876 = sst [smem:[#allocation25_spill]] %s1853_s0 }
   0x2   :  { %1877 = sst [smem:[#allocation26_spill]] %s1854_s1 }
   0x3   :  { %1878 = sst [smem:[#allocation27_spill]] %s1855_s2 }
   0x4   :  { %1879 = sst [smem:[#allocation28_spill]] %s1856_s3 }
   0x5   :  { %1880 = sst [smem:[#allocation29_spill]] %s1857_s4 }
   0x6   :  { %9 = vsyncpa [#allocation6], 0 }
   0x7   :  { %11 = vsyncpa [#allocation6 + $0x1], 0 }
   0x8   :  { %12 = vsyncpa [#allocation9], 0 }
   0x9   :  { %14 = vsyncpa [#allocation9 + $0x1], 0 }
   0xa   :  { %15 = vsyncpa [#allocation12], 0 }
   0xb   :  { %17 = vsyncpa [#allocation12 + $0x1], 0 }
   0xc   :  { %18 = vsyncpa [#allocation7], 0 }
   0xd   :  { %20 = vsyncpa [#allocation7 + $0x1], 0  ;;  %s1358_s15 = smov 0   ;;  %s1360_s16 = smov 0  }
   0xe   :  { %s1362_s17 = smov 0   ;;  %s1364_s18 = smov 0  }
   0xf   :  { %s1366_s19 = smov 0   ;;  %s1368_s20 = smov 0  }
  0x10   :  { %s1370_s21 = smov 0   ;;  %s1372_s22 = smov 0  }
  0x11   :  { %s1374_s23 = smov 0   ;;  %s1376_s24 = smov 0  }
  0x12   :  { %s1378_s25 = smov 0   ;;  %s1380_s26 = smov 0  }
  0x13   :  { %s1382_s27 = smov 0   ;;  %s1384_s28 = smov 0  }
  0x14 LB: > { %1881 = sst [smem:[#allocation19_spill]] %s1263_s15  ;;  %s815_s29 = sadd.s32 4294967294, %s1315_s28   ;;  %s1315_s28 = sphi %s1384_s28, %s26_s28   ;;  %s1311_s27 = sphi %s1382_s27, %s1938_s27   ;;  %s1307_s26 = sphi %s1380_s26, %s1937_s26   ;;  %s1303_s25 = sphi %s1378_s25, %s1936_s25   ;;  %s1299_s24 = sphi %s1376_s24, %s1935_s24   ;;  %s1295_s23 = sphi %s1374_s23, %s1934_s23   ;;  %s1291_s22 = sphi %s1372_s22, %s1933_s22   ;;  %s1287_s21 = sphi %s1370_s21, %s1932_s21   ;;  %s1283_s20 = sphi %s1368_s20, %s1931_s20   ;;  %s1279_s19 = sphi %s1366_s19, %s1930_s19   ;;  %s1275_s18 = sphi %s1364_s18, %s1929_s18   ;;  %s1271_s17 = sphi %s1362_s17, %s1928_s17   ;;  %s1267_s16 = sphi %s1360_s16, %s1927_s16   ;;  %s1263_s15 = sphi %s1358_s15, %s1926_s15  }
  0x15   : > { %1882 = sst [smem:[#allocation20_spill]] %s1299_s24  ;;  %p1862_p0 = scmp.ne.s32.totalorder %s1295_s23, %s1291_s22 }
  0x16   : > { %1883 = sst [smem:[#allocation21_spill]] %s1303_s25  ;;  %p1865_p1 = scmp.eq.s32.totalorder %s1315_s28, 0 }
  0x17   : > { %p1863_p2 = scmp.ne.s32.totalorder %s1291_s22, %s1287_s21  ;;  %p200_p3 = scmp.eq.s32.totalorder %s815_s29, 3 }
  0x18   : > { %p72_p4 = por %p1865_p1, %p1862_p0  ;;  %p1864_p6 = scmp.lt.s32.totalorder %s1315_s28, 4 }
  0x19   : > { %p1443_p5 = por %p200_p3, %p1863_p2  ;;  %s1858_s6 = sand.u32 1, %s1295_s23  }
  0x1a   : > { %s1451_s7 = sshll.u32 %s1858_s6, 3  ;;  %p1455_p7 = pnand %p1864_p6, %p72_p4 }
  0x1b   : > { %s1884_s5 = scalar_select %p1443_p5, 1, 0 }
  0x1c   : > { %s245_s9 = sand.u32 1, %s1315_s28   ;;  %s822_s10 = sshll.u32 %s1311_s27, 3 }
  0x1d   : > { %1885 = sst [smem:[#allocation22_spill]] %s1884_s5  ;;  %s1462_s11 = sadd.s32 %s1307_s26, %s822_s10 }
  0x1e   : > { %s249_s12 = scalar_lea.vmem [#allocation8], %s1451_s7  ;;  %s1861_s14 = sshll.u32 %s1462_s11, 6 }
  0x1f   : > { %s260_s13 = sshll.u32 %s249_s12, 4  ;;  %s1887_s1 = sld [smem:[#allocation26_spill]]  ;;  %s1466_s13 = int_to_ptr.vmem [resolvable:$true] %s260_s13 }
  0x20   : > { %s1475_s5 = scalar_lea.sflag [#allocation9], %s245_s9  ;;  %p1038_p9 = pneg %p1455_p7 }
  0x25   : > { %s1473_s6 = scalar_lea.hbm %s1887_s1, %s1861_s14  ;;  %s1041_s30 = scalar_lea.hbm %s1887_s1, 1024 }
  0x26   : > { %s1036_s10 = scalar_lea.hbm %s1473_s6, 128  ;;  %p1042_p12 = scmp.lt.u32.totalorder %s1473_s6, %s1887_s1 }
  0x27   : > { %p1037_p8 = scmp.ne.s32.totalorder %s1473_s6, %s1036_s10  ;;  %p1043_p13 = scmp.lt.u32.totalorder %s1041_s30, %s1036_s10 }
  0x28   : > { %p1045_p4 = scmp.lt.u32.totalorder %s1036_s10, %s1473_s6 }
  0x29   : > { %p1039_p10 = pnand %p1038_p9, %p1037_p8  ;;  %p1044_p3 = por %p1043_p13, %p1042_p12 }
  0x2b   : > { %p1040_p11 = pneg %p1039_p10  ;;  %p1046_p0 = por %p1045_p4, %p1044_p3 }
  0x2d   : > { %p1047_p2 = pnand %p1046_p0, %p1040_p11 }
  0x2f   : > { %1050 = shalt.err (!%p1047_p2)
}
  0x30   : > { %s1051_s9 = scalar_lea.vmem %s1466_s13, 128  ;;  %s1317_s4 = smov [#allocation8]  }
  0x31   : > { %p1052_p8 = scmp.ne.s32.totalorder %s1466_s13, %s1051_s9  ;;  %s1056_s12 = sshll.u32 %s1317_s4, 4  ;;  %s1057_s12 = int_to_ptr.vmem [resolvable:$false] %s1056_s12 }
  0x32   : > { %s1058_s14 = scalar_lea.vmem %s1057_s12, 256  ;;  %p1059_p1 = scmp.lt.s32.totalorder %s1466_s13, %s1057_s12 }
  0x33   : > { %p1054_p10 = pnand %p1052_p8, %p1038_p9  ;;  %p1060_p12 = scmp.lt.s32.totalorder %s1058_s14, %s1051_s9 }
  0x35   : > { %p1055_p6 = pneg %p1054_p10  ;;  %p1061_p13 = por %p1060_p12, %p1059_p1 }
  0x37   : > { %p1062_p3 = pnand %p1061_p13, %p1055_p6 }
  0x39   : > { %1065 = shalt.err (!%p1062_p3)
}
  0x3a   : > { %s1867_s10 = smov 256   ;;  %s1868_s30 = smov 64  }
  0x3b   : > { %s1320_s29 = smov 4   ;;  %s1888_s9 = sshll.u32 %s1462_s11, 6 }
  0x3c   : > { %883 = dma.hbm_to_vmem [thread:$0]  (!%p1455_p7), %s1473_s6, 128, %s1466_s13, %s1475_s5, %s1867_s10, %s1868_s30, %s1320_s29  }
  0x3d   : > { %s1889_s2 = sld [smem:[#allocation27_spill]]  ;;  %p828_p0 = scmp.ge.s32.totalorder %s1315_s28, 1 }
  0x3e   : > { %p312_p1 = scmp.lt.s32.totalorder %s1315_s28, 5  ;;  %s819_s25 = sshll.u32 %s1311_s27, 2 }
  0x3f   : > { %s232_s3 = sadd.s32 %s1307_s26, %s819_s25  ;;  %s224_s15 = scalar_lea.vmem [#allocation5], %s1451_s7 }
  0x40   : > { %p1518_p2 = pnand %p828_p0, %p312_p1  ;;  %s235_s6 = sshll.u32 %s224_s15, 4  ;;  %s1525_s6 = int_to_ptr.vmem [resolvable:$true] %s235_s6 }
  0x41   : > { %s820_s11 = sshll.u32 %s232_s3, 6  ;;  %s1891_s0 = sld [smem:[#allocation25_spill]] }
  0x42   : > { %s1892_s12 = sand.u32 1, %s1295_s23  }
  0x43   : > { %s1511_s14 = scalar_lea.hbm %s1889_s2, %s1888_s9  ;;  %s1534_s10 = scalar_lea.sflag [#allocation6], %s1892_s12 }
  0x44   : > { %s1515_s1 = scalar_lea.hbm %s1511_s14, 128 }
  0x47   : > { %s1530_s9 = scalar_lea.hbm %s1891_s0, %s820_s11  ;;  %s1071_s25 = scalar_lea.hbm %s1891_s0, 512 }
  0x48   : > { %s1066_s30 = scalar_lea.hbm %s1530_s9, 128  ;;  %p1072_p8 = scmp.lt.u32.totalorder %s1530_s9, %s1891_s0 }
  0x49   : > { %p1067_p6 = scmp.ne.s32.totalorder %s1530_s9, %s1066_s30  ;;  %p1073_p10 = scmp.lt.u32.totalorder %s1071_s25, %s1066_s30 }
  0x4a   : > { %p1075_p13 = scmp.lt.u32.totalorder %s1066_s30, %s1530_s9 }
  0x4b   : > { %p1069_p11 = pnand %p1067_p6, %p1038_p9  ;;  %p1074_p12 = por %p1073_p10, %p1072_p8 }
  0x4d   : > { %p1070_p4 = pneg %p1069_p11  ;;  %p1076_p3 = por %p1075_p13, %p1074_p12 }
  0x4f   : > { %p1077_p0 = pnand %p1076_p3, %p1070_p4 }
  0x51   : > { %1080 = shalt.err (!%p1077_p0)
}
  0x52   : > { %s1081_s13 = scalar_lea.vmem %s1525_s6, 128  ;;  %s1321_s4 = smov [#allocation5]  }
  0x53   : > { %p1082_p1 = scmp.ne.s32.totalorder %s1525_s6, %s1081_s13  ;;  %s1086_s12 = sshll.u32 %s1321_s4, 4  ;;  %s1087_s12 = int_to_ptr.vmem [resolvable:$false] %s1086_s12 }
  0x54   : > { %s1088_s3 = scalar_lea.vmem %s1087_s12, 256  ;;  %p1089_p5 = scmp.lt.s32.totalorder %s1525_s6, %s1087_s12 }
  0x55   : > { %p1084_p6 = pnand %p1082_p1, %p1038_p9  ;;  %p1090_p8 = scmp.lt.s32.totalorder %s1088_s3, %s1081_s13 }
  0x57   : > { %p1085_p11 = pneg %p1084_p6  ;;  %p1091_p10 = por %p1090_p8, %p1089_p5 }
  0x59   : > { %p1092_p12 = pnand %p1091_p10, %p1085_p11 }
  0x5b   : > { %1095 = shalt.err (!%p1092_p12)
}
  0x5c   : > { %s1322_s30 = smov 128   ;;  %s1893_s15 = smov 64  }
  0x5d   : > { %880 = dma.hbm_to_vmem [thread:$0]  (!%p1455_p7), %s1530_s9, 128, %s1525_s6, %s1534_s10, %s1322_s30, %s1893_s15, %s1320_s29  }
  0x5e   : > { %s125_s25 = sadd.s32 1, %s1283_s20  ;;  %p132_p5 = scmp.ne.s32.totalorder %s1283_s20, %s1279_s19 }
  0x5f   : > { %s272_s7 = sand.u32 1, %s1283_s20   ;;  %p1894_p9 = scmp.eq.s32.totalorder %s1315_s28, 0 }
  0x60   : > { %s824_s8 = sshll.u32 %s272_s7, 3  ;;  %p1895_p13 = scmp.lt.s32.totalorder %s1315_s28, 4 }
  0x61   : > { %p134_p4 = por %p132_p5, %p1894_p9  ;;  %s274_s11 = scalar_lea.vmem [#allocation10], %s824_s8 }
  0x62   : > { %s286_s13 = sshll.u32 %s274_s11, 4  ;;  %s1126_s10 = scalar_lea.hbm %s1511_s14, 256  ;;  %s1574_s13 = int_to_ptr.vmem [resolvable:$true] %s286_s13 }
  0x63   : > { %p1570_p3 = pnand %p1895_p13, %p134_p4  ;;  %p1097_p7 = scmp.ne.s32.totalorder %s1515_s1, %s1126_s10 }
  0x64   : > { %s1101_s12 = scalar_lea.hbm %s1889_s2, 1024  ;;  %p1102_p11 = scmp.lt.u32.totalorder %s1515_s1, %s1889_s2 }
  0x65   : > { %p1098_p0 = pneg %p1570_p3  ;;  %p1103_p8 = scmp.lt.u32.totalorder %s1101_s12, %s1126_s10 }
  0x66   : > { %p1105_p12 = scmp.lt.u32.totalorder %s1126_s10, %s1515_s1 }
  0x67   : > { %p1099_p1 = pnand %p1098_p0, %p1097_p7  ;;  %p1104_p10 = por %p1103_p8, %p1102_p11 }
  0x69   : > { %p1100_p6 = pneg %p1099_p1  ;;  %p1106_p5 = por %p1105_p12, %p1104_p10 }
  0x6b   : > { %p1107_p9 = pnand %p1106_p5, %p1100_p6 }
  0x6d   : > { %1110 = shalt.err (!%p1107_p9)
}
  0x6e   : > { %s1111_s14 = scalar_lea.vmem %s1574_s13, 128  ;;  %s1323_s7 = smov [#allocation10]  }
  0x6f   : > { %p1112_p4 = scmp.ne.s32.totalorder %s1574_s13, %s1111_s14  ;;  %s1116_s8 = sshll.u32 %s1323_s7, 4  ;;  %s1117_s8 = int_to_ptr.vmem [resolvable:$false] %s1116_s8 }
  0x70   : > { %s1118_s11 = scalar_lea.vmem %s1117_s8, 256  ;;  %p1119_p1 = scmp.lt.s32.totalorder %s1574_s13, %s1117_s8 }
  0x71   : > { %p1114_p13 = pnand %p1112_p4, %p1098_p0  ;;  %p1120_p11 = scmp.lt.s32.totalorder %s1118_s11, %s1111_s14 }
  0x73   : > { %p1115_p7 = pneg %p1114_p13  ;;  %p1121_p8 = por %p1120_p11, %p1119_p1 }
  0x75   : > { %p1122_p10 = pnand %p1121_p8, %p1115_p7 }
  0x77   : > { %1125 = shalt.err (!%p1122_p10)
}
  0x78   : > { %s1897_s10 = smov 256   ;;  %s1606_s6 = sadd.s32 4294967295, %s1315_s28  }
  0x79   : > { %886 = dma.hbm_to_vmem [thread:$0]  (!%p1570_p3), %s1515_s1, 128, %s1574_s13, %s1475_s5, %s1897_s10, %s1893_s15, %s1320_s29  }
  0x7a   : > { %s48_s4 = sadd.s32 1, %s1307_s26  ;;  %s52_s9 = sadd.s32 1, %s1311_s27 }
  0x7b   : > { %p50_p0 = scmp.ge.s32.totalorder %s48_s4, 2  ;;  %p77_p6 = scmp.eq.s32.totalorder %s1606_s6, 0 }
  0x7c   : > { %s116_s12 = sadd.s32 2, %s1307_s26  ;;  %p1899_p3 = scmp.ne.s32.totalorder %s1291_s22, %s1287_s21 }
  0x7d   : > { %s1940_s4 = smov (%p50_p0, %s48_s4), 0  ;;  %s1942_s9 = smov (!%p50_p0, %s52_s9), %s1311_s27 }
  0x7e   : > { %1898 = sst [smem:[#allocation23_spill]] %s1940_s4  ;;  %s59_s1 = ssub.s32 %s1307_s26, %s1940_s4 }
  0x7f   : > { %p1622_p12 = por %p77_p6, %p1899_p3  ;;  %p54_p5 = scmp.ge.s32.totalorder %s1942_s9, 2 }
  0x80   : > { %s117_s29 = sadd.s32 2, %s1940_s4  ;;  %s1901_s13 = sld [smem:[#allocation19_spill]] }
  0x81   : > { %s1900_s5 = scalar_select %p1622_p12, 1, 0 }
  0x82   : > { %s121_s15 = ssub.s32 %s116_s12, %s117_s29  ;;  %p138_p9 = scmp.ne.s32.totalorder %s1279_s19, %s1275_s18 }
  0x83   : > { %s1944_s9 = smov (%p54_p5, %s1942_s9), 0  ;;  %s153_s30 = sadd.s32 1, %s1271_s17 }
  0x84   : > { %1902 = sst [smem:[#allocation24_spill]] %s1944_s9  ;;  %p1633_p4 = por %p138_p9, %p77_p6 }
  0x85   : > { %s56_s14 = ssub.s32 %s1311_s27, %s1944_s9  ;;  %p160_p13 = scmp.ne.s32.totalorder %s1271_s17, %s1267_s16 }
  0x86   : > { %s1903_s3 = scalar_select %p1633_p4, 1, 0 }
  0x87   : > { %s60_s7 = sor.u32 %s59_s1, %s56_s14  ;;  %s122_s8 = sor.u32 %s121_s15, %s56_s14 }
  0x88   : > { %p61_p7 = scmp.eq.s32.totalorder %s60_s7, 0  ;;  %p123_p1 = scmp.eq.s32.totalorder %s122_s8, 0 }
  0x89   : > { %p151_p11 = scmp.eq.s32.totalorder %s56_s14, 0  ;;  %p1904_p8 = scmp.eq.s32.totalorder %s1315_s28, 0 }
  0x8a   : > { %s1906_s11 = sadd.s32 1, %s1295_s23  ;;  %p166_p0 = scmp.ne.s32.totalorder %s1267_s16, %s1901_s13 }
  0x8b   : > { %p1644_p10 = por %p160_p13, %p1904_p8  ;;  %p194_p3 = scmp.eq.s32.totalorder %s1606_s6, 3 }
  0x8c   : > { %s1651_s10 = scalar_select %p61_p7, %s1295_s23, %s1906_s11  }
  0x8d   : > { %s1656_s12 = scalar_select %p123_p1, %s1283_s20, %s125_s25  }
  0x8e   : > { %s1659_s29 = scalar_select %p151_p11, %s1271_s17, %s153_s30  }
  0x8f   : > { %s296_s1 = sand.u32 1, %s1271_s17   ;;  %s827_s15 = sshll.u32 %s1311_s27, 4 }
  0x90   : > { %p1668_p5 = por %p166_p0, %p77_p6  ;;  %p1908_p9 = scmp.ne.s32.totalorder %s1295_s23, %s1291_s22 }
  0x91   : > { %s1910_s25 = sld [smem:[#allocation28_spill]]  ;;  %s299_s13 = scalar_lea.vmem [#allocation11], %s296_s1 }
  0x92   : > { %s1907_s14 = scalar_select %p1668_p5, 1, 0 }
  0x93   : > { %p1675_p13 = por %p194_p3, %p1908_p9  ;;  %s307_s30 = sshll.u32 %s299_s13, 4  ;;  %s1684_s30 = int_to_ptr.vmem [resolvable:$true] %s307_s30 }
  0x94   : > { %p1912_p6 = scmp.lt.s32.totalorder %s1315_s28, 4  ;;  %s297_s4 = scalar_lea.sflag [#allocation12], %s296_s1 }
  0x95   : > { %s1909_s7 = scalar_select %p1675_p13, 1, 0 }
  0x96   : > { %p1690_p7 = pnand %p1912_p6, %p1644_p10 }
  0x97   : > { %s1911_s0 = smov %s1910_s25  ;;  %s1682_s2 = scalar_lea.hbm %s1910_s25, %s827_s15 }
  0x98   : > { %s1127_s8 = scalar_lea.hbm %s1682_s2, 16  ;;  %p1129_p11 = pneg %p1690_p7 }
  0x99   : > { %p1128_p1 = scmp.ne.s32.totalorder %s1682_s2, %s1127_s8  ;;  %s1132_s18 = scalar_lea.hbm %s1911_s0, 32 }
  0x9a   : > { %p1133_p10 = scmp.lt.u32.totalorder %s1682_s2, %s1911_s0  ;;  %p1134_p3 = scmp.lt.u32.totalorder %s1132_s18, %s1127_s8 }
  0x9b   : > { %p1130_p8 = pnand %p1129_p11, %p1128_p1  ;;  %p1136_p6 = scmp.lt.u32.totalorder %s1127_s8, %s1682_s2 }
  0x9c   : > { %p1135_p9 = por %p1134_p3, %p1133_p10 }
  0x9d   : > { %p1131_p0 = pneg %p1130_p8 }
  0x9e   : > { %p1137_p13 = por %p1136_p6, %p1135_p9 }
  0xa0   : > { %p1138_p5 = pnand %p1137_p13, %p1131_p0 }
  0xa2   : > { %1141 = shalt.err (!%p1138_p5)
}
  0xa3   : > { %s1142_s1 = scalar_lea.vmem %s1684_s30, 16  ;;  %s1324_s15 = smov [#allocation11]  }
  0xa4   : > { %p1143_p1 = scmp.ne.s32.totalorder %s1684_s30, %s1142_s1  ;;  %s1147_s11 = sshll.u32 %s1324_s15, 4  ;;  %s1148_s11 = int_to_ptr.vmem [resolvable:$false] %s1147_s11 }
  0xa5   : > { %s1149_s25 = scalar_lea.vmem %s1148_s11, 32  ;;  %p1150_p12 = scmp.lt.s32.totalorder %s1684_s30, %s1148_s11 }
  0xa6   : > { %p1145_p8 = pnand %p1143_p1, %p1129_p11  ;;  %p1151_p10 = scmp.lt.s32.totalorder %s1149_s25, %s1142_s1 }
  0xa8   : > { %p1146_p4 = pneg %p1145_p8  ;;  %p1152_p3 = por %p1151_p10, %p1150_p12 }
  0xaa   : > { %p1153_p9 = pnand %p1152_p3, %p1146_p4 }
  0xac   : > { %1156 = shalt.err (!%p1153_p9)
}
  0xad   : > { %889 = dma.hbm_to_vmem [thread:$0]  (!%p1690_p7), %s1682_s2, 16, %s1684_s30, %s297_s4  }
  0xae   : > { %316 = sbr.rel (%p1518_p2) target bundleno = 1021 (0x3fd), region = 36  ;;  %s1722_s8 = sand.u32 (!%p1518_p2), 1, %s1291_s22  }
  0xaf   : > { %s1725_s18 = sshll.u32 (!%p1518_p2), %s1722_s8, 3  ;;  %s319_s13 = scalar_lea.sflag (!%p1518_p2), [#allocation6], %s1722_s8 }
  0xb0   : > { %s322_s1 = scalar_lea.vmem (!%p1518_p2), [#allocation5], %s1725_s18  ;;  %p1914_p12 = scmp.ne.s32.totalorder (!%p1518_p2), %s1900_s5, 0 }
  0xb5   : > { %1242 = dma.done.wait (%p1914_p12), %s319_s13, 128  }
  0xb6   : > { %1244 = vsyncadd (%p1914_p12), %s319_s13, 4294967168  ;;  %s327_s2 = sand.u32 1, %s1606_s6   ;;  %s331_s4 = scalar_lea.vmem [#allocation8], %s1725_s18 }
  0xb7   : > { %s328_s24 = scalar_lea.sflag [#allocation9], %s327_s2 }
  0xb8   : > { %1246 = dma.done.wait (%p1914_p12), %s328_s24, 128  }
  0xb9   : > { %1248 = vsyncadd (%p1914_p12), %s328_s24, 4294967168  ;;  %s338_s9 = sand.u32 1, %s1279_s19   ;;  %p1915_p2 = scmp.ne.s32.totalorder %s1903_s3, 0 }
  0xba   : > { %s1740_s30 = sshll.u32 %s338_s9, 3 }
  0xbb   : > { %s340_s15 = scalar_lea.vmem [#allocation10], %s1740_s30 }
  0xbc   : > { %1250 = dma.done.wait (%p1915_p2), %s328_s24, 128  }
  0xbd   : > { %1252 = vsyncadd (%p1915_p2), %s328_s24, 4294967168  ;;  %s345_s6 = sand.u32 1, %s1267_s16   ;;  %p1916_p4 = scmp.ne.s32.totalorder %s1907_s14, 0 }
  0xbe   : > { %s346_s11 = scalar_lea.sflag [#allocation12], %s345_s6  ;;  %s348_s25 = scalar_lea.vmem [#allocation11], %s345_s6 }
  0xbf   : > { %1254 = dma.done.wait (%p1916_p4), %s346_s11, 16  }
  0xc0   : > { %1256 = vsyncadd (%p1916_p4), %s346_s11, 4294967280  ;;  %v1325_v0 = vmov 0.0   ;;  %vm1326_vm0 = vmmov 0   ;;  %v1021_v1 = vld [vmem:[%s331_s4] sm:$0xff]   ;;  %v1022_v2 = vld [vmem:[%s322_s1] sm:$0xff]   ;;  %v1327_v3 = vmov 0   ;;  %v468_v5 = vlaneseq }
  0xc1   : > { %855 = vmatprep.subr.bf16.mxu0 %v1325_v0  ;;  %857 = vmatprep.mubr.msk.bf16.mxu0 %vm1326_vm0, %v1325_v0  ;;  %vm397_vm1 = vcmask 7168   ;;  %v1328_v4 = vmov -inf   ;;  %v465_v6 = vld [vmem:[%s348_s25] sm:$0x1]  ;;  %vm477_vm4 = vcmask 130048   ;;  %s1917_s5 = sld [smem:[#allocation21_spill]] }
  0xc2   : > { %861 = vmatprep.subr.bf16.mxu1 %v1325_v0  ;;  %863 = vmatprep.mubr.msk.bf16.mxu1 %vm1326_vm0, %v1325_v0  ;;  %398 = vst.msk [vmem:[#allocation2] sm:$0xff] %vm397_vm1, %v1328_v4  ;;  %399 = vst.msk [vmem:[#allocation2 + $0x8] sm:$0xff] %vm397_vm1, %v1328_v4  ;;  %v469_v7 = vshrl.u32 %v468_v5, 7  ;;  %vm466_vm2 = vcmp.eq.f32.partialorder %v465_v6, 0.0  ;;  %v1023_v29 = vld [vmem:[%s340_s15] sm:$0xff]   ;;  %s1918_s3 = sld [smem:[#allocation20_spill]] }
  0xc3   : > { %856 = vmatpush3.bf16.xpose.msra.mxu0 %v1021_v1  ;;  %1019 = vset.pattern.permute.xlu1 %v1327_v3  ;;  %400 = vst.msk [vmem:[#allocation3] sm:$0xff] %vm397_vm1, %v1325_v0  ;;  %401 = vst.msk [vmem:[#allocation3 + $0x8] sm:$0xff] %vm397_vm1, %v1325_v0  ;;  %v467_v9 = vsel %vm466_vm2, 1, %v1327_v3  ;;  %s386_s1 = scalar_lea.vmem [#allocation13], %s1725_s18  ;;  %s1919_s30 = sld [smem:[#allocation29_spill]] }
  0xc4   : > { %1020 = vset.pattern.permute.xlu0 %v1327_v3  ;;  %v470_v8 = vsub.s32 0, %v469_v7  ;;  %862 = vmatpush3.bf16.msra.mxu1 %v1023_v29  ;;  %s643_s2 = sshll.u32 %s386_s1, 4  ;;  %s626_s18 = scalar_lea.sflag [#allocation7], %s1722_s8  ;;  %s1770_s2 = int_to_ptr.vmem [resolvable:$true] %s643_s2 }
  0xc5   : > { %s1157_s6 = scalar_lea.vmem %s1770_s2, 128  ;;  %p1920_p13 = scmp.ne.s32.totalorder %s1909_s7, 0 }
  0xc6   : > { %v471_v10 = vrot.slane %v467_v9, %v470_v8  ;;  %p1158_p5 = scmp.ne.s32.totalorder %s1770_s2, %s1157_s6  ;;  %s1329_s11 = smov [#allocation13]  }
  0xc7   : > { %s840_s14 = sshll.u32 %s1917_s5, 2  ;;  %s1161_s25 = sshll.u32 %s1329_s11, 4  ;;  %s1162_s25 = int_to_ptr.vmem [resolvable:$false] %s1161_s25 }
  0xc8   : > { %vm472_vm3 = vcmp.eq.s32.totalorder %v471_v10, 1  ;;  %s640_s13 = sadd.s32 %s1918_s3, %s840_s14  ;;  %p1159_p7 = pnand %p1158_p5, %p1920_p13 }
  0xc9   : > { %v475_v21 = vld [vmem:[#allocation2] sm:$0xff]  ;;  %v476_v24 = vld [vmem:[#allocation2 + $0x8] sm:$0xff]  ;;  %s841_s24 = sshll.u32 %s640_s13, 6  ;;  %s1163_s5 = scalar_lea.vmem %s1162_s25, 256 }
  0xca   : > { %858 = vmatmul.mubr.bf16.vlgmr.msra.gmra.mrb[0].mxu0 %v1022_v2  ;;  %v508_v45 = vld [vmem:[#allocation3] sm:$0xff]  ;;  %v509_v48 = vld [vmem:[#allocation3 + $0x8] sm:$0xff]  ;;  %s1775_s15 = scalar_lea.hbm %s1919_s30, %s841_s24  ;;  %p1160_p11 = pneg %p1159_p7 }
  0xcb   : > { %p1164_p0 = scmp.lt.s32.totalorder %s1770_s2, %s1162_s25  ;;  %p1165_p6 = scmp.lt.s32.totalorder %s1163_s5, %s1157_s6 }
  0xcd   : > { %p1166_p1 = por %p1165_p6, %p1164_p0 }
  0xcf   : > { %p1167_p8 = pnand %p1166_p1, %p1160_p11 }
 0x19d   : > { %v456_v11 = vpop.f32.mrb[0].mxu0 }
 0x19e   : > { %v463_v12 = vmul.f32 0.088388346, %v456_v11  ;;  %v859_v13 = vpop.f32.mrb[1].mxu0 }
 0x19f   : > { %v459_v14 = vpop.f32.mrb[2].mxu0 }
 0x1a0   : > { %v464_v15 = vmul.f32 0.088388346, %v459_v14  ;;  %v860_v16 = vpop.f32.mrb[3].mxu0  ;;  %v473_v17 = vsel %vm472_vm3, -1e+09, %v463_v12 }
 0x1a1   : > { %v478_v18 = vsel %vm477_vm4, %v473_v17, -inf }
 0x1a2   : > { %479 = vmax.xlane.f32.xlu0 %v478_v18  ;;  %v474_v19 = vsel %vm472_vm3, -1e+09, %v464_v15 }
 0x1a3   : > { %v481_v20 = vsel %vm477_vm4, %v474_v19, -inf }
 0x1a6   : > { %482 = vmax.xlane.f32.xlu0 %v481_v20 }
 0x22f   : > { %v480_v22 = vpop.xlane.xlu0 %479 }
 0x230   : > { %v484_v23 = vmax.f32 %v475_v21, %v480_v22 }
 0x232   : > { %v486_v25 = vsub.f32 %v475_v21, %v484_v23  ;;  %592 = vst.msk [vmem:[#allocation2] sm:$0xff] %vm397_vm1, %v484_v23  ;;  %494 = vperm.xlu1 %1019, %v484_v23  }
 0x233   : > { %v483_v26 = vpop.xlane.xlu0 %482 }
 0x234   : > { %v485_v27 = vmax.f32 %v476_v24, %v483_v26  ;;  %v488_v42 = vmul.f32 1.442695, %v486_v25 }
 0x236   : > { %v487_v28 = vsub.f32 %v476_v24, %v485_v27  ;;  %593 = vst.msk [vmem:[#allocation2 + $0x8] sm:$0xff] %vm397_vm1, %v485_v27  ;;  %499 = vperm.xlu1 %1019, %v485_v27  }
 0x238   : > { %v490_v41 = vmul.f32 1.442695, %v487_v28 }
 0x2b1   : > { %v495_v30 = vpop.permute.xlu1 %494 }
 0x2b2   : > { %v502_v31 = vsub.f32 %v473_v17, %v495_v30 }
 0x2b4   : > { %v504_v32 = vmul.f32 1.442695, %v502_v31 }
 0x2b5   : > { %v500_v33 = vpop.permute.xlu1 %499 }
 0x2b6   : > { %1024 = vpow2.f32 %v504_v32  ;;  %v503_v34 = vsub.f32 %v474_v19, %v500_v33 }
 0x2b8   : > { %v506_v35 = vmul.f32 1.442695, %v503_v34 }
 0x2ba   : > { %1026 = vpow2.f32 %v506_v35 }
 0x2bb   : > { %1028 = vpow2.f32 %v490_v41 }
 0x2bc   : > { %1030 = vpow2.f32 %v488_v42 }
 0x2c0   : > { %v1025_v36 = vpop.eup %1024 }
 0x2c1   : > { %v512_v37 = vsel %vm477_vm4, %v1025_v36, 0.0 }
 0x2c2   : > { %513 = vadd.xlane.f32.xlu0 %v512_v37 }
 0x2c4   : > { %v1027_v38 = vpop.eup %1026 }
 0x2c5   : > { %v515_v39 = vsel %vm477_vm4, %v1027_v38, 0.0  ;;  %v537_v40 = vpack.c.bf16 %v1027_v38, %v1025_v36  ;;  %v1029_v43 = vpop.eup %1028 }
 0x2c6   : > { %516 = vadd.xlane.f32.xlu1 %v515_v39  ;;  %v1031_v44 = vpop.eup %1030  ;;  %v511_v50 = vmul.f32 %v1029_v43, %v509_v48 }
 0x2c7   : > { %864 = vmatmul.mubr.msk.bf16.vlgmr.msra.gmra.mrb[0].mxu1 %vm477_vm4, %v537_v40  ;;  %v510_v46 = vmul.f32 %v1031_v44, %v508_v45 }
 0x2d7   : > { %532 = vperm.xlu1 %1019, %v1029_v43  }
 0x2d8   : > { %527 = vperm.xlu0 %1020, %v1031_v44  }
 0x34f   : > { %v514_v47 = vpop.xlane.xlu0 %513 }
 0x350   : > { %v518_v49 = vadd.f32 %v514_v47, %v510_v46 }
 0x352   : > { %521 = vst.msk [vmem:[#allocation3] sm:$0xff] %vm397_vm1, %v518_v49 }
 0x353   : > { %v517_v51 = vpop.xlane.xlu1 %516 }
 0x354   : > { %v519_v52 = vadd.f32 %v517_v51, %v511_v50 }
 0x356   : > { %522 = vst.msk [vmem:[#allocation3 + $0x8] sm:$0xff] %vm397_vm1, %v519_v52 }
 0x357   : > { %v528_v61 = vpop.permute.xlu0 %527  ;;  %v533_v62 = vpop.permute.xlu1 %532 }
 0x358   : > { %v536_v0 = vmul.f32 0.0, %v533_v62  ;;  %v535_v1 = vmul.f32 0.0, %v528_v61 }
 0x359   : > { %v599_v53 = vld [vmem:[#allocation3] sm:$0xff] }
 0x35a   : > { %1032 = vrcp.f32 %v599_v53 }
 0x35d   : > { %v600_v54 = vld [vmem:[#allocation3 + $0x8] sm:$0xff] }
 0x35e   : > { %1034 = vrcp.f32 %v600_v54 }
 0x364   : > { %v1033_v55 = vpop.eup %1032 }
 0x365   : > { %605 = vperm.xlu0 %1020, %v1033_v55  }
 0x368   : > { %v1035_v56 = vpop.eup %1034 }
 0x369   : > { %610 = vperm.xlu0 %1020, %v1035_v56  }
 0x39a   : > { %v581_v57 = vpop.f32.mrb[0].mxu1 }
 0x39b   : > { %v865_v58 = vpop.f32.mrb[1].mxu1  ;;  %v588_v2 = vadd.f32 %v581_v57, %v535_v1 }
 0x39c   : > { %v584_v59 = vpop.f32.mrb[2].mxu1 }
 0x39d   : > { %v866_v60 = vpop.f32.mrb[3].mxu1  ;;  %v589_v3 = vadd.f32 %v584_v59, %v536_v0 }
 0x3e4   : > { %v606_v63 = vpop.permute.xlu0 %605 }
 0x3e5   : > { %v613_v5 = vmul.f32 %v606_v63, %v588_v2 }
 0x3e8   : > { %v611_v4 = vpop.permute.xlu0 %610 }
 0x3e9   : > { %v614_v6 = vmul.f32 %v611_v4, %v589_v3 }
 0x3eb   : > { %v849_v7 = vpack.c.bf16 %v614_v6, %v613_v5 }
 0x3ed   : > { %850 = vst [vmem:[%s386_s1] sm:$0xff] %v849_v7  }
 0x3ee   : > { %1170 = shalt.err (!%p1167_p8)
}
 0x3ef   : > { %s1171_s3 = scalar_lea.hbm %s1775_s15, 128  ;;  %s1175_s1 = scalar_lea.hbm %s1919_s30, 512 }
 0x3f0   : > { %p1172_p10 = scmp.ne.s32.totalorder %s1775_s15, %s1171_s3  ;;  %p1176_p12 = scmp.lt.u32.totalorder %s1775_s15, %s1919_s30 }
 0x3f1   : > { %p1177_p2 = scmp.lt.u32.totalorder %s1175_s1, %s1171_s3  ;;  %p1179_p5 = scmp.lt.u32.totalorder %s1171_s3, %s1775_s15 }
 0x3f2   : > { %p1173_p3 = pnand %p1172_p10, %p1920_p13 }
 0x3f3   : > { %p1178_p4 = por %p1177_p2, %p1176_p12 }
 0x3f4   : > { %p1174_p9 = pneg %p1173_p3 }
 0x3f5   : > { %p1180_p7 = por %p1179_p5, %p1178_p4 }
 0x3f7   : > { %p1181_p11 = pnand %p1180_p7, %p1174_p9 }
 0x3f9   : > { %1184 = shalt.err (!%p1181_p11)
}
 0x3fa   : > { %s1330_s9 = smov 64   ;;  %s1331_s6 = smov 128  }
 0x3fb   : > { %s1332_s11 = smov 4  }
 0x3fc   : > { %875 = dma.vmem_to_hbm [thread:$0]  (%p1920_p13), %s1770_s2, 128, %s1775_s15, %s626_s18, %s1330_s9, %s1331_s6, %s1332_s11  }
 0x3fd PF: > { %s1921_s25 = sld [smem:[#allocation22_spill]]  ;;  %p895_p0 = scmp.ge.s32.totalorder %s1315_s28, 2 }
 0x3fe   : > { %s658_s5 = sand.u32 1, %s1287_s21  }
 0x3ff   : > { %s659_s3 = scalar_lea.sflag [#allocation7], %s658_s5 }
 0x403   : > { %p1922_p6 = scmp.ne.s32.totalorder %s1921_s25, 0 }
 0x405   : > { %p891_p1 = pnand %p895_p0, %p1922_p6 }
 0x407   : > { %1258 = dma.done.wait (!%p891_p1), %s659_s3, 128  }
 0x408   : > { %1260 = vsyncadd (!%p891_p1), %s659_s3, 4294967168  ;;  %s26_s28 = sadd.s32 1, %s1315_s28   ;;  %s1924_s7 = sld [smem:[#allocation23_spill]] }
 0x409   : > { %p1806_p8 = scmp.ge.s32.totalorder %s26_s28, 6   ;;  %s1925_s8 = sld [smem:[#allocation24_spill]] }
 0x40a   : > { %s1926_s15 = smov %s1267_s16  ;;  %s1927_s16 = smov %s1271_s17 }
 0x40b   : > { %s1928_s17 = smov %s1659_s29  ;;  %s1929_s18 = smov %s1279_s19 }
 0x40c   : > { %s1930_s19 = smov %s1283_s20  ;;  %s1931_s20 = smov %s1656_s12 }
 0x40d   : > { %s1932_s21 = smov %s1291_s22  ;;  %s1933_s22 = smov %s1295_s23 }
 0x40e   : > { %s1934_s23 = smov %s1651_s10  ;;  %s1935_s24 = smov %s1307_s26 }
 0x40f   : > { %s1936_s25 = smov %s1311_s27  ;;  %s1937_s26 = smov %s1924_s7 }
 0x410   : > { %s1938_s27 = smov %s1925_s8  ;;  %25 = sbr.rel (!%p1806_p8) target bundleno = 20 (0x14), region = 126 }
 0x417   :  { %664 = vsyncpa [#allocation6], 1 }
 0x418   :  { %666 = vsyncpa [#allocation6 + $0x1], 1 }
 0x419   :  { %667 = vsyncpa [#allocation9], 1 }
 0x41a   :  { %669 = vsyncpa [#allocation9 + $0x1], 1 }
 0x41b   :  { %670 = vsyncpa [#allocation12], 1 }
 0x41c   :  { %672 = vsyncpa [#allocation12 + $0x1], 1 }
 0x41d   :  { %673 = vsyncpa [#allocation7], 1 }
 0x41e   :  { %675 = vsyncpa [#allocation7 + $0x1], 1 }

// kernel: decoder_forward.22
= control target key start
LH: loop header
LB: loop body
LE: loop exit
PB: predicated region body
PF: predicated region fallthrough
CT: control target
= control target key end

     0   :  { %8 = vsyncpa [#allocation4], 0  ;;  %s1137_s0 = inlined_call_operand.hbm [shape: bf16[32,256], index: 0, kind: input, shape index: {}]   ;;  %s1138_s1 = inlined_call_operand.hbm [shape: bf16[256,512], index: 1, kind: input, shape index: {}]   ;;  %s1139_s2 = inlined_call_operand.hbm [shape: f32[1,512], index: 2, kind: input, shape index: {}]   ;;  %s1140_s3 = inlined_call_operand.hbm [shape: bf16[32,512], index: 3, kind: output, shape index: {}]  }
   0x1   :  { %9 = vsyncpa [#allocation7], 0 }
   0x2   :  { %10 = vsyncpa [#allocation5], 0  ;;  %s1055_s12 = smov [#allocation6]   ;;  %s961_s16 = scalar_lea.hbm %s1138_s1, 8192 }
   0x3   :  { %s28_s13 = sshll.u32 %s1055_s12, 4  ;;  %p962_p0 = scmp.ne.s32.totalorder %s1138_s1, %s961_s16  ;;  %s29_s13 = int_to_ptr.vmem [resolvable:$true] %s28_s13 }
   0x4   :  { %p965_p1 = scmp.lt.u32.totalorder %s961_s16, %s1138_s1 }
   0x6   :  { %p967_p2 = pnand %p965_p1, %p962_p0 }
   0x8   :  { %970 = shalt.err (!%p967_p2)
}
   0x9   :  { %s971_s21 = scalar_lea.vmem %s29_s13, 8192  ;;  %p976_p4 = scmp.lt.s32.totalorder %s29_s13, %s29_s13 }
   0xa   :  { %p972_p3 = scmp.ne.s32.totalorder %s29_s13, %s971_s21  ;;  %p977_p5 = scmp.lt.s32.totalorder %s971_s21, %s971_s21 }
   0xc   :  { %p978_p6 = por %p977_p5, %p976_p4 }
   0xe   :  { %p979_p7 = pnand %p978_p6, %p972_p3 }
  0x10   :  { %982 = shalt.err (!%p979_p7)
}
  0x11   :  { %s1056_s22 = smov 256   ;;  %s1057_s23 = smov 16  }
  0x12   :  { %34 = dma.hbm_to_vmem [thread:$0]  %s1138_s1, 8192, %s29_s13, [#allocation7], %s1056_s22, %s1056_s22, %s1057_s23  }
  0x13   :  { %s1058_s26 = smov [#allocation3]   ;;  %s983_s30 = scalar_lea.hbm %s1137_s0, 512 }
  0x14   :  { %s16_s27 = sshll.u32 %s1058_s26, 4  ;;  %p984_p8 = scmp.ne.s32.totalorder %s1137_s0, %s983_s30  ;;  %s17_s27 = int_to_ptr.vmem [resolvable:$true] %s16_s27 }
  0x15   :  { %p987_p9 = scmp.lt.u32.totalorder %s983_s30, %s1137_s0 }
  0x17   :  { %p989_p10 = pnand %p987_p9, %p984_p8 }
  0x19   :  { %992 = shalt.err (!%p989_p10)
}
  0x1a   :  { %s993_s8 = scalar_lea.vmem %s17_s27, 512  ;;  %p998_p12 = scmp.lt.s32.totalorder %s17_s27, %s17_s27 }
  0x1b   :  { %p994_p11 = scmp.ne.s32.totalorder %s17_s27, %s993_s8  ;;  %p999_p13 = scmp.lt.s32.totalorder %s993_s8, %s993_s8 }
  0x1d   :  { %p1000_p0 = por %p999_p13, %p998_p12 }
  0x1f   :  { %p1001_p1 = pnand %p1000_p0, %p994_p11 }
  0x21   :  { %1004 = shalt.err (!%p1001_p1)
}
  0x22   :  { %s1059_s1 = smov 128   ;;  %s1060_s9 = smov 8  }
  0x23   :  { %22 = dma.hbm_to_vmem [thread:$0]  %s1137_s0, 512, %s17_s27, [#allocation4], %s1059_s1, %s1059_s1, %s1060_s9  }
  0x24   :  { %s1061_s12 = smov [#allocation8]   ;;  %s1005_s16 = scalar_lea.hbm %s1139_s2, 64 }
  0x25   :  { %s41_s13 = sshll.u32 %s1061_s12, 4  ;;  %p1006_p2 = scmp.ne.s32.totalorder %s1139_s2, %s1005_s16  ;;  %s42_s13 = int_to_ptr.vmem [resolvable:$true] %s41_s13 }
  0x26   :  { %p1009_p3 = scmp.lt.u32.totalorder %s1005_s16, %s1139_s2 }
  0x28   :  { %p1011_p4 = pnand %p1009_p3, %p1006_p2 }
  0x2a   :  { %1014 = shalt.err (!%p1011_p4)
}
  0x2b   :  { %s1015_s21 = scalar_lea.vmem %s42_s13, 64  ;;  %p1020_p6 = scmp.lt.s32.totalorder %s42_s13, %s42_s13 }
  0x2c   :  { %p1016_p5 = scmp.ne.s32.totalorder %s42_s13, %s1015_s21  ;;  %p1021_p7 = scmp.lt.s32.totalorder %s1015_s21, %s1015_s21 }
  0x2e   :  { %p1022_p8 = por %p1021_p7, %p1020_p6 }
  0x30   :  { %p1023_p9 = pnand %p1022_p8, %p1016_p5 }
  0x32   :  { %1026 = shalt.err (!%p1023_p9)
}
  0x33   :  { %44 = dma.hbm_to_vmem [thread:$0]  %s1139_s2, 64, %s42_s13, [#allocation7]  }
  0x34   :  { %1049 = dma.done.wait [#allocation4], 512  }
  0x35   :  { %1050 = vsyncadd [#allocation4], 4294966784 }
  0x36   :  { %1051 = dma.done.wait [#allocation7], 8256  }
  0x37   :  { %1052 = vsyncadd [#allocation7], 4294959040  ;;  %v859_v0 = vld [vmem:[#allocation6 + $0x4] ss:$16 sps:$4 sm:$0xff]   ;;  %v861_v1 = vld [vmem:[#allocation6 + $0xc] ss:$16 sps:$4 sm:$0xff]  }
  0x38   :  { %498 = vmatprep.subr.bf16.mxu0 %v859_v0  ;;  %v863_v2 = vld [vmem:[#allocation6] ss:$16 sps:$4 sm:$0xff]   ;;  %v864_v3 = vld [vmem:[#allocation6 + $0x8] ss:$16 sps:$4 sm:$0xff]   ;;  %551 = vmatprep.subr.bf16.mxu1 %v861_v1  ;;  %v865_v4 = vld [vmem:[#allocation6 + $0x24] ss:$16 sps:$4 sm:$0xff]  }
  0x39   :  { %499 = vmatpush1.bf16.msra.mxu0 %v863_v2  ;;  %552 = vmatpush1.bf16.msra.mxu1 %v864_v3  ;;  %v867_v5 = vld [vmem:[#allocation6 + $0x2c] ss:$16 sps:$4 sm:$0xff]   ;;  %v869_v6 = vld [vmem:[#allocation6 + $0x20] ss:$16 sps:$4 sm:$0xff]   ;;  %v870_v7 = vld [vmem:[#allocation6 + $0x28] ss:$16 sps:$4 sm:$0xff]  }
  0x3a   :  { %500 = vmatprep.subr.bf16.mxu0 %v865_v4  ;;  %553 = vmatprep.subr.bf16.mxu1 %v867_v5  ;;  %v871_v8 = vld [vmem:[#allocation6 + $0x44] ss:$16 sps:$4 sm:$0xff]   ;;  %v873_v9 = vld [vmem:[#allocation6 + $0x4c] ss:$16 sps:$4 sm:$0xff]   ;;  %v875_v10 = vld [vmem:[#allocation6 + $0x40] ss:$16 sps:$4 sm:$0xff]   ;;  %v657_v4 = vlaneseq }
  0x3b   :  { %v876_v11 = vld [vmem:[#allocation6 + $0x48] ss:$16 sps:$4 sm:$0xff]   ;;  %v877_v12 = vld [vmem:[#allocation6 + $0x64] ss:$16 sps:$4 sm:$0xff]   ;;  %v879_v13 = vld [vmem:[#allocation6 + $0x6c] ss:$16 sps:$4 sm:$0xff]  }
  0x3c   :  { %v881_v14 = vld [vmem:[#allocation6 + $0x60] ss:$16 sps:$4 sm:$0xff]   ;;  %v882_v15 = vld [vmem:[#allocation6 + $0x68] ss:$16 sps:$4 sm:$0xff]   ;;  %v883_v16 = vld [vmem:[#allocation6 + $0x84] ss:$16 sps:$4 sm:$0xff]  }
  0x3d   :  { %501 = vmatpush1.bf16.msra.mxu0 %v869_v6  ;;  %554 = vmatpush1.bf16.msra.mxu1 %v870_v7  ;;  %v885_v17 = vld [vmem:[#allocation6 + $0x8c] ss:$16 sps:$4 sm:$0xff]   ;;  %v887_v18 = vld [vmem:[#allocation6 + $0x80] ss:$16 sps:$4 sm:$0xff]   ;;  %v888_v19 = vld [vmem:[#allocation6 + $0x88] ss:$16 sps:$4 sm:$0xff]  }
  0x3e   :  { %502 = vmatprep.subr.bf16.mxu0 %v871_v8  ;;  %555 = vmatprep.subr.bf16.mxu1 %v873_v9  ;;  %v889_v20 = vld [vmem:[#allocation6 + $0xa4] ss:$16 sps:$4 sm:$0xff]   ;;  %v891_v21 = vld [vmem:[#allocation6 + $0xac] ss:$16 sps:$4 sm:$0xff]   ;;  %v893_v22 = vld [vmem:[#allocation6 + $0xa0] ss:$16 sps:$4 sm:$0xff]  }
  0x3f   :  { %v894_v23 = vld [vmem:[#allocation6 + $0xa8] ss:$16 sps:$4 sm:$0xff]   ;;  %v895_v24 = vld [vmem:[#allocation6 + $0xc4] ss:$16 sps:$4 sm:$0xff]   ;;  %v897_v25 = vld [vmem:[#allocation6 + $0xcc] ss:$16 sps:$4 sm:$0xff]  }
  0x40   :  { %v899_v26 = vld [vmem:[#allocation6 + $0xc0] ss:$16 sps:$4 sm:$0xff]   ;;  %v900_v27 = vld [vmem:[#allocation6 + $0xc8] ss:$16 sps:$4 sm:$0xff]   ;;  %v901_v28 = vld [vmem:[#allocation6 + $0xe4] ss:$16 sps:$4 sm:$0xff]  }
  0x41   :  { %503 = vmatpush1.bf16.msra.mxu0 %v875_v10  ;;  %556 = vmatpush1.bf16.msra.mxu1 %v876_v11  ;;  %v903_v29 = vld [vmem:[#allocation6 + $0xec] ss:$16 sps:$4 sm:$0xff]   ;;  %v905_v30 = vld [vmem:[#allocation6 + $0xe0] ss:$16 sps:$4 sm:$0xff]   ;;  %v906_v31 = vld [vmem:[#allocation6 + $0xe8] ss:$16 sps:$4 sm:$0xff]  }
  0x42   :  { %504 = vmatprep.subr.bf16.mxu0 %v877_v12  ;;  %557 = vmatprep.subr.bf16.mxu1 %v879_v13  ;;  %v907_v32 = vld [vmem:[#allocation6 + $0x104] ss:$16 sps:$4 sm:$0xff]   ;;  %v909_v33 = vld [vmem:[#allocation6 + $0x10c] ss:$16 sps:$4 sm:$0xff]   ;;  %v911_v34 = vld [vmem:[#allocation6 + $0x100] ss:$16 sps:$4 sm:$0xff]  }
  0x43   :  { %v912_v35 = vld [vmem:[#allocation6 + $0x108] ss:$16 sps:$4 sm:$0xff]   ;;  %v913_v36 = vld [vmem:[#allocation6 + $0x124] ss:$16 sps:$4 sm:$0xff]   ;;  %v915_v37 = vld [vmem:[#allocation6 + $0x12c] ss:$16 sps:$4 sm:$0xff]  }
  0x44   :  { %v917_v38 = vld [vmem:[#allocation6 + $0x120] ss:$16 sps:$4 sm:$0xff]   ;;  %v918_v39 = vld [vmem:[#allocation6 + $0x128] ss:$16 sps:$4 sm:$0xff]   ;;  %v919_v40 = vld [vmem:[#allocation6 + $0x144] ss:$16 sps:$4 sm:$0xff]  }
  0x45   :  { %505 = vmatpush1.bf16.msra.mxu0 %v881_v14  ;;  %558 = vmatpush1.bf16.msra.mxu1 %v882_v15  ;;  %v921_v41 = vld [vmem:[#allocation6 + $0x14c] ss:$16 sps:$4 sm:$0xff]   ;;  %v923_v42 = vld [vmem:[#allocation6 + $0x140] ss:$16 sps:$4 sm:$0xff]   ;;  %v924_v43 = vld [vmem:[#allocation6 + $0x148] ss:$16 sps:$4 sm:$0xff]  }
  0x46   :  { %506 = vmatprep.subr.bf16.mxu0 %v883_v16  ;;  %559 = vmatprep.subr.bf16.mxu1 %v885_v17  ;;  %v925_v44 = vld [vmem:[#allocation6 + $0x164] ss:$16 sps:$4 sm:$0xff]   ;;  %v927_v45 = vld [vmem:[#allocation6 + $0x16c] ss:$16 sps:$4 sm:$0xff]   ;;  %v929_v46 = vld [vmem:[#allocation6 + $0x160] ss:$16 sps:$4 sm:$0xff]  }
  0x47   :  { %v957_v47 = vld [vmem:[#allocation3 + $0x4] ss:$8 sps:$4 sm:$0xff]   ;;  %v930_v48 = vld [vmem:[#allocation6 + $0x168] ss:$16 sps:$4 sm:$0xff]   ;;  %v935_v51 = vld [vmem:[#allocation6 + $0x180] ss:$16 sps:$4 sm:$0xff]  }
  0x48   :  { %v931_v49 = vld [vmem:[#allocation6 + $0x184] ss:$16 sps:$4 sm:$0xff]   ;;  %v933_v50 = vld [vmem:[#allocation6 + $0x18c] ss:$16 sps:$4 sm:$0xff]   ;;  %530 = vmatprep.mubr.bf16.mxu0 %v957_v47  ;;  %583 = vmatprep.mubr.bf16.mxu1 %v957_v47  ;;  %v936_v52 = vld [vmem:[#allocation6 + $0x188] ss:$16 sps:$4 sm:$0xff]  }
  0x49   :  { %507 = vmatpush1.bf16.msra.mxu0 %v887_v18  ;;  %560 = vmatpush1.bf16.msra.mxu1 %v888_v19  ;;  %v937_v53 = vld [vmem:[#allocation6 + $0x1a4] ss:$16 sps:$4 sm:$0xff]   ;;  %v939_v54 = vld [vmem:[#allocation6 + $0x1ac] ss:$16 sps:$4 sm:$0xff]   ;;  %v941_v55 = vld [vmem:[#allocation6 + $0x1a0] ss:$16 sps:$4 sm:$0xff]  }
  0x4a   :  { %508 = vmatprep.subr.bf16.mxu0 %v889_v20  ;;  %561 = vmatprep.subr.bf16.mxu1 %v891_v21  ;;  %v942_v56 = vld [vmem:[#allocation6 + $0x1a8] ss:$16 sps:$4 sm:$0xff]   ;;  %v943_v57 = vld [vmem:[#allocation6 + $0x1c4] ss:$16 sps:$4 sm:$0xff]   ;;  %v945_v58 = vld [vmem:[#allocation6 + $0x1cc] ss:$16 sps:$4 sm:$0xff]  }
  0x4b   :  { %v947_v59 = vld [vmem:[#allocation6 + $0x1c0] ss:$16 sps:$4 sm:$0xff]   ;;  %v948_v60 = vld [vmem:[#allocation6 + $0x1c8] ss:$16 sps:$4 sm:$0xff]   ;;  %v949_v61 = vld [vmem:[#allocation6 + $0x1e4] ss:$16 sps:$4 sm:$0xff]  }
  0x4c   :  { %v951_v62 = vld [vmem:[#allocation6 + $0x1ec] ss:$16 sps:$4 sm:$0xff]   ;;  %v953_v63 = vld [vmem:[#allocation6 + $0x1e0] ss:$16 sps:$4 sm:$0xff]   ;;  %v954_v0 = vld [vmem:[#allocation6 + $0x1e8] ss:$16 sps:$4 sm:$0xff]  }
  0x4d   :  { %509 = vmatpush1.bf16.msra.mxu0 %v893_v22  ;;  %562 = vmatpush1.bf16.msra.mxu1 %v894_v23  ;;  %v955_v1 = vld [vmem:[#allocation3] ss:$8 sps:$4 sm:$0xff]   ;;  %v958_v2 = vld [vmem:[#allocation3 + $0x14] ss:$8 sps:$4 sm:$0xff]   ;;  %v960_v3 = vld [vmem:[#allocation3 + $0x10] ss:$8 sps:$4 sm:$0xff]  }
  0x4e   :  { %510 = vmatprep.subr.bf16.mxu0 %v895_v24  ;;  %563 = vmatprep.subr.bf16.mxu1 %v897_v25  ;;  %v658_v5 = vshrl.u32 %v657_v4, 7  ;;  %v655_v8 = vld [vmem:[#allocation8] sm:$0xf]  ;;  %s1062_s2 = smov [#allocation9]  }
  0x4f   :  { %s754_s25 = sshll.u32 %s1062_s2, 4  ;;  %s755_s25 = int_to_ptr.vmem [resolvable:$true] %s754_s25 }
  0x50   :  { %v659_v6 = vsub.s32 0, %v658_v5  ;;  %v667_v7 = vsub.s32 2, %v658_v5  ;;  %v663_v9 = vsub.s32 1, %v658_v5  ;;  %v671_v10 = vsub.s32 3, %v658_v5  ;;  %s1027_s26 = scalar_lea.vmem %s755_s25, 1024  ;;  %p1032_p11 = scmp.lt.s32.totalorder %s755_s25, %s755_s25 }
  0x51   :  { %511 = vmatpush1.bf16.msra.mxu0 %v899_v26  ;;  %564 = vmatpush1.bf16.msra.mxu1 %v900_v27  ;;  %p1028_p10 = scmp.ne.s32.totalorder %s755_s25, %s1027_s26  ;;  %p1033_p12 = scmp.lt.s32.totalorder %s1027_s26, %s1027_s26 }
  0x52   :  { %512 = vmatprep.subr.bf16.mxu0 %v901_v28  ;;  %565 = vmatprep.subr.bf16.mxu1 %v903_v29  ;;  %v660_v11 = vrot.slane %v655_v8, %v659_v6  ;;  %v668_v12 = vrot.slane %v655_v8, %v667_v7  ;;  %v664_v13 = vrot.slane %v655_v8, %v663_v9 }
  0x53   :  { %v672_v14 = vrot.slane %v655_v8, %v671_v10  ;;  %p1034_p13 = por %p1033_p12, %p1032_p11 }
  0x55   :  { %513 = vmatpush1.bf16.msra.mxu0 %v905_v30  ;;  %566 = vmatpush1.bf16.msra.mxu1 %v906_v31  ;;  %p1035_p0 = pnand %p1034_p13, %p1028_p10 }
  0x56   :  { %514 = vmatprep.subr.bf16.mxu0 %v907_v32  ;;  %567 = vmatprep.subr.bf16.mxu1 %v909_v33 }
  0x59   :  { %515 = vmatpush1.bf16.msra.mxu0 %v911_v34  ;;  %568 = vmatpush1.bf16.msra.mxu1 %v912_v35 }
  0x5a   :  { %516 = vmatprep.subr.bf16.mxu0 %v913_v36  ;;  %569 = vmatprep.subr.bf16.mxu1 %v915_v37 }
  0x5d   :  { %517 = vmatpush1.bf16.msra.mxu0 %v917_v38  ;;  %570 = vmatpush1.bf16.msra.mxu1 %v918_v39 }
  0x5e   :  { %518 = vmatprep.subr.bf16.mxu0 %v919_v40  ;;  %571 = vmatprep.subr.bf16.mxu1 %v921_v41 }
  0x61   :  { %519 = vmatpush1.bf16.msra.mxu0 %v923_v42  ;;  %572 = vmatpush1.bf16.msra.mxu1 %v924_v43 }
  0x62   :  { %520 = vmatprep.subr.bf16.mxu0 %v925_v44  ;;  %573 = vmatprep.subr.bf16.mxu1 %v927_v45 }
  0x65   :  { %521 = vmatpush1.bf16.msra.mxu0 %v929_v46  ;;  %574 = vmatpush1.bf16.msra.mxu1 %v930_v48 }
  0x66   :  { %522 = vmatprep.subr.bf16.mxu0 %v931_v49  ;;  %575 = vmatprep.subr.bf16.mxu1 %v933_v50 }
  0x69   :  { %523 = vmatpush1.bf16.msra.mxu0 %v935_v51  ;;  %576 = vmatpush1.bf16.msra.mxu1 %v936_v52 }
  0x6a   :  { %524 = vmatprep.subr.bf16.mxu0 %v937_v53  ;;  %577 = vmatprep.subr.bf16.mxu1 %v939_v54 }
  0x6d   :  { %525 = vmatpush1.bf16.msra.mxu0 %v941_v55  ;;  %578 = vmatpush1.bf16.msra.mxu1 %v942_v56 }
  0x6e   :  { %526 = vmatprep.subr.bf16.mxu0 %v943_v57  ;;  %579 = vmatprep.subr.bf16.mxu1 %v945_v58 }
  0x71   :  { %527 = vmatpush1.bf16.msra.mxu0 %v947_v59  ;;  %580 = vmatpush1.bf16.msra.mxu1 %v948_v60 }
  0x72   :  { %528 = vmatprep.subr.bf16.mxu0 %v949_v61  ;;  %581 = vmatprep.subr.bf16.mxu1 %v951_v62 }
  0x75   :  { %529 = vmatpush1.bf16.msra.mxu0 %v953_v63  ;;  %582 = vmatpush1.bf16.msra.mxu1 %v954_v0 }
  0x78   :  { %531 = vmatmul.mubr.bf16.vlgmr.msra.gmra.mrb[0].mxu0 %v955_v1  ;;  %584 = vmatmul.mubr.bf16.vlgmr.msra.gmra.mrb[0].mxu1 %v955_v1 }
  0x79   :  { %540 = vmatprep.mubr.bf16.mxu0 %v958_v2  ;;  %593 = vmatprep.mubr.bf16.mxu1 %v958_v2 }
  0x80   :  { %541 = vmatmul.mubr.bf16.gmra.mrb[4].mxu0 %v960_v3  ;;  %594 = vmatmul.mubr.bf16.gmra.mrb[4].mxu1 %v960_v3 }
 0x14b   :  { %v532_v15 = vpop.f32.mrb[0].mxu0  ;;  %v585_v16 = vpop.f32.mrb[0].mxu1 }
 0x14c   :  { %v677_v17 = vadd.f32 %v660_v11, %v532_v15  ;;  %v679_v18 = vadd.f32 %v668_v12, %v585_v16  ;;  %v534_v19 = vpop.f32.mrb[1].mxu0  ;;  %v587_v20 = vpop.f32.mrb[1].mxu1 }
 0x14d   :  { %v678_v21 = vadd.f32 %v664_v13, %v534_v19  ;;  %v680_v22 = vadd.f32 %v672_v14, %v587_v20  ;;  %v536_v23 = vpop.f32.mrb[2].mxu0  ;;  %v589_v24 = vpop.f32.mrb[2].mxu1 }
 0x14e   :  { %v681_v25 = vadd.f32 %v660_v11, %v536_v23  ;;  %v683_v26 = vadd.f32 %v668_v12, %v589_v24  ;;  %v538_v27 = vpop.f32.mrb[3].mxu0  ;;  %v591_v28 = vpop.f32.mrb[3].mxu1 }
 0x14f   :  { %v843_v29 = vpack.c.bf16 %v678_v21, %v677_v17  ;;  %v844_v30 = vpack.c.bf16 %v680_v22, %v679_v18  ;;  %v682_v31 = vadd.f32 %v664_v13, %v538_v27  ;;  %v684_v32 = vadd.f32 %v672_v14, %v591_v28 }
 0x151   :  { %741 = vst [vmem:[#allocation9] sm:$0xff] %v843_v29  ;;  %742 = vst [vmem:[#allocation9 + $0x8] sm:$0xff] %v844_v30  ;;  %v845_v33 = vpack.c.bf16 %v682_v31, %v681_v25  ;;  %v846_v34 = vpack.c.bf16 %v684_v32, %v683_v26 }
 0x153   :  { %743 = vst [vmem:[#allocation9 + $0x10] sm:$0xff] %v845_v33  ;;  %744 = vst [vmem:[#allocation9 + $0x18] sm:$0xff] %v846_v34  ;;  %v542_v35 = vpop.f32.mrb[4].mxu0  ;;  %v595_v36 = vpop.f32.mrb[4].mxu1 }
 0x154   :  { %v685_v37 = vadd.f32 %v660_v11, %v542_v35  ;;  %v687_v38 = vadd.f32 %v668_v12, %v595_v36  ;;  %v544_v39 = vpop.f32.mrb[5].mxu0  ;;  %v597_v40 = vpop.f32.mrb[5].mxu1 }
 0x155   :  { %v686_v41 = vadd.f32 %v664_v13, %v544_v39  ;;  %v688_v42 = vadd.f32 %v672_v14, %v597_v40  ;;  %v546_v43 = vpop.f32.mrb[6].mxu0  ;;  %v599_v44 = vpop.f32.mrb[6].mxu1 }
 0x156   :  { %v689_v45 = vadd.f32 %v660_v11, %v546_v43  ;;  %v691_v46 = vadd.f32 %v668_v12, %v599_v44  ;;  %v548_v47 = vpop.f32.mrb[7].mxu0  ;;  %v601_v48 = vpop.f32.mrb[7].mxu1 }
 0x157   :  { %v847_v49 = vpack.c.bf16 %v686_v41, %v685_v37  ;;  %v848_v50 = vpack.c.bf16 %v688_v42, %v687_v38  ;;  %v690_v51 = vadd.f32 %v664_v13, %v548_v47  ;;  %v692_v52 = vadd.f32 %v672_v14, %v601_v48 }
 0x159   :  { %745 = vst [vmem:[#allocation9 + $0x20] sm:$0xff] %v847_v49  ;;  %746 = vst [vmem:[#allocation9 + $0x28] sm:$0xff] %v848_v50  ;;  %v849_v53 = vpack.c.bf16 %v690_v51, %v689_v45  ;;  %v850_v54 = vpack.c.bf16 %v692_v52, %v691_v46 }
 0x15b   :  { %747 = vst [vmem:[#allocation9 + $0x30] sm:$0xff] %v849_v53  ;;  %748 = vst [vmem:[#allocation9 + $0x38] sm:$0xff] %v850_v54 }
 0x15c   :  { %1038 = shalt.err (!%p1035_p0)
}
 0x15d   :  { %s1039_s29 = scalar_lea.hbm %s1140_s3, 1024 }
 0x15e   :  { %p1040_p1 = scmp.ne.s32.totalorder %s1140_s3, %s1039_s29  ;;  %p1043_p2 = scmp.lt.u32.totalorder %s1039_s29, %s1140_s3 }
 0x160   :  { %p1045_p3 = pnand %p1043_p2, %p1040_p1 }
 0x162   :  { %1048 = shalt.err (!%p1045_p3)
}
 0x163   :  { %760 = dma.vmem_to_hbm [thread:$0]  %s755_s25, 1024, %s1140_s3, [#allocation5], %s1056_s22, %s1056_s22, %s1057_s23  }
 0x164   :  { %1053 = dma.done.wait [#allocation5], 1024  }
 0x165   :  { %1054 = vsyncadd [#allocation5], 4294966272 }
 0x166   :  { %764 = vsyncpa [#allocation4], 1 }
 0x167   :  { %765 = vsyncpa [#allocation7], 1 }
 0x168   :  { %766 = vsyncpa [#allocation5], 1 }

// kernel: decoder_forward.25
= control target key start
LH: loop header
LB: loop body
LE: loop exit
PB: predicated region body
PF: predicated region fallthrough
CT: control target
= control target key end

     0   :  { %10 = vsyncpa [#allocation4], 0  ;;  %s1390_s0 = inlined_call_operand.hbm [shape: f32[32,256], index: 0, kind: input, shape index: {}]   ;;  %s1391_s1 = inlined_call_operand.hbm [shape: f32[1,256], index: 1, kind: input, shape index: {}]   ;;  %s1392_s2 = inlined_call_operand.hbm [shape: f32[1,256], index: 2, kind: input, shape index: {}]   ;;  %s1393_s3 = inlined_call_operand.hbm [shape: bf16[256,512], index: 3, kind: input, shape index: {}]   ;;  %s1394_s4 = inlined_call_operand.hbm [shape: f32[1,512], index: 4, kind: input, shape index: {}]   ;;  %s1395_s5 = inlined_call_operand.hbm [shape: bf16[32,512], index: 5, kind: output, shape index: {}]  }
   0x1   :  { %11 = vsyncpa [#allocation7], 0 }
   0x2   :  { %12 = vsyncpa [#allocation10], 0 }
   0x3   :  { %13 = vsyncpa [#allocation5], 0  ;;  %s1183_s18 = smov [#allocation6]   ;;  %s1043_s22 = scalar_lea.hbm %s1391_s1, 32 }
   0x4   :  { %s32_s19 = sshll.u32 %s1183_s18, 4  ;;  %p1044_p0 = scmp.ne.s32.totalorder %s1391_s1, %s1043_s22  ;;  %s33_s19 = int_to_ptr.vmem [resolvable:$true] %s32_s19 }
   0x5   :  { %p1047_p1 = scmp.lt.u32.totalorder %s1043_s22, %s1391_s1 }
   0x7   :  { %p1049_p2 = pnand %p1047_p1, %p1044_p0 }
   0x9   :  { %1052 = shalt.err (!%p1049_p2)
}
   0xa   :  { %s1053_s27 = scalar_lea.vmem %s33_s19, 32  ;;  %p1058_p4 = scmp.lt.s32.totalorder %s33_s19, %s33_s19 }
   0xb   :  { %p1054_p3 = scmp.ne.s32.totalorder %s33_s19, %s1053_s27  ;;  %p1059_p5 = scmp.lt.s32.totalorder %s1053_s27, %s1053_s27 }
   0xd   :  { %p1060_p6 = por %p1059_p5, %p1058_p4 }
   0xf   :  { %p1061_p7 = pnand %p1060_p6, %p1054_p3 }
  0x11   :  { %1064 = shalt.err (!%p1061_p7)
}
  0x12   :  { %35 = dma.hbm_to_vmem [thread:$0]  %s1391_s1, 32, %s33_s19, [#allocation7]  }
  0x13   :  { %s1184_s30 = smov [#allocation9]   ;;  %s1185_s7 = smov [#allocation3]  }
  0x14   :  { %s51_s6 = sshll.u32 %s1184_s30, 4  ;;  %s19_s8 = sshll.u32 %s1185_s7, 4  ;;  %s52_s6 = int_to_ptr.vmem [resolvable:$true] %s51_s6  ;;  %s20_s8 = int_to_ptr.vmem [resolvable:$true] %s19_s8 }
  0x15   :  { %s1065_s11 = scalar_lea.hbm %s1393_s3, 8192 }
  0x16   :  { %p1066_p8 = scmp.ne.s32.totalorder %s1393_s3, %s1065_s11  ;;  %p1069_p9 = scmp.lt.u32.totalorder %s1065_s11, %s1393_s3 }
  0x18   :  { %p1071_p10 = pnand %p1069_p9, %p1066_p8 }
  0x1a   :  { %1074 = shalt.err (!%p1071_p10)
}
  0x1b   :  { %s1075_s1 = scalar_lea.vmem %s52_s6, 8192  ;;  %p1080_p12 = scmp.lt.s32.totalorder %s52_s6, %s52_s6 }
  0x1c   :  { %p1076_p11 = scmp.ne.s32.totalorder %s52_s6, %s1075_s1  ;;  %p1081_p13 = scmp.lt.s32.totalorder %s1075_s1, %s1075_s1 }
  0x1e   :  { %p1082_p0 = por %p1081_p13, %p1080_p12 }
  0x20   :  { %p1083_p1 = pnand %p1082_p0, %p1076_p11 }
  0x22   :  { %1086 = shalt.err (!%p1083_p1)
}
  0x23   :  { %s1186_s16 = smov 256   ;;  %s1187_s17 = smov 16  }
  0x24   :  { %57 = dma.hbm_to_vmem [thread:$0]  %s1393_s3, 8192, %s52_s6, [#allocation10], %s1186_s16, %s1186_s16, %s1187_s17  }
  0x25   :  { %s1087_s22 = scalar_lea.hbm %s1390_s0, 1024 }
  0x26   :  { %p1088_p2 = scmp.ne.s32.totalorder %s1390_s0, %s1087_s22  ;;  %p1091_p3 = scmp.lt.u32.totalorder %s1087_s22, %s1390_s0 }
  0x28   :  { %p1093_p4 = pnand %p1091_p3, %p1088_p2 }
  0x2a   :  { %1096 = shalt.err (!%p1093_p4)
}
  0x2b   :  { %s1097_s27 = scalar_lea.vmem %s20_s8, 1024  ;;  %p1102_p6 = scmp.lt.s32.totalorder %s20_s8, %s20_s8 }
  0x2c   :  { %p1098_p5 = scmp.ne.s32.totalorder %s20_s8, %s1097_s27  ;;  %p1103_p7 = scmp.lt.s32.totalorder %s1097_s27, %s1097_s27 }
  0x2e   :  { %p1104_p8 = por %p1103_p7, %p1102_p6 }
  0x30   :  { %p1105_p9 = pnand %p1104_p8, %p1098_p5 }
  0x32   :  { %1108 = shalt.err (!%p1105_p9)
}
  0x33   :  { %25 = dma.hbm_to_vmem [thread:$0]  %s1390_s0, 1024, %s20_s8, [#allocation4], %s1186_s16, %s1186_s16, %s1187_s17  }
  0x34   :  { %s1188_s29 = smov [#allocation8]   ;;  %s1189_s6 = smov [#allocation11]  }
  0x35   :  { %s42_s30 = sshll.u32 %s1188_s29, 4  ;;  %s64_s7 = sshll.u32 %s1189_s6, 4  ;;  %s43_s30 = int_to_ptr.vmem [resolvable:$true] %s42_s30  ;;  %s65_s7 = int_to_ptr.vmem [resolvable:$true] %s64_s7 }
  0x36   :  { %s1109_s11 = scalar_lea.hbm %s1392_s2, 32 }
  0x37   :  { %p1110_p10 = scmp.ne.s32.totalorder %s1392_s2, %s1109_s11  ;;  %p1113_p11 = scmp.lt.u32.totalorder %s1109_s11, %s1392_s2 }
  0x39   :  { %p1115_p12 = pnand %p1113_p11, %p1110_p10 }
  0x3b   :  { %1118 = shalt.err (!%p1115_p12)
}
  0x3c   :  { %s1119_s0 = scalar_lea.vmem %s43_s30, 32  ;;  %p1124_p0 = scmp.lt.s32.totalorder %s43_s30, %s43_s30 }
  0x3d   :  { %p1120_p13 = scmp.ne.s32.totalorder %s43_s30, %s1119_s0  ;;  %p1125_p1 = scmp.lt.s32.totalorder %s1119_s0, %s1119_s0 }
  0x3f   :  { %p1126_p2 = por %p1125_p1, %p1124_p0 }
  0x41   :  { %p1127_p3 = pnand %p1126_p2, %p1120_p13 }
  0x43   :  { %1130 = shalt.err (!%p1127_p3)
}
  0x44   :  { %45 = dma.hbm_to_vmem [thread:$0]  %s1392_s2, 32, %s43_s30, [#allocation7]  }
  0x45   :  { %s1131_s20 = scalar_lea.hbm %s1394_s4, 64 }
  0x46   :  { %p1132_p4 = scmp.ne.s32.totalorder %s1394_s4, %s1131_s20  ;;  %p1135_p5 = scmp.lt.u32.totalorder %s1131_s20, %s1394_s4 }
  0x48   :  { %p1137_p6 = pnand %p1135_p5, %p1132_p4 }
  0x4a   :  { %1140 = shalt.err (!%p1137_p6)
}
  0x4b   :  { %s1141_s25 = scalar_lea.vmem %s65_s7, 64  ;;  %p1146_p8 = scmp.lt.s32.totalorder %s65_s7, %s65_s7 }
  0x4c   :  { %p1142_p7 = scmp.ne.s32.totalorder %s65_s7, %s1141_s25  ;;  %p1147_p9 = scmp.lt.s32.totalorder %s1141_s25, %s1141_s25 }
  0x4e   :  { %p1148_p10 = por %p1147_p9, %p1146_p8 }
  0x50   :  { %p1149_p11 = pnand %p1148_p10, %p1142_p7 }
  0x52   :  { %1152 = shalt.err (!%p1149_p11)
}
  0x53   :  { %67 = dma.hbm_to_vmem [thread:$0]  %s1394_s4, 64, %s65_s7, [#allocation10]  }
  0x54   :  { %1175 = dma.done.wait [#allocation4], 1024  }
  0x55   :  { %1176 = vsyncadd [#allocation4], 4294966272 }
  0x56   :  { %1177 = dma.done.wait [#allocation7], 64  }
  0x57   :  { %1178 = vsyncadd [#allocation7], 4294967232 }
  0x58   :  { %1179 = dma.done.wait [#allocation10], 8256  }
  0x59   :  { %1180 = vsyncadd [#allocation10], 4294959040  ;;  %v1287_v0 = vld [vmem:[#allocation3] sm:$0xff]  ;;  %v1289_v1 = vld [vmem:[#allocation3 + $0x8] sm:$0xff]  ;;  %s1190_s4 = smov [#allocation12]  }
  0x5a   :  { %v1291_v2 = vld [vmem:[#allocation3 + $0x20] sm:$0xff]  ;;  %v95_v3 = vadd.f32 %v1289_v1, %v1287_v0  ;;  %v1295_v4 = vld [vmem:[#allocation3 + $0x28] sm:$0xff]  ;;  %v1297_v5 = vld [vmem:[#allocation3 + $0x10] sm:$0xff]  ;;  %s829_s27 = sshll.u32 %s1190_s4, 4  ;;  %s830_s27 = int_to_ptr.vmem [resolvable:$true] %s829_s27 }
  0x5b   :  { %v1299_v6 = vld [vmem:[#allocation3 + $0x18] sm:$0xff]  ;;  %v101_v7 = vadd.f32 %v1295_v4, %v1291_v2  ;;  %v1303_v8 = vld [vmem:[#allocation3 + $0x30] sm:$0xff]  ;;  %s1153_s3 = scalar_lea.vmem %s830_s27, 1024  ;;  %p1158_p13 = scmp.lt.s32.totalorder %s830_s27, %s830_s27 }
  0x5c   :  { %v1305_v9 = vld [vmem:[#allocation3 + $0x38] sm:$0xff]  ;;  %96 = vadd.xlane.f32.xlu0 %v95_v3  ;;  %v98_v10 = vadd.f32 %v1299_v6, %v1297_v5  ;;  %v933_v13 = vld [vmem:[#allocation9 + $0xc] ss:$16 sps:$4 sm:$0xff]   ;;  %v935_v14 = vld [vmem:[#allocation9] ss:$16 sps:$4 sm:$0xff]   ;;  %p1154_p12 = scmp.ne.s32.totalorder %s830_s27, %s1153_s3  ;;  %p1159_p0 = scmp.lt.s32.totalorder %s1153_s3, %s1153_s3 }
  0x5d   :  { %102 = vadd.xlane.f32.xlu1 %v101_v7  ;;  %v104_v11 = vadd.f32 %v1305_v9, %v1303_v8  ;;  %v931_v12 = vld [vmem:[#allocation9 + $0x4] ss:$16 sps:$4 sm:$0xff]   ;;  %v936_v15 = vld [vmem:[#allocation9 + $0x8] ss:$16 sps:$4 sm:$0xff]   ;;  %v939_v17 = vld [vmem:[#allocation9 + $0x2c] ss:$16 sps:$4 sm:$0xff]   ;;  %699 = vmatprep.subr.bf16.mxu1 %v933_v13 }
  0x5e   :  { %v937_v16 = vld [vmem:[#allocation9 + $0x24] ss:$16 sps:$4 sm:$0xff]   ;;  %646 = vmatprep.subr.bf16.mxu0 %v931_v12  ;;  %700 = vmatpush1.bf16.msra.mxu1 %v936_v15  ;;  %v941_v18 = vld [vmem:[#allocation9 + $0x20] ss:$16 sps:$4 sm:$0xff]   ;;  %v942_v19 = vld [vmem:[#allocation9 + $0x28] ss:$16 sps:$4 sm:$0xff]   ;;  %p1160_p1 = por %p1159_p0, %p1158_p13 }
  0x5f   :  { %647 = vmatpush1.bf16.msra.mxu0 %v935_v14  ;;  %701 = vmatprep.subr.bf16.mxu1 %v939_v17  ;;  %v943_v20 = vld [vmem:[#allocation9 + $0x44] ss:$16 sps:$4 sm:$0xff]   ;;  %v945_v21 = vld [vmem:[#allocation9 + $0x4c] ss:$16 sps:$4 sm:$0xff]   ;;  %v947_v22 = vld [vmem:[#allocation9 + $0x40] ss:$16 sps:$4 sm:$0xff]  }
  0x60   :  { %99 = vadd.xlane.f32.xlu0 %v98_v10  ;;  %648 = vmatprep.subr.bf16.mxu0 %v937_v16  ;;  %v948_v23 = vld [vmem:[#allocation9 + $0x48] ss:$16 sps:$4 sm:$0xff]   ;;  %v949_v24 = vld [vmem:[#allocation9 + $0x64] ss:$16 sps:$4 sm:$0xff]   ;;  %v951_v25 = vld [vmem:[#allocation9 + $0x6c] ss:$16 sps:$4 sm:$0xff]   ;;  %p1161_p2 = pnand %p1160_p1, %p1154_p12 }
  0x61   :  { %105 = vadd.xlane.f32.xlu1 %v104_v11  ;;  %v953_v26 = vld [vmem:[#allocation9 + $0x60] ss:$16 sps:$4 sm:$0xff]   ;;  %v954_v27 = vld [vmem:[#allocation9 + $0x68] ss:$16 sps:$4 sm:$0xff]   ;;  %v955_v28 = vld [vmem:[#allocation9 + $0x84] ss:$16 sps:$4 sm:$0xff]  }
  0x62   :  { %702 = vmatpush1.bf16.msra.mxu1 %v942_v19  ;;  %v957_v29 = vld [vmem:[#allocation9 + $0x8c] ss:$16 sps:$4 sm:$0xff]   ;;  %v959_v30 = vld [vmem:[#allocation9 + $0x80] ss:$16 sps:$4 sm:$0xff]   ;;  %v960_v31 = vld [vmem:[#allocation9 + $0x88] ss:$16 sps:$4 sm:$0xff]  }
  0x63   :  { %649 = vmatpush1.bf16.msra.mxu0 %v941_v18  ;;  %703 = vmatprep.subr.bf16.mxu1 %v945_v21  ;;  %v961_v32 = vld [vmem:[#allocation9 + $0xa4] ss:$16 sps:$4 sm:$0xff]   ;;  %v963_v33 = vld [vmem:[#allocation9 + $0xac] ss:$16 sps:$4 sm:$0xff]   ;;  %v965_v34 = vld [vmem:[#allocation9 + $0xa0] ss:$16 sps:$4 sm:$0xff]  }
  0x64   :  { %650 = vmatprep.subr.bf16.mxu0 %v943_v20  ;;  %v966_v35 = vld [vmem:[#allocation9 + $0xa8] ss:$16 sps:$4 sm:$0xff]   ;;  %v983_v10 = vld [vmem:[#allocation9 + $0x100] ss:$16 sps:$4 sm:$0xff]   ;;  %v985_v12 = vld [vmem:[#allocation9 + $0x124] ss:$16 sps:$4 sm:$0xff]  }
  0x65   :  { %v972_v3 = vld [vmem:[#allocation9 + $0xc8] ss:$16 sps:$4 sm:$0xff]   ;;  %v987_v13 = vld [vmem:[#allocation9 + $0x12c] ss:$16 sps:$4 sm:$0xff]   ;;  %v989_v14 = vld [vmem:[#allocation9 + $0x120] ss:$16 sps:$4 sm:$0xff]  }
  0x66   :  { %704 = vmatpush1.bf16.msra.mxu1 %v948_v23  ;;  %v978_v7 = vld [vmem:[#allocation9 + $0xe8] ss:$16 sps:$4 sm:$0xff]   ;;  %v991_v16 = vld [vmem:[#allocation9 + $0x144] ss:$16 sps:$4 sm:$0xff]   ;;  %v993_v17 = vld [vmem:[#allocation9 + $0x14c] ss:$16 sps:$4 sm:$0xff]  }
  0x67   :  { %651 = vmatpush1.bf16.msra.mxu0 %v947_v22  ;;  %705 = vmatprep.subr.bf16.mxu1 %v951_v25  ;;  %v984_v11 = vld [vmem:[#allocation9 + $0x108] ss:$16 sps:$4 sm:$0xff]   ;;  %v995_v18 = vld [vmem:[#allocation9 + $0x140] ss:$16 sps:$4 sm:$0xff]   ;;  %v997_v20 = vld [vmem:[#allocation9 + $0x164] ss:$16 sps:$4 sm:$0xff]  }
  0x68   :  { %652 = vmatprep.subr.bf16.mxu0 %v949_v24  ;;  %v990_v15 = vld [vmem:[#allocation9 + $0x128] ss:$16 sps:$4 sm:$0xff]   ;;  %v999_v21 = vld [vmem:[#allocation9 + $0x16c] ss:$16 sps:$4 sm:$0xff]   ;;  %v1001_v22 = vld [vmem:[#allocation9 + $0x160] ss:$16 sps:$4 sm:$0xff]  }
  0x69   :  { %v996_v19 = vld [vmem:[#allocation9 + $0x148] ss:$16 sps:$4 sm:$0xff]   ;;  %v1003_v24 = vld [vmem:[#allocation9 + $0x184] ss:$16 sps:$4 sm:$0xff]   ;;  %v1005_v25 = vld [vmem:[#allocation9 + $0x18c] ss:$16 sps:$4 sm:$0xff]  }
  0x6a   :  { %706 = vmatpush1.bf16.msra.mxu1 %v954_v27  ;;  %v1002_v23 = vld [vmem:[#allocation9 + $0x168] ss:$16 sps:$4 sm:$0xff]  }
  0x6b   :  { %653 = vmatpush1.bf16.msra.mxu0 %v953_v26  ;;  %707 = vmatprep.subr.bf16.mxu1 %v957_v29  ;;  %v1007_v26 = vld [vmem:[#allocation9 + $0x180] ss:$16 sps:$4 sm:$0xff]   ;;  %v1008_v27 = vld [vmem:[#allocation9 + $0x188] ss:$16 sps:$4 sm:$0xff]   ;;  %v1011_v29 = vld [vmem:[#allocation9 + $0x1ac] ss:$16 sps:$4 sm:$0xff]  }
  0x6c   :  { %654 = vmatprep.subr.bf16.mxu0 %v955_v28  ;;  %v1009_v28 = vld [vmem:[#allocation9 + $0x1a4] ss:$16 sps:$4 sm:$0xff]  }
  0x6e   :  { %708 = vmatpush1.bf16.msra.mxu1 %v960_v31  ;;  %v1014_v31 = vld [vmem:[#allocation9 + $0x1a8] ss:$16 sps:$4 sm:$0xff]  }
  0x6f   :  { %655 = vmatpush1.bf16.msra.mxu0 %v959_v30  ;;  %709 = vmatprep.subr.bf16.mxu1 %v963_v33  ;;  %v1013_v30 = vld [vmem:[#allocation9 + $0x1a0] ss:$16 sps:$4 sm:$0xff]   ;;  %v1017_v33 = vld [vmem:[#allocation9 + $0x1cc] ss:$16 sps:$4 sm:$0xff]  }
  0x70   :  { %656 = vmatprep.subr.bf16.mxu0 %v961_v32  ;;  %v1015_v32 = vld [vmem:[#allocation9 + $0x1c4] ss:$16 sps:$4 sm:$0xff]  }
  0x72   :  { %710 = vmatpush1.bf16.msra.mxu1 %v966_v35  ;;  %v1020_v35 = vld [vmem:[#allocation9 + $0x1c8] ss:$16 sps:$4 sm:$0xff]  }
  0x73   :  { %657 = vmatpush1.bf16.msra.mxu0 %v965_v34  ;;  %v1019_v34 = vld [vmem:[#allocation9 + $0x1c0] ss:$16 sps:$4 sm:$0xff]  }
  0xe9   :  { %v97_v36 = vpop.xlane.xlu0 %96 }
  0xea   :  { %v108_v37 = vmul.f32 0.00390625, %v97_v36  ;;  %v103_v38 = vpop.xlane.xlu1 %102  ;;  %v1021_v36 = vld [vmem:[#allocation9 + $0x1e4] ss:$16 sps:$4 sm:$0xff]  }
  0xeb   :  { %v110_v39 = vmul.f32 0.00390625, %v103_v38  ;;  %v1025_v38 = vld [vmem:[#allocation9 + $0x1e0] ss:$16 sps:$4 sm:$0xff]  }
  0xec   :  { %v1312_v40 = vsub.f32 %v1287_v0, %v108_v37  ;;  %v1315_v41 = vsub.f32 %v1289_v1, %v108_v37  ;;  %v967_v0 = vld [vmem:[#allocation9 + $0xc4] ss:$16 sps:$4 sm:$0xff]   ;;  %v969_v1 = vld [vmem:[#allocation9 + $0xcc] ss:$16 sps:$4 sm:$0xff]  }
  0xed   :  { %v1318_v42 = vsub.f32 %v1291_v2, %v110_v39  ;;  %v1321_v43 = vsub.f32 %v1295_v4, %v110_v39  ;;  %v100_v44 = vpop.xlane.xlu0 %99  ;;  %v971_v2 = vld [vmem:[#allocation9 + $0xc0] ss:$16 sps:$4 sm:$0xff]   ;;  %658 = vmatprep.subr.bf16.mxu0 %v967_v0  ;;  %711 = vmatprep.subr.bf16.mxu1 %v969_v1  ;;  %v973_v4 = vld [vmem:[#allocation9 + $0xe4] ss:$16 sps:$4 sm:$0xff]   ;;  %v1023_v37 = vld [vmem:[#allocation9 + $0x1ec] ss:$16 sps:$4 sm:$0xff]  }
  0xee   :  { %v109_v45 = vmul.f32 0.00390625, %v100_v44  ;;  %v106_v46 = vpop.xlane.xlu1 %105  ;;  %v120_v47 = vmul.f32 %v1312_v40, %v1312_v40  ;;  %v121_v49 = vmul.f32 %v1315_v41, %v1315_v41  ;;  %659 = vmatpush1.bf16.msra.mxu0 %v971_v2  ;;  %712 = vmatpush1.bf16.msra.mxu1 %v972_v3  ;;  %v1026_v39 = vld [vmem:[#allocation9 + $0x1e8] ss:$16 sps:$4 sm:$0xff]  }
  0xef   :  { %v111_v48 = vmul.f32 0.00390625, %v106_v46  ;;  %v124_v52 = vmul.f32 %v1318_v42, %v1318_v42  ;;  %v125_v53 = vmul.f32 %v1321_v43, %v1321_v43  ;;  %660 = vmatprep.subr.bf16.mxu0 %v973_v4 }
  0xf0   :  { %v1328_v50 = vsub.f32 %v1297_v5, %v109_v45  ;;  %v1331_v51 = vsub.f32 %v1299_v6, %v109_v45  ;;  %v128_v56 = vadd.f32 %v121_v49, %v120_v47  ;;  %v975_v5 = vld [vmem:[#allocation9 + $0xec] ss:$16 sps:$4 sm:$0xff]   ;;  %v977_v6 = vld [vmem:[#allocation9 + $0xe0] ss:$16 sps:$4 sm:$0xff]  }
  0xf1   :  { %v1338_v54 = vsub.f32 %v1303_v8, %v111_v48  ;;  %v1341_v55 = vsub.f32 %v1305_v9, %v111_v48  ;;  %v134_v58 = vadd.f32 %v125_v53, %v124_v52  ;;  %713 = vmatprep.subr.bf16.mxu1 %v975_v5  ;;  %v979_v8 = vld [vmem:[#allocation9 + $0x104] ss:$16 sps:$4 sm:$0xff]   ;;  %v981_v9 = vld [vmem:[#allocation9 + $0x10c] ss:$16 sps:$4 sm:$0xff]  }
  0xf2   :  { %v122_v57 = vmul.f32 %v1328_v50, %v1328_v50  ;;  %129 = vadd.xlane.f32.xlu0 %v128_v56  ;;  %v123_v59 = vmul.f32 %v1331_v51, %v1331_v51  ;;  %661 = vmatpush1.bf16.msra.mxu0 %v977_v6 }
  0xf3   :  { %v126_v60 = vmul.f32 %v1338_v54, %v1338_v54  ;;  %v127_v61 = vmul.f32 %v1341_v55, %v1341_v55  ;;  %714 = vmatpush1.bf16.msra.mxu1 %v978_v7  ;;  %662 = vmatprep.subr.bf16.mxu0 %v979_v8 }
  0xf4   :  { %v131_v62 = vadd.f32 %v123_v59, %v122_v57  ;;  %715 = vmatprep.subr.bf16.mxu1 %v981_v9  ;;  %v146_v57 = vlaneseq }
  0xf5   :  { %v137_v63 = vadd.f32 %v127_v61, %v126_v60 }
  0xf6   :  { %135 = vadd.xlane.f32.xlu0 %v134_v58  ;;  %132 = vadd.xlane.f32.xlu1 %v131_v62  ;;  %v1351_v62 = vshrl.u32 %v146_v57, 7 }
  0xf7   :  { %663 = vmatpush1.bf16.msra.mxu0 %v983_v10  ;;  %716 = vmatpush1.bf16.msra.mxu1 %v984_v11 }
  0xf8   :  { %664 = vmatprep.subr.bf16.mxu0 %v985_v12  ;;  %717 = vmatprep.subr.bf16.mxu1 %v987_v13  ;;  %v1354_v8 = vsub.s32 0, %v1351_v62  ;;  %v1357_v11 = vsub.s32 1, %v1351_v62 }
  0xfa   :  { %138 = vadd.xlane.f32.xlu1 %v137_v63 }
  0xfb   :  { %665 = vmatpush1.bf16.msra.mxu0 %v989_v14  ;;  %718 = vmatpush1.bf16.msra.mxu1 %v990_v15  ;;  %v144_v15 = vld [vmem:[#allocation6] sm:$0x3] }
  0xfc   :  { %666 = vmatprep.subr.bf16.mxu0 %v991_v16  ;;  %719 = vmatprep.subr.bf16.mxu1 %v993_v17 }
  0xff   :  { %667 = vmatpush1.bf16.msra.mxu0 %v995_v18  ;;  %720 = vmatpush1.bf16.msra.mxu1 %v996_v19 }
 0x100   :  { %668 = vmatprep.subr.bf16.mxu0 %v997_v20  ;;  %721 = vmatprep.subr.bf16.mxu1 %v999_v21  ;;  %v153_v20 = vrot.slane %v144_v15, %v1357_v11 }
 0x103   :  { %669 = vmatpush1.bf16.msra.mxu0 %v1001_v22  ;;  %722 = vmatpush1.bf16.msra.mxu1 %v1002_v23  ;;  %v149_v22 = vrot.slane %v144_v15, %v1354_v8  ;;  %v208_v23 = vld [vmem:[#allocation8] sm:$0x3] }
 0x104   :  { %670 = vmatprep.subr.bf16.mxu0 %v1003_v24  ;;  %723 = vmatprep.subr.bf16.mxu1 %v1005_v25  ;;  %v157_v25 = vmul.f32 %v153_v20, %v1315_v41 }
 0x107   :  { %671 = vmatpush1.bf16.msra.mxu0 %v1007_v26  ;;  %724 = vmatpush1.bf16.msra.mxu1 %v1008_v27  ;;  %v156_v26 = vmul.f32 %v149_v22, %v1312_v40  ;;  %v162_v40 = vmul.f32 %v149_v22, %v1338_v54 }
 0x108   :  { %672 = vmatprep.subr.bf16.mxu0 %v1009_v28  ;;  %725 = vmatprep.subr.bf16.mxu1 %v1011_v29  ;;  %v217_v28 = vrot.slane %v208_v23, %v1357_v11  ;;  %v158_v29 = vmul.f32 %v149_v22, %v1328_v50 }
 0x10b   :  { %673 = vmatpush1.bf16.msra.mxu0 %v1013_v30  ;;  %726 = vmatpush1.bf16.msra.mxu1 %v1014_v31  ;;  %v159_v30 = vmul.f32 %v153_v20, %v1331_v51  ;;  %v213_v31 = vrot.slane %v208_v23, %v1354_v8 }
 0x10c   :  { %674 = vmatprep.subr.bf16.mxu0 %v1015_v32  ;;  %727 = vmatprep.subr.bf16.mxu1 %v1017_v33 }
 0x10f   :  { %675 = vmatpush1.bf16.msra.mxu0 %v1019_v34  ;;  %728 = vmatpush1.bf16.msra.mxu1 %v1020_v35  ;;  %v161_v34 = vmul.f32 %v153_v20, %v1321_v43 }
 0x110   :  { %676 = vmatprep.subr.bf16.mxu0 %v1021_v36  ;;  %729 = vmatprep.subr.bf16.mxu1 %v1023_v37  ;;  %v160_v36 = vmul.f32 %v149_v22, %v1318_v42 }
 0x113   :  { %677 = vmatpush1.bf16.msra.mxu0 %v1025_v38  ;;  %730 = vmatpush1.bf16.msra.mxu1 %v1026_v39  ;;  %v163_v38 = vmul.f32 %v153_v20, %v1341_v55 }
 0x17f   :  { %v130_v44 = vpop.xlane.xlu0 %129 }
 0x180   :  { %v140_v45 = vmul.f32 0.00390625, %v130_v44 }
 0x182   :  { %1027 = vrsqrt.f32 %v140_v45  ;;  %vm166_vm0 = vcmp.eq.f32.partialorder %v140_v45, inf  ;;  %v169_v59 = vand.u32 2147483648, %v140_v45  ;;  %vm168_vm1 = vcmp.eq.f32.partialorder %v140_v45, 0.0 }
 0x183   :  { %v133_v46 = vpop.xlane.xlu1 %132  ;;  %v136_v47 = vpop.xlane.xlu0 %135 }
 0x184   :  { %v141_v48 = vmul.f32 0.00390625, %v133_v46  ;;  %v142_v49 = vmul.f32 0.00390625, %v136_v47 }
 0x186   :  { %1029 = vrsqrt.f32 %v141_v48  ;;  %vm173_vm2 = vcmp.eq.f32.partialorder %v141_v48, inf  ;;  %vm175_vm3 = vcmp.eq.f32.partialorder %v141_v48, 0.0  ;;  %v176_v3 = vand.u32 2147483648, %v141_v48 }
 0x187   :  { %1031 = vrsqrt.f32 %v142_v49  ;;  %v139_v52 = vpop.xlane.xlu1 %138  ;;  %vm180_vm4 = vcmp.eq.f32.partialorder %v142_v49, inf  ;;  %v183_v6 = vand.u32 2147483648, %v142_v49  ;;  %vm182_vm5 = vcmp.eq.f32.partialorder %v142_v49, 0.0 }
 0x188   :  { %v143_v53 = vmul.f32 0.00390625, %v139_v52 }
 0x18a   :  { %1033 = vrsqrt.f32 %v143_v53  ;;  %vm187_vm6 = vcmp.eq.f32.partialorder %v143_v53, inf  ;;  %v190_v16 = vand.u32 2147483648, %v143_v53  ;;  %vm189_vm7 = vcmp.eq.f32.partialorder %v143_v53, 0.0 }
 0x18c   :  { %v1028_v56 = vpop.eup %1027 }
 0x18d   :  { %v165_v58 = vmul.f32 %v1028_v56, %v140_v45 }
 0x18f   :  { %v167_v60 = vsel %vm166_vm0, %v140_v45, %v165_v58  ;;  %v316_v58 = vsub.s32 2, %v1351_v62 }
 0x190   :  { %v1030_v61 = vpop.eup %1029  ;;  %v170_v63 = vsel %vm168_vm1, %v169_v59, %v167_v60  ;;  %v304_v59 = vld [vmem:[#allocation11] sm:$0xf]  ;;  %v320_v60 = vsub.s32 3, %v1351_v62 }
 0x191   :  { %v1032_v0 = vpop.eup %1031  ;;  %v172_v1 = vmul.f32 %v1030_v61, %v141_v48  ;;  %v192_v2 = vadd.f32 1e-06, %v170_v63  ;;  %v309_v61 = vrot.slane %v304_v59, %v1354_v8  ;;  %v317_v63 = vrot.slane %v304_v59, %v316_v58 }
 0x192   :  { %v179_v4 = vmul.f32 %v1032_v0, %v142_v49  ;;  %v313_v0 = vrot.slane %v304_v59, %v1357_v11 }
 0x193   :  { %v174_v5 = vsel %vm173_vm2, %v141_v48, %v172_v1  ;;  %1035 = vrcp.f32 %v192_v2  ;;  %v321_v1 = vrot.slane %v304_v59, %v320_v60 }
 0x194   :  { %v1034_v7 = vpop.eup %1033  ;;  %v181_v9 = vsel %vm180_vm4, %v142_v49, %v179_v4  ;;  %v177_v10 = vsel %vm175_vm3, %v176_v3, %v174_v5 }
 0x195   :  { %v186_v12 = vmul.f32 %v1034_v7, %v143_v53  ;;  %v193_v13 = vadd.f32 1e-06, %v177_v10  ;;  %v184_v14 = vsel %vm182_vm5, %v183_v6, %v181_v9 }
 0x196   :  { %v194_v17 = vadd.f32 1e-06, %v184_v14 }
 0x197   :  { %v188_v18 = vsel %vm187_vm6, %v143_v53, %v186_v12  ;;  %1037 = vrcp.f32 %v193_v13 }
 0x198   :  { %v191_v19 = vsel %vm189_vm7, %v190_v16, %v188_v18  ;;  %1039 = vrcp.f32 %v194_v17 }
 0x199   :  { %v195_v21 = vadd.f32 1e-06, %v191_v19 }
 0x19b   :  { %1041 = vrcp.f32 %v195_v21 }
 0x19d   :  { %v1036_v24 = vpop.eup %1035 }
 0x19e   :  { %v198_v27 = vmul.f32 %v1036_v24, %v157_v25  ;;  %v197_v32 = vmul.f32 %v1036_v24, %v156_v26 }
 0x1a0   :  { %v221_v39 = vadd.f32 %v217_v28, %v198_v27  ;;  %v220_v45 = vadd.f32 %v213_v31, %v197_v32 }
 0x1a1   :  { %v1038_v33 = vpop.eup %1037 }
 0x1a2   :  { %v1040_v35 = vpop.eup %1039  ;;  %v201_v37 = vmul.f32 %v1038_v33, %v159_v30  ;;  %v200_v41 = vmul.f32 %v1038_v33, %v158_v29 }
 0x1a3   :  { %v204_v44 = vmul.f32 %v1040_v35, %v161_v34  ;;  %v203_v46 = vmul.f32 %v1040_v35, %v160_v36 }
 0x1a4   :  { %v223_v50 = vadd.f32 %v217_v28, %v201_v37  ;;  %v222_v51 = vadd.f32 %v213_v31, %v200_v41 }
 0x1a5   :  { %v1042_v47 = vpop.eup %1041  ;;  %v225_v53 = vadd.f32 %v217_v28, %v204_v44  ;;  %v224_v56 = vadd.f32 %v213_v31, %v203_v46 }
 0x1a6   :  { %v229_v48 = vpack.c.bf16 %v223_v50, %v221_v39  ;;  %v228_v49 = vpack.c.bf16 %v222_v51, %v220_v45  ;;  %v207_v52 = vmul.f32 %v1042_v47, %v163_v38  ;;  %v206_v43 = vmul.f32 %v1042_v47, %v162_v40 }
 0x1a8   :  { %678 = vmatprep.mubr.bf16.mxu0 %v229_v48  ;;  %731 = vmatprep.mubr.bf16.mxu1 %v229_v48  ;;  %v227_v42 = vadd.f32 %v217_v28, %v207_v52  ;;  %v226_v57 = vadd.f32 %v213_v31, %v206_v43 }
 0x1a9   :  { %679 = vmatmul.mubr.bf16.vlgmr.msra.gmra.mrb[0].mxu0 %v228_v49  ;;  %732 = vmatmul.mubr.bf16.vlgmr.msra.gmra.mrb[0].mxu1 %v228_v49 }
 0x1aa   :  { %v231_v54 = vpack.c.bf16 %v227_v42, %v225_v53  ;;  %v230_v55 = vpack.c.bf16 %v226_v57, %v224_v56 }
 0x1ac   :  { %688 = vmatprep.mubr.bf16.mxu0 %v231_v54  ;;  %741 = vmatprep.mubr.bf16.mxu1 %v231_v54 }
 0x1b1   :  { %689 = vmatmul.mubr.bf16.gmra.mrb[4].mxu0 %v230_v55  ;;  %742 = vmatmul.mubr.bf16.gmra.mrb[4].mxu1 %v230_v55 }
 0x27c   :  { %v680_v2 = vpop.f32.mrb[0].mxu0  ;;  %v733_v3 = vpop.f32.mrb[0].mxu1 }
 0x27d   :  { %v681_v4 = vadd.f32 %v680_v2, %v309_v61  ;;  %v734_v5 = vadd.f32 %v733_v3, %v317_v63  ;;  %v682_v6 = vpop.f32.mrb[1].mxu0  ;;  %v735_v7 = vpop.f32.mrb[1].mxu1 }
 0x27e   :  { %v683_v9 = vadd.f32 %v682_v6, %v313_v0  ;;  %v736_v10 = vadd.f32 %v735_v7, %v321_v1  ;;  %v684_v12 = vpop.f32.mrb[2].mxu0  ;;  %v737_v13 = vpop.f32.mrb[2].mxu1 }
 0x27f   :  { %v752_v14 = vmax.f32 %v681_v4, 0.0  ;;  %v754_v15 = vmax.f32 %v734_v5, 0.0  ;;  %v685_v16 = vadd.f32 %v684_v12, %v309_v61  ;;  %v738_v62 = vadd.f32 %v737_v13, %v317_v63  ;;  %v686_v17 = vpop.f32.mrb[3].mxu0  ;;  %v739_v8 = vpop.f32.mrb[3].mxu1 }
 0x280   :  { %v753_v18 = vmax.f32 %v683_v9, 0.0  ;;  %v755_v19 = vmax.f32 %v736_v10, 0.0  ;;  %v687_v11 = vadd.f32 %v686_v17, %v313_v0  ;;  %v740_v20 = vadd.f32 %v739_v8, %v321_v1 }
 0x281   :  { %v756_v21 = vmax.f32 %v685_v16, 0.0  ;;  %v758_v22 = vmax.f32 %v738_v62, 0.0 }
 0x282   :  { %v915_v23 = vpack.c.bf16 %v753_v18, %v752_v14  ;;  %v916_v24 = vpack.c.bf16 %v755_v19, %v754_v15  ;;  %v757_v25 = vmax.f32 %v687_v11, 0.0  ;;  %v759_v26 = vmax.f32 %v740_v20, 0.0 }
 0x284   :  { %816 = vst [vmem:[#allocation12] sm:$0xff] %v915_v23  ;;  %817 = vst [vmem:[#allocation12 + $0x8] sm:$0xff] %v916_v24  ;;  %v917_v27 = vpack.c.bf16 %v757_v25, %v756_v21  ;;  %v918_v28 = vpack.c.bf16 %v759_v26, %v758_v22  ;;  %v690_v29 = vpop.f32.mrb[4].mxu0  ;;  %v743_v30 = vpop.f32.mrb[4].mxu1 }
 0x285   :  { %v691_v31 = vadd.f32 %v690_v29, %v309_v61  ;;  %v744_v32 = vadd.f32 %v743_v30, %v317_v63  ;;  %v692_v33 = vpop.f32.mrb[5].mxu0  ;;  %v745_v34 = vpop.f32.mrb[5].mxu1 }
 0x286   :  { %818 = vst [vmem:[#allocation12 + $0x10] sm:$0xff] %v917_v27  ;;  %819 = vst [vmem:[#allocation12 + $0x18] sm:$0xff] %v918_v28  ;;  %v693_v35 = vadd.f32 %v692_v33, %v313_v0  ;;  %v746_v36 = vadd.f32 %v745_v34, %v321_v1  ;;  %v694_v37 = vpop.f32.mrb[6].mxu0  ;;  %v747_v41 = vpop.f32.mrb[6].mxu1 }
 0x287   :  { %v760_v40 = vmax.f32 %v691_v31, 0.0  ;;  %v762_v38 = vmax.f32 %v744_v32, 0.0  ;;  %v695_v39 = vadd.f32 %v694_v37, %v309_v61  ;;  %v748_v44 = vadd.f32 %v747_v41, %v317_v63  ;;  %v696_v50 = vpop.f32.mrb[7].mxu0  ;;  %v749_v45 = vpop.f32.mrb[7].mxu1 }
 0x288   :  { %v761_v51 = vmax.f32 %v693_v35, 0.0  ;;  %v763_v46 = vmax.f32 %v746_v36, 0.0  ;;  %v697_v47 = vadd.f32 %v696_v50, %v313_v0  ;;  %v750_v48 = vadd.f32 %v749_v45, %v321_v1 }
 0x289   :  { %v764_v49 = vmax.f32 %v695_v39, 0.0  ;;  %v766_v52 = vmax.f32 %v748_v44, 0.0 }
 0x28a   :  { %v919_v43 = vpack.c.bf16 %v761_v51, %v760_v40  ;;  %v920_v53 = vpack.c.bf16 %v763_v46, %v762_v38  ;;  %v765_v42 = vmax.f32 %v697_v47, 0.0  ;;  %v767_v56 = vmax.f32 %v750_v48, 0.0 }
 0x28c   :  { %820 = vst [vmem:[#allocation12 + $0x20] sm:$0xff] %v919_v43  ;;  %821 = vst [vmem:[#allocation12 + $0x28] sm:$0xff] %v920_v53  ;;  %v921_v57 = vpack.c.bf16 %v765_v42, %v764_v49  ;;  %v922_v54 = vpack.c.bf16 %v767_v56, %v766_v52 }
 0x28e   :  { %822 = vst [vmem:[#allocation12 + $0x30] sm:$0xff] %v921_v57  ;;  %823 = vst [vmem:[#allocation12 + $0x38] sm:$0xff] %v922_v54 }
 0x28f   :  { %1164 = shalt.err (!%p1161_p2)
}
 0x290   :  { %s1165_s30 = scalar_lea.hbm %s1395_s5, 1024 }
 0x291   :  { %p1166_p3 = scmp.ne.s32.totalorder %s1395_s5, %s1165_s30  ;;  %p1169_p4 = scmp.lt.u32.totalorder %s1165_s30, %s1395_s5 }
 0x293   :  { %p1171_p5 = pnand %p1169_p4, %p1166_p3 }
 0x295   :  { %1174 = shalt.err (!%p1171_p5)
}
 0x296   :  { %835 = dma.vmem_to_hbm [thread:$0]  %s830_s27, 1024, %s1395_s5, [#allocation5], %s1186_s16, %s1186_s16, %s1187_s17  }
 0x297   :  { %1181 = dma.done.wait [#allocation5], 1024  }
 0x298   :  { %1182 = vsyncadd [#allocation5], 4294966272 }
 0x299   :  { %839 = vsyncpa [#allocation4], 1 }
 0x29a   :  { %840 = vsyncpa [#allocation7], 1 }
 0x29b   :  { %841 = vsyncpa [#allocation10], 1 }
 0x29c   :  { %842 = vsyncpa [#allocation5], 1 }

// kernel: decoder_forward.26
= control target key start
LH: loop header
LB: loop body
LE: loop exit
PB: predicated region body
PF: predicated region fallthrough
CT: control target
= control target key end

     0   :  { %9 = vsyncpa [#allocation4], 0  ;;  %s1144_s0 = inlined_call_operand.hbm [shape: bf16[32,512], index: 0, kind: input, shape index: {}]   ;;  %s1145_s1 = inlined_call_operand.hbm [shape: bf16[512,256], index: 1, kind: input, shape index: {}]   ;;  %s1146_s2 = inlined_call_operand.hbm [shape: f32[1,256], index: 2, kind: input, shape index: {}]   ;;  %s1147_s3 = inlined_call_operand.hbm [shape: f32[32,256], index: 3, kind: input, shape index: {}]   ;;  %s1148_s4 = inlined_call_operand.hbm [shape: f32[32,256], index: 4, kind: output, shape index: {}]  }
   0x1   :  { %10 = vsyncpa [#allocation7], 0 }
   0x2   :  { %11 = vsyncpa [#allocation10], 0 }
   0x3   :  { %12 = vsyncpa [#allocation5], 0  ;;  %s1034_s15 = smov [#allocation6]   ;;  %s916_s19 = scalar_lea.hbm %s1145_s1, 8192 }
   0x4   :  { %s30_s16 = sshll.u32 %s1034_s15, 4  ;;  %p917_p0 = scmp.ne.s32.totalorder %s1145_s1, %s916_s19  ;;  %s31_s16 = int_to_ptr.vmem [resolvable:$true] %s30_s16 }
   0x5   :  { %p920_p1 = scmp.lt.u32.totalorder %s916_s19, %s1145_s1 }
   0x7   :  { %p922_p2 = pnand %p920_p1, %p917_p0 }
   0x9   :  { %925 = shalt.err (!%p922_p2)
}
   0xa   :  { %s926_s24 = scalar_lea.vmem %s31_s16, 8192  ;;  %p931_p4 = scmp.lt.s32.totalorder %s31_s16, %s31_s16 }
   0xb   :  { %p927_p3 = scmp.ne.s32.totalorder %s31_s16, %s926_s24  ;;  %p932_p5 = scmp.lt.s32.totalorder %s926_s24, %s926_s24 }
   0xd   :  { %p933_p6 = por %p932_p5, %p931_p4 }
   0xf   :  { %p934_p7 = pnand %p933_p6, %p927_p3 }
  0x11   :  { %937 = shalt.err (!%p934_p7)
}
  0x12   :  { %s1035_s25 = smov 128   ;;  %s1036_s26 = smov 8  }
  0x13   :  { %36 = dma.hbm_to_vmem [thread:$0]  %s1145_s1, 8192, %s31_s16, [#allocation7], %s1035_s25, %s1035_s25, %s1036_s26  }
  0x14   :  { %s1037_s29 = smov [#allocation3]   ;;  %s938_s7 = scalar_lea.hbm %s1144_s0, 1024 }
  0x15   :  { %s18_s30 = sshll.u32 %s1037_s29, 4  ;;  %p939_p8 = scmp.ne.s32.totalorder %s1144_s0, %s938_s7  ;;  %s19_s30 = int_to_ptr.vmem [resolvable:$true] %s18_s30 }
  0x16   :  { %p942_p9 = scmp.lt.u32.totalorder %s938_s7, %s1144_s0 }
  0x18   :  { %p944_p10 = pnand %p942_p9, %p939_p8 }
  0x1a   :  { %947 = shalt.err (!%p944_p10)
}
  0x1b   :  { %s948_s12 = scalar_lea.vmem %s19_s30, 1024  ;;  %p953_p12 = scmp.lt.s32.totalorder %s19_s30, %s19_s30 }
  0x1c   :  { %p949_p11 = scmp.ne.s32.totalorder %s19_s30, %s948_s12  ;;  %p954_p13 = scmp.lt.s32.totalorder %s948_s12, %s948_s12 }
  0x1e   :  { %p955_p0 = por %p954_p13, %p953_p12 }
  0x20   :  { %p956_p1 = pnand %p955_p0, %p949_p11 }
  0x22   :  { %959 = shalt.err (!%p956_p1)
}
  0x23   :  { %s1038_s1 = smov 256   ;;  %s1039_s13 = smov 16  }
  0x24   :  { %24 = dma.hbm_to_vmem [thread:$0]  %s1144_s0, 1024, %s19_s30, [#allocation4], %s1038_s1, %s1038_s1, %s1039_s13  }
  0x25   :  { %s1040_s16 = smov [#allocation8]   ;;  %s1041_s18 = smov [#allocation9]  }
  0x26   :  { %s43_s17 = sshll.u32 %s1040_s16, 4  ;;  %s52_s19 = sshll.u32 %s1041_s18, 4  ;;  %s44_s17 = int_to_ptr.vmem [resolvable:$true] %s43_s17  ;;  %s1095_s19 = int_to_ptr.vmem [resolvable:$true] %s52_s19 }
  0x27   :  { %s960_s22 = scalar_lea.hbm %s1146_s2, 32 }
  0x28   :  { %p961_p2 = scmp.ne.s32.totalorder %s1146_s2, %s960_s22  ;;  %p964_p3 = scmp.lt.u32.totalorder %s960_s22, %s1146_s2 }
  0x2a   :  { %p966_p4 = pnand %p964_p3, %p961_p2 }
  0x2c   :  { %969 = shalt.err (!%p966_p4)
}
  0x2d   :  { %s970_s0 = scalar_lea.vmem %s44_s17, 32  ;;  %p975_p6 = scmp.lt.s32.totalorder %s44_s17, %s44_s17 }
  0x2e   :  { %p971_p5 = scmp.ne.s32.totalorder %s44_s17, %s970_s0  ;;  %p976_p7 = scmp.lt.s32.totalorder %s970_s0, %s970_s0 }
  0x30   :  { %p977_p8 = por %p976_p7, %p975_p6 }
  0x32   :  { %p978_p9 = pnand %p977_p8, %p971_p5 }
  0x34   :  { %981 = shalt.err (!%p978_p9)
}
  0x35   :  { %46 = dma.hbm_to_vmem [thread:$0]  %s1146_s2, 32, %s44_s17, [#allocation7]  }
  0x36   :  { %s982_s5 = scalar_lea.hbm %s1147_s3, 1024 }
  0x37   :  { %p983_p10 = scmp.ne.s32.totalorder %s1147_s3, %s982_s5  ;;  %p986_p11 = scmp.lt.u32.totalorder %s982_s5, %s1147_s3 }
  0x39   :  { %p988_p12 = pnand %p986_p11, %p983_p10 }
  0x3b   :  { %991 = shalt.err (!%p988_p12)
}
  0x3c   :  { %s992_s10 = scalar_lea.vmem %s1095_s19, 1024  ;;  %p997_p0 = scmp.lt.s32.totalorder %s1095_s19, %s1095_s19 }
  0x3d   :  { %p993_p13 = scmp.ne.s32.totalorder %s1095_s19, %s992_s10  ;;  %p998_p1 = scmp.lt.s32.totalorder %s992_s10, %s992_s10 }
  0x3f   :  { %p999_p2 = por %p998_p1, %p997_p0 }
  0x41   :  { %p1000_p3 = pnand %p999_p2, %p993_p13 }
  0x43   :  { %1003 = shalt.err (!%p1000_p3)
}
  0x44   :  { %58 = dma.hbm_to_vmem [thread:$0]  %s1147_s3, 1024, %s1095_s19, [#allocation10], %s1038_s1, %s1038_s1, %s1039_s13  }
  0x45   :  { %1026 = dma.done.wait [#allocation4], 1024  }
  0x46   :  { %1027 = vsyncadd [#allocation4], 4294966272 }
  0x47   :  { %1028 = dma.done.wait [#allocation7], 8224  }
  0x48   :  { %1029 = vsyncadd [#allocation7], 4294959072 }
  0x49   :  { %1030 = dma.done.wait [#allocation10], 1024  }
  0x4a   :  { %1031 = vsyncadd [#allocation10], 4294966272  ;;  %v808_v0 = vld [vmem:[#allocation6 + $0x4] ss:$8 sps:$4 sm:$0xff]   ;;  %v812_v2 = vld [vmem:[#allocation6] ss:$8 sps:$4 sm:$0xff]  }
  0x4b   :  { %v810_v1 = vld [vmem:[#allocation6 + $0x104] ss:$8 sps:$4 sm:$0xff]   ;;  %523 = vmatprep.subr.bf16.mxu1 %v808_v0  ;;  %v813_v3 = vld [vmem:[#allocation6 + $0x100] ss:$8 sps:$4 sm:$0xff]   ;;  %v814_v4 = vld [vmem:[#allocation6 + $0x14] ss:$8 sps:$4 sm:$0xff]  }
  0x4c   :  { %576 = vmatprep.subr.bf16.mxu0 %v810_v1  ;;  %524 = vmatpush1.bf16.msra.mxu1 %v812_v2  ;;  %v816_v5 = vld [vmem:[#allocation6 + $0x114] ss:$8 sps:$4 sm:$0xff]   ;;  %v818_v6 = vld [vmem:[#allocation6 + $0x10] ss:$8 sps:$4 sm:$0xff]   ;;  %v820_v8 = vld [vmem:[#allocation6 + $0x24] ss:$8 sps:$4 sm:$0xff]  }
  0x4d   :  { %577 = vmatpush1.bf16.msra.mxu0 %v813_v3  ;;  %525 = vmatprep.subr.bf16.mxu1 %v814_v4  ;;  %v819_v7 = vld [vmem:[#allocation6 + $0x110] ss:$8 sps:$4 sm:$0xff]   ;;  %v822_v9 = vld [vmem:[#allocation6 + $0x124] ss:$8 sps:$4 sm:$0xff]   ;;  %v824_v10 = vld [vmem:[#allocation6 + $0x20] ss:$8 sps:$4 sm:$0xff]  }
  0x4e   :  { %578 = vmatprep.subr.bf16.mxu0 %v816_v5  ;;  %v825_v11 = vld [vmem:[#allocation6 + $0x120] ss:$8 sps:$4 sm:$0xff]   ;;  %v826_v12 = vld [vmem:[#allocation6 + $0x34] ss:$8 sps:$4 sm:$0xff]   ;;  %v830_v14 = vld [vmem:[#allocation6 + $0x30] ss:$8 sps:$4 sm:$0xff]  }
  0x4f   :  { %v828_v13 = vld [vmem:[#allocation6 + $0x134] ss:$8 sps:$4 sm:$0xff]   ;;  %v831_v15 = vld [vmem:[#allocation6 + $0x130] ss:$8 sps:$4 sm:$0xff]   ;;  %v832_v16 = vld [vmem:[#allocation6 + $0x44] ss:$8 sps:$4 sm:$0xff]  }
  0x50   :  { %526 = vmatpush1.bf16.msra.mxu1 %v818_v6  ;;  %v834_v17 = vld [vmem:[#allocation6 + $0x144] ss:$8 sps:$4 sm:$0xff]   ;;  %v836_v18 = vld [vmem:[#allocation6 + $0x40] ss:$8 sps:$4 sm:$0xff]   ;;  %v838_v20 = vld [vmem:[#allocation6 + $0x54] ss:$8 sps:$4 sm:$0xff]  }
  0x51   :  { %579 = vmatpush1.bf16.msra.mxu0 %v819_v7  ;;  %527 = vmatprep.subr.bf16.mxu1 %v820_v8  ;;  %v837_v19 = vld [vmem:[#allocation6 + $0x140] ss:$8 sps:$4 sm:$0xff]   ;;  %v840_v21 = vld [vmem:[#allocation6 + $0x154] ss:$8 sps:$4 sm:$0xff]   ;;  %v842_v22 = vld [vmem:[#allocation6 + $0x50] ss:$8 sps:$4 sm:$0xff]   ;;  %v658_v8 = vlaneseq }
  0x52   :  { %580 = vmatprep.subr.bf16.mxu0 %v822_v9  ;;  %v843_v23 = vld [vmem:[#allocation6 + $0x150] ss:$8 sps:$4 sm:$0xff]   ;;  %v844_v24 = vld [vmem:[#allocation6 + $0x64] ss:$8 sps:$4 sm:$0xff]   ;;  %v848_v26 = vld [vmem:[#allocation6 + $0x60] ss:$8 sps:$4 sm:$0xff]  }
  0x53   :  { %v846_v25 = vld [vmem:[#allocation6 + $0x164] ss:$8 sps:$4 sm:$0xff]   ;;  %v849_v27 = vld [vmem:[#allocation6 + $0x160] ss:$8 sps:$4 sm:$0xff]   ;;  %v850_v28 = vld [vmem:[#allocation6 + $0x74] ss:$8 sps:$4 sm:$0xff]  }
  0x54   :  { %528 = vmatpush1.bf16.msra.mxu1 %v824_v10  ;;  %v852_v29 = vld [vmem:[#allocation6 + $0x174] ss:$8 sps:$4 sm:$0xff]   ;;  %v854_v30 = vld [vmem:[#allocation6 + $0x70] ss:$8 sps:$4 sm:$0xff]   ;;  %v856_v32 = vld [vmem:[#allocation6 + $0x84] ss:$8 sps:$4 sm:$0xff]  }
  0x55   :  { %581 = vmatpush1.bf16.msra.mxu0 %v825_v11  ;;  %529 = vmatprep.subr.bf16.mxu1 %v826_v12  ;;  %v855_v31 = vld [vmem:[#allocation6 + $0x170] ss:$8 sps:$4 sm:$0xff]   ;;  %v858_v33 = vld [vmem:[#allocation6 + $0x184] ss:$8 sps:$4 sm:$0xff]   ;;  %v860_v34 = vld [vmem:[#allocation6 + $0x80] ss:$8 sps:$4 sm:$0xff]  }
  0x56   :  { %582 = vmatprep.subr.bf16.mxu0 %v828_v13  ;;  %v861_v35 = vld [vmem:[#allocation6 + $0x180] ss:$8 sps:$4 sm:$0xff]   ;;  %v862_v36 = vld [vmem:[#allocation6 + $0x94] ss:$8 sps:$4 sm:$0xff]   ;;  %v866_v38 = vld [vmem:[#allocation6 + $0x90] ss:$8 sps:$4 sm:$0xff]  }
  0x57   :  { %v864_v37 = vld [vmem:[#allocation6 + $0x194] ss:$8 sps:$4 sm:$0xff]   ;;  %v867_v39 = vld [vmem:[#allocation6 + $0x190] ss:$8 sps:$4 sm:$0xff]   ;;  %v868_v40 = vld [vmem:[#allocation6 + $0xa4] ss:$8 sps:$4 sm:$0xff]  }
  0x58   :  { %530 = vmatpush1.bf16.msra.mxu1 %v830_v14  ;;  %v870_v41 = vld [vmem:[#allocation6 + $0x1a4] ss:$8 sps:$4 sm:$0xff]   ;;  %v872_v42 = vld [vmem:[#allocation6 + $0xa0] ss:$8 sps:$4 sm:$0xff]   ;;  %v874_v44 = vld [vmem:[#allocation6 + $0xb4] ss:$8 sps:$4 sm:$0xff]  }
  0x59   :  { %583 = vmatpush1.bf16.msra.mxu0 %v831_v15  ;;  %531 = vmatprep.subr.bf16.mxu1 %v832_v16  ;;  %v873_v43 = vld [vmem:[#allocation6 + $0x1a0] ss:$8 sps:$4 sm:$0xff]   ;;  %v876_v45 = vld [vmem:[#allocation6 + $0x1b4] ss:$8 sps:$4 sm:$0xff]   ;;  %v878_v46 = vld [vmem:[#allocation6 + $0xb0] ss:$8 sps:$4 sm:$0xff]  }
  0x5a   :  { %584 = vmatprep.subr.bf16.mxu0 %v834_v17  ;;  %v879_v47 = vld [vmem:[#allocation6 + $0x1b0] ss:$8 sps:$4 sm:$0xff]   ;;  %v880_v48 = vld [vmem:[#allocation6 + $0xc4] ss:$8 sps:$4 sm:$0xff]   ;;  %v884_v52 = vld [vmem:[#allocation6 + $0xc0] ss:$8 sps:$4 sm:$0xff]  }
  0x5b   :  { %v906_v49 = vld [vmem:[#allocation3 + $0x4] ss:$16 sps:$4 sm:$0xff]   ;;  %v909_v51 = vld [vmem:[#allocation3 + $0xc] ss:$16 sps:$4 sm:$0xff]   ;;  %v885_v53 = vld [vmem:[#allocation6 + $0x1c0] ss:$8 sps:$4 sm:$0xff]  }
  0x5c   :  { %532 = vmatpush1.bf16.msra.mxu1 %v836_v18  ;;  %v882_v50 = vld [vmem:[#allocation6 + $0x1c4] ss:$8 sps:$4 sm:$0xff]   ;;  %555 = vmatprep.mubr.bf16.mxu1 %v906_v49  ;;  %v886_v54 = vld [vmem:[#allocation6 + $0xd4] ss:$8 sps:$4 sm:$0xff]   ;;  %v890_v56 = vld [vmem:[#allocation6 + $0xd0] ss:$8 sps:$4 sm:$0xff]  }
  0x5d   :  { %585 = vmatpush1.bf16.msra.mxu0 %v837_v19  ;;  %533 = vmatprep.subr.bf16.mxu1 %v838_v20  ;;  %v888_v55 = vld [vmem:[#allocation6 + $0x1d4] ss:$8 sps:$4 sm:$0xff]   ;;  %v891_v57 = vld [vmem:[#allocation6 + $0x1d0] ss:$8 sps:$4 sm:$0xff]   ;;  %v892_v58 = vld [vmem:[#allocation6 + $0xe4] ss:$8 sps:$4 sm:$0xff]  }
  0x5e   :  { %586 = vmatprep.subr.bf16.mxu0 %v840_v21  ;;  %608 = vmatprep.mubr.bf16.mxu0 %v909_v51  ;;  %v894_v59 = vld [vmem:[#allocation6 + $0x1e4] ss:$8 sps:$4 sm:$0xff]   ;;  %v896_v60 = vld [vmem:[#allocation6 + $0xe0] ss:$8 sps:$4 sm:$0xff]   ;;  %v898_v62 = vld [vmem:[#allocation6 + $0xf4] ss:$8 sps:$4 sm:$0xff]  }
  0x5f   :  { %v897_v61 = vld [vmem:[#allocation6 + $0x1e0] ss:$8 sps:$4 sm:$0xff]   ;;  %v900_v63 = vld [vmem:[#allocation6 + $0x1f4] ss:$8 sps:$4 sm:$0xff]   ;;  %v902_v0 = vld [vmem:[#allocation6 + $0xf0] ss:$8 sps:$4 sm:$0xff]  }
  0x60   :  { %534 = vmatpush1.bf16.msra.mxu1 %v842_v22  ;;  %v903_v1 = vld [vmem:[#allocation6 + $0x1f0] ss:$8 sps:$4 sm:$0xff]   ;;  %v910_v4 = vld [vmem:[#allocation3 + $0x24] ss:$16 sps:$4 sm:$0xff]   ;;  %v912_v5 = vld [vmem:[#allocation3 + $0x2c] ss:$16 sps:$4 sm:$0xff]  }
  0x61   :  { %587 = vmatpush1.bf16.msra.mxu0 %v843_v23  ;;  %535 = vmatprep.subr.bf16.mxu1 %v844_v24  ;;  %v904_v2 = vld [vmem:[#allocation3] ss:$16 sps:$4 sm:$0xff]   ;;  %v907_v3 = vld [vmem:[#allocation3 + $0x8] ss:$16 sps:$4 sm:$0xff]   ;;  %v659_v9 = vshrl.u32 %v658_v8, 7  ;;  %s1042_s3 = smov [#allocation11]  }
  0x62   :  { %588 = vmatprep.subr.bf16.mxu0 %v846_v25  ;;  %v914_v6 = vld [vmem:[#allocation3 + $0x20] ss:$16 sps:$4 sm:$0xff]   ;;  %v915_v7 = vld [vmem:[#allocation3 + $0x28] ss:$16 sps:$4 sm:$0xff]   ;;  %s705_s12 = sshll.u32 %s1042_s3, 4  ;;  %s706_s12 = int_to_ptr.vmem [resolvable:$true] %s705_s12 }
  0x63   :  { %v660_v10 = vsub.s32 0, %v659_v9  ;;  %v656_v11 = vld [vmem:[#allocation8] sm:$0x3]  ;;  %v664_v12 = vsub.s32 1, %v659_v9  ;;  %v676_v20 = vld [vmem:[#allocation9] sm:$0xff]  ;;  %v677_v25 = vld [vmem:[#allocation9 + $0x8] sm:$0xff]  ;;  %p1009_p5 = scmp.lt.s32.totalorder %s706_s12, %s706_s12 }
  0x64   :  { %536 = vmatpush1.bf16.msra.mxu1 %v848_v26  ;;  %v681_v49 = vld [vmem:[#allocation9 + $0x28] sm:$0xff]  ;;  %s1004_s14 = scalar_lea.vmem %s706_s12, 1024 }
  0x65   :  { %589 = vmatpush1.bf16.msra.mxu0 %v849_v27  ;;  %537 = vmatprep.subr.bf16.mxu1 %v850_v28  ;;  %v661_v13 = vrot.slane %v656_v11, %v660_v10  ;;  %v665_v16 = vrot.slane %v656_v11, %v664_v12  ;;  %p1005_p4 = scmp.ne.s32.totalorder %s706_s12, %s1004_s14  ;;  %p1010_p6 = scmp.lt.s32.totalorder %s1004_s14, %s1004_s14 }
  0x66   :  { %590 = vmatprep.subr.bf16.mxu0 %v852_v29 }
  0x67   :  { %p1011_p7 = por %p1010_p6, %p1009_p5 }
  0x68   :  { %538 = vmatpush1.bf16.msra.mxu1 %v854_v30  ;;  %v678_v30 = vld [vmem:[#allocation9 + $0x10] sm:$0xff] }
  0x69   :  { %591 = vmatpush1.bf16.msra.mxu0 %v855_v31  ;;  %539 = vmatprep.subr.bf16.mxu1 %v856_v32  ;;  %p1012_p8 = pnand %p1011_p7, %p1005_p4 }
  0x6a   :  { %592 = vmatprep.subr.bf16.mxu0 %v858_v33 }
  0x6c   :  { %540 = vmatpush1.bf16.msra.mxu1 %v860_v34  ;;  %v679_v34 = vld [vmem:[#allocation9 + $0x18] sm:$0xff] }
  0x6d   :  { %593 = vmatpush1.bf16.msra.mxu0 %v861_v35  ;;  %541 = vmatprep.subr.bf16.mxu1 %v862_v36 }
  0x6e   :  { %594 = vmatprep.subr.bf16.mxu0 %v864_v37 }
  0x70   :  { %542 = vmatpush1.bf16.msra.mxu1 %v866_v38 }
  0x71   :  { %595 = vmatpush1.bf16.msra.mxu0 %v867_v39  ;;  %543 = vmatprep.subr.bf16.mxu1 %v868_v40 }
  0x72   :  { %596 = vmatprep.subr.bf16.mxu0 %v870_v41 }
  0x74   :  { %544 = vmatpush1.bf16.msra.mxu1 %v872_v42 }
  0x75   :  { %597 = vmatpush1.bf16.msra.mxu0 %v873_v43  ;;  %545 = vmatprep.subr.bf16.mxu1 %v874_v44  ;;  %v680_v44 = vld [vmem:[#allocation9 + $0x20] sm:$0xff] }
  0x76   :  { %598 = vmatprep.subr.bf16.mxu0 %v876_v45 }
  0x78   :  { %546 = vmatpush1.bf16.msra.mxu1 %v878_v46 }
  0x79   :  { %599 = vmatpush1.bf16.msra.mxu0 %v879_v47  ;;  %547 = vmatprep.subr.bf16.mxu1 %v880_v48 }
  0x7a   :  { %600 = vmatprep.subr.bf16.mxu0 %v882_v50 }
  0x7c   :  { %548 = vmatpush1.bf16.msra.mxu1 %v884_v52 }
  0x7d   :  { %601 = vmatpush1.bf16.msra.mxu0 %v885_v53  ;;  %549 = vmatprep.subr.bf16.mxu1 %v886_v54  ;;  %v682_v54 = vld [vmem:[#allocation9 + $0x30] sm:$0xff] }
  0x7e   :  { %602 = vmatprep.subr.bf16.mxu0 %v888_v55 }
  0x80   :  { %550 = vmatpush1.bf16.msra.mxu1 %v890_v56 }
  0x81   :  { %603 = vmatpush1.bf16.msra.mxu0 %v891_v57  ;;  %551 = vmatprep.subr.bf16.mxu1 %v892_v58  ;;  %v683_v58 = vld [vmem:[#allocation9 + $0x38] sm:$0xff] }
  0x82   :  { %604 = vmatprep.subr.bf16.mxu0 %v894_v59 }
  0x84   :  { %552 = vmatpush1.bf16.msra.mxu1 %v896_v60 }
  0x85   :  { %605 = vmatpush1.bf16.msra.mxu0 %v897_v61  ;;  %553 = vmatprep.subr.bf16.mxu1 %v898_v62 }
  0x86   :  { %606 = vmatprep.subr.bf16.mxu0 %v900_v63 }
  0x88   :  { %554 = vmatpush1.bf16.msra.mxu1 %v902_v0 }
  0x89   :  { %607 = vmatpush1.bf16.msra.mxu0 %v903_v1 }
  0x8b   :  { %556 = vmatmul.mubr.bf16.vlgmr.msra.gmra.mrb[0].mxu1 %v904_v2 }
  0x8c   :  { %609 = vmatmul.mubr.bf16.vlgmr.msra.gmra.mrb[0].mxu0 %v907_v3  ;;  %565 = vmatprep.mubr.bf16.mxu1 %v910_v4 }
  0x8d   :  { %618 = vmatprep.mubr.bf16.mxu0 %v912_v5 }
  0x93   :  { %566 = vmatmul.mubr.bf16.gmra.mrb[4].mxu1 %v914_v6 }
  0x94   :  { %619 = vmatmul.mubr.bf16.gmra.mrb[4].mxu0 %v915_v7 }
 0x15e   :  { %v557_v14 = vpop.f32.mrb[0].mxu1 }
 0x15f   :  { %v610_v15 = vpop.f32.mrb[0].mxu0  ;;  %v559_v18 = vpop.f32.mrb[1].mxu1 }
 0x160   :  { %v611_v17 = vadd.f32 %v610_v15, %v557_v14  ;;  %v612_v19 = vpop.f32.mrb[1].mxu0  ;;  %v561_v22 = vpop.f32.mrb[2].mxu1 }
 0x161   :  { %v613_v21 = vadd.f32 %v612_v19, %v559_v18  ;;  %v614_v23 = vpop.f32.mrb[2].mxu0  ;;  %v563_v27 = vpop.f32.mrb[3].mxu1 }
 0x162   :  { %v668_v24 = vadd.f32 %v661_v13, %v611_v17  ;;  %v615_v26 = vadd.f32 %v614_v23, %v561_v22  ;;  %v616_v28 = vpop.f32.mrb[3].mxu0 }
 0x163   :  { %v669_v29 = vadd.f32 %v665_v16, %v613_v21  ;;  %v617_v31 = vadd.f32 %v616_v28, %v563_v27 }
 0x164   :  { %v684_v32 = vadd.f32 %v676_v20, %v668_v24  ;;  %v670_v33 = vadd.f32 %v661_v13, %v615_v26 }
 0x165   :  { %v685_v35 = vadd.f32 %v677_v25, %v669_v29  ;;  %v671_v36 = vadd.f32 %v665_v16, %v617_v31 }
 0x166   :  { %692 = vst [vmem:[#allocation11] sm:$0xff] %v684_v32  ;;  %v686_v37 = vadd.f32 %v678_v30, %v670_v33  ;;  %v567_v39 = vpop.f32.mrb[4].mxu1 }
 0x167   :  { %693 = vst [vmem:[#allocation11 + $0x8] sm:$0xff] %v685_v35  ;;  %v687_v38 = vadd.f32 %v679_v34, %v671_v36  ;;  %v620_v40 = vpop.f32.mrb[4].mxu0  ;;  %v569_v42 = vpop.f32.mrb[5].mxu1 }
 0x168   :  { %694 = vst [vmem:[#allocation11 + $0x10] sm:$0xff] %v686_v37  ;;  %v621_v41 = vadd.f32 %v620_v40, %v567_v39  ;;  %v622_v43 = vpop.f32.mrb[5].mxu0  ;;  %v571_v46 = vpop.f32.mrb[6].mxu1 }
 0x169   :  { %695 = vst [vmem:[#allocation11 + $0x18] sm:$0xff] %v687_v38  ;;  %v623_v45 = vadd.f32 %v622_v43, %v569_v42  ;;  %v624_v47 = vpop.f32.mrb[6].mxu0  ;;  %v573_v51 = vpop.f32.mrb[7].mxu1 }
 0x16a   :  { %v672_v48 = vadd.f32 %v661_v13, %v621_v41  ;;  %v625_v50 = vadd.f32 %v624_v47, %v571_v46  ;;  %v626_v52 = vpop.f32.mrb[7].mxu0 }
 0x16b   :  { %v673_v53 = vadd.f32 %v665_v16, %v623_v45  ;;  %v627_v55 = vadd.f32 %v626_v52, %v573_v51 }
 0x16c   :  { %v688_v56 = vadd.f32 %v680_v44, %v672_v48  ;;  %v674_v57 = vadd.f32 %v661_v13, %v625_v50 }
 0x16d   :  { %v689_v59 = vadd.f32 %v681_v49, %v673_v53  ;;  %v675_v60 = vadd.f32 %v665_v16, %v627_v55 }
 0x16e   :  { %696 = vst [vmem:[#allocation11 + $0x20] sm:$0xff] %v688_v56  ;;  %v690_v61 = vadd.f32 %v682_v54, %v674_v57 }
 0x16f   :  { %697 = vst [vmem:[#allocation11 + $0x28] sm:$0xff] %v689_v59  ;;  %v691_v62 = vadd.f32 %v683_v58, %v675_v60 }
 0x170   :  { %698 = vst [vmem:[#allocation11 + $0x30] sm:$0xff] %v690_v61 }
 0x171   :  { %699 = vst [vmem:[#allocation11 + $0x38] sm:$0xff] %v691_v62 }
 0x172   :  { %1015 = shalt.err (!%p1012_p8)
}
 0x173   :  { %s1016_s17 = scalar_lea.hbm %s1148_s4, 1024 }
 0x174   :  { %p1017_p9 = scmp.ne.s32.totalorder %s1148_s4, %s1016_s17  ;;  %p1020_p10 = scmp.lt.u32.totalorder %s1016_s17, %s1148_s4 }
 0x176   :  { %p1022_p11 = pnand %p1020_p10, %p1017_p9 }
 0x178   :  { %1025 = shalt.err (!%p1022_p11)
}
 0x179   :  { %711 = dma.vmem_to_hbm [thread:$0]  %s706_s12, 1024, %s1148_s4, [#allocation5], %s1038_s1, %s1038_s1, %s1039_s13  }
 0x17a   :  { %1032 = dma.done.wait [#allocation5], 1024  }
 0x17b   :  { %1033 = vsyncadd [#allocation5], 4294966272 }
 0x17c   :  { %715 = vsyncpa [#allocation4], 1 }
 0x17d   :  { %716 = vsyncpa [#allocation7], 1 }
 0x17e   :  { %717 = vsyncpa [#allocation10], 1 }
 0x17f   :  { %718 = vsyncpa [#allocation5], 1 }

</bundles_post_ra>
